<compile_context>
chip_gen: v6e
topology: v6e:2x2x1
jax: 0.10.0
libtpu: 0.0.40
codegen_flags: <defaults>
</compile_context>

<pallas_src>
import numpy as np
import jax
import jax.numpy as jnp
from jax import lax
from jax.experimental import pallas as pl
from jax.experimental.pallas import tpu as pltpu

LANE = 128


def _round_up(n, m):
    return ((n + m - 1) // m) * m


# --------------------------- fused level kernel -----------------------------

def _conv_level(x_flat, w_stack, b_stack, *, pool, H_in, W_in, C_x, C_pad, L, k):
    """One encoder level: optional 2x2 max-pool + L x (conv 'same' + ReLU).

    x_flat : (N, P_in, C_x)   flat activations, row pitch = W_in + k - 1
    w_stack: (L, k*k, C_pad, C_pad) zero-padded HWIO weights, tap-major
    b_stack: (L, 1, C_pad)
    Returns (N, H*Wp, C_pad) flat padded activations of this level, plus (H, W).
    """
    N, P_in, _ = x_flat.shape
    if pool:
        H, W = H_in // 2, W_in // 2
    else:
        H, W = H_in, W_in
    Wp = W + k - 1                       # padded row pitch ('same': pad right)
    Hp = H + k - 1
    HWp = H * Wp
    A_rows = _round_up(Hp * Wp + (k - 1), 8)
    Wp_in = W_in + k - 1                 # row pitch of the flat input
    taps = [(dh, dw) for dh in range(k) for dw in range(k)]
    T = len(taps)

    # 0/1 mask zeroing the right-padding columns of the flat output so they act
    # as zero 'same' padding for the next layer.
    mask = jnp.asarray(
        (np.arange(HWp) % Wp < W).astype(np.float32).reshape(HWp, 1))

    def kernel(x_ref, w_ref, b_ref, m_ref, o_ref, act_ref, acc_ref):
        # Zero the padded activation buffer (pad columns / bottom pad rows).
        act_ref[...] = jnp.zeros_like(act_ref)

        if pool:
            # Fused 2x2 / stride-2 max-pool of the previous level's output,
            # written directly into the padded flat conv-input buffer.
            # TODO(synk): unrolled per-row/col (fine for small W); switch to
            # strided pl.ds loads for large spatial sizes.
            for r in range(H):
                ra = x_ref[pl.ds((2 * r) * Wp_in, W_in), :]
                rb = x_ref[pl.ds((2 * r + 1) * Wp_in, W_in), :]
                m = jnp.maximum(ra, rb)
                for j in range(W):
                    act_ref[pl.ds(r * Wp + j, 1), 0:C_x] = jnp.maximum(
                        m[2 * j:2 * j + 1, :], m[2 * j + 1:2 * j + 2, :])
        else:
            # Level 0: the input already has this level's flat padded layout.
            act_ref[pl.ds(0, HWp), 0:C_x] = x_ref[...]

        # layers_per_block x (conv 'same' + ReLU), fully resident in VMEM.
        # TODO(synk): on v6e/v7x the patch/weights could be cast to bf16 for the
        # MXU; kept f32 here to match the f32 reference bit-for-bit tolerance.
        for l in range(L):
            for t, (dh, dw) in enumerate(taps):
                patch = act_ref[pl.ds(dh * Wp + dw, HWp), :]
                prod = jnp.dot(patch, w_ref[l, t],
                               preferred_element_type=jnp.float32)
                if t == 0:
                    acc_ref[...] = prod
                else:
                    acc_ref[...] += prod
            y = jnp.maximum(acc_ref[...] + b_ref[l], 0.0) * m_ref[...]
            if l + 1 < L:
                act_ref[pl.ds(0, HWp), :] = y      # becomes next layer's input
            else:
                o_ref[...] = y                     # lane-dense (128-wide) store

    out = pl.pallas_call(
        kernel,
        out_shape=jax.ShapeDtypeStruct((N, HWp, C_pad), jnp.float32),
        grid=(N,),
        in_specs=[
            pl.BlockSpec((None, P_in, C_x), lambda n: (n, 0, 0)),
            pl.BlockSpec((L, T, C_pad, C_pad), lambda n: (0, 0, 0, 0)),
            pl.BlockSpec((L, 1, C_pad), lambda n: (0, 0, 0)),
            pl.BlockSpec((HWp, 1), lambda n: (0, 0)),
        ],
        out_specs=pl.BlockSpec((None, HWp, C_pad), lambda n: (n, 0, 0)),
        scratch_shapes=[
            pltpu.VMEM((A_rows, C_pad), jnp.float32),   # padded activations
            pltpu.VMEM((HWp, C_pad), jnp.float32),      # conv accumulator
        ],
        compiler_params=pltpu.CompilerParams(
            dimension_semantics=("parallel",)),
    )(x_flat, w_stack, b_stack, mask)
    return out, H, W


# ----------------------------- host-side packing ----------------------------

def _pack_level_params(block, C_pad, k):
    ws, bs = [], []
    for (w, b) in block:
        kh, kw, cin, cout = w.shape
        wp = jnp.zeros((kh, kw, C_pad, C_pad), jnp.float32)
        wp = wp.at[:, :, :cin, :cout].set(w)
        ws.append(wp.reshape(kh * kw, C_pad, C_pad))
        bs.append(jnp.zeros((1, C_pad), jnp.float32).at[:, :cout].set(b))
    return jnp.stack(ws, axis=0), jnp.stack(bs, axis=0)


def _prep_input(x_nchw, C_pad, k):
    N, C, H, W = x_nchw.shape
    x = jnp.transpose(x_nchw, (0, 2, 3, 1))                       # NHWC
    x = jnp.pad(x, ((0, 0), (0, 0), (0, k - 1), (0, C_pad - C)))  # right + chan
    return x.reshape(N, H * (W + k - 1), C_pad)


def _unpack_level(out_flat, H, W, k, c_real):
    N = out_flat.shape[0]
    Wp = W + k - 1
    x = out_flat.reshape(N, H, Wp, -1)[:, :, :W, :c_real]
    return jnp.transpose(x, (0, 3, 1, 2))                         # NCHW


# ------------------------------ Encoder module ------------------------------

def init_encoder_params(key, in_channels, levels, init_filters,
                        layers_per_block, kernel_size):
    """Deterministic He-style init. Returns list[level] of list[(w, b)] (HWIO)."""
    params = []
    c_prev = in_channels
    filters = init_filters
    for _lvl in range(levels):
        block = []
        c_in = c_prev
        for _l in range(layers_per_block):
            key, kw_, kb_ = jax.random.split(key, 3)
            fan_in = kernel_size * kernel_size * c_in
            w = jax.random.normal(kw_, (kernel_size, kernel_size, c_in, filters),
                                  jnp.float32) * (2.0 / fan_in) ** 0.5
            b = jax.random.normal(kb_, (filters,), jnp.float32) * 0.01
            block.append((w, b))
            c_in = filters
        params.append(block)
        c_prev = filters
        filters *= 2
    return params


def encoder_forward(params, x_nchw, *, conv_kernel_size=2, pool_kernel_size=2):
    """Pallas-backed forward. x_nchw: (N, Cin, H, W). Returns list of NCHW outputs."""
    # TODO(synk): only max_pool2d_kernel_size == 2 is implemented in the fused path.
    assert pool_kernel_size == 2
    k = conv_kernel_size
    N, _, H, W = x_nchw.shape

    feats = []
    x_flat, C_x = None, None
    H_cur, W_cur = H, W
    for lvl, block in enumerate(params):
        cin_real = block[0][0].shape[2]
        cout_real = block[-1][0].shape[3]
        C_pad = _round_up(max(cin_real, cout_real), LANE)
        w_stack, b_stack = _pack_level_params(block, C_pad, k)
        if lvl == 0:
            x_flat = _prep_input(x_nchw, C_pad, k)
            C_x = C_pad
            pool = False
        else:
            pool = True
        out_flat, H_cur, W_cur = _conv_level(
            x_flat, w_stack, b_stack, pool=pool, H_in=H_cur, W_in=W_cur,
            C_x=C_x, C_pad=C_pad, L=len(block), k=k)
        feats.append(_unpack_level(out_flat, H_cur, W_cur, k, cout_real))
        x_flat, C_x = out_flat, C_pad
    return feats


def encoder_reference(params, x_nchw):
    """Pure-JAX (XLA) reference with identical semantics, for verification."""
    h = jnp.transpose(x_nchw, (0, 2, 3, 1))
    outs = []
    for lvl, block in enumerate(params):
        if lvl > 0:
            h = lax.reduce_window(outs[-1], -jnp.inf, lax.max,
                                  (1, 2, 2, 1), (1, 2, 2, 1), 'VALID')
        for (w, b) in block:
            kh, kw = w.shape[0], w.shape[1]
            h = lax.conv_general_dilated(
                h, w, (1, 1), ((0, kh - 1), (0, kw - 1)),
                dimension_numbers=('NHWC', 'HWIO', 'NHWC')) + b
            h = jnp.maximum(h, 0.0)
        outs.append(h)
    return [jnp.transpose(o, (0, 3, 1, 2)) for o in outs]


# ----------------------------------- main -----------------------------------

if __name__ == "__main__":
    # Small config consistent with the module: Encoder(in_channels=3, levels=3,
    # init_filters=8, layers_per_block=2, max_pool2d_kernel_size=2,
    # conv_block_kernel_size=2), input (2, 3, 16, 16).
    in_channels, levels, init_filters, layers_per_block, ksize = 3, 3, 8, 2, 2

    key = jax.random.PRNGKey(0)
    kx, kp = jax.random.split(key)
    x = jax.random.normal(kx, (2, in_channels, 16, 16), jnp.float32)
    params = init_encoder_params(kp, in_channels, levels, init_filters,
                                 layers_per_block, ksize)

    fwd = jax.jit(encoder_forward)
    outs = jax.block_until_ready(fwd(params, x))

    refs = encoder_reference(params, x)
    assert len(outs) == levels
    for o, r in zip(outs, refs):
        assert o.shape == r.shape, (o.shape, r.shape)
        np.testing.assert_allclose(np.asarray(o), np.asarray(r),
                                   rtol=1e-4, atol=1e-4)

    print("KERNEL_OK")
</pallas_src>

<mosaic_0001>
module attributes {stable_mosaic.version = 11 : i64} {
  func.func @kernel(%arg0: i32, %arg1: memref<1x272x128xf32, #tpu.memory_space<vmem>>, %arg2: memref<2x4x128x128xf32, #tpu.memory_space<vmem>>, %arg3: memref<2x1x128xf32, #tpu.memory_space<vmem>>, %arg4: memref<272x1xf32, #tpu.memory_space<vmem>>, %arg5: memref<1x272x128xf32, #tpu.memory_space<vmem>>, %arg6: memref<296x128xf32, #tpu.memory_space<vmem>>, %arg7: memref<272x128xf32, #tpu.memory_space<vmem>>) attributes {dimension_semantics = [#tpu.dimension_semantics<parallel>], iteration_bounds = array<i64: 2>, scalar_prefetch = 0 : i64, scratch_operands = 2 : i64, tpu.core_type = #tpu.core_type<tc>, window_params = [{transform_indices = @transform_0, window_bounds = array<i64: 1, 272, 128>}, {pipeline_mode = #tpu.pipeline_mode<synchronous>, transform_indices = @transform_1, window_bounds = array<i64: 2, 4, 128, 128>}, {pipeline_mode = #tpu.pipeline_mode<synchronous>, transform_indices = @transform_2, window_bounds = array<i64: 2, 1, 128>}, {pipeline_mode = #tpu.pipeline_mode<synchronous>, transform_indices = @transform_3, window_bounds = array<i64: 272, 1>}, {transform_indices = @transform_4, window_bounds = array<i64: 1, 272, 128>}]} {
    %cst = arith.constant 0.000000e+00 : f32
    %0 = vector.broadcast %cst : f32 to vector<296x128xf32>
    %c0 = arith.constant 0 : index
    %c0_0 = arith.constant 0 : index
    %1 = vector.load %arg6[%c0, %c0_0] : memref<296x128xf32, #tpu.memory_space<vmem>>, vector<296x128xf32>
    tpu.vector_store %arg6[%c0, %c0_0], %0 {strides = array<i32>} : memref<296x128xf32, #tpu.memory_space<vmem>>, vector<296x128xf32>,
    %c0_1 = arith.constant 0 : index
    %c0_2 = arith.constant 0 : index
    %c0_3 = arith.constant 0 : index
    %2 = vector.load %arg1[%c0_1, %c0_2, %c0_3] : memref<1x272x128xf32, #tpu.memory_space<vmem>>, vector<1x272x128xf32>
    %3 = vector.shape_cast %2 : vector<1x272x128xf32> to vector<272x128xf32>
    %c0_4 = arith.constant 0 : index
    %c0_5 = arith.constant 0 : index
    %4 = vector.load %arg6[%c0_4, %c0_5] : memref<296x128xf32, #tpu.memory_space<vmem>>, vector<272x128xf32>
    tpu.vector_store %arg6[%c0_4, %c0_5], %3 {strides = array<i32>} : memref<296x128xf32, #tpu.memory_space<vmem>>, vector<272x128xf32>,
    %c0_6 = arith.constant 0 : index
    %c0_7 = arith.constant 0 : index
    %5 = vector.load %arg6[%c0_6, %c0_7] : memref<296x128xf32, #tpu.memory_space<vmem>>, vector<272x128xf32>
    %c0_8 = arith.constant 0 : index
    %c0_9 = arith.constant 0 : index
    %c0_10 = arith.constant 0 : index
    %c0_11 = arith.constant 0 : index
    %6 = vector.load %arg2[%c0_8, %c0_9, %c0_10, %c0_11] : memref<2x4x128x128xf32, #tpu.memory_space<vmem>>, vector<1x1x128x128xf32>
    %7 = vector.shape_cast %6 : vector<1x1x128x128xf32> to vector<128x128xf32>
    %cst_12 = arith.constant dense<0.000000e+00> : vector<272x128xf32>
    %8 = tpu.matmul %5, %7, %cst_12 {dimension_numbers = #tpu.dot_dimension_numbers<[1], [0], [0], [1], [0, 0, 1, 1], [], []>} : vector<272x128xf32>, vector<128x128xf32>, vector<272x128xf32> -> vector<272x128xf32>
    %c0_13 = arith.constant 0 : index
    %c0_14 = arith.constant 0 : index
    %9 = vector.load %arg7[%c0_13, %c0_14] : memref<272x128xf32, #tpu.memory_space<vmem>>, vector<272x128xf32>
    tpu.vector_store %arg7[%c0_13, %c0_14], %8 {strides = array<i32>} : memref<272x128xf32, #tpu.memory_space<vmem>>, vector<272x128xf32>,
    %c1 = arith.constant 1 : index
    %c0_15 = arith.constant 0 : index
    %10 = vector.load %arg6[%c1, %c0_15] : memref<296x128xf32, #tpu.memory_space<vmem>>, vector<272x128xf32>
    %c0_16 = arith.constant 0 : index
    %c1_17 = arith.constant 1 : index
    %c0_18 = arith.constant 0 : index
    %c0_19 = arith.constant 0 : index
    %11 = vector.load %arg2[%c0_16, %c1_17, %c0_18, %c0_19] : memref<2x4x128x128xf32, #tpu.memory_space<vmem>>, vector<1x1x128x128xf32>
    %12 = vector.shape_cast %11 : vector<1x1x128x128xf32> to vector<128x128xf32>
    %cst_20 = arith.constant dense<0.000000e+00> : vector<272x128xf32>
    %13 = tpu.matmul %10, %12, %cst_20 {dimension_numbers = #tpu.dot_dimension_numbers<[1], [0], [0], [1], [0, 0, 1, 1], [], []>} : vector<272x128xf32>, vector<128x128xf32>, vector<272x128xf32> -> vector<272x128xf32>
    %c0_21 = arith.constant 0 : index
    %c0_22 = arith.constant 0 : index
    %14 = vector.load %arg7[%c0_21, %c0_22] : memref<272x128xf32, #tpu.memory_space<vmem>>, vector<272x128xf32>
    %15 = arith.addf %14, %13 : vector<272x128xf32>
    %c0_23 = arith.constant 0 : index
    %c0_24 = arith.constant 0 : index
    %16 = vector.load %arg7[%c0_23, %c0_24] : memref<272x128xf32, #tpu.memory_space<vmem>>, vector<272x128xf32>
    tpu.vector_store %arg7[%c0_23, %c0_24], %15 {strides = array<i32>} : memref<272x128xf32, #tpu.memory_space<vmem>>, vector<272x128xf32>,
    %c17 = arith.constant 17 : index
    %c0_25 = arith.constant 0 : index
    %17 = vector.load %arg6[%c17, %c0_25] : memref<296x128xf32, #tpu.memory_space<vmem>>, vector<272x128xf32>
    %c0_26 = arith.constant 0 : index
    %c2 = arith.constant 2 : index
    %c0_27 = arith.constant 0 : index
    %c0_28 = arith.constant 0 : index
    %18 = vector.load %arg2[%c0_26, %c2, %c0_27, %c0_28] : memref<2x4x128x128xf32, #tpu.memory_space<vmem>>, vector<1x1x128x128xf32>
    %19 = vector.shape_cast %18 : vector<1x1x128x128xf32> to vector<128x128xf32>
    %cst_29 = arith.constant dense<0.000000e+00> : vector<272x128xf32>
    %20 = tpu.matmul %17, %19, %cst_29 {dimension_numbers = #tpu.dot_dimension_numbers<[1], [0], [0], [1], [0, 0, 1, 1], [], []>} : vector<272x128xf32>, vector<128x128xf32>, vector<272x128xf32> -> vector<272x128xf32>
    %c0_30 = arith.constant 0 : index
    %c0_31 = arith.constant 0 : index
    %21 = vector.load %arg7[%c0_30, %c0_31] : memref<272x128xf32, #tpu.memory_space<vmem>>, vector<272x128xf32>
    %22 = arith.addf %21, %20 : vector<272x128xf32>
    %c0_32 = arith.constant 0 : index
    %c0_33 = arith.constant 0 : index
    %23 = vector.load %arg7[%c0_32, %c0_33] : memref<272x128xf32, #tpu.memory_space<vmem>>, vector<272x128xf32>
    tpu.vector_store %arg7[%c0_32, %c0_33], %22 {strides = array<i32>} : memref<272x128xf32, #tpu.memory_space<vmem>>, vector<272x128xf32>,
    %c18 = arith.constant 18 : index
    %c0_34 = arith.constant 0 : index
    %24 = vector.load %arg6[%c18, %c0_34] : memref<296x128xf32, #tpu.memory_space<vmem>>, vector<272x128xf32>
    %c0_35 = arith.constant 0 : index
    %c3 = arith.constant 3 : index
    %c0_36 = arith.constant 0 : index
    %c0_37 = arith.constant 0 : index
    %25 = vector.load %arg2[%c0_35, %c3, %c0_36, %c0_37] : memref<2x4x128x128xf32, #tpu.memory_space<vmem>>, vector<1x1x128x128xf32>
    %26 = vector.shape_cast %25 : vector<1x1x128x128xf32> to vector<128x128xf32>
    %cst_38 = arith.constant dense<0.000000e+00> : vector<272x128xf32>
    %27 = tpu.matmul %24, %26, %cst_38 {dimension_numbers = #tpu.dot_dimension_numbers<[1], [0], [0], [1], [0, 0, 1, 1], [], []>} : vector<272x128xf32>, vector<128x128xf32>, vector<272x128xf32> -> vector<272x128xf32>
    %c0_39 = arith.constant 0 : index
    %c0_40 = arith.constant 0 : index
    %28 = vector.load %arg7[%c0_39, %c0_40] : memref<272x128xf32, #tpu.memory_space<vmem>>, vector<272x128xf32>
    %29 = arith.addf %28, %27 : vector<272x128xf32>
    %c0_41 = arith.constant 0 : index
    %c0_42 = arith.constant 0 : index
    %30 = vector.load %arg7[%c0_41, %c0_42] : memref<272x128xf32, #tpu.memory_space<vmem>>, vector<272x128xf32>
    tpu.vector_store %arg7[%c0_41, %c0_42], %29 {strides = array<i32>} : memref<272x128xf32, #tpu.memory_space<vmem>>, vector<272x128xf32>,
    %c0_43 = arith.constant 0 : index
    %c0_44 = arith.constant 0 : index
    %31 = vector.load %arg7[%c0_43, %c0_44] : memref<272x128xf32, #tpu.memory_space<vmem>>, vector<272x128xf32>
    %c0_45 = arith.constant 0 : index
    %c0_46 = arith.constant 0 : index
    %c0_47 = arith.constant 0 : index
    %32 = vector.load %arg3[%c0_45, %c0_46, %c0_47] : memref<2x1x128xf32, #tpu.memory_space<vmem>>, vector<1x1x128xf32>
    %33 = vector.shape_cast %32 : vector<1x1x128xf32> to vector<1x128xf32>
    %34 = vector.broadcast %33 : vector<1x128xf32> to vector<272x128xf32>
    %35 = arith.addf %31, %34 : vector<272x128xf32>
    %cst_48 = arith.constant 0.000000e+00 : f32
    %36 = vector.broadcast %cst_48 : f32 to vector<272x128xf32>
    %37 = arith.maximumf %35, %36 : vector<272x128xf32>
    %c0_49 = arith.constant 0 : index
    %c0_50 = arith.constant 0 : index
    %38 = vector.load %arg4[%c0_49, %c0_50] : memref<272x1xf32, #tpu.memory_space<vmem>>, vector<272x1xf32>
    %39 = vector.broadcast %38 : vector<272x1xf32> to vector<272x128xf32>
    %40 = arith.mulf %37, %39 : vector<272x128xf32>
    %c0_51 = arith.constant 0 : index
    %c0_52 = arith.constant 0 : index
    %41 = vector.load %arg6[%c0_51, %c0_52] : memref<296x128xf32, #tpu.memory_space<vmem>>, vector<272x128xf32>
    tpu.vector_store %arg6[%c0_51, %c0_52], %40 {strides = array<i32>} : memref<296x128xf32, #tpu.memory_space<vmem>>, vector<272x128xf32>,
    %c0_53 = arith.constant 0 : index
    %c0_54 = arith.constant 0 : index
    %42 = vector.load %arg6[%c0_53, %c0_54] : memref<296x128xf32, #tpu.memory_space<vmem>>, vector<272x128xf32>
    %c1_55 = arith.constant 1 : index
    %c0_56 = arith.constant 0 : index
    %c0_57 = arith.constant 0 : index
    %c0_58 = arith.constant 0 : index
    %43 = vector.load %arg2[%c1_55, %c0_56, %c0_57, %c0_58] : memref<2x4x128x128xf32, #tpu.memory_space<vmem>>, vector<1x1x128x128xf32>
    %44 = vector.shape_cast %43 : vector<1x1x128x128xf32> to vector<128x128xf32>
    %cst_59 = arith.constant dense<0.000000e+00> : vector<272x128xf32>
    %45 = tpu.matmul %42, %44, %cst_59 {dimension_numbers = #tpu.dot_dimension_numbers<[1], [0], [0], [1], [0, 0, 1, 1], [], []>} : vector<272x128xf32>, vector<128x128xf32>, vector<272x128xf32> -> vector<272x128xf32>
    %c0_60 = arith.constant 0 : index
    %c0_61 = arith.constant 0 : index
    %46 = vector.load %arg7[%c0_60, %c0_61] : memref<272x128xf32, #tpu.memory_space<vmem>>, vector<272x128xf32>
    tpu.vector_store %arg7[%c0_60, %c0_61], %45 {strides = array<i32>} : memref<272x128xf32, #tpu.memory_space<vmem>>, vector<272x128xf32>,
    %c1_62 = arith.constant 1 : index
    %c0_63 = arith.constant 0 : index
    %47 = vector.load %arg6[%c1_62, %c0_63] : memref<296x128xf32, #tpu.memory_space<vmem>>, vector<272x128xf32>
    %c1_64 = arith.constant 1 : index
    %c1_65 = arith.constant 1 : index
    %c0_66 = arith.constant 0 : index
    %c0_67 = arith.constant 0 : index
    %48 = vector.load %arg2[%c1_64, %c1_65, %c0_66, %c0_67] : memref<2x4x128x128xf32, #tpu.memory_space<vmem>>, vector<1x1x128x128xf32>
    %49 = vector.shape_cast %48 : vector<1x1x128x128xf32> to vector<128x128xf32>
    %cst_68 = arith.constant dense<0.000000e+00> : vector<272x128xf32>
    %50 = tpu.matmul %47, %49, %cst_68 {dimension_numbers = #tpu.dot_dimension_numbers<[1], [0], [0], [1], [0, 0, 1, 1], [], []>} : vector<272x128xf32>, vector<128x128xf32>, vector<272x128xf32> -> vector<272x128xf32>
    %c0_69 = arith.constant 0 : index
    %c0_70 = arith.constant 0 : index
    %51 = vector.load %arg7[%c0_69, %c0_70] : memref<272x128xf32, #tpu.memory_space<vmem>>, vector<272x128xf32>
    %52 = arith.addf %51, %50 : vector<272x128xf32>
    %c0_71 = arith.constant 0 : index
    %c0_72 = arith.constant 0 : index
    %53 = vector.load %arg7[%c0_71, %c0_72] : memref<272x128xf32, #tpu.memory_space<vmem>>, vector<272x128xf32>
    tpu.vector_store %arg7[%c0_71, %c0_72], %52 {strides = array<i32>} : memref<272x128xf32, #tpu.memory_space<vmem>>, vector<272x128xf32>,
    %c17_73 = arith.constant 17 : index
    %c0_74 = arith.constant 0 : index
    %54 = vector.load %arg6[%c17_73, %c0_74] : memref<296x128xf32, #tpu.memory_space<vmem>>, vector<272x128xf32>
    %c1_75 = arith.constant 1 : index
    %c2_76 = arith.constant 2 : index
    %c0_77 = arith.constant 0 : index
    %c0_78 = arith.constant 0 : index
    %55 = vector.load %arg2[%c1_75, %c2_76, %c0_77, %c0_78] : memref<2x4x128x128xf32, #tpu.memory_space<vmem>>, vector<1x1x128x128xf32>
    %56 = vector.shape_cast %55 : vector<1x1x128x128xf32> to vector<128x128xf32>
    %cst_79 = arith.constant dense<0.000000e+00> : vector<272x128xf32>
    %57 = tpu.matmul %54, %56, %cst_79 {dimension_numbers = #tpu.dot_dimension_numbers<[1], [0], [0], [1], [0, 0, 1, 1], [], []>} : vector<272x128xf32>, vector<128x128xf32>, vector<272x128xf32> -> vector<272x128xf32>
    %c0_80 = arith.constant 0 : index
    %c0_81 = arith.constant 0 : index
    %58 = vector.load %arg7[%c0_80, %c0_81] : memref<272x128xf32, #tpu.memory_space<vmem>>, vector<272x128xf32>
    %59 = arith.addf %58, %57 : vector<272x128xf32>
    %c0_82 = arith.constant 0 : index
    %c0_83 = arith.constant 0 : index
    %60 = vector.load %arg7[%c0_82, %c0_83] : memref<272x128xf32, #tpu.memory_space<vmem>>, vector<272x128xf32>
    tpu.vector_store %arg7[%c0_82, %c0_83], %59 {strides = array<i32>} : memref<272x128xf32, #tpu.memory_space<vmem>>, vector<272x128xf32>,
    %c18_84 = arith.constant 18 : index
    %c0_85 = arith.constant 0 : index
    %61 = vector.load %arg6[%c18_84, %c0_85] : memref<296x128xf32, #tpu.memory_space<vmem>>, vector<272x128xf32>
    %c1_86 = arith.constant 1 : index
    %c3_87 = arith.constant 3 : index
    %c0_88 = arith.constant 0 : index
    %c0_89 = arith.constant 0 : index
    %62 = vector.load %arg2[%c1_86, %c3_87, %c0_88, %c0_89] : memref<2x4x128x128xf32, #tpu.memory_space<vmem>>, vector<1x1x128x128xf32>
    %63 = vector.shape_cast %62 : vector<1x1x128x128xf32> to vector<128x128xf32>
    %cst_90 = arith.constant dense<0.000000e+00> : vector<272x128xf32>
    %64 = tpu.matmul %61, %63, %cst_90 {dimension_numbers = #tpu.dot_dimension_numbers<[1], [0], [0], [1], [0, 0, 1, 1], [], []>} : vector<272x128xf32>, vector<128x128xf32>, vector<272x128xf32> -> vector<272x128xf32>
    %c0_91 = arith.constant 0 : index
    %c0_92 = arith.constant 0 : index
    %65 = vector.load %arg7[%c0_91, %c0_92] : memref<272x128xf32, #tpu.memory_space<vmem>>, vector<272x128xf32>
    %66 = arith.addf %65, %64 : vector<272x128xf32>
    %c0_93 = arith.constant 0 : index
    %c0_94 = arith.constant 0 : index
    %67 = vector.load %arg7[%c0_93, %c0_94] : memref<272x128xf32, #tpu.memory_space<vmem>>, vector<272x128xf32>
    tpu.vector_store %arg7[%c0_93, %c0_94], %66 {strides = array<i32>} : memref<272x128xf32, #tpu.memory_space<vmem>>, vector<272x128xf32>,
    %c0_95 = arith.constant 0 : index
    %c0_96 = arith.constant 0 : index
    %68 = vector.load %arg7[%c0_95, %c0_96] : memref<272x128xf32, #tpu.memory_space<vmem>>, vector<272x128xf32>
    %c1_97 = arith.constant 1 : index
    %c0_98 = arith.constant 0 : index
    %c0_99 = arith.constant 0 : index
    %69 = vector.load %arg3[%c1_97, %c0_98, %c0_99] : memref<2x1x128xf32, #tpu.memory_space<vmem>>, vector<1x1x128xf32>
    %70 = vector.shape_cast %69 : vector<1x1x128xf32> to vector<1x128xf32>
    %71 = vector.broadcast %70 : vector<1x128xf32> to vector<272x128xf32>
    %72 = arith.addf %68, %71 : vector<272x128xf32>
    %cst_100 = arith.constant 0.000000e+00 : f32
    %73 = vector.broadcast %cst_100 : f32 to vector<272x128xf32>
    %74 = arith.maximumf %72, %73 : vector<272x128xf32>
    %c0_101 = arith.constant 0 : index
    %c0_102 = arith.constant 0 : index
    %75 = vector.load %arg4[%c0_101, %c0_102] : memref<272x1xf32, #tpu.memory_space<vmem>>, vector<272x1xf32>
    %76 = vector.broadcast %75 : vector<272x1xf32> to vector<272x128xf32>
    %77 = arith.mulf %74, %76 : vector<272x128xf32>
    %c0_103 = arith.constant 0 : index
    %c0_104 = arith.constant 0 : index
    %c0_105 = arith.constant 0 : index
    %78 = vector.load %arg5[%c0_103, %c0_104, %c0_105] : memref<1x272x128xf32, #tpu.memory_space<vmem>>, vector<1x272x128xf32>
    %79 = vector.shape_cast %78 : vector<1x272x128xf32> to vector<272x128xf32>
    %80 = vector.shape_cast %77 : vector<272x128xf32> to vector<1x272x128xf32>
    tpu.vector_store %arg5[%c0_103, %c0_104, %c0_105], %80 {strides = array<i32>} : memref<1x272x128xf32, #tpu.memory_space<vmem>>, vector<1x272x128xf32>,
    return
  }
  func.func @transform_0(%arg0: i32) -> (i32, i32, i32) {
    %c0_i32 = arith.constant 0 : i32
    %c0_i32_0 = arith.constant 0 : i32
    %c0_i32_1 = arith.constant 0 : i32
    return %arg0, %c0_i32, %c0_i32_0 : i32, i32, i32
  }
  func.func @transform_1(%arg0: i32) -> (i32, i32, i32, i32) {
    %c0_i32 = arith.constant 0 : i32
    %c0_i32_0 = arith.constant 0 : i32
    %c0_i32_1 = arith.constant 0 : i32
    %c0_i32_2 = arith.constant 0 : i32
    %c0_i32_3 = arith.constant 0 : i32
    return %c0_i32, %c0_i32_0, %c0_i32_1, %c0_i32_2 : i32, i32, i32, i32
  }
  func.func @transform_2(%arg0: i32) -> (i32, i32, i32) {
    %c0_i32 = arith.constant 0 : i32
    %c0_i32_0 = arith.constant 0 : i32
    %c0_i32_1 = arith.constant 0 : i32
    %c0_i32_2 = arith.constant 0 : i32
    return %c0_i32, %c0_i32_0, %c0_i32_1 : i32, i32, i32
  }
  func.func @transform_3(%arg0: i32) -> (i32, i32) {
    %c0_i32 = arith.constant 0 : i32
    %c0_i32_0 = arith.constant 0 : i32
    %c0_i32_1 = arith.constant 0 : i32
    return %c0_i32, %c0_i32_0 : i32, i32
  }
  func.func @transform_4(%arg0: i32) -> (i32, i32, i32) {
    %c0_i32 = arith.constant 0 : i32
    %c0_i32_0 = arith.constant 0 : i32
    %c0_i32_1 = arith.constant 0 : i32
    return %arg0, %c0_i32, %c0_i32_0 : i32, i32, i32
  }
}

module attributes {stable_mosaic.version = 11 : i64} {
  func.func @kernel(%arg0: i32, %arg1: memref<1x272x128xf32, #tpu.memory_space<vmem>>, %arg2: memref<2x4x128x128xf32, #tpu.memory_space<vmem>>, %arg3: memref<2x1x128xf32, #tpu.memory_space<vmem>>, %arg4: memref<72x1xf32, #tpu.memory_space<vmem>>, %arg5: memref<1x72x128xf32, #tpu.memory_space<vmem>>, %arg6: memref<88x128xf32, #tpu.memory_space<vmem>>, %arg7: memref<72x128xf32, #tpu.memory_space<vmem>>) attributes {dimension_semantics = [#tpu.dimension_semantics<parallel>], iteration_bounds = array<i64: 2>, scalar_prefetch = 0 : i64, scratch_operands = 2 : i64, tpu.core_type = #tpu.core_type<tc>, window_params = [{transform_indices = @transform_0, window_bounds = array<i64: 1, 272, 128>}, {pipeline_mode = #tpu.pipeline_mode<synchronous>, transform_indices = @transform_1, window_bounds = array<i64: 2, 4, 128, 128>}, {pipeline_mode = #tpu.pipeline_mode<synchronous>, transform_indices = @transform_2, window_bounds = array<i64: 2, 1, 128>}, {pipeline_mode = #tpu.pipeline_mode<synchronous>, transform_indices = @transform_3, window_bounds = array<i64: 72, 1>}, {transform_indices = @transform_4, window_bounds = array<i64: 1, 72, 128>}]} {
    %cst = arith.constant 0.000000e+00 : f32
    %0 = vector.broadcast %cst : f32 to vector<88x128xf32>
    %c0 = arith.constant 0 : index
    %c0_0 = arith.constant 0 : index
    %1 = vector.load %arg6[%c0, %c0_0] : memref<88x128xf32, #tpu.memory_space<vmem>>, vector<88x128xf32>
    tpu.vector_store %arg6[%c0, %c0_0], %0 {strides = array<i32>} : memref<88x128xf32, #tpu.memory_space<vmem>>, vector<88x128xf32>,
    %c0_1 = arith.constant 0 : index
    %c0_2 = arith.constant 0 : index
    %c0_3 = arith.constant 0 : index
    %2 = vector.load %arg1[%c0_1, %c0_2, %c0_3] : memref<1x272x128xf32, #tpu.memory_space<vmem>>, vector<1x16x128xf32>
    %3 = vector.shape_cast %2 : vector<1x16x128xf32> to vector<16x128xf32>
    %c0_4 = arith.constant 0 : index
    %c17 = arith.constant 17 : index
    %c0_5 = arith.constant 0 : index
    %4 = vector.load %arg1[%c0_4, %c17, %c0_5] : memref<1x272x128xf32, #tpu.memory_space<vmem>>, vector<1x16x128xf32>
    %5 = vector.shape_cast %4 : vector<1x16x128xf32> to vector<16x128xf32>
    %6 = arith.maximumf %3, %5 : vector<16x128xf32>
    %7 = vector.extract_strided_slice %6 {offsets = [0, 0], sizes = [1, 128], strides = [1, 1]} : vector<16x128xf32> to vector<1x128xf32>
    %8 = vector.extract_strided_slice %6 {offsets = [1, 0], sizes = [1, 128], strides = [1, 1]} : vector<16x128xf32> to vector<1x128xf32>
    %9 = arith.maximumf %7, %8 : vector<1x128xf32>
    %c0_6 = arith.constant 0 : index
    %c0_7 = arith.constant 0 : index
    %10 = vector.load %arg6[%c0_6, %c0_7] : memref<88x128xf32, #tpu.memory_space<vmem>>, vector<1x128xf32>
    tpu.vector_store %arg6[%c0_6, %c0_7], %9 {strides = array<i32>} : memref<88x128xf32, #tpu.memory_space<vmem>>, vector<1x128xf32>,
    %11 = vector.extract_strided_slice %6 {offsets = [2, 0], sizes = [1, 128], strides = [1, 1]} : vector<16x128xf32> to vector<1x128xf32>
    %12 = vector.extract_strided_slice %6 {offsets = [3, 0], sizes = [1, 128], strides = [1, 1]} : vector<16x128xf32> to vector<1x128xf32>
    %13 = arith.maximumf %11, %12 : vector<1x128xf32>
    %c1 = arith.constant 1 : index
    %c0_8 = arith.constant 0 : index
    %14 = vector.load %arg6[%c1, %c0_8] : memref<88x128xf32, #tpu.memory_space<vmem>>, vector<1x128xf32>
    tpu.vector_store %arg6[%c1, %c0_8], %13 {strides = array<i32>} : memref<88x128xf32, #tpu.memory_space<vmem>>, vector<1x128xf32>,
    %15 = vector.extract_strided_slice %6 {offsets = [4, 0], sizes = [1, 128], strides = [1, 1]} : vector<16x128xf32> to vector<1x128xf32>
    %16 = vector.extract_strided_slice %6 {offsets = [5, 0], sizes = [1, 128], strides = [1, 1]} : vector<16x128xf32> to vector<1x128xf32>
    %17 = arith.maximumf %15, %16 : vector<1x128xf32>
    %c2 = arith.constant 2 : index
    %c0_9 = arith.constant 0 : index
    %18 = vector.load %arg6[%c2, %c0_9] : memref<88x128xf32, #tpu.memory_space<vmem>>, vector<1x128xf32>
    tpu.vector_store %arg6[%c2, %c0_9], %17 {strides = array<i32>} : memref<88x128xf32, #tpu.memory_space<vmem>>, vector<1x128xf32>,
    %19 = vector.extract_strided_slice %6 {offsets = [6, 0], sizes = [1, 128], strides = [1, 1]} : vector<16x128xf32> to vector<1x128xf32>
    %20 = vector.extract_strided_slice %6 {offsets = [7, 0], sizes = [1, 128], strides = [1, 1]} : vector<16x128xf32> to vector<1x128xf32>
    %21 = arith.maximumf %19, %20 : vector<1x128xf32>
    %c3 = arith.constant 3 : index
    %c0_10 = arith.constant 0 : index
    %22 = vector.load %arg6[%c3, %c0_10] : memref<88x128xf32, #tpu.memory_space<vmem>>, vector<1x128xf32>
    tpu.vector_store %arg6[%c3, %c0_10], %21 {strides = array<i32>} : memref<88x128xf32, #tpu.memory_space<vmem>>, vector<1x128xf32>,
    %23 = vector.extract_strided_slice %6 {offsets = [8, 0], sizes = [1, 128], strides = [1, 1]} : vector<16x128xf32> to vector<1x128xf32>
    %24 = vector.extract_strided_slice %6 {offsets = [9, 0], sizes = [1, 128], strides = [1, 1]} : vector<16x128xf32> to vector<1x128xf32>
    %25 = arith.maximumf %23, %24 : vector<1x128xf32>
    %c4 = arith.constant 4 : index
    %c0_11 = arith.constant 0 : index
    %26 = vector.load %arg6[%c4, %c0_11] : memref<88x128xf32, #tpu.memory_space<vmem>>, vector<1x128xf32>
    tpu.vector_store %arg6[%c4, %c0_11], %25 {strides = array<i32>} : memref<88x128xf32, #tpu.memory_space<vmem>>, vector<1x128xf32>,
    %27 = vector.extract_strided_slice %6 {offsets = [10, 0], sizes = [1, 128], strides = [1, 1]} : vector<16x128xf32> to vector<1x128xf32>
    %28 = vector.extract_strided_slice %6 {offsets = [11, 0], sizes = [1, 128], strides = [1, 1]} : vector<16x128xf32> to vector<1x128xf32>
    %29 = arith.maximumf %27, %28 : vector<1x128xf32>
    %c5 = arith.constant 5 : index
    %c0_12 = arith.constant 0 : index
    %30 = vector.load %arg6[%c5, %c0_12] : memref<88x128xf32, #tpu.memory_space<vmem>>, vector<1x128xf32>
    tpu.vector_store %arg6[%c5, %c0_12], %29 {strides = array<i32>} : memref<88x128xf32, #tpu.memory_space<vmem>>, vector<1x128xf32>,
    %31 = vector.extract_strided_slice %6 {offsets = [12, 0], sizes = [1, 128], strides = [1, 1]} : vector<16x128xf32> to vector<1x128xf32>
    %32 = vector.extract_strided_slice %6 {offsets = [13, 0], sizes = [1, 128], strides = [1, 1]} : vector<16x128xf32> to vector<1x128xf32>
    %33 = arith.maximumf %31, %32 : vector<1x128xf32>
    %c6 = arith.constant 6 : index
    %c0_13 = arith.constant 0 : index
    %34 = vector.load %arg6[%c6, %c0_13] : memref<88x128xf32, #tpu.memory_space<vmem>>, vector<1x128xf32>
    tpu.vector_store %arg6[%c6, %c0_13], %33 {strides = array<i32>} : memref<88x128xf32, #tpu.memory_space<vmem>>, vector<1x128xf32>,
    %35 = vector.extract_strided_slice %6 {offsets = [14, 0], sizes = [1, 128], strides = [1, 1]} : vector<16x128xf32> to vector<1x128xf32>
    %36 = vector.extract_strided_slice %6 {offsets = [15, 0], sizes = [1, 128], strides = [1, 1]} : vector<16x128xf32> to vector<1x128xf32>
    %37 = arith.maximumf %35, %36 : vector<1x128xf32>
    %c7 = arith.constant 7 : index
    %c0_14 = arith.constant 0 : index
    %38 = vector.load %arg6[%c7, %c0_14] : memref<88x128xf32, #tpu.memory_space<vmem>>, vector<1x128xf32>
    tpu.vector_store %arg6[%c7, %c0_14], %37 {strides = array<i32>} : memref<88x128xf32, #tpu.memory_space<vmem>>, vector<1x128xf32>,
    %c0_15 = arith.constant 0 : index
    %c34 = arith.constant 34 : index
    %c0_16 = arith.constant 0 : index
    %39 = vector.load %arg1[%c0_15, %c34, %c0_16] : memref<1x272x128xf32, #tpu.memory_space<vmem>>, vector<1x16x128xf32>
    %40 = vector.shape_cast %39 : vector<1x16x128xf32> to vector<16x128xf32>
    %c0_17 = arith.constant 0 : index
    %c51 = arith.constant 51 : index
    %c0_18 = arith.constant 0 : index
    %41 = vector.load %arg1[%c0_17, %c51, %c0_18] : memref<1x272x128xf32, #tpu.memory_space<vmem>>, vector<1x16x128xf32>
    %42 = vector.shape_cast %41 : vector<1x16x128xf32> to vector<16x128xf32>
    %43 = arith.maximumf %40, %42 : vector<16x128xf32>
    %44 = vector.extract_strided_slice %43 {offsets = [0, 0], sizes = [1, 128], strides = [1, 1]} : vector<16x128xf32> to vector<1x128xf32>
    %45 = vector.extract_strided_slice %43 {offsets = [1, 0], sizes = [1, 128], strides = [1, 1]} : vector<16x128xf32> to vector<1x128xf32>
    %46 = arith.maximumf %44, %45 : vector<1x128xf32>
    %c9 = arith.constant 9 : index
    %c0_19 = arith.constant 0 : index
    %47 = vector.load %arg6[%c9, %c0_19] : memref<88x128xf32, #tpu.memory_space<vmem>>, vector<1x128xf32>
    tpu.vector_store %arg6[%c9, %c0_19], %46 {strides = array<i32>} : memref<88x128xf32, #tpu.memory_space<vmem>>, vector<1x128xf32>,
    %48 = vector.extract_strided_slice %43 {offsets = [2, 0], sizes = [1, 128], strides = [1, 1]} : vector<16x128xf32> to vector<1x128xf32>
    %49 = vector.extract_strided_slice %43 {offsets = [3, 0], sizes = [1, 128], strides = [1, 1]} : vector<16x128xf32> to vector<1x128xf32>
    %50 = arith.maximumf %48, %49 : vector<1x128xf32>
    %c10 = arith.constant 10 : index
    %c0_20 = arith.constant 0 : index
    %51 = vector.load %arg6[%c10, %c0_20] : memref<88x128xf32, #tpu.memory_space<vmem>>, vector<1x128xf32>
    tpu.vector_store %arg6[%c10, %c0_20], %50 {strides = array<i32>} : memref<88x128xf32, #tpu.memory_space<vmem>>, vector<1x128xf32>,
    %52 = vector.extract_strided_slice %43 {offsets = [4, 0], sizes = [1, 128], strides = [1, 1]} : vector<16x128xf32> to vector<1x128xf32>
    %53 = vector.extract_strided_slice %43 {offsets = [5, 0], sizes = [1, 128], strides = [1, 1]} : vector<16x128xf32> to vector<1x128xf32>
    %54 = arith.maximumf %52, %53 : vector<1x128xf32>
    %c11 = arith.constant 11 : index
    %c0_21 = arith.constant 0 : index
    %55 = vector.load %arg6[%c11, %c0_21] : memref<88x128xf32, #tpu.memory_space<vmem>>, vector<1x128xf32>
    tpu.vector_store %arg6[%c11, %c0_21], %54 {strides = array<i32>} : memref<88x128xf32, #tpu.memory_space<vmem>>, vector<1x128xf32>,
    %56 = vector.extract_strided_slice %43 {offsets = [6, 0], sizes = [1, 128], strides = [1, 1]} : vector<16x128xf32> to vector<1x128xf32>
    %57 = vector.extract_strided_slice %43 {offsets = [7, 0], sizes = [1, 128], strides = [1, 1]} : vector<16x128xf32> to vector<1x128xf32>
    %58 = arith.maximumf %56, %57 : vector<1x128xf32>
    %c12 = arith.constant 12 : index
    %c0_22 = arith.constant 0 : index
    %59 = vector.load %arg6[%c12, %c0_22] : memref<88x128xf32, #tpu.memory_space<vmem>>, vector<1x128xf32>
    tpu.vector_store %arg6[%c12, %c0_22], %58 {strides = array<i32>} : memref<88x128xf32, #tpu.memory_space<vmem>>, vector<1x128xf32>,
    %60 = vector.extract_strided_slice %43 {offsets = [8, 0], sizes = [1, 128], strides = [1, 1]} : vector<16x128xf32> to vector<1x128xf32>
    %61 = vector.extract_strided_slice %43 {offsets = [9, 0], sizes = [1, 128], strides = [1, 1]} : vector<16x128xf32> to vector<1x128xf32>
    %62 = arith.maximumf %60, %61 : vector<1x128xf32>
    %c13 = arith.constant 13 : index
    %c0_23 = arith.constant 0 : index
    %63 = vector.load %arg6[%c13, %c0_23] : memref<88x128xf32, #tpu.memory_space<vmem>>, vector<1x128xf32>
    tpu.vector_store %arg6[%c13, %c0_23], %62 {strides = array<i32>} : memref<88x128xf32, #tpu.memory_space<vmem>>, vector<1x128xf32>,
    %64 = vector.extract_strided_slice %43 {offsets = [10, 0], sizes = [1, 128], strides = [1, 1]} : vector<16x128xf32> to vector<1x128xf32>
    %65 = vector.extract_strided_slice %43 {offsets = [11, 0], sizes = [1, 128], strides = [1, 1]} : vector<16x128xf32> to vector<1x128xf32>
    %66 = arith.maximumf %64, %65 : vector<1x128xf32>
    %c14 = arith.constant 14 : index
    %c0_24 = arith.constant 0 : index
    %67 = vector.load %arg6[%c14, %c0_24] : memref<88x128xf32, #tpu.memory_space<vmem>>, vector<1x128xf32>
    tpu.vector_store %arg6[%c14, %c0_24], %66 {strides = array<i32>} : memref<88x128xf32, #tpu.memory_space<vmem>>, vector<1x128xf32>,
    %68 = vector.extract_strided_slice %43 {offsets = [12, 0], sizes = [1, 128], strides = [1, 1]} : vector<16x128xf32> to vector<1x128xf32>
    %69 = vector.extract_strided_slice %43 {offsets = [13, 0], sizes = [1, 128], strides = [1, 1]} : vector<16x128xf32> to vector<1x128xf32>
    %70 = arith.maximumf %68, %69 : vector<1x128xf32>
    %c15 = arith.constant 15 : index
    %c0_25 = arith.constant 0 : index
    %71 = vector.load %arg6[%c15, %c0_25] : memref<88x128xf32, #tpu.memory_space<vmem>>, vector<1x128xf32>
    tpu.vector_store %arg6[%c15, %c0_25], %70 {strides = array<i32>} : memref<88x128xf32, #tpu.memory_space<vmem>>, vector<1x128xf32>,
    %72 = vector.extract_strided_slice %43 {offsets = [14, 0], sizes = [1, 128], strides = [1, 1]} : vector<16x128xf32> to vector<1x128xf32>
    %73 = vector.extract_strided_slice %43 {offsets = [15, 0], sizes = [1, 128], strides = [1, 1]} : vector<16x128xf32> to vector<1x128xf32>
    %74 = arith.maximumf %72, %73 : vector<1x128xf32>
    %c16 = arith.constant 16 : index
    %c0_26 = arith.constant 0 : index
    %75 = vector.load %arg6[%c16, %c0_26] : memref<88x128xf32, #tpu.memory_space<vmem>>, vector<1x128xf32>
    tpu.vector_store %arg6[%c16, %c0_26], %74 {strides = array<i32>} : memref<88x128xf32, #tpu.memory_space<vmem>>, vector<1x128xf32>,
    %c0_27 = arith.constant 0 : index
    %c68 = arith.constant 68 : index
    %c0_28 = arith.constant 0 : index
    %76 = vector.load %arg1[%c0_27, %c68, %c0_28] : memref<1x272x128xf32, #tpu.memory_space<vmem>>, vector<1x16x128xf32>
    %77 = vector.shape_cast %76 : vector<1x16x128xf32> to vector<16x128xf32>
    %c0_29 = arith.constant 0 : index
    %c85 = arith.constant 85 : index
    %c0_30 = arith.constant 0 : index
    %78 = vector.load %arg1[%c0_29, %c85, %c0_30] : memref<1x272x128xf32, #tpu.memory_space<vmem>>, vector<1x16x128xf32>
    %79 = vector.shape_cast %78 : vector<1x16x128xf32> to vector<16x128xf32>
    %80 = arith.maximumf %77, %79 : vector<16x128xf32>
    %81 = vector.extract_strided_slice %80 {offsets = [0, 0], sizes = [1, 128], strides = [1, 1]} : vector<16x128xf32> to vector<1x128xf32>
    %82 = vector.extract_strided_slice %80 {offsets = [1, 0], sizes = [1, 128], strides = [1, 1]} : vector<16x128xf32> to vector<1x128xf32>
    %83 = arith.maximumf %81, %82 : vector<1x128xf32>
    %c18 = arith.constant 18 : index
    %c0_31 = arith.constant 0 : index
    %84 = vector.load %arg6[%c18, %c0_31] : memref<88x128xf32, #tpu.memory_space<vmem>>, vector<1x128xf32>
    tpu.vector_store %arg6[%c18, %c0_31], %83 {strides = array<i32>} : memref<88x128xf32, #tpu.memory_space<vmem>>, vector<1x128xf32>,
    %85 = vector.extract_strided_slice %80 {offsets = [2, 0], sizes = [1, 128], strides = [1, 1]} : vector<16x128xf32> to vector<1x128xf32>
    %86 = vector.extract_strided_slice %80 {offsets = [3, 0], sizes = [1, 128], strides = [1, 1]} : vector<16x128xf32> to vector<1x128xf32>
    %87 = arith.maximumf %85, %86 : vector<1x128xf32>
    %c19 = arith.constant 19 : index
    %c0_32 = arith.constant 0 : index
    %88 = vector.load %arg6[%c19, %c0_32] : memref<88x128xf32, #tpu.memory_space<vmem>>, vector<1x128xf32>
    tpu.vector_store %arg6[%c19, %c0_32], %87 {strides = array<i32>} : memref<88x128xf32, #tpu.memory_space<vmem>>, vector<1x128xf32>,
    %89 = vector.extract_strided_slice %80 {offsets = [4, 0], sizes = [1, 128], strides = [1, 1]} : vector<16x128xf32> to vector<1x128xf32>
    %90 = vector.extract_strided_slice %80 {offsets = [5, 0], sizes = [1, 128], strides = [1, 1]} : vector<16x128xf32> to vector<1x128xf32>
    %91 = arith.maximumf %89, %90 : vector<1x128xf32>
    %c20 = arith.constant 20 : index
    %c0_33 = arith.constant 0 : index
    %92 = vector.load %arg6[%c20, %c0_33] : memref<88x128xf32, #tpu.memory_space<vmem>>, vector<1x128xf32>
    tpu.vector_store %arg6[%c20, %c0_33], %91 {strides = array<i32>} : memref<88x128xf32, #tpu.memory_space<vmem>>, vector<1x128xf32>,
    %93 = vector.extract_strided_slice %80 {offsets = [6, 0], sizes = [1, 128], strides = [1, 1]} : vector<16x128xf32> to vector<1x128xf32>
    %94 = vector.extract_strided_slice %80 {offsets = [7, 0], sizes = [1, 128], strides = [1, 1]} : vector<16x128xf32> to vector<1x128xf32>
    %95 = arith.maximumf %93, %94 : vector<1x128xf32>
    %c21 = arith.constant 21 : index
    %c0_34 = arith.constant 0 : index
    %96 = vector.load %arg6[%c21, %c0_34] : memref<88x128xf32, #tpu.memory_space<vmem>>, vector<1x128xf32>
    tpu.vector_store %arg6[%c21, %c0_34], %95 {strides = array<i32>} : memref<88x128xf32, #tpu.memory_space<vmem>>, vector<1x128xf32>,
    %97 = vector.extract_strided_slice %80 {offsets = [8, 0], sizes = [1, 128], strides = [1, 1]} : vector<16x128xf32> to vector<1x128xf32>
    %98 = vector.extract_strided_slice %80 {offsets = [9, 0], sizes = [1, 128], strides = [1, 1]} : vector<16x128xf32> to vector<1x128xf32>
    %99 = arith.maximumf %97, %98 : vector<1x128xf32>
    %c22 = arith.constant 22 : index
    %c0_35 = arith.constant 0 : index
    %100 = vector.load %arg6[%c22, %c0_35] : memref<88x128xf32, #tpu.memory_space<vmem>>, vector<1x128xf32>
    tpu.vector_store %arg6[%c22, %c0_35], %99 {strides = array<i32>} : memref<88x128xf32, #tpu.memory_space<vmem>>, vector<1x128xf32>,
    %101 = vector.extract_strided_slice %80 {offsets = [10, 0], sizes = [1, 128], strides = [1, 1]} : vector<16x128xf32> to vector<1x128xf32>
    %102 = vector.extract_strided_slice %80 {offsets = [11, 0], sizes = [1, 128], strides = [1, 1]} : vector<16x128xf32> to vector<1x128xf32>
    %103 = arith.maximumf %101, %102 : vector<1x128xf32>
    %c23 = arith.constant 23 : index
    %c0_36 = arith.constant 0 : index
    %104 = vector.load %arg6[%c23, %c0_36] : memref<88x128xf32, #tpu.memory_space<vmem>>, vector<1x128xf32>
    tpu.vector_store %arg6[%c23, %c0_36], %103 {strides = array<i32>} : memref<88x128xf32, #tpu.memory_space<vmem>>, vector<1x128xf32>,
    %105 = vector.extract_strided_slice %80 {offsets = [12, 0], sizes = [1, 128], strides = [1, 1]} : vector<16x128xf32> to vector<1x128xf32>
    %106 = vector.extract_strided_slice %80 {offsets = [13, 0], sizes = [1, 128], strides = [1, 1]} : vector<16x128xf32> to vector<1x128xf32>
    %107 = arith.maximumf %105, %106 : vector<1x128xf32>
    %c24 = arith.constant 24 : index
    %c0_37 = arith.constant 0 : index
    %108 = vector.load %arg6[%c24, %c0_37] : memref<88x128xf32, #tpu.memory_space<vmem>>, vector<1x128xf32>
    tpu.vector_store %arg6[%c24, %c0_37], %107 {strides = array<i32>} : memref<88x128xf32, #tpu.memory_space<vmem>>, vector<1x128xf32>,
    %109 = vector.extract_strided_slice %80 {offsets = [14, 0], sizes = [1, 128], strides = [1, 1]} : vector<16x128xf32> to vector<1x128xf32>
    %110 = vector.extract_strided_slice %80 {offsets = [15, 0], sizes = [1, 128], strides = [1, 1]} : vector<16x128xf32> to vector<1x128xf32>
    %111 = arith.maximumf %109, %110 : vector<1x128xf32>
    %c25 = arith.constant 25 : index
    %c0_38 = arith.constant 0 : index
    %112 = vector.load %arg6[%c25, %c0_38] : memref<88x128xf32, #tpu.memory_space<vmem>>, vector<1x128xf32>
    tpu.vector_store %arg6[%c25, %c0_38], %111 {strides = array<i32>} : memref<88x128xf32, #tpu.memory_space<vmem>>, vector<1x128xf32>,
    %c0_39 = arith.constant 0 : index
    %c102 = arith.constant 102 : index
    %c0_40 = arith.constant 0 : index
    %113 = vector.load %arg1[%c0_39, %c102, %c0_40] : memref<1x272x128xf32, #tpu.memory_space<vmem>>, vector<1x16x128xf32>
    %114 = vector.shape_cast %113 : vector<1x16x128xf32> to vector<16x128xf32>
    %c0_41 = arith.constant 0 : index
    %c119 = arith.constant 119 : index
    %c0_42 = arith.constant 0 : index
    %115 = vector.load %arg1[%c0_41, %c119, %c0_42] : memref<1x272x128xf32, #tpu.memory_space<vmem>>, vector<1x16x128xf32>
    %116 = vector.shape_cast %115 : vector<1x16x128xf32> to vector<16x128xf32>
    %117 = arith.maximumf %114, %116 : vector<16x128xf32>
    %118 = vector.extract_strided_slice %117 {offsets = [0, 0], sizes = [1, 128], strides = [1, 1]} : vector<16x128xf32> to vector<1x128xf32>
    %119 = vector.extract_strided_slice %117 {offsets = [1, 0], sizes = [1, 128], strides = [1, 1]} : vector<16x128xf32> to vector<1x128xf32>
    %120 = arith.maximumf %118, %119 : vector<1x128xf32>
    %c27 = arith.constant 27 : index
    %c0_43 = arith.constant 0 : index
    %121 = vector.load %arg6[%c27, %c0_43] : memref<88x128xf32, #tpu.memory_space<vmem>>, vector<1x128xf32>
    tpu.vector_store %arg6[%c27, %c0_43], %120 {strides = array<i32>} : memref<88x128xf32, #tpu.memory_space<vmem>>, vector<1x128xf32>,
    %122 = vector.extract_strided_slice %117 {offsets = [2, 0], sizes = [1, 128], strides = [1, 1]} : vector<16x128xf32> to vector<1x128xf32>
    %123 = vector.extract_strided_slice %117 {offsets = [3, 0], sizes = [1, 128], strides = [1, 1]} : vector<16x128xf32> to vector<1x128xf32>
    %124 = arith.maximumf %122, %123 : vector<1x128xf32>
    %c28 = arith.constant 28 : index
    %c0_44 = arith.constant 0 : index
    %125 = vector.load %arg6[%c28, %c0_44] : memref<88x128xf32, #tpu.memory_space<vmem>>, vector<1x128xf32>
    tpu.vector_store %arg6[%c28, %c0_44], %124 {strides = array<i32>} : memref<88x128xf32, #tpu.memory_space<vmem>>, vector<1x128xf32>,
    %126 = vector.extract_strided_slice %117 {offsets = [4, 0], sizes = [1, 128], strides = [1, 1]} : vector<16x128xf32> to vector<1x128xf32>
    %127 = vector.extract_strided_slice %117 {offsets = [5, 0], sizes = [1, 128], strides = [1, 1]} : vector<16x128xf32> to vector<1x128xf32>
    %128 = arith.maximumf %126, %127 : vector<1x128xf32>
    %c29 = arith.constant 29 : index
    %c0_45 = arith.constant 0 : index
    %129 = vector.load %arg6[%c29, %c0_45] : memref<88x128xf32, #tpu.memory_space<vmem>>, vector<1x128xf32>
    tpu.vector_store %arg6[%c29, %c0_45], %128 {strides = array<i32>} : memref<88x128xf32, #tpu.memory_space<vmem>>, vector<1x128xf32>,
    %130 = vector.extract_strided_slice %117 {offsets = [6, 0], sizes = [1, 128], strides = [1, 1]} : vector<16x128xf32> to vector<1x128xf32>
    %131 = vector.extract_strided_slice %117 {offsets = [7, 0], sizes = [1, 128], strides = [1, 1]} : vector<16x128xf32> to vector<1x128xf32>
    %132 = arith.maximumf %130, %131 : vector<1x128xf32>
    %c30 = arith.constant 30 : index
    %c0_46 = arith.constant 0 : index
    %133 = vector.load %arg6[%c30, %c0_46] : memref<88x128xf32, #tpu.memory_space<vmem>>, vector<1x128xf32>
    tpu.vector_store %arg6[%c30, %c0_46], %132 {strides = array<i32>} : memref<88x128xf32, #tpu.memory_space<vmem>>, vector<1x128xf32>,
    %134 = vector.extract_strided_slice %117 {offsets = [8, 0], sizes = [1, 128], strides = [1, 1]} : vector<16x128xf32> to vector<1x128xf32>
    %135 = vector.extract_strided_slice %117 {offsets = [9, 0], sizes = [1, 128], strides = [1, 1]} : vector<16x128xf32> to vector<1x128xf32>
    %136 = arith.maximumf %134, %135 : vector<1x128xf32>
    %c31 = arith.constant 31 : index
    %c0_47 = arith.constant 0 : index
    %137 = vector.load %arg6[%c31, %c0_47] : memref<88x128xf32, #tpu.memory_space<vmem>>, vector<1x128xf32>
    tpu.vector_store %arg6[%c31, %c0_47], %136 {strides = array<i32>} : memref<88x128xf32, #tpu.memory_space<vmem>>, vector<1x128xf32>,
    %138 = vector.extract_strided_slice %117 {offsets = [10, 0], sizes = [1, 128], strides = [1, 1]} : vector<16x128xf32> to vector<1x128xf32>
    %139 = vector.extract_strided_slice %117 {offsets = [11, 0], sizes = [1, 128], strides = [1, 1]} : vector<16x128xf32> to vector<1x128xf32>
    %140 = arith.maximumf %138, %139 : vector<1x128xf32>
    %c32 = arith.constant 32 : index
    %c0_48 = arith.constant 0 : index
    %141 = vector.load %arg6[%c32, %c0_48] : memref<88x128xf32, #tpu.memory_space<vmem>>, vector<1x128xf32>
    tpu.vector_store %arg6[%c32, %c0_48], %140 {strides = array<i32>} : memref<88x128xf32, #tpu.memory_space<vmem>>, vector<1x128xf32>,
    %142 = vector.extract_strided_slice %117 {offsets = [12, 0], sizes = [1, 128], strides = [1, 1]} : vector<16x128xf32> to vector<1x128xf32>
    %143 = vector.extract_strided_slice %117 {offsets = [13, 0], sizes = [1, 128], strides = [1, 1]} : vector<16x128xf32> to vector<1x128xf32>
    %144 = arith.maximumf %142, %143 : vector<1x128xf32>
    %c33 = arith.constant 33 : index
    %c0_49 = arith.constant 0 : index
    %145 = vector.load %arg6[%c33, %c0_49] : memref<88x128xf32, #tpu.memory_space<vmem>>, vector<1x128xf32>
    tpu.vector_store %arg6[%c33, %c0_49], %144 {strides = array<i32>} : memref<88x128xf32, #tpu.memory_space<vmem>>, vector<1x128xf32>,
    %146 = vector.extract_strided_slice %117 {offsets = [14, 0], sizes = [1, 128], strides = [1, 1]} : vector<16x128xf32> to vector<1x128xf32>
    %147 = vector.extract_strided_slice %117 {offsets = [15, 0], sizes = [1, 128], strides = [1, 1]} : vector<16x128xf32> to vector<1x128xf32>
    %148 = arith.maximumf %146, %147 : vector<1x128xf32>
    %c34_50 = arith.constant 34 : index
    %c0_51 = arith.constant 0 : index
    %149 = vector.load %arg6[%c34_50, %c0_51] : memref<88x128xf32, #tpu.memory_space<vmem>>, vector<1x128xf32>
    tpu.vector_store %arg6[%c34_50, %c0_51], %148 {strides = array<i32>} : memref<88x128xf32, #tpu.memory_space<vmem>>, vector<1x128xf32>,
    %c0_52 = arith.constant 0 : index
    %c136 = arith.constant 136 : index
    %c0_53 = arith.constant 0 : index
    %150 = vector.load %arg1[%c0_52, %c136, %c0_53] : memref<1x272x128xf32, #tpu.memory_space<vmem>>, vector<1x16x128xf32>
    %151 = vector.shape_cast %150 : vector<1x16x128xf32> to vector<16x128xf32>
    %c0_54 = arith.constant 0 : index
    %c153 = arith.constant 153 : index
    %c0_55 = arith.constant 0 : index
    %152 = vector.load %arg1[%c0_54, %c153, %c0_55] : memref<1x272x128xf32, #tpu.memory_space<vmem>>, vector<1x16x128xf32>
    %153 = vector.shape_cast %152 : vector<1x16x128xf32> to vector<16x128xf32>
    %154 = arith.maximumf %151, %153 : vector<16x128xf32>
    %155 = vector.extract_strided_slice %154 {offsets = [0, 0], sizes = [1, 128], strides = [1, 1]} : vector<16x128xf32> to vector<1x128xf32>
    %156 = vector.extract_strided_slice %154 {offsets = [1, 0], sizes = [1, 128], strides = [1, 1]} : vector<16x128xf32> to vector<1x128xf32>
    %157 = arith.maximumf %155, %156 : vector<1x128xf32>
    %c36 = arith.constant 36 : index
    %c0_56 = arith.constant 0 : index
    %158 = vector.load %arg6[%c36, %c0_56] : memref<88x128xf32, #tpu.memory_space<vmem>>, vector<1x128xf32>
    tpu.vector_store %arg6[%c36, %c0_56], %157 {strides = array<i32>} : memref<88x128xf32, #tpu.memory_space<vmem>>, vector<1x128xf32>,
    %159 = vector.extract_strided_slice %154 {offsets = [2, 0], sizes = [1, 128], strides = [1, 1]} : vector<16x128xf32> to vector<1x128xf32>
    %160 = vector.extract_strided_slice %154 {offsets = [3, 0], sizes = [1, 128], strides = [1, 1]} : vector<16x128xf32> to vector<1x128xf32>
    %161 = arith.maximumf %159, %160 : vector<1x128xf32>
    %c37 = arith.constant 37 : index
    %c0_57 = arith.constant 0 : index
    %162 = vector.load %arg6[%c37, %c0_57] : memref<88x128xf32, #tpu.memory_space<vmem>>, vector<1x128xf32>
    tpu.vector_store %arg6[%c37, %c0_57], %161 {strides = array<i32>} : memref<88x128xf32, #tpu.memory_space<vmem>>, vector<1x128xf32>,
    %163 = vector.extract_strided_slice %154 {offsets = [4, 0], sizes = [1, 128], strides = [1, 1]} : vector<16x128xf32> to vector<1x128xf32>
    %164 = vector.extract_strided_slice %154 {offsets = [5, 0], sizes = [1, 128], strides = [1, 1]} : vector<16x128xf32> to vector<1x128xf32>
    %165 = arith.maximumf %163, %164 : vector<1x128xf32>
    %c38 = arith.constant 38 : index
    %c0_58 = arith.constant 0 : index
    %166 = vector.load %arg6[%c38, %c0_58] : memref<88x128xf32, #tpu.memory_space<vmem>>, vector<1x128xf32>
    tpu.vector_store %arg6[%c38, %c0_58], %165 {strides = array<i32>} : memref<88x128xf32, #tpu.memory_space<vmem>>, vector<1x128xf32>,
    %167 = vector.extract_strided_slice %154 {offsets = [6, 0], sizes = [1, 128], strides = [1, 1]} : vector<16x128xf32> to vector<1x128xf32>
    %168 = vector.extract_strided_slice %154 {offsets = [7, 0], sizes = [1, 128], strides = [1, 1]} : vector<16x128xf32> to vector<1x128xf32>
    %169 = arith.maximumf %167, %168 : vector<1x128xf32>
    %c39 = arith.constant 39 : index
    %c0_59 = arith.constant 0 : index
    %170 = vector.load %arg6[%c39, %c0_59] : memref<88x128xf32, #tpu.memory_space<vmem>>, vector<1x128xf32>
    tpu.vector_store %arg6[%c39, %c0_59], %169 {strides = array<i32>} : memref<88x128xf32, #tpu.memory_space<vmem>>, vector<1x128xf32>,
    %171 = vector.extract_strided_slice %154 {offsets = [8, 0], sizes = [1, 128], strides = [1, 1]} : vector<16x128xf32> to vector<1x128xf32>
    %172 = vector.extract_strided_slice %154 {offsets = [9, 0], sizes = [1, 128], strides = [1, 1]} : vector<16x128xf32> to vector<1x128xf32>
    %173 = arith.maximumf %171, %172 : vector<1x128xf32>
    %c40 = arith.constant 40 : index
    %c0_60 = arith.constant 0 : index
    %174 = vector.load %arg6[%c40, %c0_60] : memref<88x128xf32, #tpu.memory_space<vmem>>, vector<1x128xf32>
    tpu.vector_store %arg6[%c40, %c0_60], %173 {strides = array<i32>} : memref<88x128xf32, #tpu.memory_space<vmem>>, vector<1x128xf32>,
    %175 = vector.extract_strided_slice %154 {offsets = [10, 0], sizes = [1, 128], strides = [1, 1]} : vector<16x128xf32> to vector<1x128xf32>
    %176 = vector.extract_strided_slice %154 {offsets = [11, 0], sizes = [1, 128], strides = [1, 1]} : vector<16x128xf32> to vector<1x128xf32>
    %177 = arith.maximumf %175, %176 : vector<1x128xf32>
    %c41 = arith.constant 41 : index
    %c0_61 = arith.constant 0 : index
    %178 = vector.load %arg6[%c41, %c0_61] : memref<88x128xf32, #tpu.memory_space<vmem>>, vector<1x128xf32>
    tpu.vector_store %arg6[%c41, %c0_61], %177 {strides = array<i32>} : memref<88x128xf32, #tpu.memory_space<vmem>>, vector<1x128xf32>,
    %179 = vector.extract_strided_slice %154 {offsets = [12, 0], sizes = [1, 128], strides = [1, 1]} : vector<16x128xf32> to vector<1x128xf32>
    %180 = vector.extract_strided_slice %154 {offsets = [13, 0], sizes = [1, 128], strides = [1, 1]} : vector<16x128xf32> to vector<1x128xf32>
    %181 = arith.maximumf %179, %180 : vector<1x128xf32>
    %c42 = arith.constant 42 : index
    %c0_62 = arith.constant 0 : index
    %182 = vector.load %arg6[%c42, %c0_62] : memref<88x128xf32, #tpu.memory_space<vmem>>, vector<1x128xf32>
    tpu.vector_store %arg6[%c42, %c0_62], %181 {strides = array<i32>} : memref<88x128xf32, #tpu.memory_space<vmem>>, vector<1x128xf32>,
    %183 = vector.extract_strided_slice %154 {offsets = [14, 0], sizes = [1, 128], strides = [1, 1]} : vector<16x128xf32> to vector<1x128xf32>
    %184 = vector.extract_strided_slice %154 {offsets = [15, 0], sizes = [1, 128], strides = [1, 1]} : vector<16x128xf32> to vector<1x128xf32>
    %185 = arith.maximumf %183, %184 : vector<1x128xf32>
    %c43 = arith.constant 43 : index
    %c0_63 = arith.constant 0 : index
    %186 = vector.load %arg6[%c43, %c0_63] : memref<88x128xf32, #tpu.memory_space<vmem>>, vector<1x128xf32>
    tpu.vector_store %arg6[%c43, %c0_63], %185 {strides = array<i32>} : memref<88x128xf32, #tpu.memory_space<vmem>>, vector<1x128xf32>,
    %c0_64 = arith.constant 0 : index
    %c170 = arith.constant 170 : index
    %c0_65 = arith.constant 0 : index
    %187 = vector.load %arg1[%c0_64, %c170, %c0_65] : memref<1x272x128xf32, #tpu.memory_space<vmem>>, vector<1x16x128xf32>
    %188 = vector.shape_cast %187 : vector<1x16x128xf32> to vector<16x128xf32>
    %c0_66 = arith.constant 0 : index
    %c187 = arith.constant 187 : index
    %c0_67 = arith.constant 0 : index
    %189 = vector.load %arg1[%c0_66, %c187, %c0_67] : memref<1x272x128xf32, #tpu.memory_space<vmem>>, vector<1x16x128xf32>
    %190 = vector.shape_cast %189 : vector<1x16x128xf32> to vector<16x128xf32>
    %191 = arith.maximumf %188, %190 : vector<16x128xf32>
    %192 = vector.extract_strided_slice %191 {offsets = [0, 0], sizes = [1, 128], strides = [1, 1]} : vector<16x128xf32> to vector<1x128xf32>
    %193 = vector.extract_strided_slice %191 {offsets = [1, 0], sizes = [1, 128], strides = [1, 1]} : vector<16x128xf32> to vector<1x128xf32>
    %194 = arith.maximumf %192, %193 : vector<1x128xf32>
    %c45 = arith.constant 45 : index
    %c0_68 = arith.constant 0 : index
    %195 = vector.load %arg6[%c45, %c0_68] : memref<88x128xf32, #tpu.memory_space<vmem>>, vector<1x128xf32>
    tpu.vector_store %arg6[%c45, %c0_68], %194 {strides = array<i32>} : memref<88x128xf32, #tpu.memory_space<vmem>>, vector<1x128xf32>,
    %196 = vector.extract_strided_slice %191 {offsets = [2, 0], sizes = [1, 128], strides = [1, 1]} : vector<16x128xf32> to vector<1x128xf32>
    %197 = vector.extract_strided_slice %191 {offsets = [3, 0], sizes = [1, 128], strides = [1, 1]} : vector<16x128xf32> to vector<1x128xf32>
    %198 = arith.maximumf %196, %197 : vector<1x128xf32>
    %c46 = arith.constant 46 : index
    %c0_69 = arith.constant 0 : index
    %199 = vector.load %arg6[%c46, %c0_69] : memref<88x128xf32, #tpu.memory_space<vmem>>, vector<1x128xf32>
    tpu.vector_store %arg6[%c46, %c0_69], %198 {strides = array<i32>} : memref<88x128xf32, #tpu.memory_space<vmem>>, vector<1x128xf32>,
    %200 = vector.extract_strided_slice %191 {offsets = [4, 0], sizes = [1, 128], strides = [1, 1]} : vector<16x128xf32> to vector<1x128xf32>
    %201 = vector.extract_strided_slice %191 {offsets = [5, 0], sizes = [1, 128], strides = [1, 1]} : vector<16x128xf32> to vector<1x128xf32>
    %202 = arith.maximumf %200, %201 : vector<1x128xf32>
    %c47 = arith.constant 47 : index
    %c0_70 = arith.constant 0 : index
    %203 = vector.load %arg6[%c47, %c0_70] : memref<88x128xf32, #tpu.memory_space<vmem>>, vector<1x128xf32>
    tpu.vector_store %arg6[%c47, %c0_70], %202 {strides = array<i32>} : memref<88x128xf32, #tpu.memory_space<vmem>>, vector<1x128xf32>,
    %204 = vector.extract_strided_slice %191 {offsets = [6, 0], sizes = [1, 128], strides = [1, 1]} : vector<16x128xf32> to vector<1x128xf32>
    %205 = vector.extract_strided_slice %191 {offsets = [7, 0], sizes = [1, 128], strides = [1, 1]} : vector<16x128xf32> to vector<1x128xf32>
    %206 = arith.maximumf %204, %205 : vector<1x128xf32>
    %c48 = arith.constant 48 : index
    %c0_71 = arith.constant 0 : index
    %207 = vector.load %arg6[%c48, %c0_71] : memref<88x128xf32, #tpu.memory_space<vmem>>, vector<1x128xf32>
    tpu.vector_store %arg6[%c48, %c0_71], %206 {strides = array<i32>} : memref<88x128xf32, #tpu.memory_space<vmem>>, vector<1x128xf32>,
    %208 = vector.extract_strided_slice %191 {offsets = [8, 0], sizes = [1, 128], strides = [1, 1]} : vector<16x128xf32> to vector<1x128xf32>
    %209 = vector.extract_strided_slice %191 {offsets = [9, 0], sizes = [1, 128], strides = [1, 1]} : vector<16x128xf32> to vector<1x128xf32>
    %210 = arith.maximumf %208, %209 : vector<1x128xf32>
    %c49 = arith.constant 49 : index
    %c0_72 = arith.constant 0 : index
    %211 = vector.load %arg6[%c49, %c0_72] : memref<88x128xf32, #tpu.memory_space<vmem>>, vector<1x128xf32>
    tpu.vector_store %arg6[%c49, %c0_72], %210 {strides = array<i32>} : memref<88x128xf32, #tpu.memory_space<vmem>>, vector<1x128xf32>,
    %212 = vector.extract_strided_slice %191 {offsets = [10, 0], sizes = [1, 128], strides = [1, 1]} : vector<16x128xf32> to vector<1x128xf32>
    %213 = vector.extract_strided_slice %191 {offsets = [11, 0], sizes = [1, 128], strides = [1, 1]} : vector<16x128xf32> to vector<1x128xf32>
    %214 = arith.maximumf %212, %213 : vector<1x128xf32>
    %c50 = arith.constant 50 : index
    %c0_73 = arith.constant 0 : index
    %215 = vector.load %arg6[%c50, %c0_73] : memref<88x128xf32, #tpu.memory_space<vmem>>, vector<1x128xf32>
    tpu.vector_store %arg6[%c50, %c0_73], %214 {strides = array<i32>} : memref<88x128xf32, #tpu.memory_space<vmem>>, vector<1x128xf32>,
    %216 = vector.extract_strided_slice %191 {offsets = [12, 0], sizes = [1, 128], strides = [1, 1]} : vector<16x128xf32> to vector<1x128xf32>
    %217 = vector.extract_strided_slice %191 {offsets = [13, 0], sizes = [1, 128], strides = [1, 1]} : vector<16x128xf32> to vector<1x128xf32>
    %218 = arith.maximumf %216, %217 : vector<1x128xf32>
    %c51_74 = arith.constant 51 : index
    %c0_75 = arith.constant 0 : index
    %219 = vector.load %arg6[%c51_74, %c0_75] : memref<88x128xf32, #tpu.memory_space<vmem>>, vector<1x128xf32>
    tpu.vector_store %arg6[%c51_74, %c0_75], %218 {strides = array<i32>} : memref<88x128xf32, #tpu.memory_space<vmem>>, vector<1x128xf32>,
    %220 = vector.extract_strided_slice %191 {offsets = [14, 0], sizes = [1, 128], strides = [1, 1]} : vector<16x128xf32> to vector<1x128xf32>
    %221 = vector.extract_strided_slice %191 {offsets = [15, 0], sizes = [1, 128], strides = [1, 1]} : vector<16x128xf32> to vector<1x128xf32>
    %222 = arith.maximumf %220, %221 : vector<1x128xf32>
    %c52 = arith.constant 52 : index
    %c0_76 = arith.constant 0 : index
    %223 = vector.load %arg6[%c52, %c0_76] : memref<88x128xf32, #tpu.memory_space<vmem>>, vector<1x128xf32>
    tpu.vector_store %arg6[%c52, %c0_76], %222 {strides = array<i32>} : memref<88x128xf32, #tpu.memory_space<vmem>>, vector<1x128xf32>,
    %c0_77 = arith.constant 0 : index
    %c204 = arith.constant 204 : index
    %c0_78 = arith.constant 0 : index
    %224 = vector.load %arg1[%c0_77, %c204, %c0_78] : memref<1x272x128xf32, #tpu.memory_space<vmem>>, vector<1x16x128xf32>
    %225 = vector.shape_cast %224 : vector<1x16x128xf32> to vector<16x128xf32>
    %c0_79 = arith.constant 0 : index
    %c221 = arith.constant 221 : index
    %c0_80 = arith.constant 0 : index
    %226 = vector.load %arg1[%c0_79, %c221, %c0_80] : memref<1x272x128xf32, #tpu.memory_space<vmem>>, vector<1x16x128xf32>
    %227 = vector.shape_cast %226 : vector<1x16x128xf32> to vector<16x128xf32>
    %228 = arith.maximumf %225, %227 : vector<16x128xf32>
    %229 = vector.extract_strided_slice %228 {offsets = [0, 0], sizes = [1, 128], strides = [1, 1]} : vector<16x128xf32> to vector<1x128xf32>
    %230 = vector.extract_strided_slice %228 {offsets = [1, 0], sizes = [1, 128], strides = [1, 1]} : vector<16x128xf32> to vector<1x128xf32>
    %231 = arith.maximumf %229, %230 : vector<1x128xf32>
    %c54 = arith.constant 54 : index
    %c0_81 = arith.constant 0 : index
    %232 = vector.load %arg6[%c54, %c0_81] : memref<88x128xf32, #tpu.memory_space<vmem>>, vector<1x128xf32>
    tpu.vector_store %arg6[%c54, %c0_81], %231 {strides = array<i32>} : memref<88x128xf32, #tpu.memory_space<vmem>>, vector<1x128xf32>,
    %233 = vector.extract_strided_slice %228 {offsets = [2, 0], sizes = [1, 128], strides = [1, 1]} : vector<16x128xf32> to vector<1x128xf32>
    %234 = vector.extract_strided_slice %228 {offsets = [3, 0], sizes = [1, 128], strides = [1, 1]} : vector<16x128xf32> to vector<1x128xf32>
    %235 = arith.maximumf %233, %234 : vector<1x128xf32>
    %c55 = arith.constant 55 : index
    %c0_82 = arith.constant 0 : index
    %236 = vector.load %arg6[%c55, %c0_82] : memref<88x128xf32, #tpu.memory_space<vmem>>, vector<1x128xf32>
    tpu.vector_store %arg6[%c55, %c0_82], %235 {strides = array<i32>} : memref<88x128xf32, #tpu.memory_space<vmem>>, vector<1x128xf32>,
    %237 = vector.extract_strided_slice %228 {offsets = [4, 0], sizes = [1, 128], strides = [1, 1]} : vector<16x128xf32> to vector<1x128xf32>
    %238 = vector.extract_strided_slice %228 {offsets = [5, 0], sizes = [1, 128], strides = [1, 1]} : vector<16x128xf32> to vector<1x128xf32>
    %239 = arith.maximumf %237, %238 : vector<1x128xf32>
    %c56 = arith.constant 56 : index
    %c0_83 = arith.constant 0 : index
    %240 = vector.load %arg6[%c56, %c0_83] : memref<88x128xf32, #tpu.memory_space<vmem>>, vector<1x128xf32>
    tpu.vector_store %arg6[%c56, %c0_83], %239 {strides = array<i32>} : memref<88x128xf32, #tpu.memory_space<vmem>>, vector<1x128xf32>,
    %241 = vector.extract_strided_slice %228 {offsets = [6, 0], sizes = [1, 128], strides = [1, 1]} : vector<16x128xf32> to vector<1x128xf32>
    %242 = vector.extract_strided_slice %228 {offsets = [7, 0], sizes = [1, 128], strides = [1, 1]} : vector<16x128xf32> to vector<1x128xf32>
    %243 = arith.maximumf %241, %242 : vector<1x128xf32>
    %c57 = arith.constant 57 : index
    %c0_84 = arith.constant 0 : index
    %244 = vector.load %arg6[%c57, %c0_84] : memref<88x128xf32, #tpu.memory_space<vmem>>, vector<1x128xf32>
    tpu.vector_store %arg6[%c57, %c0_84], %243 {strides = array<i32>} : memref<88x128xf32, #tpu.memory_space<vmem>>, vector<1x128xf32>,
    %245 = vector.extract_strided_slice %228 {offsets = [8, 0], sizes = [1, 128], strides = [1, 1]} : vector<16x128xf32> to vector<1x128xf32>
    %246 = vector.extract_strided_slice %228 {offsets = [9, 0], sizes = [1, 128], strides = [1, 1]} : vector<16x128xf32> to vector<1x128xf32>
    %247 = arith.maximumf %245, %246 : vector<1x128xf32>
    %c58 = arith.constant 58 : index
    %c0_85 = arith.constant 0 : index
    %248 = vector.load %arg6[%c58, %c0_85] : memref<88x128xf32, #tpu.memory_space<vmem>>, vector<1x128xf32>
    tpu.vector_store %arg6[%c58, %c0_85], %247 {strides = array<i32>} : memref<88x128xf32, #tpu.memory_space<vmem>>, vector<1x128xf32>,
    %249 = vector.extract_strided_slice %228 {offsets = [10, 0], sizes = [1, 128], strides = [1, 1]} : vector<16x128xf32> to vector<1x128xf32>
    %250 = vector.extract_strided_slice %228 {offsets = [11, 0], sizes = [1, 128], strides = [1, 1]} : vector<16x128xf32> to vector<1x128xf32>
    %251 = arith.maximumf %249, %250 : vector<1x128xf32>
    %c59 = arith.constant 59 : index
    %c0_86 = arith.constant 0 : index
    %252 = vector.load %arg6[%c59, %c0_86] : memref<88x128xf32, #tpu.memory_space<vmem>>, vector<1x128xf32>
    tpu.vector_store %arg6[%c59, %c0_86], %251 {strides = array<i32>} : memref<88x128xf32, #tpu.memory_space<vmem>>, vector<1x128xf32>,
    %253 = vector.extract_strided_slice %228 {offsets = [12, 0], sizes = [1, 128], strides = [1, 1]} : vector<16x128xf32> to vector<1x128xf32>
    %254 = vector.extract_strided_slice %228 {offsets = [13, 0], sizes = [1, 128], strides = [1, 1]} : vector<16x128xf32> to vector<1x128xf32>
    %255 = arith.maximumf %253, %254 : vector<1x128xf32>
    %c60 = arith.constant 60 : index
    %c0_87 = arith.constant 0 : index
    %256 = vector.load %arg6[%c60, %c0_87] : memref<88x128xf32, #tpu.memory_space<vmem>>, vector<1x128xf32>
    tpu.vector_store %arg6[%c60, %c0_87], %255 {strides = array<i32>} : memref<88x128xf32, #tpu.memory_space<vmem>>, vector<1x128xf32>,
    %257 = vector.extract_strided_slice %228 {offsets = [14, 0], sizes = [1, 128], strides = [1, 1]} : vector<16x128xf32> to vector<1x128xf32>
    %258 = vector.extract_strided_slice %228 {offsets = [15, 0], sizes = [1, 128], strides = [1, 1]} : vector<16x128xf32> to vector<1x128xf32>
    %259 = arith.maximumf %257, %258 : vector<1x128xf32>
    %c61 = arith.constant 61 : index
    %c0_88 = arith.constant 0 : index
    %260 = vector.load %arg6[%c61, %c0_88] : memref<88x128xf32, #tpu.memory_space<vmem>>, vector<1x128xf32>
    tpu.vector_store %arg6[%c61, %c0_88], %259 {strides = array<i32>} : memref<88x128xf32, #tpu.memory_space<vmem>>, vector<1x128xf32>,
    %c0_89 = arith.constant 0 : index
    %c238 = arith.constant 238 : index
    %c0_90 = arith.constant 0 : index
    %261 = vector.load %arg1[%c0_89, %c238, %c0_90] : memref<1x272x128xf32, #tpu.memory_space<vmem>>, vector<1x16x128xf32>
    %262 = vector.shape_cast %261 : vector<1x16x128xf32> to vector<16x128xf32>
    %c0_91 = arith.constant 0 : index
    %c255 = arith.constant 255 : index
    %c0_92 = arith.constant 0 : index
    %263 = vector.load %arg1[%c0_91, %c255, %c0_92] : memref<1x272x128xf32, #tpu.memory_space<vmem>>, vector<1x16x128xf32>
    %264 = vector.shape_cast %263 : vector<1x16x128xf32> to vector<16x128xf32>
    %265 = arith.maximumf %262, %264 : vector<16x128xf32>
    %266 = vector.extract_strided_slice %265 {offsets = [0, 0], sizes = [1, 128], strides = [1, 1]} : vector<16x128xf32> to vector<1x128xf32>
    %267 = vector.extract_strided_slice %265 {offsets = [1, 0], sizes = [1, 128], strides = [1, 1]} : vector<16x128xf32> to vector<1x128xf32>
    %268 = arith.maximumf %266, %267 : vector<1x128xf32>
    %c63 = arith.constant 63 : index
    %c0_93 = arith.constant 0 : index
    %269 = vector.load %arg6[%c63, %c0_93] : memref<88x128xf32, #tpu.memory_space<vmem>>, vector<1x128xf32>
    tpu.vector_store %arg6[%c63, %c0_93], %268 {strides = array<i32>} : memref<88x128xf32, #tpu.memory_space<vmem>>, vector<1x128xf32>,
    %270 = vector.extract_strided_slice %265 {offsets = [2, 0], sizes = [1, 128], strides = [1, 1]} : vector<16x128xf32> to vector<1x128xf32>
    %271 = vector.extract_strided_slice %265 {offsets = [3, 0], sizes = [1, 128], strides = [1, 1]} : vector<16x128xf32> to vector<1x128xf32>
    %272 = arith.maximumf %270, %271 : vector<1x128xf32>
    %c64 = arith.constant 64 : index
    %c0_94 = arith.constant 0 : index
    %273 = vector.load %arg6[%c64, %c0_94] : memref<88x128xf32, #tpu.memory_space<vmem>>, vector<1x128xf32>
    tpu.vector_store %arg6[%c64, %c0_94], %272 {strides = array<i32>} : memref<88x128xf32, #tpu.memory_space<vmem>>, vector<1x128xf32>,
    %274 = vector.extract_strided_slice %265 {offsets = [4, 0], sizes = [1, 128], strides = [1, 1]} : vector<16x128xf32> to vector<1x128xf32>
    %275 = vector.extract_strided_slice %265 {offsets = [5, 0], sizes = [1, 128], strides = [1, 1]} : vector<16x128xf32> to vector<1x128xf32>
    %276 = arith.maximumf %274, %275 : vector<1x128xf32>
    %c65 = arith.constant 65 : index
    %c0_95 = arith.constant 0 : index
    %277 = vector.load %arg6[%c65, %c0_95] : memref<88x128xf32, #tpu.memory_space<vmem>>, vector<1x128xf32>
    tpu.vector_store %arg6[%c65, %c0_95], %276 {strides = array<i32>} : memref<88x128xf32, #tpu.memory_space<vmem>>, vector<1x128xf32>,
    %278 = vector.extract_strided_slice %265 {offsets = [6, 0], sizes = [1, 128], strides = [1, 1]} : vector<16x128xf32> to vector<1x128xf32>
    %279 = vector.extract_strided_slice %265 {offsets = [7, 0], sizes = [1, 128], strides = [1, 1]} : vector<16x128xf32> to vector<1x128xf32>
    %280 = arith.maximumf %278, %279 : vector<1x128xf32>
    %c66 = arith.constant 66 : index
    %c0_96 = arith.constant 0 : index
    %281 = vector.load %arg6[%c66, %c0_96] : memref<88x128xf32, #tpu.memory_space<vmem>>, vector<1x128xf32>
    tpu.vector_store %arg6[%c66, %c0_96], %280 {strides = array<i32>} : memref<88x128xf32, #tpu.memory_space<vmem>>, vector<1x128xf32>,
    %282 = vector.extract_strided_slice %265 {offsets = [8, 0], sizes = [1, 128], strides = [1, 1]} : vector<16x128xf32> to vector<1x128xf32>
    %283 = vector.extract_strided_slice %265 {offsets = [9, 0], sizes = [1, 128], strides = [1, 1]} : vector<16x128xf32> to vector<1x128xf32>
    %284 = arith.maximumf %282, %283 : vector<1x128xf32>
    %c67 = arith.constant 67 : index
    %c0_97 = arith.constant 0 : index
    %285 = vector.load %arg6[%c67, %c0_97] : memref<88x128xf32, #tpu.memory_space<vmem>>, vector<1x128xf32>
    tpu.vector_store %arg6[%c67, %c0_97], %284 {strides = array<i32>} : memref<88x128xf32, #tpu.memory_space<vmem>>, vector<1x128xf32>,
    %286 = vector.extract_strided_slice %265 {offsets = [10, 0], sizes = [1, 128], strides = [1, 1]} : vector<16x128xf32> to vector<1x128xf32>
    %287 = vector.extract_strided_slice %265 {offsets = [11, 0], sizes = [1, 128], strides = [1, 1]} : vector<16x128xf32> to vector<1x128xf32>
    %288 = arith.maximumf %286, %287 : vector<1x128xf32>
    %c68_98 = arith.constant 68 : index
    %c0_99 = arith.constant 0 : index
    %289 = vector.load %arg6[%c68_98, %c0_99] : memref<88x128xf32, #tpu.memory_space<vmem>>, vector<1x128xf32>
    tpu.vector_store %arg6[%c68_98, %c0_99], %288 {strides = array<i32>} : memref<88x128xf32, #tpu.memory_space<vmem>>, vector<1x128xf32>,
    %290 = vector.extract_strided_slice %265 {offsets = [12, 0], sizes = [1, 128], strides = [1, 1]} : vector<16x128xf32> to vector<1x128xf32>
    %291 = vector.extract_strided_slice %265 {offsets = [13, 0], sizes = [1, 128], strides = [1, 1]} : vector<16x128xf32> to vector<1x128xf32>
    %292 = arith.maximumf %290, %291 : vector<1x128xf32>
    %c69 = arith.constant 69 : index
    %c0_100 = arith.constant 0 : index
    %293 = vector.load %arg6[%c69, %c0_100] : memref<88x128xf32, #tpu.memory_space<vmem>>, vector<1x128xf32>
    tpu.vector_store %arg6[%c69, %c0_100], %292 {strides = array<i32>} : memref<88x128xf32, #tpu.memory_space<vmem>>, vector<1x128xf32>,
    %294 = vector.extract_strided_slice %265 {offsets = [14, 0], sizes = [1, 128], strides = [1, 1]} : vector<16x128xf32> to vector<1x128xf32>
    %295 = vector.extract_strided_slice %265 {offsets = [15, 0], sizes = [1, 128], strides = [1, 1]} : vector<16x128xf32> to vector<1x128xf32>
    %296 = arith.maximumf %294, %295 : vector<1x128xf32>
    %c70 = arith.constant 70 : index
    %c0_101 = arith.constant 0 : index
    %297 = vector.load %arg6[%c70, %c0_101] : memref<88x128xf32, #tpu.memory_space<vmem>>, vector<1x128xf32>
    tpu.vector_store %arg6[%c70, %c0_101], %296 {strides = array<i32>} : memref<88x128xf32, #tpu.memory_space<vmem>>, vector<1x128xf32>,
    %c0_102 = arith.constant 0 : index
    %c0_103 = arith.constant 0 : index
    %298 = vector.load %arg6[%c0_102, %c0_103] : memref<88x128xf32, #tpu.memory_space<vmem>>, vector<72x128xf32>
    %c0_104 = arith.constant 0 : index
    %c0_105 = arith.constant 0 : index
    %c0_106 = arith.constant 0 : index
    %c0_107 = arith.constant 0 : index
    %299 = vector.load %arg2[%c0_104, %c0_105, %c0_106, %c0_107] : memref<2x4x128x128xf32, #tpu.memory_space<vmem>>, vector<1x1x128x128xf32>
    %300 = vector.shape_cast %299 : vector<1x1x128x128xf32> to vector<128x128xf32>
    %cst_108 = arith.constant dense<0.000000e+00> : vector<72x128xf32>
    %301 = tpu.matmul %298, %300, %cst_108 {dimension_numbers = #tpu.dot_dimension_numbers<[1], [0], [0], [1], [0, 0, 1, 1], [], []>} : vector<72x128xf32>, vector<128x128xf32>, vector<72x128xf32> -> vector<72x128xf32>
    %c0_109 = arith.constant 0 : index
    %c0_110 = arith.constant 0 : index
    %302 = vector.load %arg7[%c0_109, %c0_110] : memref<72x128xf32, #tpu.memory_space<vmem>>, vector<72x128xf32>
    tpu.vector_store %arg7[%c0_109, %c0_110], %301 {strides = array<i32>} : memref<72x128xf32, #tpu.memory_space<vmem>>, vector<72x128xf32>,
    %c1_111 = arith.constant 1 : index
    %c0_112 = arith.constant 0 : index
    %303 = vector.load %arg6[%c1_111, %c0_112] : memref<88x128xf32, #tpu.memory_space<vmem>>, vector<72x128xf32>
    %c0_113 = arith.constant 0 : index
    %c1_114 = arith.constant 1 : index
    %c0_115 = arith.constant 0 : index
    %c0_116 = arith.constant 0 : index
    %304 = vector.load %arg2[%c0_113, %c1_114, %c0_115, %c0_116] : memref<2x4x128x128xf32, #tpu.memory_space<vmem>>, vector<1x1x128x128xf32>
    %305 = vector.shape_cast %304 : vector<1x1x128x128xf32> to vector<128x128xf32>
    %cst_117 = arith.constant dense<0.000000e+00> : vector<72x128xf32>
    %306 = tpu.matmul %303, %305, %cst_117 {dimension_numbers = #tpu.dot_dimension_numbers<[1], [0], [0], [1], [0, 0, 1, 1], [], []>} : vector<72x128xf32>, vector<128x128xf32>, vector<72x128xf32> -> vector<72x128xf32>
    %c0_118 = arith.constant 0 : index
    %c0_119 = arith.constant 0 : index
    %307 = vector.load %arg7[%c0_118, %c0_119] : memref<72x128xf32, #tpu.memory_space<vmem>>, vector<72x128xf32>
    %308 = arith.addf %307, %306 : vector<72x128xf32>
    %c0_120 = arith.constant 0 : index
    %c0_121 = arith.constant 0 : index
    %309 = vector.load %arg7[%c0_120, %c0_121] : memref<72x128xf32, #tpu.memory_space<vmem>>, vector<72x128xf32>
    tpu.vector_store %arg7[%c0_120, %c0_121], %308 {strides = array<i32>} : memref<72x128xf32, #tpu.memory_space<vmem>>, vector<72x128xf32>,
    %c9_122 = arith.constant 9 : index
    %c0_123 = arith.constant 0 : index
    %310 = vector.load %arg6[%c9_122, %c0_123] : memref<88x128xf32, #tpu.memory_space<vmem>>, vector<72x128xf32>
    %c0_124 = arith.constant 0 : index
    %c2_125 = arith.constant 2 : index
    %c0_126 = arith.constant 0 : index
    %c0_127 = arith.constant 0 : index
    %311 = vector.load %arg2[%c0_124, %c2_125, %c0_126, %c0_127] : memref<2x4x128x128xf32, #tpu.memory_space<vmem>>, vector<1x1x128x128xf32>
    %312 = vector.shape_cast %311 : vector<1x1x128x128xf32> to vector<128x128xf32>
    %cst_128 = arith.constant dense<0.000000e+00> : vector<72x128xf32>
    %313 = tpu.matmul %310, %312, %cst_128 {dimension_numbers = #tpu.dot_dimension_numbers<[1], [0], [0], [1], [0, 0, 1, 1], [], []>} : vector<72x128xf32>, vector<128x128xf32>, vector<72x128xf32> -> vector<72x128xf32>
    %c0_129 = arith.constant 0 : index
    %c0_130 = arith.constant 0 : index
    %314 = vector.load %arg7[%c0_129, %c0_130] : memref<72x128xf32, #tpu.memory_space<vmem>>, vector<72x128xf32>
    %315 = arith.addf %314, %313 : vector<72x128xf32>
    %c0_131 = arith.constant 0 : index
    %c0_132 = arith.constant 0 : index
    %316 = vector.load %arg7[%c0_131, %c0_132] : memref<72x128xf32, #tpu.memory_space<vmem>>, vector<72x128xf32>
    tpu.vector_store %arg7[%c0_131, %c0_132], %315 {strides = array<i32>} : memref<72x128xf32, #tpu.memory_space<vmem>>, vector<72x128xf32>,
    %c10_133 = arith.constant 10 : index
    %c0_134 = arith.constant 0 : index
    %317 = vector.load %arg6[%c10_133, %c0_134] : memref<88x128xf32, #tpu.memory_space<vmem>>, vector<72x128xf32>
    %c0_135 = arith.constant 0 : index
    %c3_136 = arith.constant 3 : index
    %c0_137 = arith.constant 0 : index
    %c0_138 = arith.constant 0 : index
    %318 = vector.load %arg2[%c0_135, %c3_136, %c0_137, %c0_138] : memref<2x4x128x128xf32, #tpu.memory_space<vmem>>, vector<1x1x128x128xf32>
    %319 = vector.shape_cast %318 : vector<1x1x128x128xf32> to vector<128x128xf32>
    %cst_139 = arith.constant dense<0.000000e+00> : vector<72x128xf32>
    %320 = tpu.matmul %317, %319, %cst_139 {dimension_numbers = #tpu.dot_dimension_numbers<[1], [0], [0], [1], [0, 0, 1, 1], [], []>} : vector<72x128xf32>, vector<128x128xf32>, vector<72x128xf32> -> vector<72x128xf32>
    %c0_140 = arith.constant 0 : index
    %c0_141 = arith.constant 0 : index
    %321 = vector.load %arg7[%c0_140, %c0_141] : memref<72x128xf32, #tpu.memory_space<vmem>>, vector<72x128xf32>
    %322 = arith.addf %321, %320 : vector<72x128xf32>
    %c0_142 = arith.constant 0 : index
    %c0_143 = arith.constant 0 : index
    %323 = vector.load %arg7[%c0_142, %c0_143] : memref<72x128xf32, #tpu.memory_space<vmem>>, vector<72x128xf32>
    tpu.vector_store %arg7[%c0_142, %c0_143], %322 {strides = array<i32>} : memref<72x128xf32, #tpu.memory_space<vmem>>, vector<72x128xf32>,
    %c0_144 = arith.constant 0 : index
    %c0_145 = arith.constant 0 : index
    %324 = vector.load %arg7[%c0_144, %c0_145] : memref<72x128xf32, #tpu.memory_space<vmem>>, vector<72x128xf32>
    %c0_146 = arith.constant 0 : index
    %c0_147 = arith.constant 0 : index
    %c0_148 = arith.constant 0 : index
    %325 = vector.load %arg3[%c0_146, %c0_147, %c0_148] : memref<2x1x128xf32, #tpu.memory_space<vmem>>, vector<1x1x128xf32>
    %326 = vector.shape_cast %325 : vector<1x1x128xf32> to vector<1x128xf32>
    %327 = vector.broadcast %326 : vector<1x128xf32> to vector<72x128xf32>
    %328 = arith.addf %324, %327 : vector<72x128xf32>
    %cst_149 = arith.constant 0.000000e+00 : f32
    %329 = vector.broadcast %cst_149 : f32 to vector<72x128xf32>
    %330 = arith.maximumf %328, %329 : vector<72x128xf32>
    %c0_150 = arith.constant 0 : index
    %c0_151 = arith.constant 0 : index
    %331 = vector.load %arg4[%c0_150, %c0_151] : memref<72x1xf32, #tpu.memory_space<vmem>>, vector<72x1xf32>
    %332 = vector.broadcast %331 : vector<72x1xf32> to vector<72x128xf32>
    %333 = arith.mulf %330, %332 : vector<72x128xf32>
    %c0_152 = arith.constant 0 : index
    %c0_153 = arith.constant 0 : index
    %334 = vector.load %arg6[%c0_152, %c0_153] : memref<88x128xf32, #tpu.memory_space<vmem>>, vector<72x128xf32>
    tpu.vector_store %arg6[%c0_152, %c0_153], %333 {strides = array<i32>} : memref<88x128xf32, #tpu.memory_space<vmem>>, vector<72x128xf32>,
    %c0_154 = arith.constant 0 : index
    %c0_155 = arith.constant 0 : index
    %335 = vector.load %arg6[%c0_154, %c0_155] : memref<88x128xf32, #tpu.memory_space<vmem>>, vector<72x128xf32>
    %c1_156 = arith.constant 1 : index
    %c0_157 = arith.constant 0 : index
    %c0_158 = arith.constant 0 : index
    %c0_159 = arith.constant 0 : index
    %336 = vector.load %arg2[%c1_156, %c0_157, %c0_158, %c0_159] : memref<2x4x128x128xf32, #tpu.memory_space<vmem>>, vector<1x1x128x128xf32>
    %337 = vector.shape_cast %336 : vector<1x1x128x128xf32> to vector<128x128xf32>
    %cst_160 = arith.constant dense<0.000000e+00> : vector<72x128xf32>
    %338 = tpu.matmul %335, %337, %cst_160 {dimension_numbers = #tpu.dot_dimension_numbers<[1], [0], [0], [1], [0, 0, 1, 1], [], []>} : vector<72x128xf32>, vector<128x128xf32>, vector<72x128xf32> -> vector<72x128xf32>
    %c0_161 = arith.constant 0 : index
    %c0_162 = arith.constant 0 : index
    %339 = vector.load %arg7[%c0_161, %c0_162] : memref<72x128xf32, #tpu.memory_space<vmem>>, vector<72x128xf32>
    tpu.vector_store %arg7[%c0_161, %c0_162], %338 {strides = array<i32>} : memref<72x128xf32, #tpu.memory_space<vmem>>, vector<72x128xf32>,
    %c1_163 = arith.constant 1 : index
    %c0_164 = arith.constant 0 : index
    %340 = vector.load %arg6[%c1_163, %c0_164] : memref<88x128xf32, #tpu.memory_space<vmem>>, vector<72x128xf32>
    %c1_165 = arith.constant 1 : index
    %c1_166 = arith.constant 1 : index
    %c0_167 = arith.constant 0 : index
    %c0_168 = arith.constant 0 : index
    %341 = vector.load %arg2[%c1_165, %c1_166, %c0_167, %c0_168] : memref<2x4x128x128xf32, #tpu.memory_space<vmem>>, vector<1x1x128x128xf32>
    %342 = vector.shape_cast %341 : vector<1x1x128x128xf32> to vector<128x128xf32>
    %cst_169 = arith.constant dense<0.000000e+00> : vector<72x128xf32>
    %343 = tpu.matmul %340, %342, %cst_169 {dimension_numbers = #tpu.dot_dimension_numbers<[1], [0], [0], [1], [0, 0, 1, 1], [], []>} : vector<72x128xf32>, vector<128x128xf32>, vector<72x128xf32> -> vector<72x128xf32>
    %c0_170 = arith.constant 0 : index
    %c0_171 = arith.constant 0 : index
    %344 = vector.load %arg7[%c0_170, %c0_171] : memref<72x128xf32, #tpu.memory_space<vmem>>, vector<72x128xf32>
    %345 = arith.addf %344, %343 : vector<72x128xf32>
    %c0_172 = arith.constant 0 : index
    %c0_173 = arith.constant 0 : index
    %346 = vector.load %arg7[%c0_172, %c0_173] : memref<72x128xf32, #tpu.memory_space<vmem>>, vector<72x128xf32>
    tpu.vector_store %arg7[%c0_172, %c0_173], %345 {strides = array<i32>} : memref<72x128xf32, #tpu.memory_space<vmem>>, vector<72x128xf32>,
    %c9_174 = arith.constant 9 : index
    %c0_175 = arith.constant 0 : index
    %347 = vector.load %arg6[%c9_174, %c0_175] : memref<88x128xf32, #tpu.memory_space<vmem>>, vector<72x128xf32>
    %c1_176 = arith.constant 1 : index
    %c2_177 = arith.constant 2 : index
    %c0_178 = arith.constant 0 : index
    %c0_179 = arith.constant 0 : index
    %348 = vector.load %arg2[%c1_176, %c2_177, %c0_178, %c0_179] : memref<2x4x128x128xf32, #tpu.memory_space<vmem>>, vector<1x1x128x128xf32>
    %349 = vector.shape_cast %348 : vector<1x1x128x128xf32> to vector<128x128xf32>
    %cst_180 = arith.constant dense<0.000000e+00> : vector<72x128xf32>
    %350 = tpu.matmul %347, %349, %cst_180 {dimension_numbers = #tpu.dot_dimension_numbers<[1], [0], [0], [1], [0, 0, 1, 1], [], []>} : vector<72x128xf32>, vector<128x128xf32>, vector<72x128xf32> -> vector<72x128xf32>
    %c0_181 = arith.constant 0 : index
    %c0_182 = arith.constant 0 : index
    %351 = vector.load %arg7[%c0_181, %c0_182] : memref<72x128xf32, #tpu.memory_space<vmem>>, vector<72x128xf32>
    %352 = arith.addf %351, %350 : vector<72x128xf32>
    %c0_183 = arith.constant 0 : index
    %c0_184 = arith.constant 0 : index
    %353 = vector.load %arg7[%c0_183, %c0_184] : memref<72x128xf32, #tpu.memory_space<vmem>>, vector<72x128xf32>
    tpu.vector_store %arg7[%c0_183, %c0_184], %352 {strides = array<i32>} : memref<72x128xf32, #tpu.memory_space<vmem>>, vector<72x128xf32>,
    %c10_185 = arith.constant 10 : index
    %c0_186 = arith.constant 0 : index
    %354 = vector.load %arg6[%c10_185, %c0_186] : memref<88x128xf32, #tpu.memory_space<vmem>>, vector<72x128xf32>
    %c1_187 = arith.constant 1 : index
    %c3_188 = arith.constant 3 : index
    %c0_189 = arith.constant 0 : index
    %c0_190 = arith.constant 0 : index
    %355 = vector.load %arg2[%c1_187, %c3_188, %c0_189, %c0_190] : memref<2x4x128x128xf32, #tpu.memory_space<vmem>>, vector<1x1x128x128xf32>
    %356 = vector.shape_cast %355 : vector<1x1x128x128xf32> to vector<128x128xf32>
    %cst_191 = arith.constant dense<0.000000e+00> : vector<72x128xf32>
    %357 = tpu.matmul %354, %356, %cst_191 {dimension_numbers = #tpu.dot_dimension_numbers<[1], [0], [0], [1], [0, 0, 1, 1], [], []>} : vector<72x128xf32>, vector<128x128xf32>, vector<72x128xf32> -> vector<72x128xf32>
    %c0_192 = arith.constant 0 : index
    %c0_193 = arith.constant 0 : index
    %358 = vector.load %arg7[%c0_192, %c0_193] : memref<72x128xf32, #tpu.memory_space<vmem>>, vector<72x128xf32>
    %359 = arith.addf %358, %357 : vector<72x128xf32>
    %c0_194 = arith.constant 0 : index
    %c0_195 = arith.constant 0 : index
    %360 = vector.load %arg7[%c0_194, %c0_195] : memref<72x128xf32, #tpu.memory_space<vmem>>, vector<72x128xf32>
    tpu.vector_store %arg7[%c0_194, %c0_195], %359 {strides = array<i32>} : memref<72x128xf32, #tpu.memory_space<vmem>>, vector<72x128xf32>,
    %c0_196 = arith.constant 0 : index
    %c0_197 = arith.constant 0 : index
    %361 = vector.load %arg7[%c0_196, %c0_197] : memref<72x128xf32, #tpu.memory_space<vmem>>, vector<72x128xf32>
    %c1_198 = arith.constant 1 : index
    %c0_199 = arith.constant 0 : index
    %c0_200 = arith.constant 0 : index
    %362 = vector.load %arg3[%c1_198, %c0_199, %c0_200] : memref<2x1x128xf32, #tpu.memory_space<vmem>>, vector<1x1x128xf32>
    %363 = vector.shape_cast %362 : vector<1x1x128xf32> to vector<1x128xf32>
    %364 = vector.broadcast %363 : vector<1x128xf32> to vector<72x128xf32>
    %365 = arith.addf %361, %364 : vector<72x128xf32>
    %cst_201 = arith.constant 0.000000e+00 : f32
    %366 = vector.broadcast %cst_201 : f32 to vector<72x128xf32>
    %367 = arith.maximumf %365, %366 : vector<72x128xf32>
    %c0_202 = arith.constant 0 : index
    %c0_203 = arith.constant 0 : index
    %368 = vector.load %arg4[%c0_202, %c0_203] : memref<72x1xf32, #tpu.memory_space<vmem>>, vector<72x1xf32>
    %369 = vector.broadcast %368 : vector<72x1xf32> to vector<72x128xf32>
    %370 = arith.mulf %367, %369 : vector<72x128xf32>
    %c0_204 = arith.constant 0 : index
    %c0_205 = arith.constant 0 : index
    %c0_206 = arith.constant 0 : index
    %371 = vector.load %arg5[%c0_204, %c0_205, %c0_206] : memref<1x72x128xf32, #tpu.memory_space<vmem>>, vector<1x72x128xf32>
    %372 = vector.shape_cast %371 : vector<1x72x128xf32> to vector<72x128xf32>
    %373 = vector.shape_cast %370 : vector<72x128xf32> to vector<1x72x128xf32>
    tpu.vector_store %arg5[%c0_204, %c0_205, %c0_206], %373 {strides = array<i32>} : memref<1x72x128xf32, #tpu.memory_space<vmem>>, vector<1x72x128xf32>,
    return
  }
  func.func @transform_0(%arg0: i32) -> (i32, i32, i32) {
    %c0_i32 = arith.constant 0 : i32
    %c0_i32_0 = arith.constant 0 : i32
    %c0_i32_1 = arith.constant 0 : i32
    return %arg0, %c0_i32, %c0_i32_0 : i32, i32, i32
  }
  func.func @transform_1(%arg0: i32) -> (i32, i32, i32, i32) {
    %c0_i32 = arith.constant 0 : i32
    %c0_i32_0 = arith.constant 0 : i32
    %c0_i32_1 = arith.constant 0 : i32
    %c0_i32_2 = arith.constant 0 : i32
    %c0_i32_3 = arith.constant 0 : i32
    return %c0_i32, %c0_i32_0, %c0_i32_1, %c0_i32_2 : i32, i32, i32, i32
  }
  func.func @transform_2(%arg0: i32) -> (i32, i32, i32) {
    %c0_i32 = arith.constant 0 : i32
    %c0_i32_0 = arith.constant 0 : i32
    %c0_i32_1 = arith.constant 0 : i32
    %c0_i32_2 = arith.constant 0 : i32
    return %c0_i32, %c0_i32_0, %c0_i32_1 : i32, i32, i32
  }
  func.func @transform_3(%arg0: i32) -> (i32, i32) {
    %c0_i32 = arith.constant 0 : i32
    %c0_i32_0 = arith.constant 0 : i32
    %c0_i32_1 = arith.constant 0 : i32
    return %c0_i32, %c0_i32_0 : i32, i32
  }
  func.func @transform_4(%arg0: i32) -> (i32, i32, i32) {
    %c0_i32 = arith.constant 0 : i32
    %c0_i32_0 = arith.constant 0 : i32
    %c0_i32_1 = arith.constant 0 : i32
    return %arg0, %c0_i32, %c0_i32_0 : i32, i32, i32
  }
}

module attributes {stable_mosaic.version = 11 : i64} {
  func.func @kernel(%arg0: i32, %arg1: memref<1x72x128xf32, #tpu.memory_space<vmem>>, %arg2: memref<2x4x128x128xf32, #tpu.memory_space<vmem>>, %arg3: memref<2x1x128xf32, #tpu.memory_space<vmem>>, %arg4: memref<20x1xf32, #tpu.memory_space<vmem>>, %arg5: memref<1x20x128xf32, #tpu.memory_space<vmem>>, %arg6: memref<32x128xf32, #tpu.memory_space<vmem>>, %arg7: memref<20x128xf32, #tpu.memory_space<vmem>>) attributes {dimension_semantics = [#tpu.dimension_semantics<parallel>], iteration_bounds = array<i64: 2>, scalar_prefetch = 0 : i64, scratch_operands = 2 : i64, tpu.core_type = #tpu.core_type<tc>, window_params = [{transform_indices = @transform_0, window_bounds = array<i64: 1, 72, 128>}, {pipeline_mode = #tpu.pipeline_mode<synchronous>, transform_indices = @transform_1, window_bounds = array<i64: 2, 4, 128, 128>}, {pipeline_mode = #tpu.pipeline_mode<synchronous>, transform_indices = @transform_2, window_bounds = array<i64: 2, 1, 128>}, {pipeline_mode = #tpu.pipeline_mode<synchronous>, transform_indices = @transform_3, window_bounds = array<i64: 20, 1>}, {transform_indices = @transform_4, window_bounds = array<i64: 1, 20, 128>}]} {
    %cst = arith.constant 0.000000e+00 : f32
    %0 = vector.broadcast %cst : f32 to vector<32x128xf32>
    %c0 = arith.constant 0 : index
    %c0_0 = arith.constant 0 : index
    %1 = vector.load %arg6[%c0, %c0_0] : memref<32x128xf32, #tpu.memory_space<vmem>>, vector<32x128xf32>
    tpu.vector_store %arg6[%c0, %c0_0], %0 {strides = array<i32>} : memref<32x128xf32, #tpu.memory_space<vmem>>, vector<32x128xf32>,
    %c0_1 = arith.constant 0 : index
    %c0_2 = arith.constant 0 : index
    %c0_3 = arith.constant 0 : index
    %2 = vector.load %arg1[%c0_1, %c0_2, %c0_3] : memref<1x72x128xf32, #tpu.memory_space<vmem>>, vector<1x8x128xf32>
    %3 = vector.shape_cast %2 : vector<1x8x128xf32> to vector<8x128xf32>
    %c0_4 = arith.constant 0 : index
    %c9 = arith.constant 9 : index
    %c0_5 = arith.constant 0 : index
    %4 = vector.load %arg1[%c0_4, %c9, %c0_5] : memref<1x72x128xf32, #tpu.memory_space<vmem>>, vector<1x8x128xf32>
    %5 = vector.shape_cast %4 : vector<1x8x128xf32> to vector<8x128xf32>
    %6 = arith.maximumf %3, %5 : vector<8x128xf32>
    %7 = vector.extract_strided_slice %6 {offsets = [0, 0], sizes = [1, 128], strides = [1, 1]} : vector<8x128xf32> to vector<1x128xf32>
    %8 = vector.extract_strided_slice %6 {offsets = [1, 0], sizes = [1, 128], strides = [1, 1]} : vector<8x128xf32> to vector<1x128xf32>
    %9 = arith.maximumf %7, %8 : vector<1x128xf32>
    %c0_6 = arith.constant 0 : index
    %c0_7 = arith.constant 0 : index
    %10 = vector.load %arg6[%c0_6, %c0_7] : memref<32x128xf32, #tpu.memory_space<vmem>>, vector<1x128xf32>
    tpu.vector_store %arg6[%c0_6, %c0_7], %9 {strides = array<i32>} : memref<32x128xf32, #tpu.memory_space<vmem>>, vector<1x128xf32>,
    %11 = vector.extract_strided_slice %6 {offsets = [2, 0], sizes = [1, 128], strides = [1, 1]} : vector<8x128xf32> to vector<1x128xf32>
    %12 = vector.extract_strided_slice %6 {offsets = [3, 0], sizes = [1, 128], strides = [1, 1]} : vector<8x128xf32> to vector<1x128xf32>
    %13 = arith.maximumf %11, %12 : vector<1x128xf32>
    %c1 = arith.constant 1 : index
    %c0_8 = arith.constant 0 : index
    %14 = vector.load %arg6[%c1, %c0_8] : memref<32x128xf32, #tpu.memory_space<vmem>>, vector<1x128xf32>
    tpu.vector_store %arg6[%c1, %c0_8], %13 {strides = array<i32>} : memref<32x128xf32, #tpu.memory_space<vmem>>, vector<1x128xf32>,
    %15 = vector.extract_strided_slice %6 {offsets = [4, 0], sizes = [1, 128], strides = [1, 1]} : vector<8x128xf32> to vector<1x128xf32>
    %16 = vector.extract_strided_slice %6 {offsets = [5, 0], sizes = [1, 128], strides = [1, 1]} : vector<8x128xf32> to vector<1x128xf32>
    %17 = arith.maximumf %15, %16 : vector<1x128xf32>
    %c2 = arith.constant 2 : index
    %c0_9 = arith.constant 0 : index
    %18 = vector.load %arg6[%c2, %c0_9] : memref<32x128xf32, #tpu.memory_space<vmem>>, vector<1x128xf32>
    tpu.vector_store %arg6[%c2, %c0_9], %17 {strides = array<i32>} : memref<32x128xf32, #tpu.memory_space<vmem>>, vector<1x128xf32>,
    %19 = vector.extract_strided_slice %6 {offsets = [6, 0], sizes = [1, 128], strides = [1, 1]} : vector<8x128xf32> to vector<1x128xf32>
    %20 = vector.extract_strided_slice %6 {offsets = [7, 0], sizes = [1, 128], strides = [1, 1]} : vector<8x128xf32> to vector<1x128xf32>
    %21 = arith.maximumf %19, %20 : vector<1x128xf32>
    %c3 = arith.constant 3 : index
    %c0_10 = arith.constant 0 : index
    %22 = vector.load %arg6[%c3, %c0_10] : memref<32x128xf32, #tpu.memory_space<vmem>>, vector<1x128xf32>
    tpu.vector_store %arg6[%c3, %c0_10], %21 {strides = array<i32>} : memref<32x128xf32, #tpu.memory_space<vmem>>, vector<1x128xf32>,
    %c0_11 = arith.constant 0 : index
    %c18 = arith.constant 18 : index
    %c0_12 = arith.constant 0 : index
    %23 = vector.load %arg1[%c0_11, %c18, %c0_12] : memref<1x72x128xf32, #tpu.memory_space<vmem>>, vector<1x8x128xf32>
    %24 = vector.shape_cast %23 : vector<1x8x128xf32> to vector<8x128xf32>
    %c0_13 = arith.constant 0 : index
    %c27 = arith.constant 27 : index
    %c0_14 = arith.constant 0 : index
    %25 = vector.load %arg1[%c0_13, %c27, %c0_14] : memref<1x72x128xf32, #tpu.memory_space<vmem>>, vector<1x8x128xf32>
    %26 = vector.shape_cast %25 : vector<1x8x128xf32> to vector<8x128xf32>
    %27 = arith.maximumf %24, %26 : vector<8x128xf32>
    %28 = vector.extract_strided_slice %27 {offsets = [0, 0], sizes = [1, 128], strides = [1, 1]} : vector<8x128xf32> to vector<1x128xf32>
    %29 = vector.extract_strided_slice %27 {offsets = [1, 0], sizes = [1, 128], strides = [1, 1]} : vector<8x128xf32> to vector<1x128xf32>
    %30 = arith.maximumf %28, %29 : vector<1x128xf32>
    %c5 = arith.constant 5 : index
    %c0_15 = arith.constant 0 : index
    %31 = vector.load %arg6[%c5, %c0_15] : memref<32x128xf32, #tpu.memory_space<vmem>>, vector<1x128xf32>
    tpu.vector_store %arg6[%c5, %c0_15], %30 {strides = array<i32>} : memref<32x128xf32, #tpu.memory_space<vmem>>, vector<1x128xf32>,
    %32 = vector.extract_strided_slice %27 {offsets = [2, 0], sizes = [1, 128], strides = [1, 1]} : vector<8x128xf32> to vector<1x128xf32>
    %33 = vector.extract_strided_slice %27 {offsets = [3, 0], sizes = [1, 128], strides = [1, 1]} : vector<8x128xf32> to vector<1x128xf32>
    %34 = arith.maximumf %32, %33 : vector<1x128xf32>
    %c6 = arith.constant 6 : index
    %c0_16 = arith.constant 0 : index
    %35 = vector.load %arg6[%c6, %c0_16] : memref<32x128xf32, #tpu.memory_space<vmem>>, vector<1x128xf32>
    tpu.vector_store %arg6[%c6, %c0_16], %34 {strides = array<i32>} : memref<32x128xf32, #tpu.memory_space<vmem>>, vector<1x128xf32>,
    %36 = vector.extract_strided_slice %27 {offsets = [4, 0], sizes = [1, 128], strides = [1, 1]} : vector<8x128xf32> to vector<1x128xf32>
    %37 = vector.extract_strided_slice %27 {offsets = [5, 0], sizes = [1, 128], strides = [1, 1]} : vector<8x128xf32> to vector<1x128xf32>
    %38 = arith.maximumf %36, %37 : vector<1x128xf32>
    %c7 = arith.constant 7 : index
    %c0_17 = arith.constant 0 : index
    %39 = vector.load %arg6[%c7, %c0_17] : memref<32x128xf32, #tpu.memory_space<vmem>>, vector<1x128xf32>
    tpu.vector_store %arg6[%c7, %c0_17], %38 {strides = array<i32>} : memref<32x128xf32, #tpu.memory_space<vmem>>, vector<1x128xf32>,
    %40 = vector.extract_strided_slice %27 {offsets = [6, 0], sizes = [1, 128], strides = [1, 1]} : vector<8x128xf32> to vector<1x128xf32>
    %41 = vector.extract_strided_slice %27 {offsets = [7, 0], sizes = [1, 128], strides = [1, 1]} : vector<8x128xf32> to vector<1x128xf32>
    %42 = arith.maximumf %40, %41 : vector<1x128xf32>
    %c8 = arith.constant 8 : index
    %c0_18 = arith.constant 0 : index
    %43 = vector.load %arg6[%c8, %c0_18] : memref<32x128xf32, #tpu.memory_space<vmem>>, vector<1x128xf32>
    tpu.vector_store %arg6[%c8, %c0_18], %42 {strides = array<i32>} : memref<32x128xf32, #tpu.memory_space<vmem>>, vector<1x128xf32>,
    %c0_19 = arith.constant 0 : index
    %c36 = arith.constant 36 : index
    %c0_20 = arith.constant 0 : index
    %44 = vector.load %arg1[%c0_19, %c36, %c0_20] : memref<1x72x128xf32, #tpu.memory_space<vmem>>, vector<1x8x128xf32>
    %45 = vector.shape_cast %44 : vector<1x8x128xf32> to vector<8x128xf32>
    %c0_21 = arith.constant 0 : index
    %c45 = arith.constant 45 : index
    %c0_22 = arith.constant 0 : index
    %46 = vector.load %arg1[%c0_21, %c45, %c0_22] : memref<1x72x128xf32, #tpu.memory_space<vmem>>, vector<1x8x128xf32>
    %47 = vector.shape_cast %46 : vector<1x8x128xf32> to vector<8x128xf32>
    %48 = arith.maximumf %45, %47 : vector<8x128xf32>
    %49 = vector.extract_strided_slice %48 {offsets = [0, 0], sizes = [1, 128], strides = [1, 1]} : vector<8x128xf32> to vector<1x128xf32>
    %50 = vector.extract_strided_slice %48 {offsets = [1, 0], sizes = [1, 128], strides = [1, 1]} : vector<8x128xf32> to vector<1x128xf32>
    %51 = arith.maximumf %49, %50 : vector<1x128xf32>
    %c10 = arith.constant 10 : index
    %c0_23 = arith.constant 0 : index
    %52 = vector.load %arg6[%c10, %c0_23] : memref<32x128xf32, #tpu.memory_space<vmem>>, vector<1x128xf32>
    tpu.vector_store %arg6[%c10, %c0_23], %51 {strides = array<i32>} : memref<32x128xf32, #tpu.memory_space<vmem>>, vector<1x128xf32>,
    %53 = vector.extract_strided_slice %48 {offsets = [2, 0], sizes = [1, 128], strides = [1, 1]} : vector<8x128xf32> to vector<1x128xf32>
    %54 = vector.extract_strided_slice %48 {offsets = [3, 0], sizes = [1, 128], strides = [1, 1]} : vector<8x128xf32> to vector<1x128xf32>
    %55 = arith.maximumf %53, %54 : vector<1x128xf32>
    %c11 = arith.constant 11 : index
    %c0_24 = arith.constant 0 : index
    %56 = vector.load %arg6[%c11, %c0_24] : memref<32x128xf32, #tpu.memory_space<vmem>>, vector<1x128xf32>
    tpu.vector_store %arg6[%c11, %c0_24], %55 {strides = array<i32>} : memref<32x128xf32, #tpu.memory_space<vmem>>, vector<1x128xf32>,
    %57 = vector.extract_strided_slice %48 {offsets = [4, 0], sizes = [1, 128], strides = [1, 1]} : vector<8x128xf32> to vector<1x128xf32>
    %58 = vector.extract_strided_slice %48 {offsets = [5, 0], sizes = [1, 128], strides = [1, 1]} : vector<8x128xf32> to vector<1x128xf32>
    %59 = arith.maximumf %57, %58 : vector<1x128xf32>
    %c12 = arith.constant 12 : index
    %c0_25 = arith.constant 0 : index
    %60 = vector.load %arg6[%c12, %c0_25] : memref<32x128xf32, #tpu.memory_space<vmem>>, vector<1x128xf32>
    tpu.vector_store %arg6[%c12, %c0_25], %59 {strides = array<i32>} : memref<32x128xf32, #tpu.memory_space<vmem>>, vector<1x128xf32>,
    %61 = vector.extract_strided_slice %48 {offsets = [6, 0], sizes = [1, 128], strides = [1, 1]} : vector<8x128xf32> to vector<1x128xf32>
    %62 = vector.extract_strided_slice %48 {offsets = [7, 0], sizes = [1, 128], strides = [1, 1]} : vector<8x128xf32> to vector<1x128xf32>
    %63 = arith.maximumf %61, %62 : vector<1x128xf32>
    %c13 = arith.constant 13 : index
    %c0_26 = arith.constant 0 : index
    %64 = vector.load %arg6[%c13, %c0_26] : memref<32x128xf32, #tpu.memory_space<vmem>>, vector<1x128xf32>
    tpu.vector_store %arg6[%c13, %c0_26], %63 {strides = array<i32>} : memref<32x128xf32, #tpu.memory_space<vmem>>, vector<1x128xf32>,
    %c0_27 = arith.constant 0 : index
    %c54 = arith.constant 54 : index
    %c0_28 = arith.constant 0 : index
    %65 = vector.load %arg1[%c0_27, %c54, %c0_28] : memref<1x72x128xf32, #tpu.memory_space<vmem>>, vector<1x8x128xf32>
    %66 = vector.shape_cast %65 : vector<1x8x128xf32> to vector<8x128xf32>
    %c0_29 = arith.constant 0 : index
    %c63 = arith.constant 63 : index
    %c0_30 = arith.constant 0 : index
    %67 = vector.load %arg1[%c0_29, %c63, %c0_30] : memref<1x72x128xf32, #tpu.memory_space<vmem>>, vector<1x8x128xf32>
    %68 = vector.shape_cast %67 : vector<1x8x128xf32> to vector<8x128xf32>
    %69 = arith.maximumf %66, %68 : vector<8x128xf32>
    %70 = vector.extract_strided_slice %69 {offsets = [0, 0], sizes = [1, 128], strides = [1, 1]} : vector<8x128xf32> to vector<1x128xf32>
    %71 = vector.extract_strided_slice %69 {offsets = [1, 0], sizes = [1, 128], strides = [1, 1]} : vector<8x128xf32> to vector<1x128xf32>
    %72 = arith.maximumf %70, %71 : vector<1x128xf32>
    %c15 = arith.constant 15 : index
    %c0_31 = arith.constant 0 : index
    %73 = vector.load %arg6[%c15, %c0_31] : memref<32x128xf32, #tpu.memory_space<vmem>>, vector<1x128xf32>
    tpu.vector_store %arg6[%c15, %c0_31], %72 {strides = array<i32>} : memref<32x128xf32, #tpu.memory_space<vmem>>, vector<1x128xf32>,
    %74 = vector.extract_strided_slice %69 {offsets = [2, 0], sizes = [1, 128], strides = [1, 1]} : vector<8x128xf32> to vector<1x128xf32>
    %75 = vector.extract_strided_slice %69 {offsets = [3, 0], sizes = [1, 128], strides = [1, 1]} : vector<8x128xf32> to vector<1x128xf32>
    %76 = arith.maximumf %74, %75 : vector<1x128xf32>
    %c16 = arith.constant 16 : index
    %c0_32 = arith.constant 0 : index
    %77 = vector.load %arg6[%c16, %c0_32] : memref<32x128xf32, #tpu.memory_space<vmem>>, vector<1x128xf32>
    tpu.vector_store %arg6[%c16, %c0_32], %76 {strides = array<i32>} : memref<32x128xf32, #tpu.memory_space<vmem>>, vector<1x128xf32>,
    %78 = vector.extract_strided_slice %69 {offsets = [4, 0], sizes = [1, 128], strides = [1, 1]} : vector<8x128xf32> to vector<1x128xf32>
    %79 = vector.extract_strided_slice %69 {offsets = [5, 0], sizes = [1, 128], strides = [1, 1]} : vector<8x128xf32> to vector<1x128xf32>
    %80 = arith.maximumf %78, %79 : vector<1x128xf32>
    %c17 = arith.constant 17 : index
    %c0_33 = arith.constant 0 : index
    %81 = vector.load %arg6[%c17, %c0_33] : memref<32x128xf32, #tpu.memory_space<vmem>>, vector<1x128xf32>
    tpu.vector_store %arg6[%c17, %c0_33], %80 {strides = array<i32>} : memref<32x128xf32, #tpu.memory_space<vmem>>, vector<1x128xf32>,
    %82 = vector.extract_strided_slice %69 {offsets = [6, 0], sizes = [1, 128], strides = [1, 1]} : vector<8x128xf32> to vector<1x128xf32>
    %83 = vector.extract_strided_slice %69 {offsets = [7, 0], sizes = [1, 128], strides = [1, 1]} : vector<8x128xf32> to vector<1x128xf32>
    %84 = arith.maximumf %82, %83 : vector<1x128xf32>
    %c18_34 = arith.constant 18 : index
    %c0_35 = arith.constant 0 : index
    %85 = vector.load %arg6[%c18_34, %c0_35] : memref<32x128xf32, #tpu.memory_space<vmem>>, vector<1x128xf32>
    tpu.vector_store %arg6[%c18_34, %c0_35], %84 {strides = array<i32>} : memref<32x128xf32, #tpu.memory_space<vmem>>, vector<1x128xf32>,
    %c0_36 = arith.constant 0 : index
    %c0_37 = arith.constant 0 : index
    %86 = vector.load %arg6[%c0_36, %c0_37] : memref<32x128xf32, #tpu.memory_space<vmem>>, vector<20x128xf32>
    %c0_38 = arith.constant 0 : index
    %c0_39 = arith.constant 0 : index
    %c0_40 = arith.constant 0 : index
    %c0_41 = arith.constant 0 : index
    %87 = vector.load %arg2[%c0_38, %c0_39, %c0_40, %c0_41] : memref<2x4x128x128xf32, #tpu.memory_space<vmem>>, vector<1x1x128x128xf32>
    %88 = vector.shape_cast %87 : vector<1x1x128x128xf32> to vector<128x128xf32>
    %cst_42 = arith.constant dense<0.000000e+00> : vector<20x128xf32>
    %89 = tpu.matmul %86, %88, %cst_42 {dimension_numbers = #tpu.dot_dimension_numbers<[1], [0], [0], [1], [0, 0, 1, 1], [], []>} : vector<20x128xf32>, vector<128x128xf32>, vector<20x128xf32> -> vector<20x128xf32>
    %c0_43 = arith.constant 0 : index
    %c0_44 = arith.constant 0 : index
    %90 = vector.load %arg7[%c0_43, %c0_44] : memref<20x128xf32, #tpu.memory_space<vmem>>, vector<20x128xf32>
    tpu.vector_store %arg7[%c0_43, %c0_44], %89 {strides = array<i32>} : memref<20x128xf32, #tpu.memory_space<vmem>>, vector<20x128xf32>,
    %c1_45 = arith.constant 1 : index
    %c0_46 = arith.constant 0 : index
    %91 = vector.load %arg6[%c1_45, %c0_46] : memref<32x128xf32, #tpu.memory_space<vmem>>, vector<20x128xf32>
    %c0_47 = arith.constant 0 : index
    %c1_48 = arith.constant 1 : index
    %c0_49 = arith.constant 0 : index
    %c0_50 = arith.constant 0 : index
    %92 = vector.load %arg2[%c0_47, %c1_48, %c0_49, %c0_50] : memref<2x4x128x128xf32, #tpu.memory_space<vmem>>, vector<1x1x128x128xf32>
    %93 = vector.shape_cast %92 : vector<1x1x128x128xf32> to vector<128x128xf32>
    %cst_51 = arith.constant dense<0.000000e+00> : vector<20x128xf32>
    %94 = tpu.matmul %91, %93, %cst_51 {dimension_numbers = #tpu.dot_dimension_numbers<[1], [0], [0], [1], [0, 0, 1, 1], [], []>} : vector<20x128xf32>, vector<128x128xf32>, vector<20x128xf32> -> vector<20x128xf32>
    %c0_52 = arith.constant 0 : index
    %c0_53 = arith.constant 0 : index
    %95 = vector.load %arg7[%c0_52, %c0_53] : memref<20x128xf32, #tpu.memory_space<vmem>>, vector<20x128xf32>
    %96 = arith.addf %95, %94 : vector<20x128xf32>
    %c0_54 = arith.constant 0 : index
    %c0_55 = arith.constant 0 : index
    %97 = vector.load %arg7[%c0_54, %c0_55] : memref<20x128xf32, #tpu.memory_space<vmem>>, vector<20x128xf32>
    tpu.vector_store %arg7[%c0_54, %c0_55], %96 {strides = array<i32>} : memref<20x128xf32, #tpu.memory_space<vmem>>, vector<20x128xf32>,
    %c5_56 = arith.constant 5 : index
    %c0_57 = arith.constant 0 : index
    %98 = vector.load %arg6[%c5_56, %c0_57] : memref<32x128xf32, #tpu.memory_space<vmem>>, vector<20x128xf32>
    %c0_58 = arith.constant 0 : index
    %c2_59 = arith.constant 2 : index
    %c0_60 = arith.constant 0 : index
    %c0_61 = arith.constant 0 : index
    %99 = vector.load %arg2[%c0_58, %c2_59, %c0_60, %c0_61] : memref<2x4x128x128xf32, #tpu.memory_space<vmem>>, vector<1x1x128x128xf32>
    %100 = vector.shape_cast %99 : vector<1x1x128x128xf32> to vector<128x128xf32>
    %cst_62 = arith.constant dense<0.000000e+00> : vector<20x128xf32>
    %101 = tpu.matmul %98, %100, %cst_62 {dimension_numbers = #tpu.dot_dimension_numbers<[1], [0], [0], [1], [0, 0, 1, 1], [], []>} : vector<20x128xf32>, vector<128x128xf32>, vector<20x128xf32> -> vector<20x128xf32>
    %c0_63 = arith.constant 0 : index
    %c0_64 = arith.constant 0 : index
    %102 = vector.load %arg7[%c0_63, %c0_64] : memref<20x128xf32, #tpu.memory_space<vmem>>, vector<20x128xf32>
    %103 = arith.addf %102, %101 : vector<20x128xf32>
    %c0_65 = arith.constant 0 : index
    %c0_66 = arith.constant 0 : index
    %104 = vector.load %arg7[%c0_65, %c0_66] : memref<20x128xf32, #tpu.memory_space<vmem>>, vector<20x128xf32>
    tpu.vector_store %arg7[%c0_65, %c0_66], %103 {strides = array<i32>} : memref<20x128xf32, #tpu.memory_space<vmem>>, vector<20x128xf32>,
    %c6_67 = arith.constant 6 : index
    %c0_68 = arith.constant 0 : index
    %105 = vector.load %arg6[%c6_67, %c0_68] : memref<32x128xf32, #tpu.memory_space<vmem>>, vector<20x128xf32>
    %c0_69 = arith.constant 0 : index
    %c3_70 = arith.constant 3 : index
    %c0_71 = arith.constant 0 : index
    %c0_72 = arith.constant 0 : index
    %106 = vector.load %arg2[%c0_69, %c3_70, %c0_71, %c0_72] : memref<2x4x128x128xf32, #tpu.memory_space<vmem>>, vector<1x1x128x128xf32>
    %107 = vector.shape_cast %106 : vector<1x1x128x128xf32> to vector<128x128xf32>
    %cst_73 = arith.constant dense<0.000000e+00> : vector<20x128xf32>
    %108 = tpu.matmul %105, %107, %cst_73 {dimension_numbers = #tpu.dot_dimension_numbers<[1], [0], [0], [1], [0, 0, 1, 1], [], []>} : vector<20x128xf32>, vector<128x128xf32>, vector<20x128xf32> -> vector<20x128xf32>
    %c0_74 = arith.constant 0 : index
    %c0_75 = arith.constant 0 : index
    %109 = vector.load %arg7[%c0_74, %c0_75] : memref<20x128xf32, #tpu.memory_space<vmem>>, vector<20x128xf32>
    %110 = arith.addf %109, %108 : vector<20x128xf32>
    %c0_76 = arith.constant 0 : index
    %c0_77 = arith.constant 0 : index
    %111 = vector.load %arg7[%c0_76, %c0_77] : memref<20x128xf32, #tpu.memory_space<vmem>>, vector<20x128xf32>
    tpu.vector_store %arg7[%c0_76, %c0_77], %110 {strides = array<i32>} : memref<20x128xf32, #tpu.memory_space<vmem>>, vector<20x128xf32>,
    %c0_78 = arith.constant 0 : index
    %c0_79 = arith.constant 0 : index
    %112 = vector.load %arg7[%c0_78, %c0_79] : memref<20x128xf32, #tpu.memory_space<vmem>>, vector<20x128xf32>
    %c0_80 = arith.constant 0 : index
    %c0_81 = arith.constant 0 : index
    %c0_82 = arith.constant 0 : index
    %113 = vector.load %arg3[%c0_80, %c0_81, %c0_82] : memref<2x1x128xf32, #tpu.memory_space<vmem>>, vector<1x1x128xf32>
    %114 = vector.shape_cast %113 : vector<1x1x128xf32> to vector<1x128xf32>
    %115 = vector.broadcast %114 : vector<1x128xf32> to vector<20x128xf32>
    %116 = arith.addf %112, %115 : vector<20x128xf32>
    %cst_83 = arith.constant 0.000000e+00 : f32
    %117 = vector.broadcast %cst_83 : f32 to vector<20x128xf32>
    %118 = arith.maximumf %116, %117 : vector<20x128xf32>
    %c0_84 = arith.constant 0 : index
    %c0_85 = arith.constant 0 : index
    %119 = vector.load %arg4[%c0_84, %c0_85] : memref<20x1xf32, #tpu.memory_space<vmem>>, vector<20x1xf32>
    %120 = vector.broadcast %119 : vector<20x1xf32> to vector<20x128xf32>
    %121 = arith.mulf %118, %120 : vector<20x128xf32>
    %c0_86 = arith.constant 0 : index
    %c0_87 = arith.constant 0 : index
    %122 = vector.load %arg6[%c0_86, %c0_87] : memref<32x128xf32, #tpu.memory_space<vmem>>, vector<20x128xf32>
    tpu.vector_store %arg6[%c0_86, %c0_87], %121 {strides = array<i32>} : memref<32x128xf32, #tpu.memory_space<vmem>>, vector<20x128xf32>,
    %c0_88 = arith.constant 0 : index
    %c0_89 = arith.constant 0 : index
    %123 = vector.load %arg6[%c0_88, %c0_89] : memref<32x128xf32, #tpu.memory_space<vmem>>, vector<20x128xf32>
    %c1_90 = arith.constant 1 : index
    %c0_91 = arith.constant 0 : index
    %c0_92 = arith.constant 0 : index
    %c0_93 = arith.constant 0 : index
    %124 = vector.load %arg2[%c1_90, %c0_91, %c0_92, %c0_93] : memref<2x4x128x128xf32, #tpu.memory_space<vmem>>, vector<1x1x128x128xf32>
    %125 = vector.shape_cast %124 : vector<1x1x128x128xf32> to vector<128x128xf32>
    %cst_94 = arith.constant dense<0.000000e+00> : vector<20x128xf32>
    %126 = tpu.matmul %123, %125, %cst_94 {dimension_numbers = #tpu.dot_dimension_numbers<[1], [0], [0], [1], [0, 0, 1, 1], [], []>} : vector<20x128xf32>, vector<128x128xf32>, vector<20x128xf32> -> vector<20x128xf32>
    %c0_95 = arith.constant 0 : index
    %c0_96 = arith.constant 0 : index
    %127 = vector.load %arg7[%c0_95, %c0_96] : memref<20x128xf32, #tpu.memory_space<vmem>>, vector<20x128xf32>
    tpu.vector_store %arg7[%c0_95, %c0_96], %126 {strides = array<i32>} : memref<20x128xf32, #tpu.memory_space<vmem>>, vector<20x128xf32>,
    %c1_97 = arith.constant 1 : index
    %c0_98 = arith.constant 0 : index
    %128 = vector.load %arg6[%c1_97, %c0_98] : memref<32x128xf32, #tpu.memory_space<vmem>>, vector<20x128xf32>
    %c1_99 = arith.constant 1 : index
    %c1_100 = arith.constant 1 : index
    %c0_101 = arith.constant 0 : index
    %c0_102 = arith.constant 0 : index
    %129 = vector.load %arg2[%c1_99, %c1_100, %c0_101, %c0_102] : memref<2x4x128x128xf32, #tpu.memory_space<vmem>>, vector<1x1x128x128xf32>
    %130 = vector.shape_cast %129 : vector<1x1x128x128xf32> to vector<128x128xf32>
    %cst_103 = arith.constant dense<0.000000e+00> : vector<20x128xf32>
    %131 = tpu.matmul %128, %130, %cst_103 {dimension_numbers = #tpu.dot_dimension_numbers<[1], [0], [0], [1], [0, 0, 1, 1], [], []>} : vector<20x128xf32>, vector<128x128xf32>, vector<20x128xf32> -> vector<20x128xf32>
    %c0_104 = arith.constant 0 : index
    %c0_105 = arith.constant 0 : index
    %132 = vector.load %arg7[%c0_104, %c0_105] : memref<20x128xf32, #tpu.memory_space<vmem>>, vector<20x128xf32>
    %133 = arith.addf %132, %131 : vector<20x128xf32>
    %c0_106 = arith.constant 0 : index
    %c0_107 = arith.constant 0 : index
    %134 = vector.load %arg7[%c0_106, %c0_107] : memref<20x128xf32, #tpu.memory_space<vmem>>, vector<20x128xf32>
    tpu.vector_store %arg7[%c0_106, %c0_107], %133 {strides = array<i32>} : memref<20x128xf32, #tpu.memory_space<vmem>>, vector<20x128xf32>,
    %c5_108 = arith.constant 5 : index
    %c0_109 = arith.constant 0 : index
    %135 = vector.load %arg6[%c5_108, %c0_109] : memref<32x128xf32, #tpu.memory_space<vmem>>, vector<20x128xf32>
    %c1_110 = arith.constant 1 : index
    %c2_111 = arith.constant 2 : index
    %c0_112 = arith.constant 0 : index
    %c0_113 = arith.constant 0 : index
    %136 = vector.load %arg2[%c1_110, %c2_111, %c0_112, %c0_113] : memref<2x4x128x128xf32, #tpu.memory_space<vmem>>, vector<1x1x128x128xf32>
    %137 = vector.shape_cast %136 : vector<1x1x128x128xf32> to vector<128x128xf32>
    %cst_114 = arith.constant dense<0.000000e+00> : vector<20x128xf32>
    %138 = tpu.matmul %135, %137, %cst_114 {dimension_numbers = #tpu.dot_dimension_numbers<[1], [0], [0], [1], [0, 0, 1, 1], [], []>} : vector<20x128xf32>, vector<128x128xf32>, vector<20x128xf32> -> vector<20x128xf32>
    %c0_115 = arith.constant 0 : index
    %c0_116 = arith.constant 0 : index
    %139 = vector.load %arg7[%c0_115, %c0_116] : memref<20x128xf32, #tpu.memory_space<vmem>>, vector<20x128xf32>
    %140 = arith.addf %139, %138 : vector<20x128xf32>
    %c0_117 = arith.constant 0 : index
    %c0_118 = arith.constant 0 : index
    %141 = vector.load %arg7[%c0_117, %c0_118] : memref<20x128xf32, #tpu.memory_space<vmem>>, vector<20x128xf32>
    tpu.vector_store %arg7[%c0_117, %c0_118], %140 {strides = array<i32>} : memref<20x128xf32, #tpu.memory_space<vmem>>, vector<20x128xf32>,
    %c6_119 = arith.constant 6 : index
    %c0_120 = arith.constant 0 : index
    %142 = vector.load %arg6[%c6_119, %c0_120] : memref<32x128xf32, #tpu.memory_space<vmem>>, vector<20x128xf32>
    %c1_121 = arith.constant 1 : index
    %c3_122 = arith.constant 3 : index
    %c0_123 = arith.constant 0 : index
    %c0_124 = arith.constant 0 : index
    %143 = vector.load %arg2[%c1_121, %c3_122, %c0_123, %c0_124] : memref<2x4x128x128xf32, #tpu.memory_space<vmem>>, vector<1x1x128x128xf32>
    %144 = vector.shape_cast %143 : vector<1x1x128x128xf32> to vector<128x128xf32>
    %cst_125 = arith.constant dense<0.000000e+00> : vector<20x128xf32>
    %145 = tpu.matmul %142, %144, %cst_125 {dimension_numbers = #tpu.dot_dimension_numbers<[1], [0], [0], [1], [0, 0, 1, 1], [], []>} : vector<20x128xf32>, vector<128x128xf32>, vector<20x128xf32> -> vector<20x128xf32>
    %c0_126 = arith.constant 0 : index
    %c0_127 = arith.constant 0 : index
    %146 = vector.load %arg7[%c0_126, %c0_127] : memref<20x128xf32, #tpu.memory_space<vmem>>, vector<20x128xf32>
    %147 = arith.addf %146, %145 : vector<20x128xf32>
    %c0_128 = arith.constant 0 : index
    %c0_129 = arith.constant 0 : index
    %148 = vector.load %arg7[%c0_128, %c0_129] : memref<20x128xf32, #tpu.memory_space<vmem>>, vector<20x128xf32>
    tpu.vector_store %arg7[%c0_128, %c0_129], %147 {strides = array<i32>} : memref<20x128xf32, #tpu.memory_space<vmem>>, vector<20x128xf32>,
    %c0_130 = arith.constant 0 : index
    %c0_131 = arith.constant 0 : index
    %149 = vector.load %arg7[%c0_130, %c0_131] : memref<20x128xf32, #tpu.memory_space<vmem>>, vector<20x128xf32>
    %c1_132 = arith.constant 1 : index
    %c0_133 = arith.constant 0 : index
    %c0_134 = arith.constant 0 : index
    %150 = vector.load %arg3[%c1_132, %c0_133, %c0_134] : memref<2x1x128xf32, #tpu.memory_space<vmem>>, vector<1x1x128xf32>
    %151 = vector.shape_cast %150 : vector<1x1x128xf32> to vector<1x128xf32>
    %152 = vector.broadcast %151 : vector<1x128xf32> to vector<20x128xf32>
    %153 = arith.addf %149, %152 : vector<20x128xf32>
    %cst_135 = arith.constant 0.000000e+00 : f32
    %154 = vector.broadcast %cst_135 : f32 to vector<20x128xf32>
    %155 = arith.maximumf %153, %154 : vector<20x128xf32>
    %c0_136 = arith.constant 0 : index
    %c0_137 = arith.constant 0 : index
    %156 = vector.load %arg4[%c0_136, %c0_137] : memref<20x1xf32, #tpu.memory_space<vmem>>, vector<20x1xf32>
    %157 = vector.broadcast %156 : vector<20x1xf32> to vector<20x128xf32>
    %158 = arith.mulf %155, %157 : vector<20x128xf32>
    %c0_138 = arith.constant 0 : index
    %c0_139 = arith.constant 0 : index
    %c0_140 = arith.constant 0 : index
    %159 = vector.load %arg5[%c0_138, %c0_139, %c0_140] : memref<1x20x128xf32, #tpu.memory_space<vmem>>, vector<1x20x128xf32>
    %160 = vector.shape_cast %159 : vector<1x20x128xf32> to vector<20x128xf32>
    %161 = vector.shape_cast %158 : vector<20x128xf32> to vector<1x20x128xf32>
    tpu.vector_store %arg5[%c0_138, %c0_139, %c0_140], %161 {strides = array<i32>} : memref<1x20x128xf32, #tpu.memory_space<vmem>>, vector<1x20x128xf32>,
    return
  }
  func.func @transform_0(%arg0: i32) -> (i32, i32, i32) {
    %c0_i32 = arith.constant 0 : i32
    %c0_i32_0 = arith.constant 0 : i32
    %c0_i32_1 = arith.constant 0 : i32
    return %arg0, %c0_i32, %c0_i32_0 : i32, i32, i32
  }
  func.func @transform_1(%arg0: i32) -> (i32, i32, i32, i32) {
    %c0_i32 = arith.constant 0 : i32
    %c0_i32_0 = arith.constant 0 : i32
    %c0_i32_1 = arith.constant 0 : i32
    %c0_i32_2 = arith.constant 0 : i32
    %c0_i32_3 = arith.constant 0 : i32
    return %c0_i32, %c0_i32_0, %c0_i32_1, %c0_i32_2 : i32, i32, i32, i32
  }
  func.func @transform_2(%arg0: i32) -> (i32, i32, i32) {
    %c0_i32 = arith.constant 0 : i32
    %c0_i32_0 = arith.constant 0 : i32
    %c0_i32_1 = arith.constant 0 : i32
    %c0_i32_2 = arith.constant 0 : i32
    return %c0_i32, %c0_i32_0, %c0_i32_1 : i32, i32, i32
  }
  func.func @transform_3(%arg0: i32) -> (i32, i32) {
    %c0_i32 = arith.constant 0 : i32
    %c0_i32_0 = arith.constant 0 : i32
    %c0_i32_1 = arith.constant 0 : i32
    return %c0_i32, %c0_i32_0 : i32, i32
  }
  func.func @transform_4(%arg0: i32) -> (i32, i32, i32) {
    %c0_i32 = arith.constant 0 : i32
    %c0_i32_0 = arith.constant 0 : i32
    %c0_i32_1 = arith.constant 0 : i32
    return %arg0, %c0_i32, %c0_i32_0 : i32, i32, i32
  }
}

</mosaic_0001>

<bundles_post_ra>
// kernel: encoder_forward.4
= control target key start
LH: loop header
LB: loop body
LE: loop exit
PB: predicated region body
PF: predicated region fallthrough
CT: control target
= control target key end

     0   :  { %s2768_s15 = smov 0   ;;  %s3685_s0 = inlined_call_operand.vmem [shape: f32[2,272,128], index: 0, kind: input, shape index: {}]   ;;  %s3686_s1 = inlined_call_operand.vmem [shape: f32[2,4,128,128], index: 1, kind: input, shape index: {}]   ;;  %s3687_s2 = inlined_call_operand.vmem [shape: f32[2,1,128], index: 2, kind: input, shape index: {}]   ;;  %s3688_s3 = inlined_call_operand.vmem [shape: f32[72,1], index: 3, kind: input, shape index: {}]   ;;  %s3689_s4 = inlined_call_operand.vmem [shape: f32[2,72,128], index: 4, kind: output, shape index: {}]  }
   0x1 LB: > { %s1920_s16 = sadd.s32 4294967295, %s2738_s15   ;;  %p1924_p0 = scmp.ge.s32.totalorder %s2738_s15, 1  ;;  %s2738_s15 = sphi %s2768_s15, %s14_s15  }
   0x2   : > { %p162_p1 = scmp.lt.s32.totalorder %s2738_s15, 3 }
   0x4   : > { %p163_p2 = pnand %p1924_p0, %p162_p1 }
   0x5   : > { %p2782_p3 = scmp.lt.s32.totalorder (!%p163_p2), %s1920_s16, 1 }
   0x6   : > { %166 = sbr.rel (%p163_p2) target bundleno = 585 (0x249), region = 36 }
   0xb   : > { %v409_v0 = vld [vmem:[%s3686_s1 + $0x78] sm:$0xff]  ;;  %v2740_v2 = vmov 0.0   ;;  %v408_v3 = vld [vmem:[%s3686_s1 + $0x70] sm:$0xff]  ;;  %s3692_s16 = smov (!%p2782_p3, %s1920_s16), 1  ;;  %v407_v5 = vld [vmem:[%s3686_s1 + $0x68] sm:$0xff]  ;;  %vm2741_vm0 = vmmov 0  }
   0xc   : > { %v1942_v1 = vld [vmem:[%s3686_s1 + $0xf8] sm:$0xff]  ;;  %2244 = vmatprep.subr.mxu0 %v2740_v2  ;;  %198 = vst [vmem:[#allocation2] sm:$0xff] %v2740_v2  ;;  %199 = vst [vmem:[#allocation2 + $0x8] sm:$0xff] %v2740_v2  ;;  %2303 = vmatprep.subr.mxu1 %v2740_v2  ;;  %v1941_v4 = vld [vmem:[%s3686_s1 + $0xf0] sm:$0xff]  ;;  %s2716_s30 = smul.u32 272, %s3692_s16 }
   0xd   : > { %200 = vst [vmem:[#allocation2 + $0x10] sm:$0xff] %v2740_v2  ;;  %201 = vst [vmem:[#allocation2 + $0x18] sm:$0xff] %v2740_v2  ;;  %2245 = vmatpush3.msra.mxu0 %v409_v0  ;;  %2304 = vmatpush3.msra.mxu1 %v1942_v1  ;;  %v1940_v6 = vld [vmem:[%s3686_s1 + $0xe8] sm:$0xff]  ;;  %v406_v7 = vld [vmem:[%s3686_s1 + $0x60] sm:$0xff]  ;;  %s2717_s11 = smul.u32 72, %s3692_s16 }
   0xe   : > { %202 = vst [vmem:[#allocation2 + $0x20] sm:$0xff] %v2740_v2  ;;  %203 = vst [vmem:[#allocation2 + $0x28] sm:$0xff] %v2740_v2  ;;  %2246 = vmatprep.subr.mxu0 %v2740_v2  ;;  %2305 = vmatprep.subr.mxu1 %v2740_v2  ;;  %v1939_v8 = vld [vmem:[%s3686_s1 + $0xe0] sm:$0xff]  ;;  %v405_v9 = vld [vmem:[%s3686_s1 + $0x58] sm:$0xff]  ;;  %s2837_s17 = scalar_lea.vmem %s3685_s0, %s2716_s30 }
   0xf   : > { %204 = vst [vmem:[#allocation2 + $0x30] sm:$0xff] %v2740_v2  ;;  %205 = vst [vmem:[#allocation2 + $0x38] sm:$0xff] %v2740_v2  ;;  %2247 = vmatpush3.msra.mxu0 %v408_v3  ;;  %2306 = vmatpush3.msra.mxu1 %v1941_v4  ;;  %v1938_v10 = vld [vmem:[%s3686_s1 + $0xd8] sm:$0xff]  ;;  %v404_v11 = vld [vmem:[%s3686_s1 + $0x50] sm:$0xff]  ;;  %s3654_s14 = scalar_lea.vmem %s3689_s4, %s2717_s11 }
  0x10   : > { %206 = vst [vmem:[#allocation2 + $0x40] sm:$0xff] %v2740_v2  ;;  %207 = vst [vmem:[#allocation2 + $0x48] sm:$0xff] %v2740_v2  ;;  %2248 = vmatprep.subr.mxu0 %v2740_v2  ;;  %2307 = vmatprep.subr.mxu1 %v2740_v2  ;;  %v1937_v12 = vld [vmem:[%s3686_s1 + $0xd0] sm:$0xff]  ;;  %v403_v13 = vld [vmem:[%s3686_s1 + $0x48] sm:$0xff] }
  0x11   : > { %208 = vst [vmem:[#allocation2 + $0x50] sm:$0xff] %v2740_v2  ;;  %2249 = vmatpush3.msra.mxu0 %v407_v5  ;;  %2308 = vmatpush3.msra.mxu1 %v1940_v6  ;;  %v209_v14 = vld [vmem:[%s2837_s17] sm:$0xff]  ;;  %v210_v15 = vld [vmem:[%s2837_s17 + $0x8] sm:$0xff]  ;;  %v211_v17 = vld [vmem:[%s2837_s17 + $0x11] sm:$0xff] }
  0x12   : > { %2250 = vmatprep.subr.mxu0 %v2740_v2  ;;  %2309 = vmatprep.subr.mxu1 %v2740_v2  ;;  %v1936_v16 = vld [vmem:[%s3686_s1 + $0xc8] sm:$0xff]  ;;  %v212_v18 = vld [vmem:[%s2837_s17 + $0x19] sm:$0xff]  ;;  %v213_v21 = vmax.f32 %v209_v14, %v211_v17  ;;  %v400_v41 = vld [vmem:[%s3686_s1 + $0x30] sm:$0xff] }
  0x13   : > { %2251 = vmatpush3.msra.mxu0 %v406_v7  ;;  %2310 = vmatpush3.msra.mxu1 %v1939_v8  ;;  %v402_v19 = vld [vmem:[%s3686_s1 + $0x40] sm:$0xff]  ;;  %v214_v22 = vmax.f32 %v210_v15, %v212_v18  ;;  %v232_v24 = vld [vmem:[%s2837_s17 + $0x2a] sm:$0xff]  ;;  %v233_v25 = vld [vmem:[%s2837_s17 + $0x33] sm:$0xff] }
  0x14   : > { %2252 = vmatprep.subr.mxu0 %v2740_v2  ;;  %2311 = vmatprep.subr.mxu1 %v2740_v2  ;;  %v1935_v20 = vld [vmem:[%s3686_s1 + $0xc0] sm:$0xff]  ;;  %v401_v27 = vld [vmem:[%s3686_s1 + $0x38] sm:$0xff]  ;;  %v216_v29 = vrot.slane %v213_v21, 1  ;;  %v254_v34 = vld [vmem:[%s2837_s17 + $0x4c] sm:$0xff] }
  0x15   : > { %2253 = vmatpush3.msra.mxu0 %v405_v9  ;;  %2312 = vmatpush3.msra.mxu1 %v1938_v10  ;;  %v231_v23 = vld [vmem:[%s2837_s17 + $0x22] sm:$0xff]  ;;  %v1934_v28 = vld [vmem:[%s3686_s1 + $0xb8] sm:$0xff]  ;;  %v224_v30 = vrot.slane %v214_v22, 1  ;;  %v1933_v42 = vld [vmem:[%s3686_s1 + $0xb0] sm:$0xff] }
  0x16   : > { %2254 = vmatprep.subr.mxu0 %v2740_v2  ;;  %2313 = vmatprep.subr.mxu1 %v2740_v2  ;;  %v234_v26 = vld [vmem:[%s2837_s17 + $0x3b] sm:$0xff]  ;;  %v235_v31 = vmax.f32 %v231_v23, %v233_v25  ;;  %v253_v33 = vld [vmem:[%s2837_s17 + $0x44] sm:$0xff]  ;;  %v218_v36 = vmax.f32 %v213_v21, %v216_v29  ;;  %v276_v48 = vld [vmem:[%s2837_s17 + $0x6e] sm:$0xff] }
  0x17   : > { %2255 = vmatpush3.msra.mxu0 %v404_v11  ;;  %2314 = vmatpush3.msra.mxu1 %v1937_v12  ;;  %v236_v32 = vmax.f32 %v232_v24, %v234_v26  ;;  %v255_v35 = vld [vmem:[%s2837_s17 + $0x55] sm:$0xff]  ;;  %v226_v37 = vmax.f32 %v214_v22, %v224_v30  ;;  %v256_v40 = vld [vmem:[%s2837_s17 + $0x5d] sm:$0xff]  ;;  %v275_v45 = vld [vmem:[%s2837_s17 + $0x66] sm:$0xff] }
  0x18   : > { %2256 = vmatprep.subr.mxu0 %v2740_v2  ;;  %2315 = vmatprep.subr.mxu1 %v2740_v2  ;;  %v238_v38 = vrot.slane %v235_v31, 1  ;;  %v257_v43 = vmax.f32 %v253_v33, %v255_v35  ;;  %v258_v44 = vmax.f32 %v254_v34, %v256_v40  ;;  %219 = vst [vmem:[#allocation2] sm:$0x1] %v218_v36  ;;  %220 = vst [vmem:[#allocation2 - $0x1] sm:$0x4] %v218_v36  ;;  %v277_v49 = vld [vmem:[%s2837_s17 + $0x77] sm:$0xff] }
  0x19   : > { %2257 = vmatpush3.msra.mxu0 %v403_v13  ;;  %2316 = vmatpush3.msra.mxu1 %v1936_v16  ;;  %v246_v39 = vrot.slane %v236_v32, 1  ;;  %221 = vst [vmem:[#allocation2 - $0x2] sm:$0x10] %v218_v36  ;;  %222 = vst [vmem:[#allocation2 - $0x3] sm:$0x40] %v218_v36  ;;  %v278_v50 = vld [vmem:[%s2837_s17 + $0x7f] sm:$0xff]  ;;  %v279_v55 = vmax.f32 %v275_v45, %v277_v49 }
  0x1a   : > { %2258 = vmatprep.subr.mxu0 %v2740_v2  ;;  %2317 = vmatprep.subr.mxu1 %v2740_v2  ;;  %227 = vst [vmem:[#allocation2 + $0x4] sm:$0x1] %v226_v37  ;;  %228 = vst [vmem:[#allocation2 + $0x3] sm:$0x4] %v226_v37  ;;  %v240_v46 = vmax.f32 %v235_v31, %v238_v38  ;;  %v399_v51 = vld [vmem:[%s3686_s1 + $0x28] sm:$0xff]  ;;  %v260_v53 = vrot.slane %v257_v43, 1  ;;  %v280_v56 = vmax.f32 %v276_v48, %v278_v50 }
  0x1b   : > { %2259 = vmatpush3.msra.mxu0 %v402_v19  ;;  %2318 = vmatpush3.msra.mxu1 %v1935_v20  ;;  %229 = vst [vmem:[#allocation2 + $0x2] sm:$0x10] %v226_v37  ;;  %230 = vst [vmem:[#allocation2 + $0x1] sm:$0x40] %v226_v37  ;;  %v248_v47 = vmax.f32 %v236_v32, %v246_v39  ;;  %v1932_v52 = vld [vmem:[%s3686_s1 + $0xa8] sm:$0xff]  ;;  %v268_v54 = vrot.slane %v258_v44, 1 }
  0x1c   : > { %2260 = vmatprep.subr.mxu0 %v2740_v2  ;;  %2319 = vmatprep.subr.mxu1 %v2740_v2  ;;  %v398_v57 = vld [vmem:[%s3686_s1 + $0x20] sm:$0xff]  ;;  %241 = vst [vmem:[#allocation2 + $0x9] sm:$0x1] %v240_v46  ;;  %242 = vst [vmem:[#allocation2 + $0x8] sm:$0x4] %v240_v46  ;;  %v297_v58 = vld [vmem:[%s2837_s17 + $0x88] sm:$0xff]  ;;  %v262_v61 = vmax.f32 %v257_v43, %v260_v53 }
  0x1d   : > { %2261 = vmatpush3.msra.mxu0 %v401_v27  ;;  %2320 = vmatpush3.msra.mxu1 %v1934_v28  ;;  %243 = vst [vmem:[#allocation2 + $0x7] sm:$0x10] %v240_v46  ;;  %244 = vst [vmem:[#allocation2 + $0x6] sm:$0x40] %v240_v46  ;;  %v299_v59 = vld [vmem:[%s2837_s17 + $0x99] sm:$0xff]  ;;  %v270_v62 = vmax.f32 %v258_v44, %v268_v54  ;;  %v282_v63 = vrot.slane %v279_v55, 1 }
  0x1e   : > { %2262 = vmatprep.subr.mxu0 %v2740_v2  ;;  %2321 = vmatprep.subr.mxu1 %v2740_v2  ;;  %249 = vst [vmem:[#allocation2 + $0xd] sm:$0x1] %v248_v47  ;;  %250 = vst [vmem:[#allocation2 + $0xc] sm:$0x4] %v248_v47  ;;  %v1931_v60 = vld [vmem:[%s3686_s1 + $0xa0] sm:$0xff]  ;;  %v290_v0 = vrot.slane %v280_v56, 1  ;;  %v301_v5 = vmax.f32 %v297_v58, %v299_v59 }
  0x1f   : > { %2263 = vmatpush3.msra.mxu0 %v400_v41  ;;  %2322 = vmatpush3.msra.mxu1 %v1933_v42  ;;  %251 = vst [vmem:[#allocation2 + $0xb] sm:$0x10] %v248_v47  ;;  %252 = vst [vmem:[#allocation2 + $0xa] sm:$0x40] %v248_v47  ;;  %v298_v1 = vld [vmem:[%s2837_s17 + $0x90] sm:$0xff]  ;;  %v300_v3 = vld [vmem:[%s2837_s17 + $0xa1] sm:$0xff]  ;;  %v284_v8 = vmax.f32 %v279_v55, %v282_v63 }
  0x20   : > { %2264 = vmatprep.subr.mxu0 %v2740_v2  ;;  %2323 = vmatprep.subr.mxu1 %v2740_v2  ;;  %v397_v4 = vld [vmem:[%s3686_s1 + $0x18] sm:$0xff]  ;;  %v302_v6 = vmax.f32 %v298_v1, %v300_v3  ;;  %263 = vst [vmem:[#allocation2 + $0x12] sm:$0x1] %v262_v61  ;;  %264 = vst [vmem:[#allocation2 + $0x11] sm:$0x4] %v262_v61  ;;  %v292_v9 = vmax.f32 %v280_v56, %v290_v0  ;;  %v319_v10 = vld [vmem:[%s2837_s17 + $0xaa] sm:$0xff] }
  0x21   : > { %2265 = vmatpush3.msra.mxu0 %v399_v51  ;;  %2324 = vmatpush3.msra.mxu1 %v1932_v52  ;;  %v1930_v7 = vld [vmem:[%s3686_s1 + $0x98] sm:$0xff]  ;;  %265 = vst [vmem:[#allocation2 + $0x10] sm:$0x10] %v262_v61  ;;  %266 = vst [vmem:[#allocation2 + $0xf] sm:$0x40] %v262_v61  ;;  %v304_v12 = vrot.slane %v301_v5, 1 }
  0x22   : > { %2266 = vmatprep.subr.mxu0 %v2740_v2  ;;  %2325 = vmatprep.subr.mxu1 %v2740_v2  ;;  %271 = vst [vmem:[#allocation2 + $0x16] sm:$0x1] %v270_v62  ;;  %272 = vst [vmem:[#allocation2 + $0x15] sm:$0x4] %v270_v62  ;;  %v321_v11 = vld [vmem:[%s2837_s17 + $0xbb] sm:$0xff]  ;;  %v312_v13 = vrot.slane %v302_v6, 1 }
  0x23   : > { %273 = vst [vmem:[#allocation2 + $0x14] sm:$0x10] %v270_v62  ;;  %274 = vst [vmem:[#allocation2 + $0x13] sm:$0x40] %v270_v62  ;;  %2267 = vmatpush3.msra.mxu0 %v398_v57  ;;  %2326 = vmatpush3.msra.mxu1 %v1931_v60  ;;  %v323_v14 = vmax.f32 %v319_v10, %v321_v11  ;;  %v320_v15 = vld [vmem:[%s2837_s17 + $0xb2] sm:$0xff]  ;;  %v322_v16 = vld [vmem:[%s2837_s17 + $0xc3] sm:$0xff]  ;;  %v306_v21 = vmax.f32 %v301_v5, %v304_v12 }
  0x24   : > { %2268 = vmatprep.subr.mxu0 %v2740_v2  ;;  %2327 = vmatprep.subr.mxu1 %v2740_v2  ;;  %v396_v17 = vld [vmem:[%s3686_s1 + $0x10] sm:$0xff]  ;;  %285 = vst [vmem:[#allocation2 + $0x1b] sm:$0x1] %v284_v8  ;;  %286 = vst [vmem:[#allocation2 + $0x1a] sm:$0x4] %v284_v8  ;;  %v324_v19 = vmax.f32 %v320_v15, %v322_v16  ;;  %v314_v22 = vmax.f32 %v302_v6, %v312_v13  ;;  %v343_v24 = vld [vmem:[%s2837_s17 + $0xdd] sm:$0xff] }
  0x25   : > { %v1929_v18 = vld [vmem:[%s3686_s1 + $0x90] sm:$0xff]  ;;  %287 = vst [vmem:[#allocation2 + $0x19] sm:$0x10] %v284_v8  ;;  %288 = vst [vmem:[#allocation2 + $0x18] sm:$0x40] %v284_v8  ;;  %2269 = vmatpush3.msra.mxu0 %v397_v4  ;;  %2328 = vmatpush3.msra.mxu1 %v1930_v7  ;;  %v326_v23 = vrot.slane %v323_v14, 1 }
  0x26   : > { %293 = vst [vmem:[#allocation2 + $0x1f] sm:$0x1] %v292_v9  ;;  %294 = vst [vmem:[#allocation2 + $0x1e] sm:$0x4] %v292_v9  ;;  %v341_v20 = vld [vmem:[%s2837_s17 + $0xcc] sm:$0xff]  ;;  %2270 = vmatprep.subr.mxu0 %v2740_v2  ;;  %2329 = vmatprep.subr.mxu1 %v2740_v2  ;;  %v334_v27 = vrot.slane %v324_v19, 1 }
  0x27   : > { %295 = vst [vmem:[#allocation2 + $0x1d] sm:$0x10] %v292_v9  ;;  %296 = vst [vmem:[#allocation2 + $0x1c] sm:$0x40] %v292_v9  ;;  %v395_v25 = vld [vmem:[%s3686_s1 + $0x8] sm:$0xff]  ;;  %v345_v28 = vmax.f32 %v341_v20, %v343_v24  ;;  %2271 = vmatpush3.msra.mxu0 %v396_v17  ;;  %2330 = vmatpush3.msra.mxu1 %v1929_v18  ;;  %v328_v29 = vmax.f32 %v323_v14, %v326_v23  ;;  %v342_v30 = vld [vmem:[%s2837_s17 + $0xd4] sm:$0xff] }
  0x28   : > { %v1928_v26 = vld [vmem:[%s3686_s1 + $0x88] sm:$0xff]  ;;  %307 = vst [vmem:[#allocation2 + $0x24] sm:$0x1] %v306_v21  ;;  %308 = vst [vmem:[#allocation2 + $0x23] sm:$0x4] %v306_v21  ;;  %2272 = vmatprep.subr.mxu0 %v2740_v2  ;;  %2331 = vmatprep.subr.mxu1 %v2740_v2  ;;  %v394_v32 = vld [vmem:[%s3686_s1] sm:$0xff]  ;;  %v336_v33 = vmax.f32 %v324_v19, %v334_v27 }
  0x29   : > { %309 = vst [vmem:[#allocation2 + $0x22] sm:$0x10] %v306_v21  ;;  %310 = vst [vmem:[#allocation2 + $0x21] sm:$0x40] %v306_v21  ;;  %v344_v31 = vld [vmem:[%s2837_s17 + $0xe5] sm:$0xff]  ;;  %v348_v34 = vrot.slane %v345_v28, 1  ;;  %2273 = vmatpush3.msra.mxu0 %v395_v25  ;;  %2332 = vmatpush3.msra.mxu1 %v1928_v26 }
  0x2a   : > { %315 = vst [vmem:[#allocation2 + $0x28] sm:$0x1] %v314_v22  ;;  %316 = vst [vmem:[#allocation2 + $0x27] sm:$0x4] %v314_v22  ;;  %v346_v35 = vmax.f32 %v342_v30, %v344_v31  ;;  %v363_v36 = vld [vmem:[%s2837_s17 + $0xee] sm:$0xff]  ;;  %v365_v37 = vld [vmem:[%s2837_s17 + $0xff] sm:$0xff]  ;;  %2274 = vmatprep.subr.mxu0 %v2740_v2  ;;  %2276 = vmatprep.mubr.msk.f32.mxu0 %vm2741_vm0, %v2740_v2 }
  0x2b   : > { %317 = vst [vmem:[#allocation2 + $0x26] sm:$0x10] %v314_v22  ;;  %318 = vst [vmem:[#allocation2 + $0x25] sm:$0x40] %v314_v22  ;;  %v385_v38 = vld [vmem:[#allocation2] sm:$0xff]  ;;  %v367_v40 = vmax.f32 %v363_v36, %v365_v37  ;;  %v350_v41 = vmax.f32 %v345_v28, %v348_v34  ;;  %v364_v43 = vld [vmem:[%s2837_s17 + $0xf6] sm:$0xff]  ;;  %2275 = vmatpush3.msra.mxu0 %v394_v32  ;;  %2333 = vmatprep.subr.mxu1 %v2740_v2 }
  0x2c   : > { %v1927_v39 = vld [vmem:[%s3686_s1 + $0x80] sm:$0xff]  ;;  %329 = vst [vmem:[#allocation2 + $0x2d] sm:$0x1] %v328_v29  ;;  %330 = vst [vmem:[#allocation2 + $0x2c] sm:$0x4] %v328_v29  ;;  %v356_v42 = vrot.slane %v346_v35, 1  ;;  %2277 = vmatmul.mubr.f32.vlgmr.msra.gmra.mxu0 %v385_v38  ;;  %2335 = vmatprep.mubr.msk.f32.mxu1 %vm2741_vm0, %v2740_v2 }
  0x2d   : > { %331 = vst [vmem:[#allocation2 + $0x2b] sm:$0x10] %v328_v29  ;;  %332 = vst [vmem:[#allocation2 + $0x2a] sm:$0x40] %v328_v29  ;;  %v529_v44 = vld [vmem:[#allocation2 + $0x1] sm:$0xff]  ;;  %v1958_v45 = vld [vmem:[%s3686_s1 + $0x178] sm:$0xff]  ;;  %2334 = vmatpush3.msra.mxu1 %v1927_v39  ;;  %2362 = vmatprep.subr.mxu0 %v2740_v2 }
  0x2e   : > { %337 = vst [vmem:[#allocation2 + $0x31] sm:$0x1] %v336_v33  ;;  %338 = vst [vmem:[#allocation2 + $0x30] sm:$0x4] %v336_v33  ;;  %v370_v46 = vrot.slane %v367_v40, 1  ;;  %v366_v47 = vld [vmem:[%s2837_s17 + $0x107] sm:$0xff]  ;;  %v358_v48 = vmax.f32 %v346_v35, %v356_v42  ;;  %2336 = vmatmul.mubr.f32.vlgmr.msra.gmra.mxu1 %v529_v44  ;;  %2363 = vmatpush3.msra.mxu0 %v1958_v45 }
  0x2f   : > { %339 = vst [vmem:[#allocation2 + $0x2f] sm:$0x10] %v336_v33  ;;  %340 = vst [vmem:[#allocation2 + $0x2e] sm:$0x40] %v336_v33  ;;  %v368_v49 = vmax.f32 %v364_v43, %v366_v47  ;;  %v1974_v50 = vld [vmem:[%s3686_s1 + $0x1f8] sm:$0xff]  ;;  %v386_v52 = vld [vmem:[#allocation2 + $0x8] sm:$0xff]  ;;  %2421 = vmatprep.subr.mxu1 %v2740_v2  ;;  %2279 = vmatprep.mubr.msk.f32.mxu0 %vm2741_vm0, %v2740_v2 }
  0x30   : > { %351 = vst [vmem:[#allocation2 + $0x36] sm:$0x1] %v350_v41  ;;  %352 = vst [vmem:[#allocation2 + $0x35] sm:$0x4] %v350_v41  ;;  %v372_v51 = vmax.f32 %v367_v40, %v370_v46  ;;  %v1957_v54 = vld [vmem:[%s3686_s1 + $0x170] sm:$0xff]  ;;  %2364 = vmatprep.subr.mxu0 %v2740_v2  ;;  %2422 = vmatpush3.msra.mxu1 %v1974_v50  ;;  %v1956_v57 = vld [vmem:[%s3686_s1 + $0x168] sm:$0xff] }
  0x31   : > { %353 = vst [vmem:[#allocation2 + $0x34] sm:$0x10] %v350_v41  ;;  %354 = vst [vmem:[#allocation2 + $0x33] sm:$0x40] %v350_v41  ;;  %v378_v53 = vrot.slane %v368_v49, 1  ;;  %v2978_v55 = vld [vmem:[#allocation2 + $0x9] sm:$0xff]  ;;  %2280 = vmatmul.mubr.f32.gmra.mxu0 %v386_v52  ;;  %2338 = vmatprep.mubr.msk.f32.mxu1 %vm2741_vm0, %v2740_v2 }
  0x32   : > { %359 = vst [vmem:[#allocation2 + $0x3a] sm:$0x1] %v358_v48  ;;  %360 = vst [vmem:[#allocation2 + $0x39] sm:$0x4] %v358_v48  ;;  %v1973_v58 = vld [vmem:[%s3686_s1 + $0x1f0] sm:$0xff]  ;;  %2365 = vmatpush3.msra.mxu0 %v1957_v54  ;;  %2339 = vmatmul.mubr.f32.gmra.mxu1 %v2978_v55  ;;  %v1955_v60 = vld [vmem:[%s3686_s1 + $0x160] sm:$0xff] }
  0x33   : > { %361 = vst [vmem:[#allocation2 + $0x38] sm:$0x10] %v358_v48  ;;  %362 = vst [vmem:[#allocation2 + $0x37] sm:$0x40] %v358_v48  ;;  %v380_v56 = vmax.f32 %v368_v49, %v378_v53  ;;  %2366 = vmatprep.subr.mxu0 %v2740_v2  ;;  %2423 = vmatprep.subr.mxu1 %v2740_v2  ;;  %v387_v59 = vld [vmem:[#allocation2 + $0x10] sm:$0xff]  ;;  %v1972_v61 = vld [vmem:[%s3686_s1 + $0x1e8] sm:$0xff] }
  0x34   : > { %373 = vst [vmem:[#allocation2 + $0x3f] sm:$0x1] %v372_v51  ;;  %374 = vst [vmem:[#allocation2 + $0x3e] sm:$0x4] %v372_v51  ;;  %2367 = vmatpush3.msra.mxu0 %v1956_v57  ;;  %2424 = vmatpush3.msra.mxu1 %v1973_v58  ;;  %v3002_v62 = vld [vmem:[#allocation2 + $0x11] sm:$0xff]  ;;  %v1971_v0 = vld [vmem:[%s3686_s1 + $0x1e0] sm:$0xff] }
  0x35   : > { %375 = vst [vmem:[#allocation2 + $0x3d] sm:$0x10] %v372_v51  ;;  %376 = vst [vmem:[#allocation2 + $0x3c] sm:$0x40] %v372_v51  ;;  %2282 = vmatprep.mubr.msk.f32.mxu0 %vm2741_vm0, %v2740_v2  ;;  %2368 = vmatprep.subr.mxu0 %v2740_v2  ;;  %v1954_v63 = vld [vmem:[%s3686_s1 + $0x158] sm:$0xff]  ;;  %v1953_v5 = vld [vmem:[%s3686_s1 + $0x150] sm:$0xff] }
  0x36   : > { %381 = vst [vmem:[#allocation2 + $0x43] sm:$0x1] %v380_v56  ;;  %382 = vst [vmem:[#allocation2 + $0x42] sm:$0x4] %v380_v56  ;;  %2425 = vmatprep.subr.mxu1 %v2740_v2  ;;  %2283 = vmatmul.mubr.f32.gmra.mxu0 %v387_v59  ;;  %v388_v1 = vld [vmem:[#allocation2 + $0x18] sm:$0xff]  ;;  %v1952_v6 = vld [vmem:[%s3686_s1 + $0x148] sm:$0xff] }
  0x37   : > { %383 = vst [vmem:[#allocation2 + $0x41] sm:$0x10] %v380_v56  ;;  %384 = vst [vmem:[#allocation2 + $0x40] sm:$0x40] %v380_v56  ;;  %2341 = vmatprep.mubr.msk.f32.mxu1 %vm2741_vm0, %v2740_v2  ;;  %2369 = vmatpush3.msra.mxu0 %v1955_v60  ;;  %v1970_v3 = vld [vmem:[%s3686_s1 + $0x1d8] sm:$0xff]  ;;  %v1969_v7 = vld [vmem:[%s3686_s1 + $0x1d0] sm:$0xff] }
  0x38   : > { %2426 = vmatpush3.msra.mxu1 %v1972_v61  ;;  %2370 = vmatprep.subr.mxu0 %v2740_v2  ;;  %v3021_v4 = vld [vmem:[#allocation2 + $0x19] sm:$0xff]  ;;  %v3040_v9 = vld [vmem:[#allocation2 + $0x21] sm:$0xff]  ;;  %v3063_v15 = vld [vmem:[#allocation2 + $0x29] sm:$0xff]  ;;  %v2742_v39 = vmov 0  }
  0x39   : > { %2342 = vmatmul.mubr.f32.gmra.mxu1 %v3002_v62  ;;  %2427 = vmatprep.subr.mxu1 %v2740_v2  ;;  %v389_v8 = vld [vmem:[#allocation2 + $0x20] sm:$0xff]  ;;  %v1968_v11 = vld [vmem:[%s3686_s1 + $0x1c8] sm:$0xff]  ;;  %v1950_v12 = vld [vmem:[%s3686_s1 + $0x138] sm:$0xff] }
  0x3a   : > { %2371 = vmatpush3.msra.mxu0 %v1954_v63  ;;  %2428 = vmatpush3.msra.mxu1 %v1971_v0  ;;  %v1951_v10 = vld [vmem:[%s3686_s1 + $0x140] sm:$0xff]  ;;  %v390_v14 = vld [vmem:[#allocation2 + $0x28] sm:$0xff]  ;;  %v1966_v16 = vld [vmem:[%s3686_s1 + $0x1b8] sm:$0xff] }
  0x3b   : > { %2285 = vmatprep.mubr.msk.f32.mxu0 %vm2741_vm0, %v2740_v2  ;;  %2429 = vmatprep.subr.mxu1 %v2740_v2  ;;  %v1967_v13 = vld [vmem:[%s3686_s1 + $0x1c0] sm:$0xff]  ;;  %v1949_v17 = vld [vmem:[%s3686_s1 + $0x130] sm:$0xff]  ;;  %v1948_v19 = vld [vmem:[%s3686_s1 + $0x128] sm:$0xff] }
  0x3c   : > { %2286 = vmatmul.mubr.f32.gmra.mxu0 %v388_v1  ;;  %2344 = vmatprep.mubr.msk.f32.mxu1 %vm2741_vm0, %v2740_v2  ;;  %v391_v18 = vld [vmem:[#allocation2 + $0x30] sm:$0xff]  ;;  %v1947_v22 = vld [vmem:[%s3686_s1 + $0x120] sm:$0xff]  ;;  %v1964_v23 = vld [vmem:[%s3686_s1 + $0x1a8] sm:$0xff] }
  0x3d   : > { %2372 = vmatprep.subr.mxu0 %v2740_v2  ;;  %2430 = vmatpush3.msra.mxu1 %v1970_v3  ;;  %v1965_v20 = vld [vmem:[%s3686_s1 + $0x1b0] sm:$0xff]  ;;  %v392_v24 = vld [vmem:[#allocation2 + $0x38] sm:$0xff]  ;;  %v1963_v26 = vld [vmem:[%s3686_s1 + $0x1a0] sm:$0xff] }
  0x3e   : > { %2345 = vmatmul.mubr.f32.gmra.mxu1 %v3021_v4  ;;  %2373 = vmatpush3.msra.mxu0 %v1953_v5  ;;  %v3086_v21 = vld [vmem:[#allocation2 + $0x31] sm:$0xff]  ;;  %v3109_v27 = vld [vmem:[#allocation2 + $0x39] sm:$0xff]  ;;  %v3128_v32 = vld [vmem:[#allocation2 + $0x41] sm:$0xff] }
  0x3f   : > { %2374 = vmatprep.subr.mxu0 %v2740_v2  ;;  %2431 = vmatprep.subr.mxu1 %v2740_v2  ;;  %v1946_v25 = vld [vmem:[%s3686_s1 + $0x118] sm:$0xff]  ;;  %v1945_v29 = vld [vmem:[%s3686_s1 + $0x110] sm:$0xff]  ;;  %v393_v30 = vld [vmem:[#allocation2 + $0x40] sm:$0xff] }
  0x40   : > { %2288 = vmatprep.mubr.msk.f32.mxu0 %vm2741_vm0, %v2740_v2  ;;  %2375 = vmatpush3.msra.mxu0 %v1952_v6  ;;  %v1962_v28 = vld [vmem:[%s3686_s1 + $0x198] sm:$0xff]  ;;  %v1961_v31 = vld [vmem:[%s3686_s1 + $0x190] sm:$0xff]  ;;  %v1944_v33 = vld [vmem:[%s3686_s1 + $0x108] sm:$0xff] }
  0x41   : > { %2432 = vmatpush3.msra.mxu1 %v1969_v7  ;;  %2289 = vmatmul.mubr.f32.gmra.mxu0 %v389_v8  ;;  %v1960_v34 = vld [vmem:[%s3686_s1 + $0x188] sm:$0xff]  ;;  %v1943_v35 = vld [vmem:[%s3686_s1 + $0x100] sm:$0xff]  ;;  %v1054_v40 = vld [vmem:[%s3688_s3 + $0x10] sm:$0xff] }
  0x42   : > { %2347 = vmatprep.mubr.msk.f32.mxu1 %vm2741_vm0, %v2740_v2  ;;  %2376 = vmatprep.subr.mxu0 %v2740_v2  ;;  %v1959_v36 = vld [vmem:[%s3686_s1 + $0x180] sm:$0xff]  ;;  %v855_v37 = vld [vmem:[#allocation2 + $0xa] sm:$0xff]  ;;  %v856_v41 = vld [vmem:[#allocation2 + $0x12] sm:$0xff] }
  0x43   : > { %2433 = vmatprep.subr.mxu1 %v2740_v2  ;;  %2348 = vmatmul.mubr.f32.gmra.mxu1 %v3040_v9  ;;  %v1052_v38 = vld [vmem:[%s3688_s3] sm:$0xff]  ;;  %v1053_v42 = vld [vmem:[%s3688_s3 + $0x8] sm:$0xff]  ;;  %v1055_v43 = vld [vmem:[%s3688_s3 + $0x18] sm:$0xff] }
  0x44   : > { %2377 = vmatpush3.msra.mxu0 %v1951_v10  ;;  %2434 = vmatpush3.msra.mxu1 %v1968_v11  ;;  %v857_v44 = vld [vmem:[#allocation2 + $0x1a] sm:$0xff]  ;;  %v1057_v46 = vld [vmem:[%s3688_s3 + $0x28] sm:$0xff]  ;;  %v1058_v48 = vld [vmem:[%s3688_s3 + $0x30] sm:$0xff] }
  0x45   : > { %2378 = vmatprep.subr.mxu0 %v2740_v2  ;;  %2435 = vmatprep.subr.mxu1 %v2740_v2  ;;  %v1056_v45 = vld [vmem:[%s3688_s3 + $0x20] sm:$0xff]  ;;  %v1059_v49 = vld [vmem:[%s3688_s3 + $0x38] sm:$0xff]  ;;  %v859_v50 = vld [vmem:[#allocation2 + $0x2a] sm:$0xff] }
  0x46   : > { %2291 = vmatprep.mubr.msk.f32.mxu0 %vm2741_vm0, %v2740_v2  ;;  %2379 = vmatpush3.msra.mxu0 %v1950_v12  ;;  %v858_v47 = vld [vmem:[#allocation2 + $0x22] sm:$0xff]  ;;  %v860_v52 = vld [vmem:[#allocation2 + $0x32] sm:$0xff]  ;;  %v861_v53 = vld [vmem:[#allocation2 + $0x3a] sm:$0xff] }
  0x47   : > { %2436 = vmatpush3.msra.mxu1 %v1967_v13  ;;  %2292 = vmatmul.mubr.f32.gmra.mxu0 %v390_v14  ;;  %v1060_v51 = vld [vmem:[%s3688_s3 + $0x40] sm:$0xff]  ;;  %v3224_v56 = vld [vmem:[#allocation2 + $0x4a] sm:$0xff]  ;;  %v1991_v57 = vld [vmem:[%s3686_s1 + $0x278] sm:$0xff] }
  0x48   : > { %2350 = vmatprep.mubr.msk.f32.mxu1 %vm2741_vm0, %v2740_v2  ;;  %2437 = vmatprep.subr.mxu1 %v2740_v2  ;;  %v862_v54 = vld [vmem:[#allocation2 + $0x42] sm:$0xff]  ;;  %v2007_v58 = vld [vmem:[%s3686_s1 + $0x2f8] sm:$0xff]  ;;  %v1990_v59 = vld [vmem:[%s3686_s1 + $0x270] sm:$0xff] }
  0x49   : > { %2351 = vmatmul.mubr.f32.gmra.mxu1 %v3063_v15  ;;  %2380 = vmatprep.subr.mxu0 %v2740_v2  ;;  %v1989_v60 = vld [vmem:[%s3686_s1 + $0x268] sm:$0xff]  ;;  %v2006_v61 = vld [vmem:[%s3686_s1 + $0x2f0] sm:$0xff]  ;;  %v1987_v63 = vld [vmem:[%s3686_s1 + $0x258] sm:$0xff] }
  0x4a   : > { %2438 = vmatpush3.msra.mxu1 %v1966_v16  ;;  %2381 = vmatpush3.msra.mxu0 %v1949_v17  ;;  %v1986_v0 = vld [vmem:[%s3686_s1 + $0x250] sm:$0xff]  ;;  %v2005_v1 = vld [vmem:[%s3686_s1 + $0x2e8] sm:$0xff]  ;;  %v2004_v3 = vld [vmem:[%s3686_s1 + $0x2e0] sm:$0xff] }
  0x4b   : > { %2294 = vmatprep.mubr.msk.f32.mxu0 %vm2741_vm0, %v2740_v2  ;;  %2382 = vmatprep.subr.mxu0 %v2740_v2  ;;  %v1984_v5 = vld [vmem:[%s3686_s1 + $0x240] sm:$0xff]  ;;  %v2003_v6 = vld [vmem:[%s3686_s1 + $0x2d8] sm:$0xff]  ;;  %v3286_v8 = vld [vmem:[#allocation2 + $0x48] sm:$0xff] }
  0x4c   : > { %2439 = vmatprep.subr.mxu1 %v2740_v2  ;;  %2295 = vmatmul.mubr.f32.gmra.mxu0 %v391_v18  ;;  %v1983_v7 = vld [vmem:[%s3686_s1 + $0x238] sm:$0xff]  ;;  %v1981_v10 = vld [vmem:[%s3686_s1 + $0x228] sm:$0xff]  ;;  %v1980_v11 = vld [vmem:[%s3686_s1 + $0x220] sm:$0xff] }
  0x4d   : > { %2353 = vmatprep.mubr.msk.f32.mxu1 %vm2741_vm0, %v2740_v2  ;;  %2383 = vmatpush3.msra.mxu0 %v1948_v19  ;;  %v2001_v12 = vld [vmem:[%s3686_s1 + $0x2c8] sm:$0xff]  ;;  %v1979_v13 = vld [vmem:[%s3686_s1 + $0x218] sm:$0xff]  ;;  %v2000_v14 = vld [vmem:[%s3686_s1 + $0x2c0] sm:$0xff] }
  0x4e   : > { %2440 = vmatpush3.msra.mxu1 %v1965_v20  ;;  %2384 = vmatprep.subr.mxu0 %v2740_v2  ;;  %v1999_v16 = vld [vmem:[%s3686_s1 + $0x2b8] sm:$0xff]  ;;  %v1977_v17 = vld [vmem:[%s3686_s1 + $0x208] sm:$0xff]  ;;  %v1998_v18 = vld [vmem:[%s3686_s1 + $0x2b0] sm:$0xff] }
  0x4f   : > { %2354 = vmatmul.mubr.f32.gmra.mxu1 %v3086_v21  ;;  %2441 = vmatprep.subr.mxu1 %v2740_v2  ;;  %v1976_v19 = vld [vmem:[%s3686_s1 + $0x200] sm:$0xff]  ;;  %v1997_v20 = vld [vmem:[%s3686_s1 + $0x2a8] sm:$0xff] }
  0x50   : > { %2385 = vmatpush3.msra.mxu0 %v1947_v22  ;;  %2442 = vmatpush3.msra.mxu1 %v1964_v23  ;;  %v1995_v22 = vld [vmem:[%s3686_s1 + $0x298] sm:$0xff]  ;;  %v1994_v23 = vld [vmem:[%s3686_s1 + $0x290] sm:$0xff] }
  0x51   : > { %2297 = vmatprep.mubr.msk.f32.mxu0 %vm2741_vm0, %v2740_v2  ;;  %2386 = vmatprep.subr.mxu0 %v2740_v2 }
  0x52   : > { %2443 = vmatprep.subr.mxu1 %v2740_v2  ;;  %2298 = vmatmul.mubr.f32.gmra.mxu0 %v392_v24  ;;  %v1993_v24 = vld [vmem:[%s3686_s1 + $0x288] sm:$0xff] }
  0x53   : > { %2356 = vmatprep.mubr.msk.f32.mxu1 %vm2741_vm0, %v2740_v2  ;;  %2387 = vmatpush3.msra.mxu0 %v1946_v25  ;;  %v1992_v25 = vld [vmem:[%s3686_s1 + $0x280] sm:$0xff] }
  0x54   : > { %2444 = vmatpush3.msra.mxu1 %v1963_v26  ;;  %2388 = vmatprep.subr.mxu0 %v2740_v2 }
  0x55   : > { %2357 = vmatmul.mubr.f32.gmra.mxu1 %v3109_v27  ;;  %2445 = vmatprep.subr.mxu1 %v2740_v2 }
  0x56   : > { %2446 = vmatpush3.msra.mxu1 %v1962_v28  ;;  %2300 = vmatprep.mubr.msk.f32.mxu0 %vm2741_vm0, %v2740_v2 }
  0x57   : > { %2389 = vmatpush3.msra.mxu0 %v1945_v29  ;;  %2447 = vmatprep.subr.mxu1 %v2740_v2 }
  0x58   : > { %2301 = vmatmul.mubr.f32.gmra.mxu0 %v393_v30  ;;  %2359 = vmatprep.mubr.msk.f32.mxu1 %vm2741_vm0, %v2740_v2 }
  0x59   : > { %2390 = vmatprep.subr.mxu0 %v2740_v2  ;;  %2448 = vmatpush3.msra.mxu1 %v1961_v31 }
  0x5a   : > { %2360 = vmatmul.mubr.f32.gmra.mxu1 %v3128_v32  ;;  %2391 = vmatpush3.msra.mxu0 %v1944_v33 }
  0x5b   : > { %2449 = vmatprep.subr.mxu1 %v2740_v2  ;;  %2392 = vmatprep.subr.mxu0 %v2740_v2 }
  0x5c   : > { %2450 = vmatpush3.msra.mxu1 %v1960_v34  ;;  %2393 = vmatpush3.msra.mxu0 %v1943_v35 }
  0x5d   : > { %2394 = vmatprep.mubr.msk.f32.mxu0 %vm2741_vm0, %v2740_v2  ;;  %2451 = vmatprep.subr.mxu1 %v2740_v2 }
  0x5e   : > { %2395 = vmatmul.mubr.f32.vlgmr.msra.gmra.mxu0 %v2978_v55  ;;  %2452 = vmatpush3.msra.mxu1 %v1959_v36  ;;  %v3220_v55 = vld [vmem:[#allocation2 + $0x49] sm:$0xff] }
  0x5f   : > { %2453 = vmatprep.mubr.msk.f32.mxu1 %vm2741_vm0, %v2740_v2  ;;  %2397 = vmatprep.mubr.msk.f32.mxu0 %vm2741_vm0, %v2740_v2 }
  0x60   : > { %2454 = vmatmul.mubr.f32.vlgmr.msra.gmra.mxu1 %v855_v37  ;;  %2729 = vset.pattern.permute.xlu0 %v2742_v39 }
  0x61   : > { %2456 = vmatprep.mubr.msk.f32.mxu1 %vm2741_vm0, %v2740_v2  ;;  %1063 = vperm.xlu0 %2729, %v1052_v38  }
  0x62   : > { %2398 = vmatmul.mubr.f32.gmra.mxu0 %v3002_v62  ;;  %2730 = vset.pattern.permute.xlu1 %v2742_v39  ;;  %v1988_v62 = vld [vmem:[%s3686_s1 + $0x260] sm:$0xff] }
  0x63   : > { %2400 = vmatprep.mubr.msk.f32.mxu0 %vm2741_vm0, %v2740_v2  ;;  %1073 = vperm.xlu1 %2730, %v1054_v40  }
  0x64   : > { %2457 = vmatmul.mubr.f32.gmra.mxu1 %v856_v41  ;;  %2480 = vmatprep.subr.mxu0 %v2740_v2 }
  0x65   : > { %2459 = vmatprep.mubr.msk.f32.mxu1 %vm2741_vm0, %v2740_v2  ;;  %1068 = vperm.xlu0 %2729, %v1053_v42  }
  0x66   : > { %2401 = vmatmul.mubr.f32.gmra.mxu0 %v3021_v4  ;;  %2539 = vmatprep.subr.mxu1 %v2740_v2  ;;  %v1985_v4 = vld [vmem:[%s3686_s1 + $0x248] sm:$0xff] }
  0x67   : > { %2403 = vmatprep.mubr.msk.f32.mxu0 %vm2741_vm0, %v2740_v2  ;;  %1078 = vperm.xlu1 %2730, %v1055_v43  }
  0x68   : > { %2460 = vmatmul.mubr.f32.gmra.mxu1 %v857_v44  ;;  %2481 = vmatpush3.msra.mxu0 %v1991_v57 }
  0x69   : > { %2462 = vmatprep.mubr.msk.f32.mxu1 %vm2741_vm0, %v2740_v2  ;;  %1083 = vperm.xlu0 %2729, %v1056_v45  }
  0x6a   : > { %2404 = vmatmul.mubr.f32.gmra.mxu0 %v3040_v9  ;;  %2482 = vmatprep.subr.mxu0 %v2740_v2  ;;  %v1982_v9 = vld [vmem:[%s3686_s1 + $0x230] sm:$0xff] }
  0x6b   : > { %2406 = vmatprep.mubr.msk.f32.mxu0 %vm2741_vm0, %v2740_v2  ;;  %1088 = vperm.xlu1 %2730, %v1057_v46  }
  0x6c   : > { %2463 = vmatmul.mubr.f32.gmra.mxu1 %v858_v47  ;;  %2483 = vmatpush3.msra.mxu0 %v1990_v59 }
  0x6d   : > { %2465 = vmatprep.mubr.msk.f32.mxu1 %vm2741_vm0, %v2740_v2  ;;  %1093 = vperm.xlu0 %2729, %v1058_v48  }
  0x6e   : > { %2407 = vmatmul.mubr.f32.gmra.mxu0 %v3063_v15  ;;  %2540 = vmatpush3.msra.mxu1 %v2007_v58  ;;  %v1978_v15 = vld [vmem:[%s3686_s1 + $0x210] sm:$0xff] }
  0x6f   : > { %2409 = vmatprep.mubr.msk.f32.mxu0 %vm2741_vm0, %v2740_v2  ;;  %1098 = vperm.xlu1 %2730, %v1059_v49  }
  0x70   : > { %2466 = vmatmul.mubr.f32.gmra.mxu1 %v859_v50  ;;  %2541 = vmatprep.subr.mxu1 %v2740_v2 }
  0x71   : > { %2468 = vmatprep.mubr.msk.f32.mxu1 %vm2741_vm0, %v2740_v2  ;;  %1103 = vperm.xlu0 %2729, %v1060_v51  }
  0x72   : > { %2410 = vmatmul.mubr.f32.gmra.mxu0 %v3086_v21  ;;  %2484 = vmatprep.subr.mxu0 %v2740_v2  ;;  %v1996_v21 = vld [vmem:[%s3686_s1 + $0x2a0] sm:$0xff] }
  0x73   : > { %2412 = vmatprep.mubr.msk.f32.mxu0 %vm2741_vm0, %v2740_v2  ;;  %1804 = vperm.xlu1 %2730, %v1052_v38  }
  0x74   : > { %2469 = vmatmul.mubr.f32.gmra.mxu1 %v860_v52  ;;  %2485 = vmatpush3.msra.mxu0 %v1989_v60 }
  0x75   : > { %2471 = vmatprep.mubr.msk.f32.mxu1 %vm2741_vm0, %v2740_v2  ;;  %1809 = vperm.xlu0 %2729, %v1053_v42  }
  0x76   : > { %2413 = vmatmul.mubr.f32.gmra.mxu0 %v3109_v27  ;;  %2486 = vmatprep.subr.mxu0 %v2740_v2 }
  0x77   : > { %2415 = vmatprep.mubr.msk.f32.mxu0 %vm2741_vm0, %v2740_v2  ;;  %1814 = vperm.xlu1 %2730, %v1054_v40  }
  0x78   : > { %2472 = vmatmul.mubr.f32.gmra.mxu1 %v861_v53  ;;  %2487 = vmatpush3.msra.mxu0 %v1988_v62 }
  0x79   : > { %2474 = vmatprep.mubr.msk.f32.mxu1 %vm2741_vm0, %v2740_v2  ;;  %1819 = vperm.xlu0 %2729, %v1055_v43  }
  0x7a   : > { %2416 = vmatmul.mubr.f32.gmra.mxu0 %v3128_v32  ;;  %2542 = vmatpush3.msra.mxu1 %v2006_v61 }
  0x7b   : > { %2418 = vmatprep.mubr.msk.f32.mxu0 %vm2741_vm0, %v2740_v2  ;;  %1824 = vperm.xlu1 %2730, %v1056_v45  }
  0x7c   : > { %2475 = vmatmul.mubr.f32.gmra.mxu1 %v862_v54  ;;  %2543 = vmatprep.subr.mxu1 %v2740_v2 }
  0x7d   : > { %2477 = vmatprep.mubr.msk.f32.mxu1 %vm2741_vm0, %v2740_v2  ;;  %1829 = vperm.xlu0 %2729, %v1057_v46  }
  0x7e   : > { %2419 = vmatmul.mubr.f32.gmra.mxu0 %v3220_v55  ;;  %2488 = vmatprep.subr.mxu0 %v2740_v2 }
  0x7f   : > { %1834 = vperm.xlu1 %2730, %v1058_v48   ;;  %2512 = vmatprep.mubr.msk.f32.mxu0 %vm2741_vm0, %v2740_v2 }
  0x80   : > { %2478 = vmatmul.mubr.f32.gmra.mxu1 %v3224_v56  ;;  %2489 = vmatpush3.msra.mxu0 %v1987_v63 }
  0x81   : > { %1839 = vperm.xlu0 %2729, %v1059_v49   ;;  %2571 = vmatprep.mubr.msk.f32.mxu1 %vm2741_vm0, %v2740_v2 }
  0x82   : > { %2490 = vmatprep.subr.mxu0 %v2740_v2  ;;  %2544 = vmatpush3.msra.mxu1 %v2005_v1 }
  0x83   : > { %1844 = vperm.xlu1 %2730, %v1060_v51   ;;  %2491 = vmatpush3.msra.mxu0 %v1986_v0 }
  0x84   : > { %2492 = vmatprep.subr.mxu0 %v2740_v2  ;;  %2545 = vmatprep.subr.mxu1 %v2740_v2 }
  0x85   : > { %2493 = vmatpush3.msra.mxu0 %v1985_v4  ;;  %2546 = vmatpush3.msra.mxu1 %v2004_v3 }
  0x86   : > { %2494 = vmatprep.subr.mxu0 %v2740_v2  ;;  %2547 = vmatprep.subr.mxu1 %v2740_v2 }
  0x87   : > { %2495 = vmatpush3.msra.mxu0 %v1984_v5  ;;  %2548 = vmatpush3.msra.mxu1 %v2003_v6  ;;  %v3385_v5 = vld [vmem:[%s3687_s2] ss:$0 sm:$0xff] }
  0x88   : > { %2496 = vmatprep.subr.mxu0 %v2740_v2  ;;  %2549 = vmatprep.subr.mxu1 %v3286_v8  ;;  %v2002_v2 = vld [vmem:[%s3686_s1 + $0x2d0] sm:$0xff] }
  0x89   : > { %2497 = vmatpush3.msra.mxu0 %v1983_v7  ;;  %2550 = vmatpush3.msra.mxu1 %v2002_v2 }
  0x8a   : > { %2498 = vmatprep.subr.mxu0 %v3286_v8  ;;  %2551 = vmatprep.subr.mxu1 %v3286_v8 }
  0x8b   : > { %2499 = vmatpush3.msra.mxu0 %v1982_v9  ;;  %2552 = vmatpush3.msra.mxu1 %v2001_v12 }
  0x8c   : > { %2500 = vmatprep.subr.mxu0 %v3286_v8  ;;  %2553 = vmatprep.subr.mxu1 %v3286_v8 }
  0x8d   : > { %2501 = vmatpush3.msra.mxu0 %v1981_v10  ;;  %2554 = vmatpush3.msra.mxu1 %v2000_v14 }
  0x8e   : > { %2502 = vmatprep.subr.mxu0 %v3286_v8  ;;  %2555 = vmatprep.subr.mxu1 %v3286_v8 }
  0x8f   : > { %2503 = vmatpush3.msra.mxu0 %v1980_v11  ;;  %2556 = vmatpush3.msra.mxu1 %v1999_v16 }
  0x90   : > { %2504 = vmatprep.subr.mxu0 %v3286_v8  ;;  %2557 = vmatprep.subr.mxu1 %v3286_v8 }
  0x91   : > { %2505 = vmatpush3.msra.mxu0 %v1979_v13  ;;  %2558 = vmatpush3.msra.mxu1 %v1998_v18 }
  0x92   : > { %2506 = vmatprep.subr.mxu0 %v3286_v8  ;;  %2559 = vmatprep.subr.mxu1 %v3286_v8 }
  0x93   : > { %2507 = vmatpush3.msra.mxu0 %v1978_v15  ;;  %2560 = vmatpush3.msra.mxu1 %v1997_v20 }
  0x94   : > { %2508 = vmatprep.subr.mxu0 %v3286_v8  ;;  %2561 = vmatprep.subr.mxu1 %v3286_v8 }
  0x95   : > { %2509 = vmatpush3.msra.mxu0 %v1977_v17  ;;  %2562 = vmatpush3.msra.mxu1 %v1996_v21 }
  0x96   : > { %2510 = vmatprep.subr.mxu0 %v3286_v8  ;;  %2563 = vmatprep.subr.mxu1 %v3286_v8 }
  0x97   : > { %2511 = vmatpush3.msra.mxu0 %v1976_v19  ;;  %2564 = vmatpush3.msra.mxu1 %v1995_v22 }
  0x98   : > { %2598 = vmatprep.subr.mxu0 %v3286_v8  ;;  %2565 = vmatprep.subr.mxu1 %v3286_v8 }
  0x99   : > { %2566 = vmatpush3.msra.mxu1 %v1994_v23 }
  0x9a   : > { %2567 = vmatprep.subr.mxu1 %v3286_v8 }
  0x9b   : > { %2568 = vmatpush3.msra.mxu1 %v1993_v24  ;;  %v2023_v24 = vld [vmem:[%s3686_s1 + $0x378] sm:$0xff] }
  0x9c   : > { %2569 = vmatprep.subr.mxu1 %v3286_v8 }
  0x9d   : > { %2570 = vmatpush3.msra.mxu1 %v1992_v25 }
  0x9e   : > { %2657 = vmatprep.subr.mxu1 %v3286_v8 }
  0xdc   : > { %v1064_v11 = vpop.permute.xlu0 %1063 }
  0xec   : > { %v476_v26 = vpop.f32.mrf.mxu0 }
  0xee   : > { %v621_v27 = vpop.f32.mrf.mxu1  ;;  %v2278_v28 = vpop.f32.mrf.mxu0 }
  0xef   : > { %v674_v0 = vadd.f32 %v621_v27, %v476_v26  ;;  %v1069_v28 = vpop.permute.xlu0 %1068 }
  0xf0   : > { %v2337_v29 = vpop.f32.mrf.mxu1 }
  0xf1   : > { %v481_v30 = vpop.f32.mrf.mxu0 }
  0xf2   : > { %v626_v31 = vpop.f32.mrf.mxu1 }
  0xf3   : > { %v2281_v32 = vpop.f32.mrf.mxu0  ;;  %v675_v7 = vadd.f32 %v626_v31, %v481_v30  ;;  %v2022_v31 = vld [vmem:[%s3686_s1 + $0x370] sm:$0xff] }
  0xf4   : > { %v2340_v33 = vpop.f32.mrf.mxu1 }
  0xf6   : > { %v486_v34 = vpop.f32.mrf.mxu0 }
  0xf8   : > { %v2284_v35 = vpop.f32.mrf.mxu0 }
  0xf9   : > { %v631_v36 = vpop.f32.mrf.mxu1 }
  0xfa   : > { %v676_v16 = vadd.f32 %v631_v36, %v486_v34  ;;  %v1074_v34 = vpop.permute.xlu1 %1073 }
  0xfb   : > { %v2343_v37 = vpop.f32.mrf.mxu1 }
  0xfc   : > { %v491_v38 = vpop.f32.mrf.mxu0 }
  0xfe   : > { %v636_v39 = vpop.f32.mrf.mxu1  ;;  %v2287_v40 = vpop.f32.mrf.mxu0 }
  0xff   : > { %v677_v27 = vadd.f32 %v636_v39, %v491_v38  ;;  %v2021_v38 = vld [vmem:[%s3686_s1 + $0x368] sm:$0xff] }
 0x100   : > { %v2346_v41 = vpop.f32.mrf.mxu1 }
 0x101   : > { %v3362_v42 = vpop.f32.mrf.mxu0 }
 0x103   : > { %v3364_v43 = vpop.f32.mrf.mxu1  ;;  %v2290_v44 = vpop.f32.mrf.mxu0 }
 0x104   : > { %v678_v41 = vadd.f32 %v3364_v43, %v3362_v42  ;;  %v2019_v43 = vld [vmem:[%s3686_s1 + $0x358] sm:$0xff] }
 0x105   : > { %v2349_v45 = vpop.f32.mrf.mxu1 }
 0x107   : > { %v3366_v46 = vpop.f32.mrf.mxu0 }
 0x109   : > { %v3368_v47 = vpop.f32.mrf.mxu1  ;;  %v2293_v48 = vpop.f32.mrf.mxu0 }
 0x10a   : > { %v2020_v48 = vld [vmem:[%s3686_s1 + $0x360] sm:$0xff] }
 0x10b   : > { %v2352_v49 = vpop.f32.mrf.mxu1 }
 0x10c   : > { %v3370_v50 = vpop.f32.mrf.mxu0 }
 0x10e   : > { %v2296_v51 = vpop.f32.mrf.mxu0 }
 0x10f   : > { %v3372_v52 = vpop.f32.mrf.mxu1 }
 0x111   : > { %v2355_v53 = vpop.f32.mrf.mxu1 }
 0x112   : > { %v3374_v54 = vpop.f32.mrf.mxu0 }
 0x114   : > { %v2299_v57 = vpop.f32.mrf.mxu0 }
 0x115   : > { %v3376_v58 = vpop.f32.mrf.mxu1 }
 0x117   : > { %v2358_v59 = vpop.f32.mrf.mxu1 }
 0x118   : > { %v3378_v60 = vpop.f32.mrf.mxu0 }
 0x11a   : > { %v3380_v61 = vpop.f32.mrf.mxu1  ;;  %v2302_v62 = vpop.f32.mrf.mxu0 }
 0x11c   : > { %v2361_v63 = vpop.f32.mrf.mxu1 }
 0x11d   : > { %v679_v63 = vadd.f32 %v3368_v47, %v3366_v46 }
 0x11e   : > { %v784_v1 = vpop.f32.mrf.mxu0 }
 0x11f   : > { %v837_v3 = vadd.f32 %v784_v1, %v674_v0  ;;  %v1079_v0 = vpop.permute.xlu1 %1078 }
 0x120   : > { %v947_v4 = vpop.f32.mrf.mxu1  ;;  %v2396_v6 = vpop.f32.mrf.mxu0 }
 0x121   : > { %v1000_v9 = vadd.f32 %v947_v4, %v837_v3  ;;  %v2018_v4 = vld [vmem:[%s3686_s1 + $0x350] sm:$0xff] }
 0x122   : > { %v2455_v2 = vpop.f32.mrf.mxu1  ;;  %v789_v10 = vpop.f32.mrf.mxu0 }
 0x123   : > { %v1034_v12 = vadd.f32 %v3385_v5, %v1000_v9  ;;  %v838_v13 = vadd.f32 %v789_v10, %v675_v7  ;;  %v2039_v2 = vld [vmem:[%s3686_s1 + $0x3f8] sm:$0xff] }
 0x124   : > { %v952_v14 = vpop.f32.mrf.mxu1  ;;  %v2399_v15 = vpop.f32.mrf.mxu0 }
 0x125   : > { %v1043_v17 = vmax.f32 %v1034_v12, 0.0  ;;  %v1001_v18 = vadd.f32 %v952_v14, %v838_v13  ;;  %v1084_v13 = vpop.permute.xlu0 %1083  ;;  %v680_v14 = vadd.f32 %v3372_v52, %v3370_v50  ;;  %v2037_v50 = vld [vmem:[%s3686_s1 + $0x3e8] sm:$0xff] }
 0x126   : > { %v2458_v19 = vpop.f32.mrf.mxu1  ;;  %v794_v20 = vpop.f32.mrf.mxu0 }
 0x127   : > { %v1106_v21 = vmul.f32 %v1064_v11, %v1043_v17  ;;  %v1035_v22 = vadd.f32 %v3385_v5, %v1001_v18  ;;  %v839_v23 = vadd.f32 %v794_v20, %v676_v16  ;;  %v2038_v17 = vld [vmem:[%s3686_s1 + $0x3f0] sm:$0xff] }
 0x128   : > { %v957_v25 = vpop.f32.mrf.mxu1  ;;  %v2402_v26 = vpop.f32.mrf.mxu0 }
 0x129   : > { %1115 = vst [vmem:[#allocation2] sm:$0xff] %v1106_v21  ;;  %v1044_v29 = vmax.f32 %v1035_v22, 0.0  ;;  %v1002_v30 = vadd.f32 %v957_v25, %v839_v23  ;;  %2513 = vmatmul.mubr.f32.vlgmr.msra.gmra.mxu0 %v1106_v21  ;;  %v1089_v25 = vpop.permute.xlu1 %1088  ;;  %v681_v26 = vadd.f32 %v3376_v58, %v3374_v54 }
 0x12a   : > { %v2461_v32 = vpop.f32.mrf.mxu1  ;;  %v799_v33 = vpop.f32.mrf.mxu0  ;;  %2515 = vmatprep.mubr.msk.f32.mxu0 %vm2741_vm0, %v3286_v8  ;;  %2599 = vmatpush3.msra.mxu0 %v2023_v24 }
 0x12b   : > { %v1107_v35 = vmul.f32 %v1069_v28, %v1044_v29  ;;  %v1036_v36 = vadd.f32 %v3385_v5, %v1002_v30  ;;  %v840_v37 = vadd.f32 %v799_v33, %v677_v27  ;;  %2600 = vmatprep.subr.mxu0 %v3286_v8  ;;  %v2036_v29 = vld [vmem:[%s3686_s1 + $0x3e0] sm:$0xff]  ;;  %v2017_v30 = vld [vmem:[%s3686_s1 + $0x348] sm:$0xff] }
 0x12c   : > { %v962_v39 = vpop.f32.mrf.mxu1  ;;  %v2405_v40 = vpop.f32.mrf.mxu0  ;;  %2601 = vmatpush3.msra.mxu0 %v2022_v31 }
 0x12d   : > { %1116 = vst [vmem:[#allocation2 + $0x8] sm:$0xff] %v1107_v35  ;;  %v1045_v44 = vmax.f32 %v1036_v36, 0.0  ;;  %v1003_v45 = vadd.f32 %v962_v39, %v840_v37  ;;  %2516 = vmatmul.mubr.f32.gmra.mxu0 %v1107_v35  ;;  %2602 = vmatprep.subr.mxu0 %v3286_v8  ;;  %v682_v39 = vadd.f32 %v3380_v61, %v3378_v60 }
 0x12e   : > { %v2464_v49 = vpop.f32.mrf.mxu1  ;;  %v804_v51 = vpop.f32.mrf.mxu0  ;;  %2518 = vmatprep.mubr.msk.f32.mxu0 %vm2741_vm0, %v3286_v8  ;;  %2603 = vmatpush3.msra.mxu0 %v2021_v38 }
 0x12f   : > { %v1108_v53 = vmul.f32 %v1074_v34, %v1045_v44  ;;  %v1037_v57 = vadd.f32 %v3385_v5, %v1003_v45  ;;  %v841_v42 = vadd.f32 %v804_v51, %v678_v41  ;;  %2604 = vmatprep.subr.mxu0 %v3286_v8  ;;  %v2035_v34 = vld [vmem:[%s3686_s1 + $0x3d8] sm:$0xff]  ;;  %v1094_v38 = vpop.permute.xlu0 %1093  ;;  %v2034_v44 = vld [vmem:[%s3686_s1 + $0x3d0] sm:$0xff]  ;;  %v2016_v51 = vld [vmem:[%s3686_s1 + $0x340] sm:$0xff] }
 0x130   : > { %v967_v59 = vpop.f32.mrf.mxu1  ;;  %v2408_v62 = vpop.f32.mrf.mxu0  ;;  %2605 = vmatpush3.msra.mxu0 %v2020_v48 }
 0x131   : > { %1117 = vst [vmem:[#allocation2 + $0x10] sm:$0xff] %v1108_v53  ;;  %v1046_v1 = vmax.f32 %v1037_v57, 0.0  ;;  %v1004_v3 = vadd.f32 %v967_v59, %v841_v42  ;;  %2519 = vmatmul.mubr.f32.gmra.mxu0 %v1108_v53  ;;  %2606 = vmatprep.subr.mxu0 %v3286_v8 }
 0x132   : > { %v2467_v6 = vpop.f32.mrf.mxu1  ;;  %v809_v7 = vpop.f32.mrf.mxu0  ;;  %2521 = vmatprep.mubr.msk.f32.mxu0 %vm2741_vm0, %v3286_v8  ;;  %2607 = vmatpush3.msra.mxu0 %v2019_v43  ;;  %v2033_v43 = vld [vmem:[%s3686_s1 + $0x3c8] sm:$0xff] }
 0x133   : > { %v1109_v9 = vmul.f32 %v1079_v0, %v1046_v1  ;;  %v1038_v46 = vadd.f32 %v3385_v5, %v1004_v3  ;;  %v842_v47 = vadd.f32 %v809_v7, %v679_v63  ;;  %2608 = vmatprep.subr.mxu0 %v3286_v8  ;;  %v1099_v63 = vpop.permute.xlu1 %1098  ;;  %v2015_v1 = vld [vmem:[%s3686_s1 + $0x338] sm:$0xff]  ;;  %v2032_v6 = vld [vmem:[%s3686_s1 + $0x3c0] sm:$0xff] }
 0x134   : > { %v972_v10 = vpop.f32.mrf.mxu1  ;;  %v2411_v11 = vpop.f32.mrf.mxu0  ;;  %v1269_v12 = vld [vmem:[#allocation2 + $0x1] sm:$0xff]  ;;  %2609 = vmatpush3.msra.mxu0 %v2018_v4 }
 0x135   : > { %1118 = vst [vmem:[#allocation2 + $0x18] sm:$0xff] %v1109_v9  ;;  %v1047_v15 = vmax.f32 %v1038_v46, 0.0  ;;  %v1005_v16 = vadd.f32 %v972_v10, %v842_v47  ;;  %2572 = vmatmul.mubr.f32.vlgmr.msra.gmra.mxu1 %v1269_v12  ;;  %2522 = vmatmul.mubr.f32.gmra.mxu0 %v1109_v9  ;;  %v1104_v46 = vpop.permute.xlu0 %1103  ;;  %v2031_v47 = vld [vmem:[%s3686_s1 + $0x3b8] sm:$0xff]  ;;  %v2013_v11 = vld [vmem:[%s3686_s1 + $0x328] sm:$0xff]  ;;  %v2030_v12 = vld [vmem:[%s3686_s1 + $0x3b0] sm:$0xff] }
 0x136   : > { %v2470_v18 = vpop.f32.mrf.mxu1  ;;  %v814_v19 = vpop.f32.mrf.mxu0  ;;  %2658 = vmatpush3.msra.mxu1 %v2039_v2  ;;  %2574 = vmatprep.mubr.msk.f32.mxu1 %vm2741_vm0, %v3286_v8 }
 0x137   : > { %v1110_v20 = vmul.f32 %v1084_v13, %v1047_v15  ;;  %v1039_v21 = vadd.f32 %v3385_v5, %v1005_v16  ;;  %v843_v22 = vadd.f32 %v814_v19, %v680_v14  ;;  %2659 = vmatprep.subr.mxu1 %v3286_v8  ;;  %2524 = vmatprep.mubr.msk.f32.mxu0 %vm2741_vm0, %v3286_v8  ;;  %v2012_v13 = vld [vmem:[%s3686_s1 + $0x320] sm:$0xff]  ;;  %v2029_v15 = vld [vmem:[%s3686_s1 + $0x3a8] sm:$0xff]  ;;  %v2011_v16 = vld [vmem:[%s3686_s1 + $0x318] sm:$0xff] }
 0x138   : > { %v977_v52 = vpop.f32.mrf.mxu1  ;;  %v2414_v23 = vpop.f32.mrf.mxu0  ;;  %v3442_v24 = vld [vmem:[#allocation2 + $0x9] sm:$0xff]  ;;  %2660 = vmatpush3.msra.mxu1 %v2038_v17  ;;  %2610 = vmatprep.subr.mxu0 %v3286_v8  ;;  %v2028_v17 = vld [vmem:[%s3686_s1 + $0x3a0] sm:$0xff] }
 0x139   : > { %1119 = vst [vmem:[#allocation2 + $0x20] sm:$0xff] %v1110_v20  ;;  %v1048_v27 = vmax.f32 %v1039_v21, 0.0  ;;  %v1006_v28 = vadd.f32 %v977_v52, %v843_v22  ;;  %2575 = vmatmul.mubr.f32.gmra.mxu1 %v3442_v24  ;;  %2661 = vmatprep.subr.mxu1 %v3286_v8  ;;  %v2010_v18 = vld [vmem:[%s3686_s1 + $0x310] sm:$0xff]  ;;  %v2009_v21 = vld [vmem:[%s3686_s1 + $0x308] sm:$0xff]  ;;  %v2008_v22 = vld [vmem:[%s3686_s1 + $0x300] sm:$0xff] }
 0x13a   : > { %v2473_v31 = vpop.f32.mrf.mxu1  ;;  %v819_v32 = vpop.f32.mrf.mxu0  ;;  %2662 = vmatpush3.msra.mxu1 %v2037_v50  ;;  %2577 = vmatprep.mubr.msk.f32.mxu1 %vm2741_vm0, %v3286_v8  ;;  %v2026_v50 = vld [vmem:[%s3686_s1 + $0x390] sm:$0xff]  ;;  %v2025_v52 = vld [vmem:[%s3686_s1 + $0x388] sm:$0xff] }
 0x13b   : > { %v1111_v54 = vmul.f32 %v1089_v25, %v1048_v27  ;;  %v1040_v58 = vadd.f32 %v3385_v5, %v1006_v28  ;;  %v844_v33 = vadd.f32 %v819_v32, %v681_v26  ;;  %2663 = vmatprep.subr.mxu1 %v3286_v8  ;;  %2525 = vmatmul.mubr.f32.gmra.mxu0 %v1110_v20  ;;  %v2027_v20 = vld [vmem:[%s3686_s1 + $0x398] sm:$0xff]  ;;  %v2024_v25 = vld [vmem:[%s3686_s1 + $0x380] sm:$0xff] }
 0x13c   : > { %v982_v35 = vpop.f32.mrf.mxu1  ;;  %v2417_v36 = vpop.f32.mrf.mxu0  ;;  %v3462_v37 = vld [vmem:[#allocation2 + $0x11] sm:$0xff]  ;;  %2664 = vmatpush3.msra.mxu1 %v2036_v29  ;;  %2611 = vmatpush3.msra.mxu0 %v2017_v30 }
 0x13d   : > { %1120 = vst [vmem:[#allocation2 + $0x28] sm:$0xff] %v1111_v54  ;;  %v1049_v40 = vmax.f32 %v1040_v58, 0.0  ;;  %v1007_v41 = vadd.f32 %v982_v35, %v844_v33  ;;  %2578 = vmatmul.mubr.f32.gmra.mxu1 %v3462_v37  ;;  %2665 = vmatprep.subr.mxu1 %v3286_v8  ;;  %v1596_v26 = vld [vmem:[#allocation2 + $0x12] sm:$0xff] }
 0x13e   : > { %v2476_v45 = vpop.f32.mrf.mxu1  ;;  %v824_v48 = vpop.f32.mrf.mxu0  ;;  %2666 = vmatpush3.msra.mxu1 %v2035_v34  ;;  %2580 = vmatprep.mubr.msk.f32.mxu1 %vm2741_vm0, %v3286_v8 }
 0x13f   : > { %v1112_v49 = vmul.f32 %v1094_v38, %v1049_v40  ;;  %v1041_v60 = vadd.f32 %v3385_v5, %v1007_v41  ;;  %v845_v61 = vadd.f32 %v824_v48, %v682_v39  ;;  %2667 = vmatprep.subr.mxu1 %v3286_v8  ;;  %2612 = vmatprep.subr.mxu0 %v3286_v8 }
 0x140   : > { %v987_v53 = vpop.f32.mrf.mxu1  ;;  %v2420_v57 = vpop.f32.mrf.mxu0  ;;  %v3479_v42 = vld [vmem:[#allocation2 + $0x19] sm:$0xff]  ;;  %2668 = vmatpush3.msra.mxu1 %v2034_v44  ;;  %2527 = vmatprep.mubr.msk.f32.mxu0 %vm2741_vm0, %v3286_v8 }
 0x141   : > { %1121 = vst [vmem:[#allocation2 + $0x30] sm:$0xff] %v1112_v49  ;;  %v1050_v59 = vmax.f32 %v1041_v60, 0.0  ;;  %v1008_v62 = vadd.f32 %v987_v53, %v845_v61  ;;  %2581 = vmatmul.mubr.f32.gmra.mxu1 %v3479_v42  ;;  %2669 = vmatprep.subr.mxu1 %v3286_v8  ;;  %v1597_v27 = vld [vmem:[#allocation2 + $0x1a] sm:$0xff] }
 0x142   : > { %v2479_v0 = vpop.f32.mrf.mxu1  ;;  %2583 = vmatprep.mubr.msk.f32.mxu1 %vm2741_vm0, %v3286_v8  ;;  %2613 = vmatpush3.msra.mxu0 %v2016_v51 }
 0x143   : > { %v1113_v3 = vmul.f32 %v1099_v63, %v1050_v59  ;;  %v1042_v4 = vadd.f32 %v3385_v5, %v1008_v62  ;;  %2670 = vmatpush3.msra.mxu1 %v2033_v43  ;;  %2528 = vmatmul.mubr.f32.gmra.mxu0 %v1111_v54  ;;  %v2014_v5 = vld [vmem:[%s3686_s1 + $0x330] sm:$0xff] }
 0x144   : > { %v3497_v7 = vld [vmem:[#allocation2 + $0x21] sm:$0xff]  ;;  %2614 = vmatprep.subr.mxu0 %v3286_v8  ;;  %2671 = vmatprep.subr.mxu1 %v3286_v8 }
 0x145   : > { %1122 = vst [vmem:[#allocation2 + $0x38] sm:$0xff] %v1113_v3  ;;  %v1051_v9 = vmax.f32 %v1042_v4, 0.0  ;;  %2584 = vmatmul.mubr.f32.gmra.mxu1 %v3497_v7  ;;  %2615 = vmatpush3.msra.mxu0 %v2015_v1  ;;  %v1598_v28 = vld [vmem:[#allocation2 + $0x22] sm:$0xff] }
 0x146   : > { %2672 = vmatpush3.msra.mxu1 %v2032_v6  ;;  %2616 = vmatprep.subr.mxu0 %v3286_v8 }
 0x147   : > { %v1114_v2 = vmul.f32 %v1104_v46, %v1051_v9  ;;  %2673 = vmatprep.subr.mxu1 %v3286_v8  ;;  %2530 = vmatprep.mubr.msk.f32.mxu0 %vm2741_vm0, %v3286_v8 }
 0x148   : > { %2586 = vmatprep.mubr.msk.f32.mxu1 %vm2741_vm0, %v3286_v8  ;;  %2617 = vmatpush3.msra.mxu0 %v2014_v5  ;;  %v3514_v10 = vld [vmem:[#allocation2 + $0x29] sm:$0xff] }
 0x149   : > { %1123 = vst [vmem:[#allocation2 + $0x40] sm:$0xff] %v1114_v2  ;;  %2674 = vmatpush3.msra.mxu1 %v2031_v47  ;;  %2531 = vmatmul.mubr.f32.gmra.mxu0 %v1112_v49  ;;  %v1599_v29 = vld [vmem:[#allocation2 + $0x2a] sm:$0xff] }
 0x14a   : > { %2587 = vmatmul.mubr.f32.gmra.mxu1 %v3514_v10  ;;  %2618 = vmatprep.subr.mxu0 %v3286_v8 }
 0x14b   : > { %2619 = vmatpush3.msra.mxu0 %v2013_v11  ;;  %2675 = vmatprep.subr.mxu1 %v3286_v8 }
 0x14c   : > { %2620 = vmatprep.subr.mxu0 %v3286_v8  ;;  %2676 = vmatpush3.msra.mxu1 %v2030_v12  ;;  %v3529_v14 = vld [vmem:[#allocation2 + $0x31] sm:$0xff] }
 0x14d   : > { %2533 = vmatprep.mubr.msk.f32.mxu0 %vm2741_vm0, %v3286_v8  ;;  %2589 = vmatprep.mubr.msk.f32.mxu1 %vm2741_vm0, %v3286_v8  ;;  %v1600_v30 = vld [vmem:[#allocation2 + $0x32] sm:$0xff] }
 0x14e   : > { %2621 = vmatpush3.msra.mxu0 %v2012_v13  ;;  %2677 = vmatprep.subr.mxu1 %v3286_v8  ;;  %v3647_v13 = vld [vmem:[%s3687_s2 + $0x1] ss:$0 sm:$0xff] }
 0x14f   : > { %2534 = vmatmul.mubr.f32.gmra.mxu0 %v1113_v3  ;;  %2590 = vmatmul.mubr.f32.gmra.mxu1 %v3529_v14 }
 0x150   : > { %2622 = vmatprep.subr.mxu0 %v3286_v8  ;;  %2678 = vmatpush3.msra.mxu1 %v2029_v15  ;;  %v1276_v19 = vld [vmem:[#allocation2 + $0x39] sm:$0xff]  ;;  %v1277_v23 = vld [vmem:[#allocation2 + $0x41] sm:$0xff] }
 0x151   : > { %2623 = vmatpush3.msra.mxu0 %v2011_v16  ;;  %2679 = vmatprep.subr.mxu1 %v3286_v8  ;;  %v1601_v31 = vld [vmem:[#allocation2 + $0x3a] sm:$0xff]  ;;  %v1602_v32 = vld [vmem:[#allocation2 + $0x42] sm:$0xff] }
 0x152   : > { %2624 = vmatprep.subr.mxu0 %v3286_v8  ;;  %2680 = vmatpush3.msra.mxu1 %v2028_v17 }
 0x153   : > { %2536 = vmatprep.mubr.msk.f32.mxu0 %vm2741_vm0, %v3286_v8  ;;  %2592 = vmatprep.mubr.msk.f32.mxu1 %vm2741_vm0, %v3286_v8 }
 0x154   : > { %2625 = vmatpush3.msra.mxu0 %v2010_v18  ;;  %2681 = vmatprep.subr.mxu1 %v3286_v8 }
 0x155   : > { %2537 = vmatmul.mubr.f32.gmra.mxu0 %v1114_v2  ;;  %2593 = vmatmul.mubr.f32.gmra.mxu1 %v1276_v19 }
 0x156   : > { %2626 = vmatprep.subr.mxu0 %v3286_v8  ;;  %2682 = vmatpush3.msra.mxu1 %v2027_v20 }
 0x157   : > { %2627 = vmatpush3.msra.mxu0 %v2009_v21  ;;  %2683 = vmatprep.subr.mxu1 %v3286_v8 }
 0x158   : > { %2628 = vmatprep.subr.mxu0 %v3286_v8  ;;  %2595 = vmatprep.mubr.msk.f32.mxu1 %vm2741_vm0, %v3286_v8 }
 0x159   : > { %2629 = vmatpush3.msra.mxu0 %v2008_v22  ;;  %2630 = vmatprep.mubr.msk.f32.mxu0 %vm2741_vm0, %v3286_v8 }
 0x15a   : > { %2684 = vmatpush3.msra.mxu1 %v2026_v50  ;;  %2631 = vmatmul.mubr.f32.vlgmr.msra.gmra.mxu0 %v3442_v24  ;;  %v1595_v24 = vld [vmem:[#allocation2 + $0xa] sm:$0xff] }
 0x15b   : > { %2596 = vmatmul.mubr.f32.gmra.mxu1 %v1277_v23  ;;  %2685 = vmatprep.subr.mxu1 %v3286_v8 }
 0x15c   : > { %2686 = vmatpush3.msra.mxu1 %v2025_v52  ;;  %2633 = vmatprep.mubr.msk.f32.mxu0 %vm2741_vm0, %v3286_v8 }
 0x15d   : > { %2687 = vmatprep.subr.mxu1 %v3286_v8  ;;  %2689 = vmatprep.mubr.msk.f32.mxu1 %vm2741_vm0, %v3286_v8 }
 0x15e   : > { %2688 = vmatpush3.msra.mxu1 %v2024_v25  ;;  %2634 = vmatmul.mubr.f32.gmra.mxu0 %v3462_v37  ;;  %v1805_v25 = vpop.permute.xlu1 %1804 }
 0x15f   : > { %2690 = vmatmul.mubr.f32.vlgmr.msra.gmra.mxu1 %v1595_v24  ;;  %2636 = vmatprep.mubr.msk.f32.mxu0 %vm2741_vm0, %v3286_v8 }
 0x160   : > { %2692 = vmatprep.mubr.msk.f32.mxu1 %vm2741_vm0, %v3286_v8 }
 0x162   : > { %2637 = vmatmul.mubr.f32.gmra.mxu0 %v3479_v42 }
 0x163   : > { %2693 = vmatmul.mubr.f32.gmra.mxu1 %v1596_v26  ;;  %2639 = vmatprep.mubr.msk.f32.mxu0 %vm2741_vm0, %v3286_v8 }
 0x164   : > { %2695 = vmatprep.mubr.msk.f32.mxu1 %vm2741_vm0, %v3286_v8 }
 0x166   : > { %2640 = vmatmul.mubr.f32.gmra.mxu0 %v3497_v7 }
 0x167   : > { %2696 = vmatmul.mubr.f32.gmra.mxu1 %v1597_v27  ;;  %2642 = vmatprep.mubr.msk.f32.mxu0 %vm2741_vm0, %v3286_v8 }
 0x168   : > { %2698 = vmatprep.mubr.msk.f32.mxu1 %vm2741_vm0, %v3286_v8 }
 0x16a   : > { %2643 = vmatmul.mubr.f32.gmra.mxu0 %v3514_v10 }
 0x16b   : > { %2699 = vmatmul.mubr.f32.gmra.mxu1 %v1598_v28  ;;  %2645 = vmatprep.mubr.msk.f32.mxu0 %vm2741_vm0, %v3286_v8 }
 0x16c   : > { %2701 = vmatprep.mubr.msk.f32.mxu1 %vm2741_vm0, %v3286_v8 }
 0x16e   : > { %2646 = vmatmul.mubr.f32.gmra.mxu0 %v3529_v14 }
 0x16f   : > { %2702 = vmatmul.mubr.f32.gmra.mxu1 %v1599_v29  ;;  %2648 = vmatprep.mubr.msk.f32.mxu0 %vm2741_vm0, %v3286_v8 }
 0x170   : > { %2704 = vmatprep.mubr.msk.f32.mxu1 %vm2741_vm0, %v3286_v8 }
 0x172   : > { %2649 = vmatmul.mubr.f32.gmra.mxu0 %v1276_v19 }
 0x173   : > { %2705 = vmatmul.mubr.f32.gmra.mxu1 %v1600_v30  ;;  %2651 = vmatprep.mubr.msk.f32.mxu0 %vm2741_vm0, %v3286_v8 }
 0x174   : > { %2707 = vmatprep.mubr.msk.f32.mxu1 %vm2741_vm0, %v3286_v8 }
 0x176   : > { %2652 = vmatmul.mubr.f32.gmra.mxu0 %v1277_v23 }
 0x177   : > { %2708 = vmatmul.mubr.f32.gmra.mxu1 %v1601_v31  ;;  %2654 = vmatprep.mubr.msk.f32.mxu0 %vm2741_vm0, %v3286_v8 }
 0x178   : > { %2710 = vmatprep.mubr.msk.f32.mxu1 %vm2741_vm0, %v3286_v8 }
 0x17a   : > { %2655 = vmatmul.mubr.f32.gmra.mxu0 %v3220_v55 }
 0x17b   : > { %2711 = vmatmul.mubr.f32.gmra.mxu1 %v1602_v32 }
 0x17c   : > { %2713 = vmatprep.mubr.msk.f32.mxu1 %vm2741_vm0, %v3286_v8 }
 0x17f   : > { %2714 = vmatmul.mubr.f32.gmra.mxu1 %v3224_v56 }
 0x1e9   : > { %v1216_v54 = vpop.f32.mrf.mxu0 }
 0x1eb   : > { %v2514_v58 = vpop.f32.mrf.mxu0 }
 0x1ed   : > { %v1221_v33 = vpop.f32.mrf.mxu0 }
 0x1ef   : > { %v2517_v34 = vpop.f32.mrf.mxu0 }
 0x1f1   : > { %v1226_v35 = vpop.f32.mrf.mxu0 }
 0x1f3   : > { %v2520_v36 = vpop.f32.mrf.mxu0 }
 0x1f5   : > { %v1361_v37 = vpop.f32.mrf.mxu1  ;;  %v1231_v38 = vpop.f32.mrf.mxu0 }
 0x1f6   : > { %v1414_v46 = vadd.f32 %v1361_v37, %v1216_v54 }
 0x1f7   : > { %v2573_v39 = vpop.f32.mrf.mxu1  ;;  %v2523_v40 = vpop.f32.mrf.mxu0 }
 0x1f9   : > { %v1366_v41 = vpop.f32.mrf.mxu1 }
 0x1fa   : > { %v1415_v14 = vadd.f32 %v1366_v41, %v1221_v33  ;;  %v1810_v33 = vpop.permute.xlu0 %1809 }
 0x1fb   : > { %v2576_v44 = vpop.f32.mrf.mxu1  ;;  %v3626_v55 = vpop.f32.mrf.mxu0 }
 0x1fd   : > { %v1371_v45 = vpop.f32.mrf.mxu1  ;;  %v2526_v48 = vpop.f32.mrf.mxu0 }
 0x1fe   : > { %v1416_v22 = vadd.f32 %v1371_v45, %v1226_v35 }
 0x1ff   : > { %v2579_v49 = vpop.f32.mrf.mxu1 }
 0x201   : > { %v1376_v8 = vpop.f32.mrf.mxu1 }
 0x202   : > { %v1417_v31 = vadd.f32 %v1376_v8, %v1231_v38  ;;  %v1815_v38 = vpop.permute.xlu1 %1814 }
 0x203   : > { %v2582_v60 = vpop.f32.mrf.mxu1  ;;  %v3628_v56 = vpop.f32.mrf.mxu0 }
 0x205   : > { %v1381_v61 = vpop.f32.mrf.mxu1  ;;  %v2529_v51 = vpop.f32.mrf.mxu0 }
 0x206   : > { %v1418_v41 = vadd.f32 %v1381_v61, %v3626_v55  ;;  %v1820_v61 = vpop.permute.xlu0 %1819 }
 0x207   : > { %v2585_v53 = vpop.f32.mrf.mxu1 }
 0x209   : > { %v3630_v57 = vpop.f32.mrf.mxu0 }
 0x20a   : > { %v3632_v42 = vpop.f32.mrf.mxu1 }
 0x20b   : > { %v2532_v43 = vpop.f32.mrf.mxu0 }
 0x20c   : > { %v2588_v59 = vpop.f32.mrf.mxu1 }
 0x20d   : > { %v1419_v59 = vadd.f32 %v3632_v42, %v3628_v56  ;;  %v1825_v42 = vpop.permute.xlu1 %1824 }
 0x20f   : > { %v3634_v62 = vpop.f32.mrf.mxu0  ;;  %v3636_v63 = vpop.f32.mrf.mxu1 }
 0x211   : > { %v2535_v0 = vpop.f32.mrf.mxu0  ;;  %v2591_v1 = vpop.f32.mrf.mxu1 }
 0x215   : > { %v3638_v3 = vpop.f32.mrf.mxu0  ;;  %v3640_v4 = vpop.f32.mrf.mxu1 }
 0x217   : > { %v2538_v6 = vpop.f32.mrf.mxu0  ;;  %v2594_v7 = vpop.f32.mrf.mxu1 }
 0x21a   : > { %v1524_v9 = vpop.f32.mrf.mxu0 }
 0x21b   : > { %v3642_v5 = vpop.f32.mrf.mxu1  ;;  %v1577_v10 = vadd.f32 %v1524_v9, %v1414_v46 }
 0x21c   : > { %v2632_v47 = vpop.f32.mrf.mxu0 }
 0x21d   : > { %v2597_v2 = vpop.f32.mrf.mxu1 }
 0x21e   : > { %v1529_v11 = vpop.f32.mrf.mxu0 }
 0x21f   : > { %v1687_v12 = vpop.f32.mrf.mxu1  ;;  %v1578_v18 = vadd.f32 %v1529_v11, %v1415_v14 }
 0x220   : > { %v1740_v15 = vadd.f32 %v1687_v12, %v1577_v10  ;;  %v2635_v16 = vpop.f32.mrf.mxu0  ;;  %v1420_v10 = vadd.f32 %v3636_v63, %v3630_v57  ;;  %v1830_v63 = vpop.permute.xlu0 %1829 }
 0x221   : > { %v2691_v17 = vpop.f32.mrf.mxu1 }
 0x222   : > { %v1775_v19 = vadd.f32 %v3647_v13, %v1740_v15  ;;  %v1534_v20 = vpop.f32.mrf.mxu0 }
 0x223   : > { %v1692_v21 = vpop.f32.mrf.mxu1  ;;  %v1579_v27 = vadd.f32 %v1534_v20, %v1416_v22  ;;  %v1421_v20 = vadd.f32 %v3640_v4, %v3634_v62 }
 0x224   : > { %v1784_v50 = vmax.f32 %v1775_v19, 0.0  ;;  %v1741_v52 = vadd.f32 %v1692_v21, %v1578_v18  ;;  %v2638_v23 = vpop.f32.mrf.mxu0 }
 0x225   : > { %v2694_v24 = vpop.f32.mrf.mxu1 }
 0x226   : > { %v1847_v26 = vmul.f32 %v1805_v25, %v1784_v50  ;;  %v1776_v28 = vadd.f32 %v3647_v13, %v1741_v52  ;;  %v1539_v29 = vpop.f32.mrf.mxu0 }
 0x227   : > { %v1697_v30 = vpop.f32.mrf.mxu1  ;;  %v1580_v36 = vadd.f32 %v1539_v29, %v1417_v31  ;;  %v1835_v29 = vpop.permute.xlu1 %1834 }
 0x228   : > { %1856 = vst [vmem:[%s3654_s14] sm:$0xff] %v1847_v26  ;;  %v1785_v32 = vmax.f32 %v1776_v28, 0.0  ;;  %v1742_v54 = vadd.f32 %v1697_v30, %v1579_v27  ;;  %v2641_v58 = vpop.f32.mrf.mxu0  ;;  %v1422_v27 = vadd.f32 %v3642_v5, %v3638_v3 }
 0x229   : > { %v2697_v34 = vpop.f32.mrf.mxu1 }
 0x22a   : > { %v1848_v35 = vmul.f32 %v1810_v33, %v1785_v32  ;;  %v1777_v37 = vadd.f32 %v3647_v13, %v1742_v54  ;;  %v1544_v39 = vpop.f32.mrf.mxu0 }
 0x22b   : > { %v1702_v40 = vpop.f32.mrf.mxu1  ;;  %v1581_v60 = vadd.f32 %v1544_v39, %v1418_v41  ;;  %v1845_v39 = vpop.permute.xlu1 %1844 }
 0x22c   : > { %1857 = vst [vmem:[%s3654_s14 + $0x8] sm:$0xff] %v1848_v35  ;;  %v1786_v44 = vmax.f32 %v1777_v37, 0.0  ;;  %v1743_v45 = vadd.f32 %v1702_v40, %v1580_v36  ;;  %v2644_v48 = vpop.f32.mrf.mxu0  ;;  %v1840_v35 = vpop.permute.xlu0 %1839 }
 0x22d   : > { %v2700_v49 = vpop.f32.mrf.mxu1 }
 0x22e   : > { %v1849_v8 = vmul.f32 %v1815_v38, %v1786_v44  ;;  %v1778_v51 = vadd.f32 %v3647_v13, %v1743_v45  ;;  %v1549_v53 = vpop.f32.mrf.mxu0 }
 0x22f   : > { %v1707_v43 = vpop.f32.mrf.mxu1  ;;  %v1582_v9 = vadd.f32 %v1549_v53, %v1419_v59 }
 0x230   : > { %1858 = vst [vmem:[%s3654_s14 + $0x10] sm:$0xff] %v1849_v8  ;;  %v1787_v0 = vmax.f32 %v1778_v51, 0.0  ;;  %v1744_v1 = vadd.f32 %v1707_v43, %v1581_v60  ;;  %v2647_v55 = vpop.f32.mrf.mxu0 }
 0x231   : > { %v2703_v6 = vpop.f32.mrf.mxu1 }
 0x232   : > { %v1850_v7 = vmul.f32 %v1820_v61, %v1787_v0  ;;  %v1779_v46 = vadd.f32 %v3647_v13, %v1744_v1  ;;  %v1554_v47 = vpop.f32.mrf.mxu0 }
 0x233   : > { %v1712_v2 = vpop.f32.mrf.mxu1  ;;  %v1583_v16 = vadd.f32 %v1554_v47, %v1420_v10 }
 0x234   : > { %1859 = vst [vmem:[%s3654_s14 + $0x18] sm:$0xff] %v1850_v7  ;;  %v1788_v11 = vmax.f32 %v1779_v46, 0.0  ;;  %v1745_v12 = vadd.f32 %v1712_v2, %v1582_v9  ;;  %v2650_v56 = vpop.f32.mrf.mxu0 }
 0x235   : > { %v2706_v14 = vpop.f32.mrf.mxu1 }
 0x236   : > { %v1851_v15 = vmul.f32 %v1825_v42, %v1788_v11  ;;  %v1780_v17 = vadd.f32 %v3647_v13, %v1745_v12  ;;  %v1559_v18 = vpop.f32.mrf.mxu0 }
 0x237   : > { %v1717_v19 = vpop.f32.mrf.mxu1  ;;  %v1584_v23 = vadd.f32 %v1559_v18, %v1421_v20 }
 0x238   : > { %1860 = vst [vmem:[%s3654_s14 + $0x20] sm:$0xff] %v1851_v15  ;;  %v1789_v21 = vmax.f32 %v1780_v17, 0.0  ;;  %v1746_v22 = vadd.f32 %v1717_v19, %v1583_v16  ;;  %v2653_v57 = vpop.f32.mrf.mxu0 }
 0x239   : > { %v2709_v50 = vpop.f32.mrf.mxu1 }
 0x23a   : > { %v1852_v52 = vmul.f32 %v1830_v63, %v1789_v21  ;;  %v1781_v25 = vadd.f32 %v3647_v13, %v1746_v22  ;;  %v1564_v24 = vpop.f32.mrf.mxu0 }
 0x23b   : > { %v1722_v26 = vpop.f32.mrf.mxu1  ;;  %v1585_v32 = vadd.f32 %v1564_v24, %v1422_v27 }
 0x23c   : > { %1861 = vst [vmem:[%s3654_s14 + $0x28] sm:$0xff] %v1852_v52  ;;  %v1790_v28 = vmax.f32 %v1781_v25, 0.0  ;;  %v1747_v62 = vadd.f32 %v1722_v26, %v1584_v23  ;;  %v2656_v4 = vpop.f32.mrf.mxu0 }
 0x23d   : > { %v2712_v30 = vpop.f32.mrf.mxu1 }
 0x23e   : > { %v1853_v31 = vmul.f32 %v1835_v29, %v1790_v28  ;;  %v1782_v54 = vadd.f32 %v3647_v13, %v1747_v62 }
 0x23f   : > { %v1727_v58 = vpop.f32.mrf.mxu1 }
 0x240   : > { %1862 = vst [vmem:[%s3654_s14 + $0x30] sm:$0xff] %v1853_v31  ;;  %v1791_v33 = vmax.f32 %v1782_v54, 0.0  ;;  %v1748_v34 = vadd.f32 %v1727_v58, %v1585_v32 }
 0x241   : > { %v2715_v36 = vpop.f32.mrf.mxu1 }
 0x242   : > { %v1854_v37 = vmul.f32 %v1840_v35, %v1791_v33  ;;  %v1783_v3 = vadd.f32 %v3647_v13, %v1748_v34 }
 0x244   : > { %1863 = vst [vmem:[%s3654_s14 + $0x38] sm:$0xff] %v1854_v37  ;;  %v1792_v5 = vmax.f32 %v1783_v3, 0.0 }
 0x246   : > { %v1855_v40 = vmul.f32 %v1845_v39, %v1792_v5 }
 0x248   : > { %1864 = vst [vmem:[%s3654_s14 + $0x40] sm:$0xff] %v1855_v40 }
 0x249 PF: > { %s14_s15 = sadd.s32 1, %s2738_s15  }
 0x24a   : > { %p11_p4 = scmp.ge.s32.totalorder %s14_s15, 4  }
 0x24c   :  { %13 = sbr.rel (!%p11_p4) target bundleno = 1 (0x1), region = 74 }

// kernel: encoder_forward.5
= control target key start
LH: loop header
LB: loop body
LE: loop exit
PB: predicated region body
PF: predicated region fallthrough
CT: control target
= control target key end

     0   :  { %s1897_s15 = smov 0   ;;  %s2493_s0 = inlined_call_operand.vmem [shape: f32[2,72,128], index: 0, kind: input, shape index: {}]   ;;  %s2494_s1 = inlined_call_operand.vmem [shape: f32[2,4,128,128], index: 1, kind: input, shape index: {}]   ;;  %s2495_s2 = inlined_call_operand.vmem [shape: f32[2,1,128], index: 2, kind: input, shape index: {}]   ;;  %s2496_s3 = inlined_call_operand.vmem [shape: f32[20,1], index: 3, kind: input, shape index: {}]   ;;  %s2497_s4 = inlined_call_operand.vmem [shape: f32[2,20,128], index: 4, kind: output, shape index: {}]  }
   0x1 LB: > { %s1241_s16 = sadd.s32 4294967295, %s1867_s15   ;;  %p1245_p0 = scmp.ge.s32.totalorder %s1867_s15, 1  ;;  %s1867_s15 = sphi %s1897_s15, %s14_s15  }
   0x2   : > { %p162_p1 = scmp.lt.s32.totalorder %s1867_s15, 3 }
   0x4   : > { %p163_p2 = pnand %p1245_p0, %p162_p1 }
   0x5   : > { %p188_p3 = scmp.lt.s32.totalorder (!%p163_p2), %s1241_s16, 1 }
   0x6   : > { %166 = sbr.rel (%p163_p2) target bundleno = 552 (0x228), region = 36 }
   0xb   : > { %v264_v0 = vld [vmem:[%s2494_s1 + $0x78] sm:$0xff]  ;;  %v1869_v1 = vmov 0.0   ;;  %v263_v2 = vld [vmem:[%s2494_s1 + $0x70] sm:$0xff]  ;;  %s2499_s16 = smov (!%p188_p3, %s1241_s16), 1  ;;  %v262_v5 = vld [vmem:[%s2494_s1 + $0x68] sm:$0xff]  ;;  %vm1870_vm0 = vmmov 0  }
   0xc   : > { %1517 = vmatprep.subr.mxu0 %v1869_v1  ;;  %198 = vst [vmem:[#allocation2] sm:$0xff] %v1869_v1  ;;  %199 = vst [vmem:[#allocation2 + $0x8] sm:$0xff] %v1869_v1  ;;  %1558 = vmatprep.subr.mxu1 %v1869_v1  ;;  %v1263_v3 = vld [vmem:[%s2494_s1 + $0xf8] sm:$0xff]  ;;  %v1262_v4 = vld [vmem:[%s2494_s1 + $0xf0] sm:$0xff]  ;;  %s1845_s29 = smul.u32 72, %s2499_s16 }
   0xd   : > { %200 = vst [vmem:[#allocation2 + $0x10] sm:$0xff] %v1869_v1  ;;  %201 = vst [vmem:[#allocation2 + $0x18] sm:$0xff] %v1869_v1  ;;  %1518 = vmatpush3.msra.mxu0 %v264_v0  ;;  %1559 = vmatpush3.msra.mxu1 %v1263_v3  ;;  %v1261_v6 = vld [vmem:[%s2494_s1 + $0xe8] sm:$0xff]  ;;  %v261_v7 = vld [vmem:[%s2494_s1 + $0x60] sm:$0xff]  ;;  %s1846_s25 = smul.u32 24, %s2499_s16 }
   0xe   : > { %1519 = vmatprep.subr.mxu0 %v1869_v1  ;;  %1560 = vmatprep.subr.mxu1 %v1869_v1  ;;  %v1260_v8 = vld [vmem:[%s2494_s1 + $0xe0] sm:$0xff]  ;;  %s1945_s10 = scalar_lea.vmem %s2493_s0, %s1845_s29  ;;  %v260_v9 = vld [vmem:[%s2494_s1 + $0x58] sm:$0xff]  ;;  %v259_v11 = vld [vmem:[%s2494_s1 + $0x50] sm:$0xff] }
   0xf   : > { %1520 = vmatpush3.msra.mxu0 %v263_v2  ;;  %1561 = vmatpush3.msra.mxu1 %v1262_v4  ;;  %v1259_v10 = vld [vmem:[%s2494_s1 + $0xd8] sm:$0xff]  ;;  %v1258_v12 = vld [vmem:[%s2494_s1 + $0xd0] sm:$0xff]  ;;  %v202_v13 = vld [vmem:[%s1945_s10] sm:$0xff]  ;;  %s197_s28 = scalar_lea.vmem %s2497_s4, %s1846_s25 }
  0x10   : > { %1521 = vmatprep.subr.mxu0 %v1869_v1  ;;  %1562 = vmatprep.subr.mxu1 %v1869_v1  ;;  %v203_v14 = vld [vmem:[%s1945_s10 + $0x9] sm:$0xff]  ;;  %v213_v16 = vld [vmem:[%s1945_s10 + $0x12] sm:$0xff]  ;;  %v214_v17 = vld [vmem:[%s1945_s10 + $0x1b] sm:$0xff] }
  0x11   : > { %1522 = vmatpush3.msra.mxu0 %v262_v5  ;;  %1563 = vmatpush3.msra.mxu1 %v1261_v6  ;;  %v204_v15 = vmax.f32 %v202_v13, %v203_v14  ;;  %v258_v18 = vld [vmem:[%s2494_s1 + $0x48] sm:$0xff]  ;;  %v215_v20 = vmax.f32 %v213_v16, %v214_v17  ;;  %v257_v22 = vld [vmem:[%s2494_s1 + $0x40] sm:$0xff]  ;;  %v256_v26 = vld [vmem:[%s2494_s1 + $0x38] sm:$0xff] }
  0x12   : > { %1523 = vmatprep.subr.mxu0 %v1869_v1  ;;  %1564 = vmatprep.subr.mxu1 %v1869_v1  ;;  %v1257_v19 = vld [vmem:[%s2494_s1 + $0xc8] sm:$0xff]  ;;  %v1256_v23 = vld [vmem:[%s2494_s1 + $0xc0] sm:$0xff]  ;;  %v1255_v27 = vld [vmem:[%s2494_s1 + $0xb8] sm:$0xff] }
  0x13   : > { %1524 = vmatpush3.msra.mxu0 %v261_v7  ;;  %1565 = vmatpush3.msra.mxu1 %v1260_v8  ;;  %v206_v21 = vrot.slane %v204_v15, 1  ;;  %v217_v24 = vrot.slane %v215_v20, 1  ;;  %v255_v29 = vld [vmem:[%s2494_s1 + $0x30] sm:$0xff]  ;;  %v224_v31 = vld [vmem:[%s1945_s10 + $0x24] sm:$0xff]  ;;  %v252_v45 = vld [vmem:[%s2494_s1 + $0x18] sm:$0xff] }
  0x14   : > { %1525 = vmatprep.subr.mxu0 %v1869_v1  ;;  %1566 = vmatprep.subr.mxu1 %v1869_v1  ;;  %v1254_v30 = vld [vmem:[%s2494_s1 + $0xb0] sm:$0xff]  ;;  %v236_v34 = vld [vmem:[%s1945_s10 + $0x3f] sm:$0xff]  ;;  %v254_v37 = vld [vmem:[%s2494_s1 + $0x28] sm:$0xff] }
  0x15   : > { %1526 = vmatpush3.msra.mxu0 %v260_v9  ;;  %1567 = vmatpush3.msra.mxu1 %v1259_v10  ;;  %v208_v25 = vmax.f32 %v204_v15, %v206_v21  ;;  %v219_v28 = vmax.f32 %v215_v20, %v217_v24  ;;  %v225_v32 = vld [vmem:[%s1945_s10 + $0x2d] sm:$0xff]  ;;  %v235_v33 = vld [vmem:[%s1945_s10 + $0x36] sm:$0xff]  ;;  %v253_v41 = vld [vmem:[%s2494_s1 + $0x20] sm:$0xff] }
  0x16   : > { %1527 = vmatprep.subr.mxu0 %v1869_v1  ;;  %1568 = vmatprep.subr.mxu1 %v1869_v1  ;;  %v226_v35 = vmax.f32 %v224_v31, %v225_v32  ;;  %v237_v36 = vmax.f32 %v235_v33, %v236_v34  ;;  %v1253_v38 = vld [vmem:[%s2494_s1 + $0xa8] sm:$0xff]  ;;  %v1252_v42 = vld [vmem:[%s2494_s1 + $0xa0] sm:$0xff]  ;;  %v1251_v46 = vld [vmem:[%s2494_s1 + $0x98] sm:$0xff] }
  0x17   : > { %1528 = vmatpush3.msra.mxu0 %v259_v11  ;;  %1569 = vmatpush3.msra.mxu1 %v1258_v12  ;;  %209 = vst [vmem:[#allocation2] sm:$0x1] %v208_v25  ;;  %210 = vst [vmem:[#allocation2 - $0x1] sm:$0x4] %v208_v25  ;;  %v251_v47 = vld [vmem:[%s2494_s1 + $0x10] sm:$0xff]  ;;  %v250_v49 = vld [vmem:[%s2494_s1 + $0x8] sm:$0xff] }
  0x18   : > { %1529 = vmatprep.subr.mxu0 %v1869_v1  ;;  %1570 = vmatprep.subr.mxu1 %v1869_v1  ;;  %211 = vst [vmem:[#allocation2 - $0x2] sm:$0x10] %v208_v25  ;;  %212 = vst [vmem:[#allocation2 - $0x3] sm:$0x40] %v208_v25  ;;  %v228_v39 = vrot.slane %v226_v35, 1  ;;  %v239_v40 = vrot.slane %v237_v36, 1 }
  0x19   : > { %1530 = vmatpush3.msra.mxu0 %v258_v18  ;;  %1571 = vmatpush3.msra.mxu1 %v1257_v19  ;;  %220 = vst [vmem:[#allocation2 + $0x5] sm:$0x1] %v219_v28  ;;  %221 = vst [vmem:[#allocation2 + $0x4] sm:$0x4] %v219_v28  ;;  %v1250_v48 = vld [vmem:[%s2494_s1 + $0x90] sm:$0xff]  ;;  %v1249_v50 = vld [vmem:[%s2494_s1 + $0x88] sm:$0xff] }
  0x1a   : > { %1531 = vmatprep.subr.mxu0 %v1869_v1  ;;  %1572 = vmatprep.subr.mxu1 %v1869_v1  ;;  %222 = vst [vmem:[#allocation2 + $0x3] sm:$0x10] %v219_v28  ;;  %223 = vst [vmem:[#allocation2 + $0x2] sm:$0x40] %v219_v28  ;;  %v230_v43 = vmax.f32 %v226_v35, %v228_v39  ;;  %v241_v44 = vmax.f32 %v237_v36, %v239_v40  ;;  %v249_v51 = vld [vmem:[%s2494_s1] sm:$0xff]  ;;  %v1279_v53 = vld [vmem:[%s2494_s1 + $0x178] sm:$0xff] }
  0x1b   : > { %1532 = vmatpush3.msra.mxu0 %v257_v22  ;;  %1573 = vmatpush3.msra.mxu1 %v1256_v23  ;;  %v1248_v54 = vld [vmem:[%s2494_s1 + $0x80] sm:$0xff]  ;;  %v1278_v55 = vld [vmem:[%s2494_s1 + $0x170] sm:$0xff]  ;;  %v1277_v57 = vld [vmem:[%s2494_s1 + $0x168] sm:$0xff] }
  0x1c   : > { %1533 = vmatprep.subr.mxu0 %v1869_v1  ;;  %1574 = vmatprep.subr.mxu1 %v1869_v1  ;;  %231 = vst [vmem:[#allocation2 + $0xa] sm:$0x1] %v230_v43  ;;  %232 = vst [vmem:[#allocation2 + $0x9] sm:$0x4] %v230_v43  ;;  %v1295_v58 = vld [vmem:[%s2494_s1 + $0x1f8] sm:$0xff]  ;;  %v1276_v59 = vld [vmem:[%s2494_s1 + $0x160] sm:$0xff] }
  0x1d   : > { %1534 = vmatpush3.msra.mxu0 %v256_v26  ;;  %1575 = vmatpush3.msra.mxu1 %v1255_v27  ;;  %233 = vst [vmem:[#allocation2 + $0x8] sm:$0x10] %v230_v43  ;;  %234 = vst [vmem:[#allocation2 + $0x7] sm:$0x40] %v230_v43  ;;  %v1294_v60 = vld [vmem:[%s2494_s1 + $0x1f0] sm:$0xff]  ;;  %v1275_v61 = vld [vmem:[%s2494_s1 + $0x158] sm:$0xff] }
  0x1e   : > { %1535 = vmatprep.subr.mxu0 %v1869_v1  ;;  %1576 = vmatprep.subr.mxu1 %v1869_v1  ;;  %242 = vst [vmem:[#allocation2 + $0xf] sm:$0x1] %v241_v44  ;;  %243 = vst [vmem:[#allocation2 + $0xe] sm:$0x4] %v241_v44  ;;  %v1293_v62 = vld [vmem:[%s2494_s1 + $0x1e8] sm:$0xff]  ;;  %v1274_v63 = vld [vmem:[%s2494_s1 + $0x150] sm:$0xff] }
  0x1f   : > { %1536 = vmatpush3.msra.mxu0 %v255_v29  ;;  %1577 = vmatpush3.msra.mxu1 %v1254_v30  ;;  %244 = vst [vmem:[#allocation2 + $0xd] sm:$0x10] %v241_v44  ;;  %245 = vst [vmem:[#allocation2 + $0xc] sm:$0x40] %v241_v44  ;;  %v1292_v0 = vld [vmem:[%s2494_s1 + $0x1e0] sm:$0xff]  ;;  %v1273_v2 = vld [vmem:[%s2494_s1 + $0x148] sm:$0xff] }
  0x20   : > { %1537 = vmatprep.subr.mxu0 %v1869_v1  ;;  %1578 = vmatprep.subr.mxu1 %v1869_v1  ;;  %v1291_v3 = vld [vmem:[%s2494_s1 + $0x1d8] sm:$0xff]  ;;  %v1272_v4 = vld [vmem:[%s2494_s1 + $0x140] sm:$0xff]  ;;  %v1290_v7 = vld [vmem:[%s2494_s1 + $0x1d0] sm:$0xff]  ;;  %v1871_v29 = vmov 0  }
  0x21   : > { %1538 = vmatpush3.msra.mxu0 %v254_v37  ;;  %1579 = vmatpush3.msra.mxu1 %v1253_v38  ;;  %v246_v52 = vld [vmem:[#allocation2] sm:$0xff]  ;;  %v1271_v6 = vld [vmem:[%s2494_s1 + $0x138] sm:$0xff]  ;;  %v1270_v8 = vld [vmem:[%s2494_s1 + $0x130] sm:$0xff] }
  0x22   : > { %1539 = vmatprep.subr.mxu0 %v1869_v1  ;;  %1580 = vmatprep.subr.mxu1 %v1869_v1  ;;  %v348_v56 = vld [vmem:[#allocation2 + $0x1] sm:$0xff]  ;;  %v1267_v14 = vld [vmem:[%s2494_s1 + $0x118] sm:$0xff]  ;;  %v1266_v17 = vld [vmem:[%s2494_s1 + $0x110] sm:$0xff] }
  0x23   : > { %1540 = vmatpush3.msra.mxu0 %v253_v41  ;;  %1549 = vmatprep.mubr.msk.f32.mxu0 %vm1870_vm0, %v1869_v1  ;;  %v1289_v9 = vld [vmem:[%s2494_s1 + $0x1c8] sm:$0xff]  ;;  %v1268_v12 = vld [vmem:[%s2494_s1 + $0x120] sm:$0xff]  ;;  %v1287_v15 = vld [vmem:[%s2494_s1 + $0x1b8] sm:$0xff] }
  0x24   : > { %1541 = vmatprep.subr.mxu0 %v1869_v1  ;;  %1581 = vmatpush3.msra.mxu1 %v1252_v42  ;;  %v1269_v10 = vld [vmem:[%s2494_s1 + $0x128] sm:$0xff]  ;;  %v1288_v13 = vld [vmem:[%s2494_s1 + $0x1c0] sm:$0xff]  ;;  %v1286_v18 = vld [vmem:[%s2494_s1 + $0x1b0] sm:$0xff] }
  0x25   : > { %1542 = vmatpush3.msra.mxu0 %v252_v45  ;;  %1582 = vmatprep.subr.mxu1 %v1869_v1  ;;  %v247_v5 = vld [vmem:[#allocation2 + $0x8] sm:$0xff]  ;;  %v1264_v22 = vld [vmem:[%s2494_s1 + $0x100] sm:$0xff]  ;;  %v1283_v25 = vld [vmem:[%s2494_s1 + $0x198] sm:$0xff] }
  0x26   : > { %1543 = vmatprep.subr.mxu0 %v1869_v1  ;;  %1583 = vmatpush3.msra.mxu1 %v1251_v46  ;;  %v248_v11 = vld [vmem:[#allocation2 + $0x10] sm:$0xf]  ;;  %v1265_v19 = vld [vmem:[%s2494_s1 + $0x108] sm:$0xff]  ;;  %v1284_v23 = vld [vmem:[%s2494_s1 + $0x1a0] sm:$0xff] }
  0x27   : > { %1544 = vmatpush3.msra.mxu0 %v251_v47  ;;  %1584 = vmatprep.subr.mxu1 %v1869_v1  ;;  %v349_v16 = vld [vmem:[#allocation2 + $0x9] sm:$0xff]  ;;  %v350_v21 = vld [vmem:[#allocation2 + $0x11] sm:$0xf]  ;;  %v691_v30 = vld [vmem:[%s2496_s3] sm:$0xff] }
  0x28   : > { %1545 = vmatprep.subr.mxu0 %v1869_v1  ;;  %1585 = vmatpush3.msra.mxu1 %v1250_v48  ;;  %v1285_v20 = vld [vmem:[%s2494_s1 + $0x1a8] sm:$0xff]  ;;  %v1282_v26 = vld [vmem:[%s2494_s1 + $0x190] sm:$0xff]  ;;  %v1280_v31 = vld [vmem:[%s2494_s1 + $0x180] sm:$0xff] }
  0x29   : > { %1546 = vmatpush3.msra.mxu0 %v250_v49  ;;  %1586 = vmatprep.subr.mxu1 %v1869_v1  ;;  %v457_v24 = vld [vmem:[#allocation2 + $0x5] sm:$0xff]  ;;  %v458_v27 = vld [vmem:[#allocation2 + $0xd] sm:$0xff]  ;;  %v459_v32 = vld [vmem:[#allocation2 + $0x15] sm:$0xf] }
  0x2a   : > { %1547 = vmatprep.subr.mxu0 %v1869_v1  ;;  %1587 = vmatpush3.msra.mxu1 %v1249_v50  ;;  %v1281_v28 = vld [vmem:[%s2494_s1 + $0x188] sm:$0xff]  ;;  %v693_v34 = vld [vmem:[%s2496_s3 + $0x10] sm:$0xf]  ;;  %v568_v37 = vld [vmem:[#allocation2 + $0x16] sm:$0xf] }
  0x2b   : > { %1548 = vmatpush3.msra.mxu0 %v249_v51  ;;  %1588 = vmatprep.subr.mxu1 %v1869_v1  ;;  %v566_v33 = vld [vmem:[#allocation2 + $0x6] sm:$0xff]  ;;  %v567_v36 = vld [vmem:[#allocation2 + $0xe] sm:$0xff]  ;;  %v1312_v39 = vld [vmem:[%s2494_s1 + $0x278] sm:$0xff] }
  0x2c   : > { %1550 = vmatmul.mubr.f32.vlgmr.msra.gmra.mxu0 %v246_v52  ;;  %1599 = vmatprep.subr.mxu0 %v1869_v1  ;;  %v692_v35 = vld [vmem:[%s2496_s3 + $0x8] sm:$0xff]  ;;  %v1164_v38 = vld [vmem:[%s2496_s3 + $0x10] sm:$0xf]  ;;  %v1309_v42 = vld [vmem:[%s2494_s1 + $0x260] sm:$0xff] }
  0x2d   : > { %1600 = vmatpush3.msra.mxu0 %v1279_v53  ;;  %1589 = vmatpush3.msra.mxu1 %v1248_v54  ;;  %v1311_v40 = vld [vmem:[%s2494_s1 + $0x270] sm:$0xff]  ;;  %v1310_v41 = vld [vmem:[%s2494_s1 + $0x268] sm:$0xff]  ;;  %v1308_v43 = vld [vmem:[%s2494_s1 + $0x258] sm:$0xff] }
  0x2e   : > { %1601 = vmatprep.subr.mxu0 %v1869_v1  ;;  %1590 = vmatprep.mubr.msk.f32.mxu1 %vm1870_vm0, %v1869_v1  ;;  %v1307_v44 = vld [vmem:[%s2494_s1 + $0x250] sm:$0xff]  ;;  %v1328_v45 = vld [vmem:[%s2494_s1 + $0x2f8] sm:$0xff]  ;;  %v1306_v46 = vld [vmem:[%s2494_s1 + $0x248] sm:$0xff] }
  0x2f   : > { %1602 = vmatpush3.msra.mxu0 %v1278_v55  ;;  %1640 = vmatprep.subr.mxu1 %v1869_v1  ;;  %v1327_v47 = vld [vmem:[%s2494_s1 + $0x2f0] sm:$0xff]  ;;  %v1305_v48 = vld [vmem:[%s2494_s1 + $0x240] sm:$0xff]  ;;  %v1326_v49 = vld [vmem:[%s2494_s1 + $0x2e8] sm:$0xff] }
  0x30   : > { %1603 = vmatprep.subr.mxu0 %v1869_v1  ;;  %1591 = vmatmul.mubr.f32.vlgmr.msra.gmra.mxu1 %v348_v56  ;;  %v1304_v50 = vld [vmem:[%s2494_s1 + $0x238] sm:$0xff]  ;;  %v1325_v51 = vld [vmem:[%s2494_s1 + $0x2e0] sm:$0xff]  ;;  %v1303_v52 = vld [vmem:[%s2494_s1 + $0x230] sm:$0xff] }
  0x31   : > { %1604 = vmatpush3.msra.mxu0 %v1277_v57  ;;  %1641 = vmatpush3.msra.mxu1 %v1295_v58  ;;  %v1324_v53 = vld [vmem:[%s2494_s1 + $0x2d8] sm:$0xff]  ;;  %v1302_v54 = vld [vmem:[%s2494_s1 + $0x228] sm:$0xff]  ;;  %v1323_v55 = vld [vmem:[%s2494_s1 + $0x2d0] sm:$0xff] }
  0x32   : > { %1605 = vmatprep.subr.mxu0 %v1869_v1  ;;  %1642 = vmatprep.subr.mxu1 %v1869_v1  ;;  %v1301_v56 = vld [vmem:[%s2494_s1 + $0x220] sm:$0xff]  ;;  %v1322_v57 = vld [vmem:[%s2494_s1 + $0x2c8] sm:$0xff]  ;;  %v1300_v58 = vld [vmem:[%s2494_s1 + $0x218] sm:$0xff] }
  0x33   : > { %1606 = vmatpush3.msra.mxu0 %v1276_v59  ;;  %1643 = vmatpush3.msra.mxu1 %v1294_v60  ;;  %v1321_v59 = vld [vmem:[%s2494_s1 + $0x2c0] sm:$0xff]  ;;  %v1299_v60 = vld [vmem:[%s2494_s1 + $0x210] sm:$0xff] }
  0x34   : > { %1607 = vmatprep.subr.mxu0 %v1869_v1  ;;  %1644 = vmatprep.subr.mxu1 %v1869_v1 }
  0x35   : > { %1608 = vmatpush3.msra.mxu0 %v1275_v61  ;;  %1645 = vmatpush3.msra.mxu1 %v1293_v62  ;;  %v1320_v61 = vld [vmem:[%s2494_s1 + $0x2b8] sm:$0xff]  ;;  %v1298_v62 = vld [vmem:[%s2494_s1 + $0x208] sm:$0xff] }
  0x36   : > { %1609 = vmatprep.subr.mxu0 %v1869_v1  ;;  %1646 = vmatprep.subr.mxu1 %v1869_v1 }
  0x37   : > { %1610 = vmatpush3.msra.mxu0 %v1274_v63  ;;  %1647 = vmatpush3.msra.mxu1 %v1292_v0  ;;  %v1319_v63 = vld [vmem:[%s2494_s1 + $0x2b0] sm:$0xff]  ;;  %v1297_v0 = vld [vmem:[%s2494_s1 + $0x200] sm:$0xff] }
  0x38   : > { %1611 = vmatprep.subr.mxu0 %v1869_v1  ;;  %1648 = vmatprep.subr.mxu1 %v1869_v1 }
  0x39   : > { %1612 = vmatpush3.msra.mxu0 %v1273_v2  ;;  %1552 = vmatprep.mubr.msk.f32.mxu0 %vm1870_vm0, %v1869_v1  ;;  %v1318_v2 = vld [vmem:[%s2494_s1 + $0x2a8] sm:$0xff] }
  0x3a   : > { %1613 = vmatprep.subr.mxu0 %v1869_v1  ;;  %1649 = vmatpush3.msra.mxu1 %v1291_v3  ;;  %v1317_v3 = vld [vmem:[%s2494_s1 + $0x2a0] sm:$0xff] }
  0x3b   : > { %1614 = vmatpush3.msra.mxu0 %v1272_v4  ;;  %1650 = vmatprep.subr.mxu1 %v1869_v1  ;;  %v1316_v4 = vld [vmem:[%s2494_s1 + $0x298] sm:$0xff] }
  0x3c   : > { %1615 = vmatprep.subr.mxu0 %v1869_v1  ;;  %1553 = vmatmul.mubr.f32.gmra.mxu0 %v247_v5  ;;  %v1315_v5 = vld [vmem:[%s2494_s1 + $0x290] sm:$0xff] }
  0x3d   : > { %1616 = vmatpush3.msra.mxu0 %v1271_v6  ;;  %1651 = vmatpush3.msra.mxu1 %v1290_v7  ;;  %v1314_v6 = vld [vmem:[%s2494_s1 + $0x288] sm:$0xff]  ;;  %v1313_v7 = vld [vmem:[%s2494_s1 + $0x280] sm:$0xff] }
  0x3e   : > { %1617 = vmatprep.subr.mxu0 %v1869_v1  ;;  %1652 = vmatprep.subr.mxu1 %v1869_v1 }
  0x3f   : > { %1618 = vmatpush3.msra.mxu0 %v1270_v8  ;;  %1555 = vmatprep.mubr.msk.f32.mxu0 %vm1870_vm0, %v1869_v1 }
  0x40   : > { %1619 = vmatprep.subr.mxu0 %v1869_v1  ;;  %1653 = vmatpush3.msra.mxu1 %v1289_v9 }
  0x41   : > { %1620 = vmatpush3.msra.mxu0 %v1269_v10  ;;  %1654 = vmatprep.subr.mxu1 %v1869_v1 }
  0x42   : > { %1556 = vmatmul.mubr.f32.gmra.mxu0 %v248_v11  ;;  %1621 = vmatprep.subr.mxu0 %v1869_v1 }
  0x43   : > { %1622 = vmatpush3.msra.mxu0 %v1268_v12  ;;  %1655 = vmatpush3.msra.mxu1 %v1288_v13 }
  0x44   : > { %1623 = vmatprep.subr.mxu0 %v1869_v1  ;;  %1656 = vmatprep.subr.mxu1 %v1869_v1 }
  0x45   : > { %1593 = vmatprep.mubr.msk.f32.mxu1 %vm1870_vm0, %v1869_v1  ;;  %1624 = vmatpush3.msra.mxu0 %v1267_v14 }
  0x46   : > { %1657 = vmatpush3.msra.mxu1 %v1287_v15  ;;  %1625 = vmatprep.subr.mxu0 %v1869_v1 }
  0x47   : > { %1594 = vmatmul.mubr.f32.gmra.mxu1 %v349_v16  ;;  %1658 = vmatprep.subr.mxu1 %v1869_v1 }
  0x48   : > { %1626 = vmatpush3.msra.mxu0 %v1266_v17  ;;  %1659 = vmatpush3.msra.mxu1 %v1286_v18 }
  0x49   : > { %1627 = vmatprep.subr.mxu0 %v1869_v1  ;;  %1660 = vmatprep.subr.mxu1 %v1869_v1 }
  0x4a   : > { %1596 = vmatprep.mubr.msk.f32.mxu1 %vm1870_vm0, %v1869_v1  ;;  %1628 = vmatpush3.msra.mxu0 %v1265_v19 }
  0x4b   : > { %1661 = vmatpush3.msra.mxu1 %v1285_v20  ;;  %1629 = vmatprep.subr.mxu0 %v1869_v1 }
  0x4c   : > { %1597 = vmatmul.mubr.f32.gmra.mxu1 %v350_v21  ;;  %1662 = vmatprep.subr.mxu1 %v1869_v1 }
  0x4d   : > { %1630 = vmatpush3.msra.mxu0 %v1264_v22  ;;  %1631 = vmatprep.mubr.msk.f32.mxu0 %vm1870_vm0, %v1869_v1 }
  0x4e   : > { %1663 = vmatpush3.msra.mxu1 %v1284_v23  ;;  %1632 = vmatmul.mubr.f32.vlgmr.msra.gmra.mxu0 %v457_v24 }
  0x4f   : > { %1664 = vmatprep.subr.mxu1 %v1869_v1  ;;  %1634 = vmatprep.mubr.msk.f32.mxu0 %vm1870_vm0, %v1869_v1 }
  0x50   : > { %1665 = vmatpush3.msra.mxu1 %v1283_v25  ;;  %1672 = vmatprep.mubr.msk.f32.mxu1 %vm1870_vm0, %v1869_v1 }
  0x51   : > { %1666 = vmatprep.subr.mxu1 %v1869_v1  ;;  %1858 = vset.pattern.permute.xlu0 %v1871_v29 }
  0x52   : > { %1667 = vmatpush3.msra.mxu1 %v1282_v26  ;;  %1635 = vmatmul.mubr.f32.gmra.mxu0 %v458_v27 }
  0x53   : > { %1668 = vmatprep.subr.mxu1 %v1869_v1  ;;  %1637 = vmatprep.mubr.msk.f32.mxu0 %vm1870_vm0, %v1869_v1 }
  0x54   : > { %1669 = vmatpush3.msra.mxu1 %v1281_v28  ;;  %696 = vperm.xlu0 %1858, %v691_v30  }
  0x55   : > { %1670 = vmatprep.subr.mxu1 %v1869_v1  ;;  %1859 = vset.pattern.permute.xlu1 %v1871_v29 }
  0x56   : > { %1671 = vmatpush3.msra.mxu1 %v1280_v31  ;;  %1638 = vmatmul.mubr.f32.gmra.mxu0 %v459_v32 }
  0x57   : > { %1673 = vmatmul.mubr.f32.vlgmr.msra.gmra.mxu1 %v566_v33  ;;  %706 = vperm.xlu1 %1859, %v693_v34   ;;  %v1296_v33 = vld [vmem:[%s2495_s2] ss:$0 sm:$0xff] }
  0x58   : > { %1675 = vmatprep.mubr.msk.f32.mxu1 %vm1870_vm0, %v1869_v1  ;;  %701 = vperm.xlu0 %1858, %v692_v35  }
  0x59   : > { %1681 = vmatprep.subr.mxu0 %v1869_v1  ;;  %1722 = vmatprep.subr.mxu1 %v1869_v1 }
  0x5a   : > { %1713 = vmatprep.mubr.msk.f32.mxu0 %vm1870_vm0, %v1869_v1  ;;  %1682 = vmatpush3.msra.mxu0 %v1312_v39 }
  0x5b   : > { %1676 = vmatmul.mubr.f32.gmra.mxu1 %v567_v36  ;;  %1167 = vperm.xlu1 %1859, %v691_v30  }
  0x5c   : > { %1678 = vmatprep.mubr.msk.f32.mxu1 %vm1870_vm0, %v1869_v1  ;;  %1172 = vperm.xlu0 %1858, %v692_v35  }
  0x5d   : > { %1683 = vmatprep.subr.mxu0 %v1869_v1  ;;  %1723 = vmatpush3.msra.mxu1 %v1328_v45 }
  0x5e   : > { %1684 = vmatpush3.msra.mxu0 %v1311_v40  ;;  %1724 = vmatprep.subr.mxu1 %v1869_v1 }
  0x5f   : > { %1679 = vmatmul.mubr.f32.gmra.mxu1 %v568_v37  ;;  %1177 = vperm.xlu1 %1859, %v1164_v38  }
  0x60   : > { %1754 = vmatprep.mubr.msk.f32.mxu1 %vm1870_vm0, %v1869_v1  ;;  %1685 = vmatprep.subr.mxu0 %v1869_v1 }
  0x61   : > { %1686 = vmatpush3.msra.mxu0 %v1310_v41  ;;  %1725 = vmatpush3.msra.mxu1 %v1327_v47 }
  0x62   : > { %1687 = vmatprep.subr.mxu0 %v1869_v1  ;;  %1726 = vmatprep.subr.mxu1 %v1869_v1 }
  0x63   : > { %1688 = vmatpush3.msra.mxu0 %v1309_v42  ;;  %1727 = vmatpush3.msra.mxu1 %v1326_v49 }
  0x64   : > { %1689 = vmatprep.subr.mxu0 %v1869_v1  ;;  %1728 = vmatprep.subr.mxu1 %v1869_v1 }
  0x65   : > { %1690 = vmatpush3.msra.mxu0 %v1308_v43  ;;  %1729 = vmatpush3.msra.mxu1 %v1325_v51  ;;  %v1343_v51 = vld [vmem:[%s2494_s1 + $0x370] sm:$0xff] }
  0x66   : > { %1691 = vmatprep.subr.mxu0 %v1869_v1  ;;  %1730 = vmatprep.subr.mxu1 %v1869_v1 }
  0x67   : > { %1692 = vmatpush3.msra.mxu0 %v1307_v44  ;;  %1731 = vmatpush3.msra.mxu1 %v1324_v53 }
  0x68   : > { %1693 = vmatprep.subr.mxu0 %v1869_v1  ;;  %1732 = vmatprep.subr.mxu1 %v1869_v1 }
  0x69   : > { %1694 = vmatpush3.msra.mxu0 %v1306_v46  ;;  %1733 = vmatpush3.msra.mxu1 %v1323_v55  ;;  %v1344_v46 = vld [vmem:[%s2494_s1 + $0x378] sm:$0xff]  ;;  %v1342_v55 = vld [vmem:[%s2494_s1 + $0x368] sm:$0xff] }
  0x6a   : > { %1695 = vmatprep.subr.mxu0 %v1869_v1  ;;  %1734 = vmatprep.subr.mxu1 %v1869_v1 }
  0x6b   : > { %1696 = vmatpush3.msra.mxu0 %v1305_v48  ;;  %1735 = vmatpush3.msra.mxu1 %v1322_v57  ;;  %v1340_v57 = vld [vmem:[%s2494_s1 + $0x358] sm:$0xff] }
  0x6c   : > { %1697 = vmatprep.subr.mxu0 %v1869_v1  ;;  %1736 = vmatprep.subr.mxu1 %v1869_v1 }
  0x6d   : > { %1698 = vmatpush3.msra.mxu0 %v1304_v50  ;;  %1737 = vmatpush3.msra.mxu1 %v1321_v59 }
  0x6e   : > { %1699 = vmatprep.subr.mxu0 %v1869_v1  ;;  %1738 = vmatprep.subr.mxu1 %v1869_v1 }
  0x6f   : > { %1700 = vmatpush3.msra.mxu0 %v1303_v52  ;;  %1739 = vmatpush3.msra.mxu1 %v1320_v61 }
  0x70   : > { %1701 = vmatprep.subr.mxu0 %v1869_v1  ;;  %1740 = vmatprep.subr.mxu1 %v1869_v1 }
  0x71   : > { %1702 = vmatpush3.msra.mxu0 %v1302_v54  ;;  %1741 = vmatpush3.msra.mxu1 %v1319_v63  ;;  %v1338_v63 = vld [vmem:[%s2494_s1 + $0x348] sm:$0xff] }
  0x72   : > { %1703 = vmatprep.subr.mxu0 %v1869_v1  ;;  %1742 = vmatprep.subr.mxu1 %v1869_v1 }
  0x73   : > { %1704 = vmatpush3.msra.mxu0 %v1301_v56  ;;  %1743 = vmatpush3.msra.mxu1 %v1318_v2  ;;  %v1341_v56 = vld [vmem:[%s2494_s1 + $0x360] sm:$0xff] }
  0x74   : > { %1705 = vmatprep.subr.mxu0 %v1869_v1  ;;  %1744 = vmatprep.subr.mxu1 %v1869_v1 }
  0x75   : > { %1706 = vmatpush3.msra.mxu0 %v1300_v58  ;;  %1745 = vmatpush3.msra.mxu1 %v1317_v3  ;;  %v1339_v58 = vld [vmem:[%s2494_s1 + $0x350] sm:$0xff]  ;;  %v1337_v3 = vld [vmem:[%s2494_s1 + $0x340] sm:$0xff] }
  0x76   : > { %1707 = vmatprep.subr.mxu0 %v1869_v1  ;;  %1746 = vmatprep.subr.mxu1 %v1869_v1 }
  0x77   : > { %1708 = vmatpush3.msra.mxu0 %v1299_v60  ;;  %1747 = vmatpush3.msra.mxu1 %v1316_v4  ;;  %v1360_v60 = vld [vmem:[%s2494_s1 + $0x3f8] sm:$0xff] }
  0x78   : > { %1709 = vmatprep.subr.mxu0 %v1869_v1  ;;  %1748 = vmatprep.subr.mxu1 %v1869_v1 }
  0x79   : > { %1710 = vmatpush3.msra.mxu0 %v1298_v62  ;;  %1749 = vmatpush3.msra.mxu1 %v1315_v5  ;;  %v1358_v5 = vld [vmem:[%s2494_s1 + $0x3e8] sm:$0xff] }
  0x7a   : > { %1711 = vmatprep.subr.mxu0 %v1869_v1  ;;  %1750 = vmatprep.subr.mxu1 %v1869_v1 }
  0x7b   : > { %1712 = vmatpush3.msra.mxu0 %v1297_v0  ;;  %1751 = vmatpush3.msra.mxu1 %v1314_v6  ;;  %v1359_v0 = vld [vmem:[%s2494_s1 + $0x3f0] sm:$0xff] }
  0x7c   : > { %1763 = vmatprep.subr.mxu0 %v1869_v1  ;;  %1752 = vmatprep.subr.mxu1 %v1869_v1 }
  0x7d   : > { %1753 = vmatpush3.msra.mxu1 %v1313_v7  ;;  %v1336_v7 = vld [vmem:[%s2494_s1 + $0x338] sm:$0xff] }
  0x7e   : > { %1804 = vmatprep.subr.mxu1 %v1869_v1 }
  0xcf   : > { %v697_v38 = vpop.permute.xlu0 %696 }
  0xd2   : > { %v707_v4 = vpop.permute.xlu1 %706 }
  0xd3   : > { %v702_v48 = vpop.permute.xlu0 %701 }
  0xec   : > { %v331_v8 = vpop.f32.mrf.mxu0 }
  0xee   : > { %v1551_v9 = vpop.f32.mrf.mxu0 }
  0xef   : > { %v1335_v9 = vld [vmem:[%s2494_s1 + $0x330] sm:$0xff] }
  0xf0   : > { %v434_v10 = vpop.f32.mrf.mxu1 }
  0xf1   : > { %v451_v24 = vadd.f32 %v434_v10, %v331_v8  ;;  %v1357_v8 = vld [vmem:[%s2494_s1 + $0x3e0] sm:$0xff]  ;;  %v1356_v10 = vld [vmem:[%s2494_s1 + $0x3d8] sm:$0xff] }
  0xf2   : > { %v1592_v11 = vpop.f32.mrf.mxu1 }
  0xf3   : > { %v1334_v11 = vld [vmem:[%s2494_s1 + $0x328] sm:$0xff] }
  0xfc   : > { %v336_v12 = vpop.f32.mrf.mxu0 }
  0xfe   : > { %v1554_v13 = vpop.f32.mrf.mxu0 }
  0xff   : > { %v1333_v13 = vld [vmem:[%s2494_s1 + $0x320] sm:$0xff] }
 0x102   : > { %v341_v14 = vpop.f32.mrf.mxu0 }
 0x103   : > { %347 = vst [vmem:[#allocation3 + $0x8] sm:$0xf] %v341_v14  ;;  %v1354_v14 = vld [vmem:[%s2494_s1 + $0x3c8] sm:$0xff] }
 0x104   : > { %v1557_v15 = vpop.f32.mrf.mxu0 }
 0x107   : > { %v439_v16 = vpop.f32.mrf.mxu1 }
 0x108   : > { %v452_v28 = vadd.f32 %v439_v16, %v336_v12  ;;  %v1355_v12 = vld [vmem:[%s2494_s1 + $0x3d0] sm:$0xff] }
 0x109   : > { %v1595_v17 = vpop.f32.mrf.mxu1 }
 0x10a   : > { %v450_v18 = vld [vmem:[#allocation3 + $0x8] sm:$0xf]  ;;  %v1353_v17 = vld [vmem:[%s2494_s1 + $0x3c0] sm:$0xff] }
 0x10c   : > { %v444_v19 = vpop.f32.mrf.mxu1 }
 0x10d   : > { %v453_v20 = vadd.f32 %v450_v18, %v444_v19  ;;  %v1332_v18 = vld [vmem:[%s2494_s1 + $0x318] sm:$0xff] }
 0x10e   : > { %v543_v21 = vpop.f32.mrf.mxu0  ;;  %v1598_v22 = vpop.f32.mrf.mxu1  ;;  %v1352_v19 = vld [vmem:[%s2494_s1 + $0x3b8] sm:$0xff] }
 0x10f   : > { %456 = vst [vmem:[#allocation3 + $0x8] sm:$0xf] %v453_v20  ;;  %v560_v26 = vadd.f32 %v543_v21, %v451_v24  ;;  %v1331_v21 = vld [vmem:[%s2494_s1 + $0x310] sm:$0xff]  ;;  %v1860_v22 = vld [vmem:[#allocation2 + $0x18] sm:$0xff]  ;;  %v1350_v24 = vld [vmem:[%s2494_s1 + $0x3a8] sm:$0xff] }
 0x110   : > { %v1633_v23 = vpop.f32.mrf.mxu0 }
 0x111   : > { %v1351_v23 = vld [vmem:[%s2494_s1 + $0x3b0] sm:$0xff] }
 0x112   : > { %v548_v25 = vpop.f32.mrf.mxu0 }
 0x113   : > { %v561_v34 = vadd.f32 %v548_v25, %v452_v28  ;;  %v1329_v25 = vld [vmem:[%s2494_s1 + $0x300] sm:$0xff] }
 0x114   : > { %v1636_v27 = vpop.f32.mrf.mxu0 }
 0x115   : > { %v1348_v27 = vld [vmem:[%s2494_s1 + $0x398] sm:$0xff] }
 0x116   : > { %v553_v29 = vpop.f32.mrf.mxu0  ;;  %v559_v30 = vld [vmem:[#allocation3 + $0x8] sm:$0xf] }
 0x117   : > { %v562_v31 = vadd.f32 %v559_v30, %v553_v29  ;;  %v652_v32 = vpop.f32.mrf.mxu1  ;;  %v1347_v29 = vld [vmem:[%s2494_s1 + $0x390] sm:$0xff]  ;;  %v1346_v30 = vld [vmem:[%s2494_s1 + $0x388] sm:$0xff] }
 0x118   : > { %v669_v35 = vadd.f32 %v652_v32, %v560_v26  ;;  %v1639_v36 = vpop.f32.mrf.mxu0  ;;  %v1349_v26 = vld [vmem:[%s2494_s1 + $0x3a0] sm:$0xff] }
 0x119   : > { %565 = vst [vmem:[#allocation3 + $0x8] sm:$0xf] %v562_v31  ;;  %v1674_v37 = vpop.f32.mrf.mxu1  ;;  %v1345_v32 = vld [vmem:[%s2494_s1 + $0x380] sm:$0xff]  ;;  %v1038_v36 = vld [vmem:[#allocation2 + $0x16] sm:$0xf] }
 0x11a   : > { %v685_v39 = vadd.f32 %v1296_v33, %v669_v35 }
 0x11b   : > { %v657_v40 = vpop.f32.mrf.mxu1 }
 0x11c   : > { %v670_v41 = vadd.f32 %v657_v40, %v561_v34  ;;  %v688_v42 = vmax.f32 %v685_v39, 0.0 }
 0x11d   : > { %v1677_v43 = vpop.f32.mrf.mxu1 }
 0x11e   : > { %v709_v44 = vmul.f32 %v697_v38, %v688_v42  ;;  %v686_v45 = vadd.f32 %v1296_v33, %v670_v41 }
 0x11f   : > { %v662_v47 = vpop.f32.mrf.mxu1 }
 0x120   : > { %712 = vst [vmem:[#allocation2] sm:$0xff] %v709_v44  ;;  %v668_v49 = vld [vmem:[#allocation3 + $0x8] sm:$0xf]  ;;  %v689_v50 = vmax.f32 %v686_v45, 0.0  ;;  %1714 = vmatmul.mubr.f32.vlgmr.msra.gmra.mxu0 %v709_v44 }
 0x121   : > { %v671_v52 = vadd.f32 %v668_v49, %v662_v47  ;;  %v1680_v53 = vpop.f32.mrf.mxu1  ;;  %1764 = vmatpush3.msra.mxu0 %v1344_v46  ;;  %1716 = vmatprep.mubr.msk.f32.mxu0 %vm1870_vm0, %v1869_v1 }
 0x122   : > { %v710_v54 = vmul.f32 %v702_v48, %v689_v50  ;;  %1765 = vmatprep.subr.mxu0 %v1869_v1 }
 0x123   : > { %674 = vst [vmem:[#allocation3 + $0x8] sm:$0xf] %v671_v52  ;;  %1766 = vmatpush3.msra.mxu0 %v1343_v51 }
 0x124   : > { %713 = vst [vmem:[#allocation2 + $0x8] sm:$0xff] %v710_v54  ;;  %1767 = vmatprep.subr.mxu0 %v1869_v1  ;;  %1717 = vmatmul.mubr.f32.gmra.mxu0 %v710_v54 }
 0x125   : > { %1768 = vmatpush3.msra.mxu0 %v1342_v55  ;;  %1719 = vmatprep.mubr.msk.f32.mxu0 %vm1870_vm0, %v1869_v1 }
 0x126   : > { %1769 = vmatprep.subr.mxu0 %v1869_v1 }
 0x127   : > { %1770 = vmatpush3.msra.mxu0 %v1341_v56 }
 0x128   : > { %1771 = vmatprep.subr.mxu0 %v1869_v1 }
 0x129   : > { %1772 = vmatpush3.msra.mxu0 %v1340_v57 }
 0x12a   : > { %v677_v59 = vld [vmem:[#allocation3 + $0x8] sm:$0xf]  ;;  %1773 = vmatprep.subr.mxu0 %v1869_v1 }
 0x12b   : > { %v687_v61 = vadd.f32 %v1296_v33, %v677_v59  ;;  %v818_v62 = vld [vmem:[#allocation2 + $0x1] sm:$0xff]  ;;  %1774 = vmatpush3.msra.mxu0 %v1339_v58  ;;  %v929_v33 = vld [vmem:[#allocation2 + $0x15] sm:$0xf] }
 0x12c   : > { %1755 = vmatmul.mubr.f32.vlgmr.msra.gmra.mxu1 %v818_v62  ;;  %1775 = vmatprep.subr.mxu0 %v1869_v1  ;;  %v927_v28 = vld [vmem:[#allocation2 + $0x5] sm:$0xff]  ;;  %v1362_v59 = vld [vmem:[%s2495_s2 + $0x1] ss:$0 sm:$0xff] }
 0x12d   : > { %v690_v2 = vmax.f32 %v687_v61, 0.0  ;;  %1805 = vmatpush3.msra.mxu1 %v1360_v60  ;;  %1757 = vmatprep.mubr.msk.f32.mxu1 %vm1870_vm0, %v1869_v1  ;;  %v1036_v34 = vld [vmem:[#allocation2 + $0x6] sm:$0xff] }
 0x12e   : > { %1806 = vmatprep.subr.mxu1 %v1869_v1  ;;  %1776 = vmatpush3.msra.mxu0 %v1338_v63 }
 0x12f   : > { %v711_v6 = vmul.f32 %v707_v4, %v690_v2  ;;  %1807 = vmatpush3.msra.mxu1 %v1359_v0  ;;  %1777 = vmatprep.subr.mxu0 %v1869_v1 }
 0x130   : > { %1808 = vmatprep.subr.mxu1 %v1869_v1  ;;  %1778 = vmatpush3.msra.mxu0 %v1337_v3 }
 0x131   : > { %714 = vst [vmem:[#allocation2 + $0x10] sm:$0xf] %v711_v6  ;;  %1809 = vmatpush3.msra.mxu1 %v1358_v5  ;;  %1779 = vmatprep.subr.mxu0 %v1869_v1 }
 0x132   : > { %1810 = vmatprep.subr.mxu1 %v1869_v1  ;;  %1780 = vmatpush3.msra.mxu0 %v1336_v7 }
 0x133   : > { %1811 = vmatpush3.msra.mxu1 %v1357_v8  ;;  %1781 = vmatprep.subr.mxu0 %v1869_v1  ;;  %v1168_v8 = vpop.permute.xlu1 %1167 }
 0x134   : > { %1812 = vmatprep.subr.mxu1 %v1869_v1  ;;  %1782 = vmatpush3.msra.mxu0 %v1335_v9 }
 0x135   : > { %1813 = vmatpush3.msra.mxu1 %v1356_v10  ;;  %1783 = vmatprep.subr.mxu0 %v1869_v1 }
 0x136   : > { %1814 = vmatprep.subr.mxu1 %v1869_v1  ;;  %1784 = vmatpush3.msra.mxu0 %v1334_v11 }
 0x137   : > { %1815 = vmatpush3.msra.mxu1 %v1355_v12  ;;  %1785 = vmatprep.subr.mxu0 %v1869_v1 }
 0x138   : > { %v717_v15 = vld [vmem:[#allocation2 + $0x10] sm:$0xf]  ;;  %1816 = vmatprep.subr.mxu1 %v1869_v1  ;;  %1786 = vmatpush3.msra.mxu0 %v1333_v13 }
 0x139   : > { %v819_v16 = vld [vmem:[#allocation2 + $0x9] sm:$0xff]  ;;  %1720 = vmatmul.mubr.f32.gmra.mxu0 %v717_v15  ;;  %1817 = vmatpush3.msra.mxu1 %v1354_v14  ;;  %v820_v20 = vld [vmem:[#allocation2 + $0x11] sm:$0xf]  ;;  %v1173_v14 = vpop.permute.xlu0 %1172 }
 0x13a   : > { %1758 = vmatmul.mubr.f32.gmra.mxu1 %v819_v16  ;;  %1818 = vmatprep.subr.mxu1 %v1869_v1  ;;  %v928_v31 = vld [vmem:[#allocation2 + $0xd] sm:$0xff] }
 0x13b   : > { %1760 = vmatprep.mubr.msk.f32.mxu1 %vm1870_vm0, %v1869_v1  ;;  %1787 = vmatprep.subr.mxu0 %v1869_v1  ;;  %v1330_v1 = vld [vmem:[%s2494_s1 + $0x308] sm:$0xff] }
 0x13c   : > { %1819 = vmatpush3.msra.mxu1 %v1353_v17  ;;  %1788 = vmatpush3.msra.mxu0 %v1332_v18  ;;  %v1037_v35 = vld [vmem:[#allocation2 + $0xe] sm:$0xff] }
 0x13d   : > { %1820 = vmatprep.subr.mxu1 %v1860_v22  ;;  %1789 = vmatprep.subr.mxu0 %v1860_v22 }
 0x13e   : > { %1761 = vmatmul.mubr.f32.gmra.mxu1 %v820_v20  ;;  %1790 = vmatpush3.msra.mxu0 %v1331_v21 }
 0x13f   : > { %1821 = vmatpush3.msra.mxu1 %v1352_v19  ;;  %1791 = vmatprep.subr.mxu0 %v1860_v22 }
 0x140   : > { %1822 = vmatprep.subr.mxu1 %v1860_v22  ;;  %1792 = vmatpush3.msra.mxu0 %v1330_v1 }
 0x141   : > { %1823 = vmatpush3.msra.mxu1 %v1351_v23  ;;  %1793 = vmatprep.subr.mxu0 %v1860_v22 }
 0x142   : > { %1824 = vmatprep.subr.mxu1 %v1860_v22  ;;  %1794 = vmatpush3.msra.mxu0 %v1329_v25 }
 0x143   : > { %1825 = vmatpush3.msra.mxu1 %v1350_v24  ;;  %1795 = vmatprep.mubr.msk.f32.mxu0 %vm1870_vm0, %v1860_v22 }
 0x144   : > { %1826 = vmatprep.subr.mxu1 %v1860_v22  ;;  %1796 = vmatmul.mubr.f32.vlgmr.msra.gmra.mxu0 %v927_v28 }
 0x145   : > { %1827 = vmatpush3.msra.mxu1 %v1349_v26  ;;  %1798 = vmatprep.mubr.msk.f32.mxu0 %vm1870_vm0, %v1860_v22 }
 0x146   : > { %1828 = vmatprep.subr.mxu1 %v1860_v22  ;;  %1836 = vmatprep.mubr.msk.f32.mxu1 %vm1870_vm0, %v1860_v22 }
 0x147   : > { %1829 = vmatpush3.msra.mxu1 %v1348_v27 }
 0x148   : > { %1830 = vmatprep.subr.mxu1 %v1860_v22  ;;  %1799 = vmatmul.mubr.f32.gmra.mxu0 %v928_v31 }
 0x149   : > { %1831 = vmatpush3.msra.mxu1 %v1347_v29  ;;  %1801 = vmatprep.mubr.msk.f32.mxu0 %vm1870_vm0, %v1860_v22 }
 0x14a   : > { %1832 = vmatprep.subr.mxu1 %v1860_v22 }
 0x14b   : > { %1833 = vmatpush3.msra.mxu1 %v1346_v30 }
 0x14c   : > { %1834 = vmatprep.subr.mxu1 %v1860_v22  ;;  %1802 = vmatmul.mubr.f32.gmra.mxu0 %v929_v33 }
 0x14d   : > { %1835 = vmatpush3.msra.mxu1 %v1345_v32 }
 0x14e   : > { %1837 = vmatmul.mubr.f32.vlgmr.msra.gmra.mxu1 %v1036_v34 }
 0x14f   : > { %1839 = vmatprep.mubr.msk.f32.mxu1 %vm1870_vm0, %v1860_v22 }
 0x152   : > { %1840 = vmatmul.mubr.f32.gmra.mxu1 %v1037_v35 }
 0x153   : > { %1842 = vmatprep.mubr.msk.f32.mxu1 %vm1870_vm0, %v1860_v22  ;;  %v1178_v22 = vpop.permute.xlu1 %1177 }
 0x156   : > { %1843 = vmatmul.mubr.f32.gmra.mxu1 %v1038_v36 }
 0x1e0   : > { %v801_v37 = vpop.f32.mrf.mxu0 }
 0x1e2   : > { %v1715_v38 = vpop.f32.mrf.mxu0 }
 0x1e4   : > { %v806_v39 = vpop.f32.mrf.mxu0 }
 0x1e6   : > { %v1718_v40 = vpop.f32.mrf.mxu0 }
 0x1ec   : > { %v904_v41 = vpop.f32.mrf.mxu1 }
 0x1ed   : > { %v921_v54 = vadd.f32 %v904_v41, %v801_v37 }
 0x1ee   : > { %v1756_v42 = vpop.f32.mrf.mxu1 }
 0x1f9   : > { %v811_v43 = vpop.f32.mrf.mxu0 }
 0x1fa   : > { %v909_v44 = vpop.f32.mrf.mxu1  ;;  %817 = vst [vmem:[#allocation3 + $0x8] sm:$0xf] %v811_v43 }
 0x1fb   : > { %v1721_v46 = vpop.f32.mrf.mxu0  ;;  %v922_v61 = vadd.f32 %v909_v44, %v806_v39 }
 0x1fc   : > { %v1759_v45 = vpop.f32.mrf.mxu1 }
 0x1fe   : > { %v914_v47 = vpop.f32.mrf.mxu1 }
 0x200   : > { %v1762_v48 = vpop.f32.mrf.mxu1 }
 0x201   : > { %v920_v49 = vld [vmem:[#allocation3 + $0x8] sm:$0xf] }
 0x202   : > { %v923_v50 = vadd.f32 %v920_v49, %v914_v47 }
 0x204   : > { %926 = vst [vmem:[#allocation3 + $0x8] sm:$0xf] %v923_v50  ;;  %v1013_v51 = vpop.f32.mrf.mxu0 }
 0x205   : > { %v1030_v57 = vadd.f32 %v1013_v51, %v921_v54 }
 0x206   : > { %v1797_v52 = vpop.f32.mrf.mxu0 }
 0x208   : > { %v1018_v53 = vpop.f32.mrf.mxu0 }
 0x209   : > { %v1031_v3 = vadd.f32 %v1018_v53, %v922_v61 }
 0x20a   : > { %v1800_v55 = vpop.f32.mrf.mxu0 }
 0x20b   : > { %v1029_v56 = vld [vmem:[#allocation3 + $0x8] sm:$0xf] }
 0x20c   : > { %v1023_v60 = vpop.f32.mrf.mxu0 }
 0x20d   : > { %v1032_v63 = vadd.f32 %v1029_v56, %v1023_v60 }
 0x20e   : > { %v1122_v58 = vpop.f32.mrf.mxu1  ;;  %v1803_v2 = vpop.f32.mrf.mxu0 }
 0x20f   : > { %v1139_v62 = vadd.f32 %v1122_v58, %v1030_v57  ;;  %1035 = vst [vmem:[#allocation3 + $0x8] sm:$0xf] %v1032_v63 }
 0x210   : > { %v1838_v0 = vpop.f32.mrf.mxu1 }
 0x211   : > { %v1156_v4 = vadd.f32 %v1362_v59, %v1139_v62 }
 0x212   : > { %v1127_v5 = vpop.f32.mrf.mxu1 }
 0x213   : > { %v1159_v6 = vmax.f32 %v1156_v4, 0.0  ;;  %v1140_v7 = vadd.f32 %v1127_v5, %v1031_v3 }
 0x214   : > { %v1841_v9 = vpop.f32.mrf.mxu1 }
 0x215   : > { %v1180_v10 = vmul.f32 %v1168_v8, %v1159_v6  ;;  %v1157_v11 = vadd.f32 %v1362_v59, %v1140_v7 }
 0x216   : > { %v1132_v12 = vpop.f32.mrf.mxu1  ;;  %v1138_v15 = vld [vmem:[#allocation3 + $0x8] sm:$0xf] }
 0x217   : > { %1183 = vst [vmem:[%s197_s28] sm:$0xff] %v1180_v10  ;;  %v1160_v13 = vmax.f32 %v1157_v11, 0.0  ;;  %v1141_v18 = vadd.f32 %v1138_v15, %v1132_v12 }
 0x218   : > { %v1844_v16 = vpop.f32.mrf.mxu1 }
 0x219   : > { %v1181_v17 = vmul.f32 %v1173_v14, %v1160_v13  ;;  %1144 = vst [vmem:[#allocation3 + $0x8] sm:$0xf] %v1141_v18 }
 0x21b   : > { %1184 = vst [vmem:[%s197_s28 + $0x8] sm:$0xff] %v1181_v17 }
 0x220   : > { %v1147_v19 = vld [vmem:[#allocation3 + $0x8] sm:$0xf] }
 0x221   : > { %v1158_v20 = vadd.f32 %v1362_v59, %v1147_v19 }
 0x223   : > { %v1161_v21 = vmax.f32 %v1158_v20, 0.0 }
 0x225   : > { %v1182_v23 = vmul.f32 %v1178_v22, %v1161_v21 }
 0x227   : > { %1185 = vst [vmem:[%s197_s28 + $0x10] sm:$0xf] %v1182_v23 }
 0x228 PF: > { %s14_s15 = sadd.s32 1, %s1867_s15  }
 0x229   : > { %p11_p4 = scmp.ge.s32.totalorder %s14_s15, 4  }
 0x22b   :  { %13 = sbr.rel (!%p11_p4) target bundleno = 1 (0x1), region = 74 }

// kernel: encoder_forward.3
= control target key start
LH: loop header
LB: loop body
LE: loop exit
PB: predicated region body
PF: predicated region fallthrough
CT: control target
= control target key end

     0   :  { %s5324_s15 = smov 0   ;;  %s6902_s0 = inlined_call_operand.vmem [shape: f32[2,272,128], index: 0, kind: input, shape index: {}]   ;;  %s6903_s1 = inlined_call_operand.vmem [shape: f32[2,4,128,128], index: 1, kind: input, shape index: {}]   ;;  %s6904_s2 = inlined_call_operand.vmem [shape: f32[2,1,128], index: 2, kind: input, shape index: {}]   ;;  %s6905_s3 = inlined_call_operand.vmem [shape: f32[272,1], index: 3, kind: input, shape index: {}]   ;;  %s6906_s4 = inlined_call_operand.vmem [shape: f32[2,272,128], index: 4, kind: output, shape index: {}]  }
   0x1 LB: > { %s4088_s16 = sadd.s32 4294967295, %s5295_s15   ;;  %p4092_p0 = scmp.ge.s32.totalorder %s5295_s15, 1  ;;  %s5295_s15 = sphi %s5324_s15, %s14_s15  }
   0x2   : > { %p162_p1 = scmp.lt.s32.totalorder %s5295_s15, 3 }
   0x4   : > { %p163_p2 = pnand %p4092_p0, %p162_p1 }
   0x6   : > { %166 = sbr.rel (%p163_p2) target bundleno = 680 (0x2a8), region = 36 }
   0xb   : > { %v352_v0 = vld [vmem:[%s6903_s1 + $0x78] sm:$0xff]  ;;  %v351_v2 = vld [vmem:[%s6903_s1 + $0x70] sm:$0xff]  ;;  %p188_p3 = scmp.lt.s32.totalorder %s4088_s16, 1  ;;  %v5297_v4 = vmov 0.0   ;;  %v350_v5 = vld [vmem:[%s6903_s1 + $0x68] sm:$0xff] }
   0xc   : > { %v4110_v1 = vld [vmem:[%s6903_s1 + $0xf8] sm:$0xff]  ;;  %4612 = vmatprep.subr.mxu0 %v352_v0  ;;  %v4109_v3 = vld [vmem:[%s6903_s1 + $0xf0] sm:$0xff]  ;;  %232 = vst [vmem:[#allocation2 + $0x110] sm:$0xff] %v5297_v4  ;;  %233 = vst [vmem:[#allocation2 + $0x118] sm:$0xff] %v5297_v4 }
   0xd   : > { %4695 = vmatprep.subr.mxu1 %v4110_v1  ;;  %234 = vst [vmem:[#allocation2 + $0x120] sm:$0xff] %v5297_v4  ;;  %4613 = vmatpush3.msra.mxu0 %v352_v0  ;;  %v4108_v6 = vld [vmem:[%s6903_s1 + $0xe8] sm:$0xff]  ;;  %s6938_s16 = smov (!%p188_p3, %s4088_s16), 1  ;;  %v349_v7 = vld [vmem:[%s6903_s1 + $0x60] sm:$0xff]  ;;  %v348_v9 = vld [vmem:[%s6903_s1 + $0x58] sm:$0xff] }
   0xe   : > { %4696 = vmatpush3.msra.mxu1 %v4110_v1  ;;  %4614 = vmatprep.subr.mxu0 %v351_v2  ;;  %v4107_v8 = vld [vmem:[%s6903_s1 + $0xe0] sm:$0xff]  ;;  %s5276_s7 = smul.u32 272, %s6938_s16  ;;  %v4106_v10 = vld [vmem:[%s6903_s1 + $0xd8] sm:$0xff]  ;;  %v347_v11 = vld [vmem:[%s6903_s1 + $0x50] sm:$0xff] }
   0xf   : > { %4697 = vmatprep.subr.mxu1 %v4109_v3  ;;  %4615 = vmatpush3.msra.mxu0 %v351_v2  ;;  %v4105_v12 = vld [vmem:[%s6903_s1 + $0xd0] sm:$0xff]  ;;  %v346_v13 = vld [vmem:[%s6903_s1 + $0x48] sm:$0xff]  ;;  %v345_v16 = vld [vmem:[%s6903_s1 + $0x40] sm:$0xff] }
  0x10   : > { %4698 = vmatpush3.msra.mxu1 %v4109_v3  ;;  %4616 = vmatprep.subr.mxu0 %v350_v5  ;;  %s5370_s14 = scalar_lea.vmem %s6902_s0, %s5276_s7  ;;  %v4104_v14 = vld [vmem:[%s6903_s1 + $0xc8] sm:$0xff]  ;;  %v4103_v19 = vld [vmem:[%s6903_s1 + $0xc0] sm:$0xff]  ;;  %v344_v22 = vld [vmem:[%s6903_s1 + $0x38] sm:$0xff]  ;;  %s6762_s30 = scalar_lea.vmem %s6906_s4, %s5276_s7 }
  0x11   : > { %4699 = vmatprep.subr.mxu1 %v4108_v6  ;;  %4617 = vmatpush3.msra.mxu0 %v350_v5  ;;  %v5385_v15 = vld [vmem:[%s5370_s14] sm:$0xff]  ;;  %v5392_v17 = vld [vmem:[%s5370_s14 + $0x8] sm:$0xff]  ;;  %v5395_v18 = vld [vmem:[%s5370_s14 + $0x10] sm:$0xff] }
  0x12   : > { %4700 = vmatpush3.msra.mxu1 %v4108_v6  ;;  %4618 = vmatprep.subr.mxu0 %v349_v7  ;;  %269 = vst [vmem:[#allocation2] sm:$0xff] %v5385_v15  ;;  %270 = vst [vmem:[#allocation2 + $0x8] sm:$0xff] %v5392_v17  ;;  %v5403_v20 = vld [vmem:[%s5370_s14 + $0x18] sm:$0xff]  ;;  %v5406_v21 = vld [vmem:[%s5370_s14 + $0x20] sm:$0xff] }
  0x13   : > { %4701 = vmatprep.subr.mxu1 %v4107_v8  ;;  %4619 = vmatpush3.msra.mxu0 %v349_v7  ;;  %271 = vst [vmem:[#allocation2 + $0x10] sm:$0xff] %v5395_v18  ;;  %272 = vst [vmem:[#allocation2 + $0x18] sm:$0xff] %v5403_v20  ;;  %v5414_v23 = vld [vmem:[%s5370_s14 + $0x28] sm:$0xff]  ;;  %v4102_v24 = vld [vmem:[%s6903_s1 + $0xb8] sm:$0xff] }
  0x14   : > { %4702 = vmatpush3.msra.mxu1 %v4107_v8  ;;  %4620 = vmatprep.subr.mxu0 %v348_v9  ;;  %273 = vst [vmem:[#allocation2 + $0x20] sm:$0xff] %v5406_v21  ;;  %274 = vst [vmem:[#allocation2 + $0x28] sm:$0xff] %v5414_v23  ;;  %v5421_v25 = vld [vmem:[%s5370_s14 + $0x30] sm:$0xff]  ;;  %v5424_v26 = vld [vmem:[%s5370_s14 + $0x38] sm:$0xff] }
  0x15   : > { %4703 = vmatprep.subr.mxu1 %v4106_v10  ;;  %4621 = vmatpush3.msra.mxu0 %v348_v9  ;;  %275 = vst [vmem:[#allocation2 + $0x30] sm:$0xff] %v5421_v25  ;;  %276 = vst [vmem:[#allocation2 + $0x38] sm:$0xff] %v5424_v26  ;;  %v5429_v27 = vld [vmem:[%s5370_s14 + $0x40] sm:$0xff]  ;;  %v343_v28 = vld [vmem:[%s6903_s1 + $0x30] sm:$0xff] }
  0x16   : > { %4704 = vmatpush3.msra.mxu1 %v4106_v10  ;;  %4622 = vmatprep.subr.mxu0 %v347_v11  ;;  %v4101_v29 = vld [vmem:[%s6903_s1 + $0xb0] sm:$0xff]  ;;  %277 = vst [vmem:[#allocation2 + $0x40] sm:$0xff] %v5429_v27  ;;  %v5439_v30 = vld [vmem:[%s5370_s14 + $0x48] sm:$0xff]  ;;  %v5453_v34 = vld [vmem:[%s5370_s14 + $0x58] sm:$0xff] }
  0x17   : > { %4705 = vmatprep.subr.mxu1 %v4105_v12  ;;  %4623 = vmatpush3.msra.mxu0 %v347_v11  ;;  %278 = vst [vmem:[#allocation2 + $0x48] sm:$0xff] %v5439_v30  ;;  %v5443_v31 = vld [vmem:[%s5370_s14 + $0x50] sm:$0xff]  ;;  %v342_v32 = vld [vmem:[%s6903_s1 + $0x28] sm:$0xff]  ;;  %280 = vst [vmem:[#allocation2 + $0x58] sm:$0xff] %v5453_v34 }
  0x18   : > { %4706 = vmatpush3.msra.mxu1 %v4105_v12  ;;  %4624 = vmatprep.subr.mxu0 %v346_v13  ;;  %v4100_v33 = vld [vmem:[%s6903_s1 + $0xa8] sm:$0xff]  ;;  %279 = vst [vmem:[#allocation2 + $0x50] sm:$0xff] %v5443_v31  ;;  %v5457_v35 = vld [vmem:[%s5370_s14 + $0x60] sm:$0xff]  ;;  %v340_v38 = vld [vmem:[%s6903_s1 + $0x18] sm:$0xff] }
  0x19   : > { %4707 = vmatprep.subr.mxu1 %v4104_v14  ;;  %4625 = vmatpush3.msra.mxu0 %v346_v13  ;;  %v341_v36 = vld [vmem:[%s6903_s1 + $0x20] sm:$0xff]  ;;  %281 = vst [vmem:[#allocation2 + $0x60] sm:$0xff] %v5457_v35  ;;  %v4098_v39 = vld [vmem:[%s6903_s1 + $0x98] sm:$0xff]  ;;  %v5473_v40 = vld [vmem:[%s5370_s14 + $0x68] sm:$0xff] }
  0x1a   : > { %4708 = vmatpush3.msra.mxu1 %v4104_v14  ;;  %4626 = vmatprep.subr.mxu0 %v345_v16  ;;  %v4099_v37 = vld [vmem:[%s6903_s1 + $0xa0] sm:$0xff]  ;;  %282 = vst [vmem:[#allocation2 + $0x68] sm:$0xff] %v5473_v40  ;;  %v5477_v41 = vld [vmem:[%s5370_s14 + $0x70] sm:$0xff]  ;;  %v5487_v44 = vld [vmem:[%s5370_s14 + $0x78] sm:$0xff] }
  0x1b   : > { %4709 = vmatprep.subr.mxu1 %v4103_v19  ;;  %4627 = vmatpush3.msra.mxu0 %v345_v16  ;;  %v339_v42 = vld [vmem:[%s6903_s1 + $0x10] sm:$0xff]  ;;  %283 = vst [vmem:[#allocation2 + $0x70] sm:$0xff] %v5477_v41  ;;  %v338_v45 = vld [vmem:[%s6903_s1 + $0x8] sm:$0xff]  ;;  %284 = vst [vmem:[#allocation2 + $0x78] sm:$0xff] %v5487_v44 }
  0x1c   : > { %4710 = vmatpush3.msra.mxu1 %v4103_v19  ;;  %4628 = vmatprep.subr.mxu0 %v344_v22  ;;  %v4097_v43 = vld [vmem:[%s6903_s1 + $0x90] sm:$0xff]  ;;  %v4096_v46 = vld [vmem:[%s6903_s1 + $0x88] sm:$0xff]  ;;  %v5497_v47 = vld [vmem:[%s5370_s14 + $0x80] sm:$0xff] }
  0x1d   : > { %4711 = vmatprep.subr.mxu1 %v4102_v24  ;;  %4629 = vmatpush3.msra.mxu0 %v344_v22  ;;  %v337_v48 = vld [vmem:[%s6903_s1] sm:$0xff]  ;;  %285 = vst [vmem:[#allocation2 + $0x80] sm:$0xff] %v5497_v47  ;;  %v5507_v50 = vld [vmem:[%s5370_s14 + $0x88] sm:$0xff]  ;;  %v5510_v51 = vld [vmem:[%s5370_s14 + $0x90] sm:$0xff] }
  0x1e   : > { %4712 = vmatpush3.msra.mxu1 %v4102_v24  ;;  %4630 = vmatprep.subr.mxu0 %v343_v28  ;;  %v4095_v49 = vld [vmem:[%s6903_s1 + $0x80] sm:$0xff]  ;;  %286 = vst [vmem:[#allocation2 + $0x88] sm:$0xff] %v5507_v50  ;;  %287 = vst [vmem:[#allocation2 + $0x90] sm:$0xff] %v5510_v51  ;;  %v5515_v53 = vld [vmem:[%s5370_s14 + $0x98] sm:$0xff] }
  0x1f   : > { %4713 = vmatprep.subr.mxu1 %v4101_v29  ;;  %4631 = vmatpush3.msra.mxu0 %v343_v28  ;;  %v622_v52 = vld [vmem:[#allocation2 + $0x1] sm:$0xff]  ;;  %v623_v54 = vld [vmem:[#allocation2 + $0x9] sm:$0xff]  ;;  %288 = vst [vmem:[#allocation2 + $0x98] sm:$0xff] %v5515_v53  ;;  %v4126_v56 = vld [vmem:[%s6903_s1 + $0x178] sm:$0xff] }
  0x20   : > { %4714 = vmatpush3.msra.mxu1 %v4101_v29  ;;  %4632 = vmatprep.subr.mxu0 %v342_v32  ;;  %v5519_v55 = vld [vmem:[%s5370_s14 + $0xa0] sm:$0xff]  ;;  %v4142_v57 = vld [vmem:[%s6903_s1 + $0x1f8] sm:$0xff]  ;;  %v5530_v58 = vld [vmem:[%s5370_s14 + $0xa8] sm:$0xff] }
  0x21   : > { %4715 = vmatprep.subr.mxu1 %v4100_v33  ;;  %4633 = vmatpush3.msra.mxu0 %v342_v32  ;;  %289 = vst [vmem:[#allocation2 + $0xa0] sm:$0xff] %v5519_v55  ;;  %290 = vst [vmem:[#allocation2 + $0xa8] sm:$0xff] %v5530_v58  ;;  %v5534_v59 = vld [vmem:[%s5370_s14 + $0xb0] sm:$0xff]  ;;  %v5540_v61 = vld [vmem:[#allocation2 + $0x19] sm:$0xff] }
  0x22   : > { %4716 = vmatpush3.msra.mxu1 %v4100_v33  ;;  %4634 = vmatprep.subr.mxu0 %v341_v36  ;;  %v5537_v60 = vld [vmem:[#allocation2 + $0x11] sm:$0xff]  ;;  %291 = vst [vmem:[#allocation2 + $0xb0] sm:$0xff] %v5534_v59  ;;  %v5551_v0 = vld [vmem:[%s5370_s14 + $0xc0] sm:$0xff]  ;;  %v4124_v3 = vld [vmem:[%s6903_s1 + $0x168] sm:$0xff] }
  0x23   : > { %4717 = vmatprep.subr.mxu1 %v4099_v37  ;;  %4635 = vmatpush3.msra.mxu0 %v341_v36  ;;  %v5543_v62 = vld [vmem:[%s5370_s14 + $0xb8] sm:$0xff]  ;;  %v4125_v63 = vld [vmem:[%s6903_s1 + $0x170] sm:$0xff]  ;;  %v5554_v1 = vld [vmem:[#allocation2 + $0x21] sm:$0xff]  ;;  %293 = vst [vmem:[#allocation2 + $0xc0] sm:$0xff] %v5551_v0 }
  0x24   : > { %4718 = vmatpush3.msra.mxu1 %v4099_v37  ;;  %4636 = vmatprep.subr.mxu0 %v340_v38  ;;  %292 = vst [vmem:[#allocation2 + $0xb8] sm:$0xff] %v5543_v62  ;;  %v4141_v2 = vld [vmem:[%s6903_s1 + $0x1f0] sm:$0xff]  ;;  %v5566_v4 = vld [vmem:[%s5370_s14 + $0xc8] sm:$0xff]  ;;  %v5580_v8 = vld [vmem:[%s5370_s14 + $0xd8] sm:$0xff] }
  0x25   : > { %4719 = vmatprep.subr.mxu1 %v4098_v39  ;;  %4637 = vmatpush3.msra.mxu0 %v340_v38  ;;  %v5569_v5 = vld [vmem:[#allocation2 + $0x29] sm:$0xff]  ;;  %294 = vst [vmem:[#allocation2 + $0xc8] sm:$0xff] %v5566_v4  ;;  %v5577_v7 = vld [vmem:[#allocation2 + $0x31] sm:$0xff]  ;;  %296 = vst [vmem:[#allocation2 + $0xd8] sm:$0xff] %v5580_v8 }
  0x26   : > { %4720 = vmatpush3.msra.mxu1 %v4098_v39  ;;  %4638 = vmatprep.subr.mxu0 %v339_v42  ;;  %v5573_v6 = vld [vmem:[%s5370_s14 + $0xd0] sm:$0xff]  ;;  %v4140_v9 = vld [vmem:[%s6903_s1 + $0x1e8] sm:$0xff]  ;;  %v5589_v10 = vld [vmem:[%s5370_s14 + $0xe0] sm:$0xff] }
  0x27   : > { %4721 = vmatprep.subr.mxu1 %v4097_v43  ;;  %4639 = vmatpush3.msra.mxu0 %v339_v42  ;;  %295 = vst [vmem:[#allocation2 + $0xd0] sm:$0xff] %v5573_v6  ;;  %v5591_v11 = vld [vmem:[#allocation2 + $0x39] sm:$0xff]  ;;  %297 = vst [vmem:[#allocation2 + $0xe0] sm:$0xff] %v5589_v10  ;;  %v5595_v12 = vld [vmem:[%s5370_s14 + $0xe8] sm:$0xff] }
  0x28   : > { %4722 = vmatpush3.msra.mxu1 %v4097_v43  ;;  %4640 = vmatprep.subr.mxu0 %v338_v45  ;;  %v4123_v13 = vld [vmem:[%s6903_s1 + $0x160] sm:$0xff]  ;;  %298 = vst [vmem:[#allocation2 + $0xe8] sm:$0xff] %v5595_v12  ;;  %v5604_v14 = vld [vmem:[%s5370_s14 + $0xf0] sm:$0xff]  ;;  %v5631_v22 = vld [vmem:[%s5370_s14 + $0x108] sm:$0xff] }
  0x29   : > { %4723 = vmatprep.subr.mxu1 %v4096_v46  ;;  %4641 = vmatpush3.msra.mxu0 %v338_v45  ;;  %v5609_v16 = vld [vmem:[%s6905_s3] sm:$0xff]  ;;  %299 = vst [vmem:[#allocation2 + $0xf0] sm:$0xff] %v5604_v14  ;;  %302 = vst [vmem:[#allocation2 + $0x108] sm:$0xff] %v5631_v22  ;;  %v5643_v24 = vld [vmem:[%s6905_s3 + $0x10] sm:$0xff] }
  0x2a   : > { %4724 = vmatpush3.msra.mxu1 %v4096_v46  ;;  %4642 = vmatprep.subr.mxu0 %v337_v48  ;;  %v5620_v19 = vld [vmem:[%s5370_s14 + $0x100] sm:$0xff]  ;;  %v5664_v29 = vld [vmem:[%s6905_s3 + $0x18] sm:$0xff]  ;;  %v4121_v32 = vld [vmem:[%s6903_s1 + $0x150] sm:$0xff] }
  0x2b   : > { %4725 = vmatprep.subr.mxu1 %v4095_v49  ;;  %4643 = vmatpush3.msra.mxu0 %v337_v48  ;;  %301 = vst [vmem:[#allocation2 + $0x100] sm:$0xff] %v5620_v19  ;;  %v5658_v28 = vld [vmem:[#allocation2 + $0x59] sm:$0xff]  ;;  %v5680_v33 = vld [vmem:[#allocation2 + $0x69] sm:$0xff] }
  0x2c   : > { %4644 = vmatprep.mubr.f32.mxu0 %v5385_v15  ;;  %4726 = vmatpush3.msra.mxu1 %v4095_v49  ;;  %v5298_v15 = vmov 0   ;;  %v4137_v36 = vld [vmem:[%s6903_s1 + $0x1d0] sm:$0xff]  ;;  %v4120_v38 = vld [vmem:[%s6903_s1 + $0x148] sm:$0xff]  ;;  %v5706_v39 = vld [vmem:[#allocation2 + $0x79] sm:$0xff] }
  0x2d   : > { %4727 = vmatprep.mubr.f32.mxu1 %v622_v52  ;;  %4645 = vmatmul.mubr.f32.vlgmr.msra.gmra.mxu0 %v5392_v17  ;;  %v5614_v17 = vld [vmem:[#allocation2 + $0x41] sm:$0xff]  ;;  %v5697_v37 = vld [vmem:[%s6905_s3 + $0x30] sm:$0xff]  ;;  %v4118_v52 = vld [vmem:[%s6903_s1 + $0x138] sm:$0xff] }
  0x2e   : > { %4728 = vmatmul.mubr.f32.vlgmr.msra.gmra.mxu1 %v623_v54  ;;  %4778 = vmatprep.subr.mxu0 %v4126_v56  ;;  %v4136_v42 = vld [vmem:[%s6903_s1 + $0x1c8] sm:$0xff]  ;;  %v5723_v43 = vld [vmem:[%s6905_s3 + $0x40] sm:$0xff]  ;;  %v5749_v49 = vld [vmem:[%s6905_s3 + $0x50] sm:$0xff] }
  0x2f   : > { %4861 = vmatprep.subr.mxu1 %v4142_v57  ;;  %4779 = vmatpush3.msra.mxu0 %v4126_v56  ;;  %v4119_v45 = vld [vmem:[%s6903_s1 + $0x140] sm:$0xff]  ;;  %v5732_v46 = vld [vmem:[#allocation2 + $0x89] sm:$0xff]  ;;  %v4134_v56 = vld [vmem:[%s6903_s1 + $0x1b8] sm:$0xff] }
  0x30   : > { %4647 = vmatprep.mubr.f32.mxu0 %v5395_v18  ;;  %4730 = vmatprep.mubr.f32.mxu1 %v5537_v60  ;;  %v5617_v18 = vld [vmem:[%s5370_s14 + $0xf8] sm:$0xff]  ;;  %v4135_v48 = vld [vmem:[%s6903_s1 + $0x1c0] sm:$0xff] }
  0x31   : > { %4862 = vmatpush3.msra.mxu1 %v4142_v57  ;;  %4648 = vmatmul.mubr.f32.gmra.mxu0 %v5403_v20  ;;  %v4139_v20 = vld [vmem:[%s6903_s1 + $0x1e0] sm:$0xff]  ;;  %300 = vst [vmem:[#allocation2 + $0xf8] sm:$0xff] %v5617_v18 }
  0x32   : > { %4731 = vmatmul.mubr.f32.gmra.mxu1 %v5540_v61  ;;  %4780 = vmatprep.subr.mxu0 %v4125_v63  ;;  %v5758_v54 = vld [vmem:[#allocation2 + $0x99] sm:$0xff] }
  0x33   : > { %4650 = vmatprep.mubr.f32.mxu0 %v5406_v21  ;;  %4781 = vmatpush3.msra.mxu0 %v4125_v63  ;;  %v5628_v21 = vld [vmem:[#allocation2 + $0x49] sm:$0xff]  ;;  %v5775_v57 = vld [vmem:[%s6905_s3 + $0x60] sm:$0xff] }
  0x34   : > { %4733 = vmatprep.mubr.f32.mxu1 %v5554_v1  ;;  %4863 = vmatprep.subr.mxu1 %v4141_v2  ;;  %v5778_v63 = vld [vmem:[#allocation2 + $0xa1] sm:$0xff] }
  0x35   : > { %4782 = vmatprep.subr.mxu0 %v4124_v3  ;;  %4651 = vmatmul.mubr.f32.gmra.mxu0 %v5414_v23  ;;  %v4122_v23 = vld [vmem:[%s6903_s1 + $0x158] sm:$0xff] }
  0x36   : > { %4734 = vmatmul.mubr.f32.gmra.mxu1 %v5569_v5  ;;  %4783 = vmatpush3.msra.mxu0 %v4124_v3  ;;  %v5795_v3 = vld [vmem:[%s6905_s3 + $0x68] sm:$0xff] }
  0x37   : > { %4864 = vmatpush3.msra.mxu1 %v4141_v2  ;;  %4653 = vmatprep.mubr.f32.mxu0 %v5421_v25  ;;  %v5648_v25 = vld [vmem:[%s6905_s3 + $0x8] sm:$0xff] }
  0x38   : > { %4736 = vmatprep.mubr.f32.mxu1 %v5577_v7  ;;  %4865 = vmatprep.subr.mxu1 %v4140_v9  ;;  %v5784_v2 = vld [vmem:[#allocation2 + $0xa9] sm:$0xff] }
  0x39   : > { %5287 = vset.pattern.permute.xlu0 %v5298_v15  ;;  %4654 = vmatmul.mubr.f32.gmra.mxu0 %v5424_v26  ;;  %v5651_v26 = vld [vmem:[#allocation2 + $0x51] sm:$0xff] }
  0x3a   : > { %4737 = vmatmul.mubr.f32.gmra.mxu1 %v5591_v11  ;;  %4784 = vmatprep.subr.mxu0 %v4123_v13 }
  0x3b   : > { %4866 = vmatpush3.msra.mxu1 %v4140_v9  ;;  %1931 = vperm.xlu0 %5287, %v5609_v16   ;;  %v5800_v9 = vld [vmem:[%s6905_s3 + $0x70] sm:$0xff] }
  0x3c   : > { %4785 = vmatpush3.msra.mxu0 %v4123_v13  ;;  %4656 = vmatprep.mubr.f32.mxu0 %v5429_v27  ;;  %v4138_v27 = vld [vmem:[%s6903_s1 + $0x1d8] sm:$0xff]  ;;  %v4116_v13 = vld [vmem:[%s6903_s1 + $0x128] sm:$0xff] }
  0x3d   : > { %4739 = vmatprep.mubr.f32.mxu1 %v5614_v17  ;;  %4867 = vmatprep.subr.mxu1 %v4139_v20 }
  0x3e   : > { %4657 = vmatmul.mubr.f32.gmra.mxu0 %v5439_v30  ;;  %4740 = vmatmul.mubr.f32.gmra.mxu1 %v5628_v21  ;;  %v5670_v30 = vld [vmem:[%s6905_s3 + $0x20] sm:$0xff] }
  0x3f   : > { %5288 = vset.pattern.permute.xlu1 %v5298_v15  ;;  %4868 = vmatpush3.msra.mxu1 %v4139_v20  ;;  %v5811_v15 = vld [vmem:[#allocation2 + $0xb9] sm:$0xff] }
  0x40   : > { %4786 = vmatprep.subr.mxu0 %v4122_v23  ;;  %1941 = vperm.xlu1 %5288, %v5643_v24   ;;  %v5821_v20 = vld [vmem:[%s6905_s3 + $0x78] sm:$0xff] }
  0x41   : > { %1936 = vperm.xlu0 %5287, %v5648_v25   ;;  %4787 = vmatpush3.msra.mxu0 %v4122_v23  ;;  %v5826_v23 = vld [vmem:[%s6905_s3 + $0x80] sm:$0xff] }
  0x42   : > { %4659 = vmatprep.mubr.f32.mxu0 %v5443_v31  ;;  %4742 = vmatprep.mubr.f32.mxu1 %v5651_v26  ;;  %v5677_v31 = vld [vmem:[#allocation2 + $0x61] sm:$0xff] }
  0x43   : > { %4869 = vmatprep.subr.mxu1 %v4138_v27  ;;  %4660 = vmatmul.mubr.f32.gmra.mxu0 %v5453_v34  ;;  %v5691_v34 = vld [vmem:[%s6905_s3 + $0x28] sm:$0xff] }
  0x44   : > { %4743 = vmatmul.mubr.f32.gmra.mxu1 %v5658_v28  ;;  %1946 = vperm.xlu1 %5288, %v5664_v29  }
  0x45   : > { %4870 = vmatpush3.msra.mxu1 %v4138_v27  ;;  %1951 = vperm.xlu0 %5287, %v5670_v30   ;;  %v4115_v27 = vld [vmem:[%s6903_s1 + $0x120] sm:$0xff] }
  0x46   : > { %4788 = vmatprep.subr.mxu0 %v4121_v32  ;;  %4662 = vmatprep.mubr.f32.mxu0 %v5457_v35  ;;  %v5703_v35 = vld [vmem:[#allocation2 + $0x71] sm:$0xff] }
  0x47   : > { %4745 = vmatprep.mubr.f32.mxu1 %v5677_v31  ;;  %4789 = vmatpush3.msra.mxu0 %v4121_v32  ;;  %v5837_v32 = vld [vmem:[#allocation2 + $0xc9] sm:$0xff] }
  0x48   : > { %4746 = vmatmul.mubr.f32.gmra.mxu1 %v5680_v33  ;;  %4663 = vmatmul.mubr.f32.gmra.mxu0 %v5473_v40  ;;  %v5717_v40 = vld [vmem:[%s6905_s3 + $0x38] sm:$0xff] }
  0x49   : > { %4871 = vmatprep.subr.mxu1 %v4137_v36  ;;  %1956 = vperm.xlu1 %5288, %v5691_v34  }
  0x4a   : > { %4872 = vmatpush3.msra.mxu1 %v4137_v36  ;;  %1961 = vperm.xlu0 %5287, %v5697_v37   ;;  %v5847_v36 = vld [vmem:[%s6905_s3 + $0x88] sm:$0xff] }
  0x4b   : > { %4790 = vmatprep.subr.mxu0 %v4120_v38  ;;  %4665 = vmatprep.mubr.f32.mxu0 %v5477_v41  ;;  %v5729_v41 = vld [vmem:[#allocation2 + $0x81] sm:$0xff] }
  0x4c   : > { %4748 = vmatprep.mubr.f32.mxu1 %v5703_v35  ;;  %4791 = vmatpush3.msra.mxu0 %v4120_v38  ;;  %v5852_v38 = vld [vmem:[%s6905_s3 + $0x90] sm:$0xff] }
  0x4d   : > { %4749 = vmatmul.mubr.f32.gmra.mxu1 %v5706_v39  ;;  %4666 = vmatmul.mubr.f32.gmra.mxu0 %v5487_v44  ;;  %v5743_v44 = vld [vmem:[%s6905_s3 + $0x48] sm:$0xff] }
  0x4e   : > { %4873 = vmatprep.subr.mxu1 %v4136_v42  ;;  %1966 = vperm.xlu1 %5288, %v5717_v40  }
  0x4f   : > { %4874 = vmatpush3.msra.mxu1 %v4136_v42  ;;  %1971 = vperm.xlu0 %5287, %v5723_v43   ;;  %v4114_v42 = vld [vmem:[%s6903_s1 + $0x118] sm:$0xff] }
  0x50   : > { %4792 = vmatprep.subr.mxu0 %v4119_v45  ;;  %4668 = vmatprep.mubr.f32.mxu0 %v5497_v47  ;;  %v5755_v47 = vld [vmem:[#allocation2 + $0x91] sm:$0xff] }
  0x51   : > { %4751 = vmatprep.mubr.f32.mxu1 %v5729_v41  ;;  %4793 = vmatpush3.msra.mxu0 %v4119_v45  ;;  %v5863_v45 = vld [vmem:[#allocation2 + $0xd9] sm:$0xff] }
  0x52   : > { %4752 = vmatmul.mubr.f32.gmra.mxu1 %v5732_v46  ;;  %4669 = vmatmul.mubr.f32.gmra.mxu0 %v5507_v50  ;;  %v5769_v50 = vld [vmem:[%s6905_s3 + $0x58] sm:$0xff] }
  0x53   : > { %4875 = vmatprep.subr.mxu1 %v4135_v48  ;;  %1976 = vperm.xlu1 %5288, %v5743_v44  }
  0x54   : > { %4876 = vmatpush3.msra.mxu1 %v4135_v48  ;;  %1981 = vperm.xlu0 %5287, %v5749_v49   ;;  %v5873_v48 = vld [vmem:[%s6905_s3 + $0x98] sm:$0xff] }
  0x55   : > { %4794 = vmatprep.subr.mxu0 %v4118_v52  ;;  %4671 = vmatprep.mubr.f32.mxu0 %v5510_v51  ;;  %v4117_v51 = vld [vmem:[%s6903_s1 + $0x130] sm:$0xff] }
  0x56   : > { %4754 = vmatprep.mubr.f32.mxu1 %v5755_v47  ;;  %4795 = vmatpush3.msra.mxu0 %v4118_v52  ;;  %v5878_v52 = vld [vmem:[%s6905_s3 + $0xa0] sm:$0xff] }
  0x57   : > { %4755 = vmatmul.mubr.f32.gmra.mxu1 %v5758_v54  ;;  %4672 = vmatmul.mubr.f32.gmra.mxu0 %v5515_v53  ;;  %v4133_v53 = vld [vmem:[%s6903_s1 + $0x1b0] sm:$0xff] }
  0x58   : > { %4877 = vmatprep.subr.mxu1 %v4134_v56  ;;  %1986 = vperm.xlu1 %5288, %v5769_v50  }
  0x59   : > { %4878 = vmatpush3.msra.mxu1 %v4134_v56  ;;  %1991 = vperm.xlu0 %5287, %v5775_v57   ;;  %v5886_v56 = vld [vmem:[#allocation2 + $0xe9] sm:$0xff] }
  0x5a   : > { %4674 = vmatprep.mubr.f32.mxu0 %v5519_v55  ;;  %4757 = vmatprep.mubr.f32.mxu1 %v5778_v63  ;;  %v5804_v55 = vld [vmem:[#allocation2 + $0xb1] sm:$0xff] }
  0x5b   : > { %4796 = vmatprep.subr.mxu0 %v4117_v51  ;;  %4675 = vmatmul.mubr.f32.gmra.mxu0 %v5530_v58  ;;  %v4132_v58 = vld [vmem:[%s6903_s1 + $0x1a8] sm:$0xff] }
  0x5c   : > { %4758 = vmatmul.mubr.f32.gmra.mxu1 %v5784_v2  ;;  %4797 = vmatpush3.msra.mxu0 %v4117_v51  ;;  %v4113_v51 = vld [vmem:[%s6903_s1 + $0x110] sm:$0xff] }
  0x5d   : > { %4879 = vmatprep.subr.mxu1 %v4133_v53  ;;  %1996 = vperm.xlu1 %5288, %v5795_v3  }
  0x5e   : > { %2001 = vperm.xlu0 %5287, %v5800_v9   ;;  %4880 = vmatpush3.msra.mxu1 %v4133_v53  ;;  %v5902_v53 = vld [vmem:[%s6905_s3 + $0xb0] sm:$0xff] }
  0x5f   : > { %4677 = vmatprep.mubr.f32.mxu0 %v5534_v59  ;;  %4760 = vmatprep.mubr.f32.mxu1 %v5804_v55  ;;  %v5830_v59 = vld [vmem:[#allocation2 + $0xc1] sm:$0xff] }
  0x60   : > { %4798 = vmatprep.subr.mxu0 %v4116_v13  ;;  %4678 = vmatmul.mubr.f32.gmra.mxu0 %v5543_v62  ;;  %v4131_v62 = vld [vmem:[%s6903_s1 + $0x1a0] sm:$0xff] }
  0x61   : > { %4761 = vmatmul.mubr.f32.gmra.mxu1 %v5811_v15  ;;  %4799 = vmatpush3.msra.mxu0 %v4116_v13  ;;  %v4129_v13 = vld [vmem:[%s6903_s1 + $0x190] sm:$0xff] }
  0x62   : > { %4881 = vmatprep.subr.mxu1 %v4132_v58  ;;  %2006 = vperm.xlu1 %5288, %v5821_v20  }
  0x63   : > { %2011 = vperm.xlu0 %5287, %v5826_v23   ;;  %4882 = vmatpush3.msra.mxu1 %v4132_v58  ;;  %v4112_v58 = vld [vmem:[%s6903_s1 + $0x108] sm:$0xff] }
  0x64   : > { %4680 = vmatprep.mubr.f32.mxu0 %v5551_v0  ;;  %4763 = vmatprep.mubr.f32.mxu1 %v5830_v59  ;;  %v5856_v0 = vld [vmem:[#allocation2 + $0xd1] sm:$0xff] }
  0x65   : > { %4800 = vmatprep.subr.mxu0 %v4115_v27  ;;  %4681 = vmatmul.mubr.f32.gmra.mxu0 %v5566_v4  ;;  %v4130_v4 = vld [vmem:[%s6903_s1 + $0x198] sm:$0xff] }
  0x66   : > { %4764 = vmatmul.mubr.f32.gmra.mxu1 %v5837_v32  ;;  %4801 = vmatpush3.msra.mxu0 %v4115_v27  ;;  %v5922_v27 = vld [vmem:[%s6905_s3 + $0xb8] sm:$0xff] }
  0x67   : > { %4883 = vmatprep.subr.mxu1 %v4131_v62  ;;  %2016 = vperm.xlu1 %5288, %v5847_v36  }
  0x68   : > { %2021 = vperm.xlu0 %5287, %v5852_v38   ;;  %4884 = vmatpush3.msra.mxu1 %v4131_v62  ;;  %v5928_v62 = vld [vmem:[%s6905_s3 + $0xc0] sm:$0xff] }
  0x69   : > { %4683 = vmatprep.mubr.f32.mxu0 %v5573_v6  ;;  %4766 = vmatprep.mubr.f32.mxu1 %v5856_v0  ;;  %v5882_v6 = vld [vmem:[#allocation2 + $0xe1] sm:$0xff]  ;;  %6909 = vst [vmem:[#allocation4_spill] sm:$0xff] %v5928_v62 }
  0x6a   : > { %4802 = vmatprep.subr.mxu0 %v4114_v42  ;;  %4684 = vmatmul.mubr.f32.gmra.mxu0 %v5580_v8  ;;  %v5895_v8 = vld [vmem:[%s6905_s3 + $0xa8] sm:$0xff] }
  0x6b   : > { %4767 = vmatmul.mubr.f32.gmra.mxu1 %v5863_v45  ;;  %4803 = vmatpush3.msra.mxu0 %v4114_v42  ;;  %v4128_v42 = vld [vmem:[%s6903_s1 + $0x188] sm:$0xff] }
  0x6c   : > { %4885 = vmatprep.subr.mxu1 %v4130_v4  ;;  %2026 = vperm.xlu1 %5288, %v5873_v48  }
  0x6d   : > { %2031 = vperm.xlu0 %5287, %v5878_v52   ;;  %4886 = vmatpush3.msra.mxu1 %v4130_v4  ;;  %v4111_v4 = vld [vmem:[%s6903_s1 + $0x100] sm:$0xff] }
  0x6e   : > { %4686 = vmatprep.mubr.f32.mxu0 %v5589_v10  ;;  %4769 = vmatprep.mubr.f32.mxu1 %v5882_v6  ;;  %v5908_v10 = vld [vmem:[#allocation2 + $0xf1] sm:$0xff] }
  0x6f   : > { %4687 = vmatmul.mubr.f32.gmra.mxu0 %v5595_v12  ;;  %4770 = vmatmul.mubr.f32.gmra.mxu1 %v5886_v56  ;;  %v5912_v12 = vld [vmem:[#allocation2 + $0xf9] sm:$0xff] }
  0x70   : > { %4804 = vmatprep.subr.mxu0 %v4113_v51  ;;  %2036 = vperm.xlu1 %5288, %v5895_v8  }
  0x71   : > { %4805 = vmatpush3.msra.mxu0 %v4113_v51  ;;  %2041 = vperm.xlu0 %5287, %v5902_v53   ;;  %v5948_v51 = vld [vmem:[%s6905_s3 + $0xc8] sm:$0xff] }
  0x72   : > { %4887 = vmatprep.subr.mxu1 %v4129_v13  ;;  %4689 = vmatprep.mubr.f32.mxu0 %v5604_v14  ;;  %v5934_v14 = vld [vmem:[#allocation2 + $0x101] sm:$0xff] }
  0x73   : > { %4772 = vmatprep.mubr.f32.mxu1 %v5908_v10  ;;  %4888 = vmatpush3.msra.mxu1 %v4129_v13  ;;  %v5954_v13 = vld [vmem:[%s6905_s3 + $0xd0] sm:$0xff] }
  0x74   : > { %4690 = vmatmul.mubr.f32.gmra.mxu0 %v5617_v18  ;;  %4773 = vmatmul.mubr.f32.gmra.mxu1 %v5912_v12  ;;  %v5938_v18 = vld [vmem:[#allocation2 + $0x109] sm:$0xff]  ;;  %6910 = vst [vmem:[#allocation5_spill] sm:$0xff] %v5954_v13 }
  0x75   : > { %4806 = vmatprep.subr.mxu0 %v4112_v58  ;;  %2046 = vperm.xlu1 %5288, %v5922_v27  }
  0x76   : > { %4807 = vmatpush3.msra.mxu0 %v4112_v58  ;;  %2051 = vperm.xlu0 %5287, %v5928_v62   ;;  %v4127_v58 = vld [vmem:[%s6903_s1 + $0x180] sm:$0xff] }
  0x77   : > { %4889 = vmatprep.subr.mxu1 %v4128_v42  ;;  %4692 = vmatprep.mubr.f32.mxu0 %v5620_v19  ;;  %v1398_v19 = vld [vmem:[#allocation2 + $0x12] sm:$0xff]  ;;  %v5971_v62 = vld [vmem:[%s6905_s3 + $0xe0] sm:$0xff] }
  0x78   : > { %4775 = vmatprep.mubr.f32.mxu1 %v5934_v14  ;;  %4890 = vmatpush3.msra.mxu1 %v4128_v42  ;;  %v5965_v42 = vld [vmem:[%s6905_s3 + $0xd8] sm:$0xff] }
  0x79   : > { %4693 = vmatmul.mubr.f32.gmra.mxu0 %v5631_v22  ;;  %4776 = vmatmul.mubr.f32.gmra.mxu1 %v5938_v18  ;;  %v1399_v22 = vld [vmem:[#allocation2 + $0x1a] sm:$0xff] }
  0x7a   : > { %4808 = vmatprep.subr.mxu0 %v4111_v4  ;;  %2056 = vperm.xlu1 %5288, %v5948_v51  }
  0x7b   : > { %4809 = vmatpush3.msra.mxu0 %v4111_v4  ;;  %2061 = vperm.xlu0 %5287, %v5954_v13   ;;  %v1400_v4 = vld [vmem:[#allocation2 + $0x22] sm:$0xff]  ;;  %v1401_v13 = vld [vmem:[#allocation2 + $0x2a] sm:$0xff] }
  0x7c   : > { %4891 = vmatprep.subr.mxu1 %v4127_v58  ;;  %4810 = vmatprep.mubr.f32.mxu0 %v5537_v60  ;;  %v5980_v60 = vld [vmem:[%s6905_s3 + $0xe8] sm:$0xff] }
  0x7d   : > { %4892 = vmatpush3.msra.mxu1 %v4127_v58  ;;  %4811 = vmatmul.mubr.f32.vlgmr.msra.gmra.mxu0 %v5540_v61  ;;  %v5985_v61 = vld [vmem:[%s6905_s3 + $0xf0] sm:$0xff] }
  0x7e   : > { %4893 = vmatprep.mubr.f32.mxu1 %v1398_v19  ;;  %2066 = vperm.xlu1 %5288, %v5965_v42   ;;  %v1402_v58 = vld [vmem:[#allocation2 + $0x32] sm:$0xff] }
  0x7f   : > { %4894 = vmatmul.mubr.f32.vlgmr.msra.gmra.mxu1 %v1399_v22  ;;  %2071 = vperm.xlu0 %5287, %v5971_v62   ;;  %v5994_v19 = vld [vmem:[%s6905_s3 + $0xf8] sm:$0xff]  ;;  %v5999_v22 = vld [vmem:[%s6905_s3 + $0x100] sm:$0xff] }
  0x80   : > { %4813 = vmatprep.mubr.f32.mxu0 %v5554_v1  ;;  %4896 = vmatprep.mubr.f32.mxu1 %v1400_v4  ;;  %v1403_v1 = vld [vmem:[#allocation2 + $0x3a] sm:$0xff]  ;;  %v1406_v4 = vld [vmem:[#allocation2 + $0x52] sm:$0xff] }
  0x81   : > { %4814 = vmatmul.mubr.f32.gmra.mxu0 %v5569_v5  ;;  %v1404_v5 = vld [vmem:[#allocation2 + $0x42] sm:$0xff] }
  0x82   : > { %2076 = vperm.xlu1 %5288, %v5980_v60   ;;  %4816 = vmatprep.mubr.f32.mxu0 %v5577_v7  ;;  %v1405_v7 = vld [vmem:[#allocation2 + $0x4a] sm:$0xff] }
  0x83   : > { %4897 = vmatmul.mubr.f32.gmra.mxu1 %v1401_v13  ;;  %2081 = vperm.xlu0 %5287, %v5985_v61   ;;  %v6008_v13 = vld [vmem:[%s6905_s3 + $0x108] sm:$0xff] }
  0x84   : > { %4899 = vmatprep.mubr.f32.mxu1 %v1402_v58  ;;  %v1409_v58 = vld [vmem:[#allocation2 + $0x6a] sm:$0xff] }
  0x85   : > { %4817 = vmatmul.mubr.f32.gmra.mxu0 %v5591_v11  ;;  %v1407_v11 = vld [vmem:[#allocation2 + $0x5a] sm:$0xff] }
  0x86   : > { %2086 = vperm.xlu1 %5288, %v5994_v19   ;;  %4819 = vmatprep.mubr.f32.mxu0 %v5614_v17  ;;  %v1408_v17 = vld [vmem:[#allocation2 + $0x62] sm:$0xff] }
  0x87   : > { %4900 = vmatmul.mubr.f32.gmra.mxu1 %v1403_v1  ;;  %2091 = vperm.xlu0 %5287, %v5999_v22   ;;  %v4145_v1 = vld [vmem:[%s6903_s1 + $0x208] sm:$0xff] }
  0x88   : > { %4902 = vmatprep.mubr.f32.mxu1 %v1404_v5  ;;  %v4160_v5 = vld [vmem:[%s6903_s1 + $0x280] sm:$0xff] }
  0x89   : > { %4820 = vmatmul.mubr.f32.gmra.mxu0 %v5628_v21  ;;  %v4159_v21 = vld [vmem:[%s6903_s1 + $0x278] sm:$0xff] }
  0x8a   : > { %2096 = vperm.xlu1 %5288, %v6008_v13   ;;  %4822 = vmatprep.mubr.f32.mxu0 %v5651_v26  ;;  %v1412_v26 = vld [vmem:[#allocation2 + $0x82] sm:$0xff] }
  0x8b   : > { %4903 = vmatmul.mubr.f32.gmra.mxu1 %v1405_v7  ;;  %3797 = vperm.xlu0 %5287, %v5609_v16   ;;  %v1410_v16 = vld [vmem:[#allocation2 + $0x72] sm:$0xff] }
  0x8c   : > { %4905 = vmatprep.mubr.f32.mxu1 %v1406_v4  ;;  %4944 = vmatprep.subr.mxu0 %v4159_v21  ;;  %v6169_v7 = vld [vmem:[%s6903_s1 + $0x378] sm:$0xff] }
  0x8d   : > { %4823 = vmatmul.mubr.f32.gmra.mxu0 %v5658_v28  ;;  %v4158_v28 = vld [vmem:[%s6903_s1 + $0x270] sm:$0xff] }
  0x8e   : > { %3802 = vperm.xlu1 %5288, %v5648_v25   ;;  %4825 = vmatprep.mubr.f32.mxu0 %v5677_v31  ;;  %v4175_v25 = vld [vmem:[%s6903_s1 + $0x2f8] sm:$0xff]  ;;  %v4174_v31 = vld [vmem:[%s6903_s1 + $0x2f0] sm:$0xff] }
  0x8f   : > { %4906 = vmatmul.mubr.f32.gmra.mxu1 %v1407_v11  ;;  %3807 = vperm.xlu0 %5287, %v5643_v24   ;;  %v1411_v24 = vld [vmem:[#allocation2 + $0x7a] sm:$0xff] }
  0x90   : > { %4908 = vmatprep.mubr.f32.mxu1 %v1408_v17  ;;  %4945 = vmatpush3.msra.mxu0 %v4159_v21 }
  0x91   : > { %4826 = vmatmul.mubr.f32.gmra.mxu0 %v5680_v33  ;;  %5027 = vmatprep.subr.mxu1 %v4175_v25  ;;  %v1415_v33 = vld [vmem:[#allocation2 + $0x9a] sm:$0xff] }
  0x92   : > { %3812 = vperm.xlu1 %5288, %v5664_v29   ;;  %4828 = vmatprep.mubr.f32.mxu0 %v5703_v35  ;;  %v1413_v29 = vld [vmem:[#allocation2 + $0x8a] sm:$0xff] }
  0x93   : > { %4909 = vmatmul.mubr.f32.gmra.mxu1 %v1409_v58  ;;  %3817 = vperm.xlu0 %5287, %v5670_v30   ;;  %v1414_v30 = vld [vmem:[#allocation2 + $0x92] sm:$0xff]  ;;  %v1417_v35 = vld [vmem:[#allocation2 + $0xaa] sm:$0xff] }
  0x94   : > { %4911 = vmatprep.mubr.f32.mxu1 %v1410_v16  ;;  %5028 = vmatpush3.msra.mxu1 %v4175_v25 }
  0x95   : > { %4829 = vmatmul.mubr.f32.gmra.mxu0 %v5706_v39  ;;  %4946 = vmatprep.subr.mxu0 %v4158_v28  ;;  %v1418_v39 = vld [vmem:[#allocation2 + $0xb2] sm:$0xff] }
  0x96   : > { %3822 = vperm.xlu1 %5288, %v5691_v34   ;;  %4831 = vmatprep.mubr.f32.mxu0 %v5729_v41  ;;  %v1416_v34 = vld [vmem:[#allocation2 + $0xa2] sm:$0xff] }
  0x97   : > { %4912 = vmatmul.mubr.f32.gmra.mxu1 %v1411_v24  ;;  %3827 = vperm.xlu0 %5287, %v5697_v37   ;;  %v4157_v37 = vld [vmem:[%s6903_s1 + $0x268] sm:$0xff] }
  0x98   : > { %4914 = vmatprep.mubr.f32.mxu1 %v1412_v26  ;;  %4947 = vmatpush3.msra.mxu0 %v4158_v28  ;;  %v1420_v41 = vld [vmem:[#allocation2 + $0xc2] sm:$0xff] }
  0x99   : > { %4832 = vmatmul.mubr.f32.gmra.mxu0 %v5732_v46  ;;  %5029 = vmatprep.subr.mxu1 %v4174_v31  ;;  %v4156_v46 = vld [vmem:[%s6903_s1 + $0x260] sm:$0xff] }
  0x9a   : > { %3832 = vperm.xlu1 %5288, %v5717_v40   ;;  %4834 = vmatprep.mubr.f32.mxu0 %v5755_v47  ;;  %v4173_v40 = vld [vmem:[%s6903_s1 + $0x2e8] sm:$0xff]  ;;  %v4172_v47 = vld [vmem:[%s6903_s1 + $0x2e0] sm:$0xff] }
  0x9b   : > { %4915 = vmatmul.mubr.f32.gmra.mxu1 %v1413_v29  ;;  %3837 = vperm.xlu0 %5287, %v5723_v43   ;;  %v1419_v43 = vld [vmem:[#allocation2 + $0xba] sm:$0xff] }
  0x9c   : > { %4917 = vmatprep.mubr.f32.mxu1 %v1414_v30  ;;  %5030 = vmatpush3.msra.mxu1 %v4174_v31 }
  0x9d   : > { %4835 = vmatmul.mubr.f32.gmra.mxu0 %v5758_v54  ;;  %4948 = vmatprep.subr.mxu0 %v4157_v37  ;;  %v1423_v54 = vld [vmem:[#allocation2 + $0xda] sm:$0xff] }
  0x9e   : > { %3842 = vperm.xlu1 %5288, %v5743_v44   ;;  %4837 = vmatprep.mubr.f32.mxu0 %v5778_v63  ;;  %v1421_v44 = vld [vmem:[#allocation2 + $0xca] sm:$0xff] }
  0x9f   : > { %4918 = vmatmul.mubr.f32.gmra.mxu1 %v1415_v33  ;;  %3847 = vperm.xlu0 %5287, %v5749_v49   ;;  %v1422_v49 = vld [vmem:[#allocation2 + $0xd2] sm:$0xff]  ;;  %v1425_v63 = vld [vmem:[#allocation2 + $0xea] sm:$0xff] }
  0xa0   : > { %4920 = vmatprep.mubr.f32.mxu1 %v1416_v34  ;;  %4949 = vmatpush3.msra.mxu0 %v4157_v37 }
  0xa1   : > { %4838 = vmatmul.mubr.f32.gmra.mxu0 %v5784_v2  ;;  %5031 = vmatprep.subr.mxu1 %v4173_v40  ;;  %v1426_v2 = vld [vmem:[#allocation2 + $0xf2] sm:$0xff] }
  0xa2   : > { %3852 = vperm.xlu1 %5288, %v5769_v50   ;;  %4840 = vmatprep.mubr.f32.mxu0 %v5804_v55  ;;  %v1424_v50 = vld [vmem:[#allocation2 + $0xe2] sm:$0xff] }
  0xa3   : > { %4921 = vmatmul.mubr.f32.gmra.mxu1 %v1417_v35  ;;  %3857 = vperm.xlu0 %5287, %v5775_v57   ;;  %v4155_v57 = vld [vmem:[%s6903_s1 + $0x258] sm:$0xff]  ;;  %v1428_v55 = vld [vmem:[#allocation2 + $0x102] sm:$0xff] }
  0xa4   : > { %4923 = vmatprep.mubr.f32.mxu1 %v1418_v39  ;;  %5032 = vmatpush3.msra.mxu1 %v4173_v40 }
  0xa5   : > { %4841 = vmatmul.mubr.f32.gmra.mxu0 %v5811_v15  ;;  %4950 = vmatprep.subr.mxu0 %v4156_v46  ;;  %v4154_v15 = vld [vmem:[%s6903_s1 + $0x250] sm:$0xff] }
  0xa6   : > { %3862 = vperm.xlu1 %5288, %v5795_v3   ;;  %4843 = vmatprep.mubr.f32.mxu0 %v5830_v59  ;;  %v4171_v3 = vld [vmem:[%s6903_s1 + $0x2d8] sm:$0xff] }
  0xa7   : > { %4924 = vmatmul.mubr.f32.gmra.mxu1 %v1419_v43  ;;  %3867 = vperm.xlu0 %5287, %v5800_v9   ;;  %v1427_v9 = vld [vmem:[#allocation2 + $0xfa] sm:$0xff]  ;;  %v1430_v59 = vld [vmem:[#allocation2 + $0x112] sm:$0xff] }
  0xa8   : > { %4926 = vmatprep.mubr.f32.mxu1 %v1420_v41  ;;  %4951 = vmatpush3.msra.mxu0 %v4156_v46 }
  0xa9   : > { %4844 = vmatmul.mubr.f32.gmra.mxu0 %v5837_v32  ;;  %5033 = vmatprep.subr.mxu1 %v4172_v47  ;;  %v1043_v32 = vld [vmem:[#allocation2 + $0x119] sm:$0xff] }
  0xaa   : > { %3872 = vperm.xlu1 %5288, %v5821_v20   ;;  %4846 = vmatprep.mubr.f32.mxu0 %v5856_v0  ;;  %v1429_v20 = vld [vmem:[#allocation2 + $0x10a] sm:$0xff]  ;;  %v1431_v0 = vld [vmem:[#allocation2 + $0x11a] sm:$0xff] }
  0xab   : > { %4927 = vmatmul.mubr.f32.gmra.mxu1 %v1421_v44  ;;  %3877 = vperm.xlu0 %5287, %v5826_v23   ;;  %v1042_v23 = vld [vmem:[#allocation2 + $0x111] sm:$0xff] }
  0xac   : > { %4929 = vmatprep.mubr.f32.mxu1 %v1422_v49  ;;  %5034 = vmatpush3.msra.mxu1 %v4172_v47 }
  0xad   : > { %4847 = vmatmul.mubr.f32.gmra.mxu0 %v5863_v45  ;;  %4952 = vmatprep.subr.mxu0 %v4155_v57  ;;  %v4153_v45 = vld [vmem:[%s6903_s1 + $0x248] sm:$0xff] }
  0xae   : > { %3882 = vperm.xlu1 %5288, %v5847_v36   ;;  %4849 = vmatprep.mubr.f32.mxu0 %v5882_v6  ;;  %v4170_v36 = vld [vmem:[%s6903_s1 + $0x2d0] sm:$0xff]  ;;  %v4152_v6 = vld [vmem:[%s6903_s1 + $0x240] sm:$0xff] }
  0xaf   : > { %4930 = vmatmul.mubr.f32.gmra.mxu1 %v1423_v54  ;;  %3887 = vperm.xlu0 %5287, %v5852_v38   ;;  %v6911_v38 = vld [vmem:[#allocation4_spill] sm:$0xff] }
  0xb0   : > { %4932 = vmatprep.mubr.f32.mxu1 %v1424_v50  ;;  %4953 = vmatpush3.msra.mxu0 %v4155_v57 }
  0xb1   : > { %4850 = vmatmul.mubr.f32.gmra.mxu0 %v5886_v56  ;;  %5035 = vmatprep.subr.mxu1 %v4171_v3  ;;  %v4168_v56 = vld [vmem:[%s6903_s1 + $0x2c0] sm:$0xff] }
  0xb2   : > { %3892 = vperm.xlu1 %5288, %v5873_v48   ;;  %4852 = vmatprep.mubr.f32.mxu0 %v5908_v10  ;;  %v4169_v48 = vld [vmem:[%s6903_s1 + $0x2c8] sm:$0xff]  ;;  %v4150_v10 = vld [vmem:[%s6903_s1 + $0x230] sm:$0xff] }
  0xb3   : > { %4933 = vmatmul.mubr.f32.gmra.mxu1 %v1425_v63  ;;  %3897 = vperm.xlu0 %5287, %v5878_v52   ;;  %v6912_v52 = vld [vmem:[#allocation5_spill] sm:$0xff] }
  0xb4   : > { %4935 = vmatprep.mubr.f32.mxu1 %v1426_v2  ;;  %5036 = vmatpush3.msra.mxu1 %v4171_v3 }
  0xb5   : > { %4853 = vmatmul.mubr.f32.gmra.mxu0 %v5912_v12  ;;  %4954 = vmatprep.subr.mxu0 %v4154_v15  ;;  %v4166_v12 = vld [vmem:[%s6903_s1 + $0x2b0] sm:$0xff] }
  0xb6   : > { %3902 = vperm.xlu1 %5288, %v5895_v8   ;;  %4855 = vmatprep.mubr.f32.mxu0 %v5934_v14  ;;  %v4151_v8 = vld [vmem:[%s6903_s1 + $0x238] sm:$0xff]  ;;  %v4148_v14 = vld [vmem:[%s6903_s1 + $0x220] sm:$0xff] }
  0xb7   : > { %4936 = vmatmul.mubr.f32.gmra.mxu1 %v1427_v9  ;;  %3907 = vperm.xlu0 %5287, %v5902_v53   ;;  %v4167_v53 = vld [vmem:[%s6903_s1 + $0x2b8] sm:$0xff] }
  0xb8   : > { %4938 = vmatprep.mubr.f32.mxu1 %v1428_v55  ;;  %4955 = vmatpush3.msra.mxu0 %v4154_v15 }
  0xb9   : > { %4856 = vmatmul.mubr.f32.gmra.mxu0 %v5938_v18  ;;  %5037 = vmatprep.subr.mxu1 %v4170_v36  ;;  %v4164_v18 = vld [vmem:[%s6903_s1 + $0x2a0] sm:$0xff] }
  0xba   : > { %3912 = vperm.xlu1 %5288, %v5922_v27   ;;  %4858 = vmatprep.mubr.f32.mxu0 %v1042_v23  ;;  %v4149_v27 = vld [vmem:[%s6903_s1 + $0x228] sm:$0xff] }
  0xbb   : > { %4939 = vmatmul.mubr.f32.gmra.mxu1 %v1429_v20  ;;  %3917 = vperm.xlu0 %5287, %v6911_v38  }
  0xbc   : > { %4941 = vmatprep.mubr.f32.mxu1 %v1430_v59  ;;  %5038 = vmatpush3.msra.mxu1 %v4170_v36 }
  0xbd   : > { %4859 = vmatmul.mubr.f32.gmra.mxu0 %v1043_v32  ;;  %4956 = vmatprep.subr.mxu0 %v4153_v45 }
  0xbe   : > { %3922 = vperm.xlu1 %5288, %v5948_v51   ;;  %5039 = vmatprep.subr.mxu1 %v4169_v48  ;;  %v4147_v51 = vld [vmem:[%s6903_s1 + $0x218] sm:$0xff] }
  0xbf   : > { %4942 = vmatmul.mubr.f32.gmra.mxu1 %v1431_v0  ;;  %3927 = vperm.xlu0 %5287, %v6912_v52  }
  0xc0   : > { %4957 = vmatpush3.msra.mxu0 %v4153_v45  ;;  %5040 = vmatpush3.msra.mxu1 %v4169_v48 }
  0xc1   : > { %4958 = vmatprep.subr.mxu0 %v4152_v6  ;;  %5041 = vmatprep.subr.mxu1 %v4168_v56 }
  0xc2   : > { %3932 = vperm.xlu1 %5288, %v5965_v42   ;;  %4959 = vmatpush3.msra.mxu0 %v4152_v6  ;;  %v4163_v42 = vld [vmem:[%s6903_s1 + $0x298] sm:$0xff] }
  0xc3   : > { %3937 = vperm.xlu0 %5287, %v5971_v62   ;;  %4960 = vmatprep.subr.mxu0 %v4151_v8  ;;  %v4165_v62 = vld [vmem:[%s6903_s1 + $0x2a8] sm:$0xff] }
  0xc4   : > { %5042 = vmatpush3.msra.mxu1 %v4168_v56  ;;  %4961 = vmatpush3.msra.mxu0 %v4151_v8 }
  0xc5   : > { %5043 = vmatprep.subr.mxu1 %v4167_v53  ;;  %4962 = vmatprep.subr.mxu0 %v4150_v10 }
  0xc6   : > { %3942 = vperm.xlu1 %5288, %v5980_v60   ;;  %5044 = vmatpush3.msra.mxu1 %v4167_v53  ;;  %v4146_v60 = vld [vmem:[%s6903_s1 + $0x210] sm:$0xff] }
  0xc7   : > { %3947 = vperm.xlu0 %5287, %v5985_v61   ;;  %5045 = vmatprep.subr.mxu1 %v4166_v12  ;;  %v4162_v61 = vld [vmem:[%s6903_s1 + $0x290] sm:$0xff] }
  0xc8   : > { %4963 = vmatpush3.msra.mxu0 %v4150_v10  ;;  %5046 = vmatpush3.msra.mxu1 %v4166_v12 }
  0xc9   : > { %4964 = vmatprep.subr.mxu0 %v4149_v27  ;;  %5047 = vmatprep.subr.mxu1 %v4165_v62 }
  0xca   : > { %3952 = vperm.xlu1 %5288, %v5994_v19   ;;  %4965 = vmatpush3.msra.mxu0 %v4149_v27  ;;  %v4161_v19 = vld [vmem:[%s6903_s1 + $0x288] sm:$0xff] }
  0xcb   : > { %3957 = vperm.xlu0 %5287, %v5999_v22   ;;  %4966 = vmatprep.subr.mxu0 %v4148_v14  ;;  %v4144_v22 = vld [vmem:[%s6903_s1 + $0x200] sm:$0xff] }
  0xcc   : > { %5048 = vmatpush3.msra.mxu1 %v4165_v62  ;;  %4967 = vmatpush3.msra.mxu0 %v4148_v14 }
  0xcd   : > { %5049 = vmatprep.subr.mxu1 %v4164_v18  ;;  %4968 = vmatprep.subr.mxu0 %v4147_v51 }
  0xce   : > { %3962 = vperm.xlu1 %5288, %v6008_v13   ;;  %5050 = vmatpush3.msra.mxu1 %v4164_v18  ;;  %v6175_v13 = vld [vmem:[%s6903_s1 + $0x3f8] sm:$0xff] }
  0xcf   : > { %4969 = vmatpush3.msra.mxu0 %v4147_v51  ;;  %5051 = vmatprep.subr.mxu1 %v4163_v42 }
  0xd0   : > { %5052 = vmatpush3.msra.mxu1 %v4163_v42  ;;  %4970 = vmatprep.subr.mxu0 %v4146_v60 }
  0xd1   : > { %4971 = vmatpush3.msra.mxu0 %v4146_v60  ;;  %5053 = vmatprep.subr.mxu1 %v4162_v61 }
  0xd2   : > { %5054 = vmatpush3.msra.mxu1 %v4162_v61  ;;  %4972 = vmatprep.subr.mxu0 %v4145_v1 }
  0xd3   : > { %4973 = vmatpush3.msra.mxu0 %v4145_v1  ;;  %5055 = vmatprep.subr.mxu1 %v4161_v19 }
  0xd4   : > { %5056 = vmatpush3.msra.mxu1 %v4161_v19  ;;  %4974 = vmatprep.subr.mxu0 %v4144_v22 }
  0xd5   : > { %4975 = vmatpush3.msra.mxu0 %v4144_v22  ;;  %5057 = vmatprep.subr.mxu1 %v4160_v5  ;;  %v6250_v22 = vpop.permute.xlu1 %1941 }
  0xd6   : > { %5058 = vmatpush3.msra.mxu1 %v4160_v5  ;;  %5110 = vmatprep.subr.mxu0 %v6169_v7 }
  0xd7   : > { %5193 = vmatprep.subr.mxu1 %v6175_v13 }
  0xed   : > { %v4646_v4 = vpop.f32.mrf.mxu0 }
  0xee   : > { %v4729_v11 = vpop.f32.mrf.mxu1 }
  0xef   : > { %v6178_v17 = vadd.f32 %v4729_v11, %v4646_v4  ;;  %v6180_v21 = vpop.f32.mrf.mxu0  ;;  %v6252_v11 = vpop.permute.xlu0 %1931 }
  0xf0   : > { %v6182_v58 = vpop.f32.mrf.mxu1 }
  0xf1   : > { %v4649_v16 = vpop.f32.mrf.mxu0 }
  0xf2   : > { %v4732_v25 = vpop.f32.mrf.mxu1 }
  0xf3   : > { %v6184_v24 = vadd.f32 %v4732_v25, %v4649_v16  ;;  %v6186_v26 = vpop.f32.mrf.mxu0 }
  0xf4   : > { %v6188_v28 = vpop.f32.mrf.mxu1 }
  0xf5   : > { %v4652_v29 = vpop.f32.mrf.mxu0 }
  0xf6   : > { %v4735_v30 = vpop.f32.mrf.mxu1 }
  0xf7   : > { %v6190_v31 = vadd.f32 %v4735_v30, %v4652_v29  ;;  %v6192_v33 = vpop.f32.mrf.mxu0 }
  0xf8   : > { %v6194_v34 = vpop.f32.mrf.mxu1 }
  0xf9   : > { %v4655_v37 = vpop.f32.mrf.mxu0 }
  0xfa   : > { %v4738_v35 = vpop.f32.mrf.mxu1 }
  0xfb   : > { %v6196_v39 = vadd.f32 %v4738_v35, %v4655_v37  ;;  %v6198_v40 = vpop.f32.mrf.mxu0  ;;  %v6258_v35 = vpop.permute.xlu1 %1946 }
  0xfc   : > { %v6200_v43 = vpop.f32.mrf.mxu1 }
  0xfe   : > { %v4658_v41 = vpop.f32.mrf.mxu0  ;;  %v4741_v46 = vpop.f32.mrf.mxu1 }
  0xff   : > { %v6202_v44 = vadd.f32 %v4741_v46, %v4658_v41 }
 0x100   : > { %v6204_v49 = vpop.f32.mrf.mxu0  ;;  %v6206_v47 = vpop.f32.mrf.mxu1 }
 0x103   : > { %v4661_v54 = vpop.f32.mrf.mxu0 }
 0x104   : > { %v4744_v50 = vpop.f32.mrf.mxu1 }
 0x105   : > { %v6208_v57 = vadd.f32 %v4744_v50, %v4661_v54  ;;  %v6210_v63 = vpop.f32.mrf.mxu0  ;;  %v1937_v50 = vpop.permute.xlu0 %1936 }
 0x106   : > { %v6212_v2 = vpop.f32.mrf.mxu1 }
 0x108   : > { %v4664_v3 = vpop.f32.mrf.mxu0  ;;  %v4747_v9 = vpop.f32.mrf.mxu1 }
 0x109   : > { %v6214_v55 = vadd.f32 %v4747_v9, %v4664_v3 }
 0x10a   : > { %v6216_v15 = vpop.f32.mrf.mxu0  ;;  %v6218_v20 = vpop.f32.mrf.mxu1 }
 0x10d   : > { %v4667_v23 = vpop.f32.mrf.mxu0  ;;  %v4750_v59 = vpop.f32.mrf.mxu1 }
 0x10e   : > { %v6220_v32 = vadd.f32 %v4750_v59, %v4667_v23 }
 0x10f   : > { %v6222_v36 = vpop.f32.mrf.mxu0  ;;  %v6224_v38 = vpop.f32.mrf.mxu1 }
 0x112   : > { %v4670_v0 = vpop.f32.mrf.mxu0  ;;  %v4753_v45 = vpop.f32.mrf.mxu1 }
 0x113   : > { %v6226_v48 = vadd.f32 %v4753_v45, %v4670_v0 }
 0x114   : > { %v6228_v52 = vpop.f32.mrf.mxu0  ;;  %v6230_v6 = vpop.f32.mrf.mxu1 }
 0x117   : > { %v4673_v56 = vpop.f32.mrf.mxu0  ;;  %v4756_v8 = vpop.f32.mrf.mxu1 }
 0x118   : > { %v6232_v53 = vadd.f32 %v4756_v8, %v4673_v56  ;;  %v6266_v56 = vpop.permute.xlu1 %1956 }
 0x119   : > { %v6234_v10 = vpop.f32.mrf.mxu0  ;;  %v6236_v12 = vpop.f32.mrf.mxu1 }
 0x11b   : > { %v4676_v27 = vpop.f32.mrf.mxu0 }
 0x11c   : > { %v4759_v62 = vpop.f32.mrf.mxu1 }
 0x11d   : > { %v6238_v14 = vadd.f32 %v4759_v62, %v4676_v27  ;;  %v6240_v18 = vpop.f32.mrf.mxu0  ;;  %v6270_v62 = vpop.permute.xlu0 %1951 }
 0x11e   : > { %v6242_v51 = vpop.f32.mrf.mxu1 }
 0x120   : > { %v4679_v42 = vpop.f32.mrf.mxu0 }
 0x121   : > { %v4762_v60 = vpop.f32.mrf.mxu1 }
 0x122   : > { %v6244_v61 = vadd.f32 %v4762_v60, %v4679_v42  ;;  %v6246_v1 = vpop.f32.mrf.mxu0 }
 0x123   : > { %v6248_v19 = vpop.f32.mrf.mxu1 }
 0x124   : > { %6913 = vst [vmem:[#allocation4_spill] sm:$0xff] %v6244_v61 }
 0x125   : > { %v4682_v5 = vpop.f32.mrf.mxu0 }
 0x126   : > { %v4765_v4 = vpop.f32.mrf.mxu1 }
 0x127   : > { %v6254_v16 = vadd.f32 %v4765_v4, %v4682_v5  ;;  %v539_v25 = vpop.f32.mrf.mxu0 }
 0x128   : > { %v859_v29 = vpop.f32.mrf.mxu1 }
 0x129   : > { %6914 = vst [vmem:[#allocation5_spill] sm:$0xff] %v6254_v16  ;;  %v6256_v30 = vadd.f32 %v859_v29, %v539_v25  ;;  %v6274_v29 = vpop.permute.xlu1 %1966 }
 0x12a   : > { %v4685_v37 = vpop.f32.mrf.mxu0 }
 0x12b   : > { %6915 = vst [vmem:[#allocation6_spill] sm:$0xff] %v6256_v30  ;;  %v4768_v41 = vpop.f32.mrf.mxu1 }
 0x12c   : > { %v6260_v46 = vadd.f32 %v4768_v41, %v4685_v37  ;;  %v549_v54 = vpop.f32.mrf.mxu0 }
 0x12d   : > { %v869_v3 = vpop.f32.mrf.mxu1 }
 0x12e   : > { %6916 = vst [vmem:[#allocation7_spill] sm:$0xff] %v6260_v46  ;;  %v6262_v9 = vadd.f32 %v869_v3, %v549_v54  ;;  %v6278_v54 = vpop.permute.xlu0 %1961 }
 0x12f   : > { %v4688_v23 = vpop.f32.mrf.mxu0  ;;  %v4771_v59 = vpop.f32.mrf.mxu1 }
 0x130   : > { %6917 = vst [vmem:[#allocation8_spill] sm:$0xff] %v6262_v9  ;;  %v6264_v0 = vadd.f32 %v4771_v59, %v4688_v23 }
 0x131   : > { %v559_v45 = vpop.f32.mrf.mxu0  ;;  %v879_v8 = vpop.f32.mrf.mxu1 }
 0x132   : > { %6918 = vst [vmem:[#allocation9_spill] sm:$0xff] %v6264_v0  ;;  %v6268_v27 = vadd.f32 %v879_v8, %v559_v45 }
 0x134   : > { %6919 = vst [vmem:[#allocation10_spill] sm:$0xff] %v6268_v27  ;;  %v4691_v42 = vpop.f32.mrf.mxu0  ;;  %v4774_v60 = vpop.f32.mrf.mxu1 }
 0x135   : > { %v6272_v5 = vadd.f32 %v4774_v60, %v4691_v42  ;;  %v6284_v27 = vpop.permute.xlu1 %1976  ;;  %v942_v60 = vadd.f32 %v6182_v58, %v6180_v21 }
 0x136   : > { %v569_v4 = vpop.f32.mrf.mxu0  ;;  %v889_v25 = vpop.f32.mrf.mxu1 }
 0x137   : > { %6920 = vst [vmem:[#allocation11_spill] sm:$0xff] %v6272_v5  ;;  %v6276_v37 = vadd.f32 %v889_v25, %v569_v4  ;;  %v6289_v25 = vpop.permute.xlu0 %1971 }
 0x139   : > { %6921 = vst [vmem:[#allocation12_spill] sm:$0xff] %v6276_v37  ;;  %v4694_v41 = vpop.f32.mrf.mxu0  ;;  %v4777_v3 = vpop.f32.mrf.mxu1  ;;  %v944_v37 = vadd.f32 %v6188_v28, %v6186_v26  ;;  %v946_v26 = vadd.f32 %v6194_v34, %v6192_v33  ;;  %v948_v33 = vadd.f32 %v6200_v43, %v6198_v40 }
 0x13a   : > { %v6280_v23 = vadd.f32 %v4777_v3, %v4694_v41  ;;  %v6294_v41 = vld [vmem:[%s6904_s2] ss:$0 sm:$0xff]  ;;  %v6300_v0 = vpop.permute.xlu1 %1986 }
 0x13b   : > { %v579_v59 = vpop.f32.mrf.mxu0  ;;  %v899_v45 = vpop.f32.mrf.mxu1 }
 0x13c   : > { %6922 = vst [vmem:[#allocation13_spill] sm:$0xff] %v6280_v23  ;;  %v6282_v8 = vadd.f32 %v899_v45, %v579_v59 }
 0x13d   : > { %v4812_v42 = vpop.f32.mrf.mxu0 }
 0x13e   : > { %6923 = vst [vmem:[#allocation14_spill] sm:$0xff] %v6282_v8  ;;  %v1331_v5 = vadd.f32 %v4812_v42, %v6178_v17  ;;  %v6311_v61 = vpop.permute.xlu1 %1996 }
 0x13f   : > { %v4895_v4 = vpop.f32.mrf.mxu1  ;;  %v1127_v3 = vpop.f32.mrf.mxu0 }
 0x140   : > { %v1719_v23 = vadd.f32 %v4895_v4, %v1331_v5  ;;  %v1330_v59 = vadd.f32 %v1127_v3, %v942_v60  ;;  %v6303_v4 = vpop.permute.xlu0 %1981 }
 0x141   : > { %v1515_v45 = vpop.f32.mrf.mxu1  ;;  %v4815_v8 = vpop.f32.mrf.mxu0 }
 0x142   : > { %v1828_v21 = vadd.f32 %v6294_v41, %v1719_v23  ;;  %v1718_v58 = vadd.f32 %v1515_v45, %v1330_v59  ;;  %v1333_v17 = vadd.f32 %v4815_v8, %v6184_v24 }
 0x143   : > { %v4898_v42 = vpop.f32.mrf.mxu1  ;;  %v1137_v9 = vpop.f32.mrf.mxu0 }
 0x144   : > { %v1862_v46 = vmax.f32 %v1828_v21, 0.0  ;;  %v1827_v30 = vadd.f32 %v6294_v41, %v1718_v58  ;;  %v1721_v16 = vadd.f32 %v4898_v42, %v1333_v17  ;;  %v1332_v5 = vadd.f32 %v1137_v9, %v944_v37 }
 0x145   : > { %v1525_v60 = vpop.f32.mrf.mxu1  ;;  %v4818_v28 = vpop.f32.mrf.mxu0 }
 0x146   : > { %v2100_v23 = vmul.f32 %v1937_v50, %v1862_v46  ;;  %v1861_v3 = vmax.f32 %v1827_v30, 0.0  ;;  %v1830_v24 = vadd.f32 %v6294_v41, %v1721_v16  ;;  %v1720_v8 = vadd.f32 %v1525_v60, %v1332_v5  ;;  %v4190_v5 = vld [vmem:[%s6903_s1 + $0x370] sm:$0xff]  ;;  %v6320_v60 = vpop.permute.xlu0 %1991 }
 0x147   : > { %v4901_v59 = vpop.f32.mrf.mxu1  ;;  %v1335_v45 = vadd.f32 %v4818_v28, %v6190_v31  ;;  %v1147_v21 = vpop.f32.mrf.mxu0 }
 0x148   : > { %2134 = vst [vmem:[#allocation2 + $0x8] sm:$0xff] %v2100_v23  ;;  %v2099_v58 = vmul.f32 %v6252_v11, %v1861_v3  ;;  %v1864_v9 = vmax.f32 %v1830_v24, 0.0  ;;  %v1829_v37 = vadd.f32 %v6294_v41, %v1720_v8  ;;  %v1334_v17 = vadd.f32 %v1147_v21, %v946_v26  ;;  %v4189_v24 = vld [vmem:[%s6903_s1 + $0x368] sm:$0xff] }
 0x149   : > { %v1535_v42 = vpop.f32.mrf.mxu1  ;;  %v1723_v34 = vadd.f32 %v4901_v59, %v1335_v45  ;;  %v4821_v16 = vpop.f32.mrf.mxu0 }
 0x14a   : > { %2133 = vst [vmem:[#allocation2] sm:$0xff] %v2099_v58  ;;  %v2102_v30 = vmul.f32 %v6258_v35, %v1864_v9  ;;  %v1863_v31 = vmax.f32 %v1829_v37, 0.0  ;;  %v1722_v46 = vadd.f32 %v1535_v42, %v1334_v17  ;;  %v1337_v50 = vadd.f32 %v4821_v16, %v6196_v39  ;;  %4976 = vmatprep.mubr.f32.mxu0 %v2099_v58  ;;  %v6334_v9 = vpop.permute.xlu1 %2006 }
 0x14b   : > { %v4904_v11 = vpop.f32.mrf.mxu1  ;;  %v1832_v26 = vadd.f32 %v6294_v41, %v1723_v34  ;;  %v1157_v40 = vpop.f32.mrf.mxu0  ;;  %4977 = vmatmul.mubr.f32.vlgmr.msra.gmra.mxu0 %v2100_v23  ;;  %v950_v37 = vadd.f32 %v6206_v47, %v6204_v49 }
 0x14c   : > { %2136 = vst [vmem:[#allocation2 + $0x18] sm:$0xff] %v2102_v30  ;;  %v2101_v43 = vmul.f32 %v6250_v22, %v1863_v31  ;;  %v1831_v35 = vadd.f32 %v6294_v41, %v1722_v46  ;;  %v1725_v28 = vadd.f32 %v4904_v11, %v1337_v50  ;;  %v1336_v3 = vadd.f32 %v1157_v40, %v948_v33  ;;  %v6341_v46 = vpop.permute.xlu0 %2001 }
 0x14d   : > { %v1545_v39 = vpop.f32.mrf.mxu1  ;;  %5111 = vmatpush3.msra.mxu0 %v6169_v7  ;;  %v1866_v8 = vmax.f32 %v1832_v26, 0.0  ;;  %v4824_v59 = vpop.f32.mrf.mxu0  ;;  %v4188_v7 = vld [vmem:[%s6903_s1 + $0x360] sm:$0xff]  ;;  %v952_v50 = vadd.f32 %v6212_v2, %v6210_v63  ;;  %v6351_v63 = vld [vmem:[%s6903_s1 + $0x358] sm:$0xff] }
 0x14e   : > { %5112 = vmatprep.subr.mxu0 %v4190_v5  ;;  %2135 = vst [vmem:[#allocation2 + $0x10] sm:$0xff] %v2101_v43  ;;  %v1865_v45 = vmax.f32 %v1831_v35, 0.0  ;;  %v1834_v23 = vadd.f32 %v6294_v41, %v1725_v28  ;;  %v1724_v21 = vadd.f32 %v1545_v39, %v1336_v3  ;;  %v1339_v22 = vadd.f32 %v4824_v59, %v6202_v44 }
 0x14f   : > { %v4907_v58 = vpop.f32.mrf.mxu1  ;;  %4979 = vmatprep.mubr.f32.mxu0 %v2101_v43  ;;  %5113 = vmatpush3.msra.mxu0 %v4190_v5  ;;  %v2104_v17 = vmul.f32 %v6266_v56, %v1866_v8  ;;  %v1167_v42 = vpop.f32.mrf.mxu0  ;;  %v954_v39 = vadd.f32 %v6218_v20, %v6216_v15 }
 0x150   : > { %4980 = vmatmul.mubr.f32.gmra.mxu0 %v2102_v30  ;;  %5114 = vmatprep.subr.mxu0 %v4189_v24  ;;  %v2103_v33 = vmul.f32 %v6270_v62, %v1865_v45  ;;  %v1868_v44 = vmax.f32 %v1834_v23, 0.0  ;;  %v1833_v34 = vadd.f32 %v6294_v41, %v1724_v21  ;;  %v1727_v16 = vadd.f32 %v4907_v58, %v1339_v22  ;;  %v6368_v58 = vpop.permute.xlu0 %2011 }
 0x151   : > { %v1555_v31 = vpop.f32.mrf.mxu1  ;;  %5115 = vmatpush3.msra.mxu0 %v4189_v24  ;;  %2138 = vst [vmem:[#allocation2 + $0x28] sm:$0xff] %v2104_v17  ;;  %v1338_v49 = vadd.f32 %v1167_v42, %v950_v37  ;;  %v4827_v47 = vpop.f32.mrf.mxu0  ;;  %v2487_v56 = vld [vmem:[#allocation2 + $0x1] sm:$0xff] }
 0x152   : > { %5116 = vmatprep.subr.mxu0 %v4188_v7  ;;  %2137 = vst [vmem:[#allocation2 + $0x20] sm:$0xff] %v2103_v33  ;;  %v2106_v30 = vmul.f32 %v6274_v29, %v1868_v44  ;;  %v1867_v62 = vmax.f32 %v1833_v34, 0.0  ;;  %v1836_v11 = vadd.f32 %v6294_v41, %v1727_v16  ;;  %v1341_v5 = vadd.f32 %v4827_v47, %v6208_v57  ;;  %v6354_v57 = vpop.permute.xlu1 %2016 }
 0x153   : > { %v4910_v26 = vpop.f32.mrf.mxu1  ;;  %5059 = vmatprep.mubr.f32.mxu1 %v2487_v56  ;;  %4982 = vmatprep.mubr.f32.mxu0 %v2103_v33  ;;  %v1726_v2 = vadd.f32 %v1555_v31, %v1338_v49  ;;  %v1177_v40 = vpop.f32.mrf.mxu0  ;;  %v956_v34 = vadd.f32 %v6224_v38, %v6222_v36  ;;  %v4204_v49 = vld [vmem:[%s6903_s1 + $0x3e0] sm:$0xff] }
 0x154   : > { %4983 = vmatmul.mubr.f32.gmra.mxu0 %v2104_v17  ;;  %2140 = vst [vmem:[#allocation2 + $0x38] sm:$0xff] %v2106_v30  ;;  %v2105_v43 = vmul.f32 %v6278_v54, %v1867_v62  ;;  %v1870_v29 = vmax.f32 %v1836_v11, 0.0  ;;  %v1729_v35 = vadd.f32 %v4910_v26, %v1341_v5  ;;  %v1340_v28 = vadd.f32 %v1177_v40, %v952_v50  ;;  %v4206_v54 = vld [vmem:[%s6903_s1 + $0x3f0] sm:$0xff]  ;;  %v4205_v17 = vld [vmem:[%s6903_s1 + $0x3e8] sm:$0xff] }
 0x155   : > { %v1565_v3 = vpop.f32.mrf.mxu1  ;;  %5117 = vmatpush3.msra.mxu0 %v4188_v7  ;;  %v1835_v24 = vadd.f32 %v6294_v41, %v1726_v2  ;;  %v4830_v8 = vpop.f32.mrf.mxu0  ;;  %v2488_v59 = vld [vmem:[#allocation2 + $0x9] sm:$0xff]  ;;  %v6359_v45 = vld [vmem:[#allocation2 + $0x11] sm:$0xff] }
 0x156   : > { %5118 = vmatprep.subr.mxu0 %v6351_v63  ;;  %2139 = vst [vmem:[#allocation2 + $0x30] sm:$0xff] %v2105_v43  ;;  %v2108_v23 = vmul.f32 %v6284_v27, %v1870_v29  ;;  %v1838_v21 = vadd.f32 %v6294_v41, %v1729_v35  ;;  %v1728_v22 = vadd.f32 %v1565_v3, %v1340_v28  ;;  %v6389_v38 = vpop.permute.xlu1 %2026 }
 0x157   : > { %v1343_v15 = vadd.f32 %v4830_v8, %v6214_v55  ;;  %v4913_v20 = vpop.f32.mrf.mxu1  ;;  %5060 = vmatmul.mubr.f32.vlgmr.msra.gmra.mxu1 %v2488_v59  ;;  %v1869_v7 = vmax.f32 %v1835_v24, 0.0  ;;  %v1187_v37 = vpop.f32.mrf.mxu0  ;;  %4985 = vmatprep.mubr.f32.mxu0 %v2105_v43  ;;  %v958_v29 = vadd.f32 %v6230_v6, %v6228_v52 }
 0x158   : > { %5062 = vmatprep.mubr.f32.mxu1 %v6359_v45  ;;  %5194 = vmatpush3.msra.mxu1 %v6175_v13  ;;  %2142 = vst [vmem:[#allocation2 + $0x48] sm:$0xff] %v2108_v23  ;;  %v1872_v27 = vmax.f32 %v1838_v21, 0.0  ;;  %v1837_v42 = vadd.f32 %v6294_v41, %v1728_v22  ;;  %v1342_v55 = vadd.f32 %v1187_v37, %v954_v39  ;;  %v6395_v43 = vpop.permute.xlu0 %2021 }
 0x159   : > { %v1731_v33 = vadd.f32 %v4913_v20, %v1343_v15  ;;  %v1575_v44 = vpop.f32.mrf.mxu1  ;;  %5195 = vmatprep.subr.mxu1 %v4206_v54  ;;  %v2107_v16 = vmul.f32 %v6289_v25, %v1869_v7  ;;  %v4833_v31 = vpop.f32.mrf.mxu0  ;;  %v6379_v13 = vld [vmem:[#allocation2 + $0x19] sm:$0xff]  ;;  %v6381_v50 = vld [vmem:[#allocation2 + $0x21] sm:$0xff]  ;;  %4986 = vmatmul.mubr.f32.gmra.mxu0 %v2106_v30 }
 0x15a   : > { %5196 = vmatpush3.msra.mxu1 %v4206_v54  ;;  %v2110_v47 = vmul.f32 %v6300_v0, %v1872_v27  ;;  %v1871_v56 = vmax.f32 %v1837_v42, 0.0  ;;  %v1730_v11 = vadd.f32 %v1575_v44, %v1342_v55  ;;  %v1345_v25 = vadd.f32 %v4833_v31, %v6220_v32  ;;  %5119 = vmatpush3.msra.mxu0 %v6351_v63  ;;  %v6417_v20 = vpop.permute.xlu1 %2036  ;;  %v4202_v63 = vld [vmem:[%s6903_s1 + $0x3d0] sm:$0xff] }
 0x15b   : > { %v1840_v62 = vadd.f32 %v6294_v41, %v1731_v33  ;;  %v4916_v36 = vpop.f32.mrf.mxu1  ;;  %5063 = vmatmul.mubr.f32.gmra.mxu1 %v6379_v13  ;;  %5197 = vmatprep.subr.mxu1 %v4205_v17  ;;  %2141 = vst [vmem:[#allocation2 + $0x40] sm:$0xff] %v2107_v16  ;;  %v1197_v30 = vpop.f32.mrf.mxu0 }
 0x15c   : > { %5065 = vmatprep.mubr.f32.mxu1 %v6381_v50  ;;  %5198 = vmatpush3.msra.mxu1 %v4205_v17  ;;  %2144 = vst [vmem:[#allocation2 + $0x58] sm:$0xff] %v2110_v47  ;;  %v2109_v0 = vmul.f32 %v6303_v4, %v1871_v56  ;;  %v1839_v26 = vadd.f32 %v6294_v41, %v1730_v11  ;;  %v4203_v4 = vld [vmem:[%s6903_s1 + $0x3d8] sm:$0xff] }
 0x15d   : > { %v1874_v5 = vmax.f32 %v1840_v62, 0.0  ;;  %v1344_v2 = vadd.f32 %v1197_v30, %v956_v34  ;;  %v1585_v40 = vpop.f32.mrf.mxu1  ;;  %4988 = vmatprep.mubr.f32.mxu0 %v2107_v16  ;;  %5199 = vmatprep.subr.mxu1 %v4204_v49  ;;  %v1733_v32 = vadd.f32 %v4916_v36, %v1345_v25  ;;  %v4836_v35 = vpop.f32.mrf.mxu0  ;;  %v6399_v28 = vld [vmem:[#allocation2 + $0x29] sm:$0xff]  ;;  %v6401_v3 = vld [vmem:[#allocation2 + $0x31] sm:$0xff]  ;;  %v960_v16 = vadd.f32 %v6236_v12, %v6234_v10 }
 0x15e   : > { %4989 = vmatmul.mubr.f32.gmra.mxu0 %v2108_v23  ;;  %5200 = vmatpush3.msra.mxu1 %v4204_v49  ;;  %2143 = vst [vmem:[#allocation2 + $0x50] sm:$0xff] %v2109_v0  ;;  %v1873_v24 = vmax.f32 %v1839_v26, 0.0  ;;  %v1347_v59 = vadd.f32 %v4836_v35, %v6226_v48  ;;  %v4186_v23 = vld [vmem:[%s6903_s1 + $0x350] sm:$0xff]  ;;  %v6428_v34 = vpop.permute.xlu0 %2031  ;;  %v962_v10 = vadd.f32 %v6242_v51, %v6240_v18 }
 0x15f   : > { %v2112_v39 = vmul.f32 %v6311_v61, %v1874_v5  ;;  %v1732_v8 = vadd.f32 %v1585_v40, %v1344_v2  ;;  %v4919_v52 = vpop.f32.mrf.mxu1  ;;  %5066 = vmatmul.mubr.f32.gmra.mxu1 %v6399_v28  ;;  %4991 = vmatprep.mubr.f32.mxu0 %v2109_v0  ;;  %v1842_v6 = vadd.f32 %v6294_v41, %v1733_v32  ;;  %v1207_v54 = vpop.f32.mrf.mxu0 }
 0x160   : > { %5068 = vmatprep.mubr.f32.mxu1 %v6401_v3  ;;  %v2111_v61 = vmul.f32 %v6320_v60, %v1873_v24  ;;  %v1735_v21 = vadd.f32 %v4919_v52, %v1347_v59  ;;  %v1346_v22 = vadd.f32 %v1207_v54, %v958_v29  ;;  %5201 = vmatprep.subr.mxu1 %v4203_v4  ;;  %v6452_v2 = vpop.permute.xlu1 %2046 }
 0x161   : > { %2146 = vst [vmem:[#allocation2 + $0x68] sm:$0xff] %v2112_v39  ;;  %v1841_v48 = vadd.f32 %v6294_v41, %v1732_v8  ;;  %v1595_v15 = vpop.f32.mrf.mxu1  ;;  %v1876_v7 = vmax.f32 %v1842_v6, 0.0  ;;  %v4839_v37 = vpop.f32.mrf.mxu0  ;;  %5202 = vmatpush3.msra.mxu1 %v4203_v4  ;;  %5120 = vmatprep.subr.mxu0 %v4186_v23  ;;  %v964_v8 = vadd.f32 %v6248_v19, %v6246_v1  ;;  %v4200_v1 = vld [vmem:[%s6903_s1 + $0x3c0] sm:$0xff] }
 0x162   : > { %4992 = vmatmul.mubr.f32.gmra.mxu0 %v2110_v47  ;;  %2145 = vst [vmem:[#allocation2 + $0x60] sm:$0xff] %v2111_v61  ;;  %v1844_v60 = vadd.f32 %v6294_v41, %v1735_v21  ;;  %v1734_v27 = vadd.f32 %v1595_v15, %v1346_v22  ;;  %v1349_v42 = vadd.f32 %v4839_v37, %v6232_v53  ;;  %v6424_v55 = vld [vmem:[#allocation2 + $0x39] sm:$0xff]  ;;  %v6426_v44 = vld [vmem:[#allocation2 + $0x41] sm:$0xff]  ;;  %v6460_v24 = vpop.permute.xlu0 %2041 }
 0x163   : > { %v1875_v17 = vmax.f32 %v1841_v48, 0.0  ;;  %v4922_v33 = vpop.f32.mrf.mxu1  ;;  %4994 = vmatprep.mubr.f32.mxu0 %v2111_v61  ;;  %v2114_v31 = vmul.f32 %v6334_v9, %v1876_v7  ;;  %5069 = vmatmul.mubr.f32.gmra.mxu1 %v6424_v55  ;;  %v1217_v49 = vpop.f32.mrf.mxu0  ;;  %v4185_v53 = vld [vmem:[%s6903_s1 + $0x348] sm:$0xff] }
 0x164   : > { %5121 = vmatpush3.msra.mxu0 %v4186_v23  ;;  %v1878_v56 = vmax.f32 %v1844_v60, 0.0  ;;  %v1843_v62 = vadd.f32 %v6294_v41, %v1734_v27  ;;  %v1737_v11 = vadd.f32 %v4922_v33, %v1349_v42  ;;  %5071 = vmatprep.mubr.f32.mxu1 %v6426_v44  ;;  %v1348_v12 = vadd.f32 %v1217_v49, %v960_v16  ;;  %v6924_v48 = vld [vmem:[#allocation4_spill] sm:$0xff]  ;;  %v6481_v27 = vpop.permute.xlu1 %2056 }
 0x165   : > { %v2113_v47 = vmul.f32 %v6341_v46, %v1875_v17  ;;  %v1605_v36 = vpop.f32.mrf.mxu1  ;;  %5203 = vmatprep.subr.mxu1 %v4202_v63  ;;  %2148 = vst [vmem:[#allocation2 + $0x78] sm:$0xff] %v2114_v31  ;;  %v4842_v9 = vpop.f32.mrf.mxu0  ;;  %v6442_v25 = vld [vmem:[#allocation2 + $0x49] sm:$0xff]  ;;  %v6444_v30 = vld [vmem:[#allocation2 + $0x51] sm:$0xff]  ;;  %5122 = vmatprep.subr.mxu0 %v4185_v53 }
 0x166   : > { %4995 = vmatmul.mubr.f32.gmra.mxu0 %v2112_v39  ;;  %5204 = vmatpush3.msra.mxu1 %v4202_v63  ;;  %v4201_v46 = vld [vmem:[%s6903_s1 + $0x3c8] sm:$0xff]  ;;  %v2116_v0 = vmul.f32 %v6354_v57, %v1878_v56  ;;  %v1877_v5 = vmax.f32 %v1843_v62, 0.0  ;;  %v1846_v26 = vadd.f32 %v6294_v41, %v1737_v11  ;;  %v1351_v18 = vadd.f32 %v4842_v9, %v6238_v14  ;;  %v4184_v14 = vld [vmem:[%s6903_s1 + $0x340] sm:$0xff]  ;;  %v6493_v11 = vpop.permute.xlu0 %2051 }
 0x167   : > { %2147 = vst [vmem:[#allocation2 + $0x70] sm:$0xff] %v2113_v47  ;;  %v4925_v51 = vpop.f32.mrf.mxu1  ;;  %4997 = vmatprep.mubr.f32.mxu0 %v2113_v47  ;;  %v1736_v40 = vadd.f32 %v1605_v36, %v1348_v12  ;;  %5072 = vmatmul.mubr.f32.gmra.mxu1 %v6442_v25  ;;  %v1227_v29 = vpop.f32.mrf.mxu0  ;;  %v6925_v36 = vld [vmem:[#allocation5_spill] sm:$0xff] }
 0x168   : > { %5123 = vmatpush3.msra.mxu0 %v4185_v53  ;;  %2150 = vst [vmem:[#allocation2 + $0x88] sm:$0xff] %v2116_v0  ;;  %v2115_v32 = vmul.f32 %v6368_v58, %v1877_v5  ;;  %v1880_v35 = vmax.f32 %v1846_v26, 0.0  ;;  %v1739_v57 = vadd.f32 %v4925_v51, %v1351_v18  ;;  %v1350_v4 = vadd.f32 %v1227_v29, %v962_v10  ;;  %v4182_v18 = vld [vmem:[%s6903_s1 + $0x330] sm:$0xff] }
 0x169   : > { %5074 = vmatprep.mubr.f32.mxu1 %v6444_v30  ;;  %v1615_v39 = vpop.f32.mrf.mxu1  ;;  %5205 = vmatprep.subr.mxu1 %v4201_v46  ;;  %v1845_v59 = vadd.f32 %v6294_v41, %v1736_v40  ;;  %v4845_v52 = vpop.f32.mrf.mxu0  ;;  %v6465_v58 = vld [vmem:[#allocation2 + $0x59] sm:$0xff]  ;;  %v6467_v6 = vld [vmem:[#allocation2 + $0x61] sm:$0xff] }
 0x16a   : > { %4998 = vmatmul.mubr.f32.gmra.mxu0 %v2114_v31  ;;  %5206 = vmatpush3.msra.mxu1 %v4201_v46  ;;  %2149 = vst [vmem:[#allocation2 + $0x80] sm:$0xff] %v2115_v32  ;;  %v2118_v54 = vmul.f32 %v6389_v38, %v1880_v35  ;;  %v1848_v23 = vadd.f32 %v6294_v41, %v1739_v57  ;;  %v4183_v38 = vld [vmem:[%s6903_s1 + $0x338] sm:$0xff] }
 0x16b   : > { %v1738_v61 = vadd.f32 %v1615_v39, %v1350_v4  ;;  %v1353_v21 = vadd.f32 %v4845_v52, %v6924_v48  ;;  %v4928_v22 = vpop.f32.mrf.mxu1  ;;  %5000 = vmatprep.mubr.f32.mxu0 %v2115_v32  ;;  %v1879_v19 = vmax.f32 %v1845_v59, 0.0  ;;  %5075 = vmatmul.mubr.f32.gmra.mxu1 %v6465_v58  ;;  %v1237_v15 = vpop.f32.mrf.mxu0  ;;  %v6927_v4 = vld [vmem:[#allocation7_spill] sm:$0xff]  ;;  %v6928_v48 = vld [vmem:[#allocation8_spill] sm:$0xff] }
 0x16c   : > { %5124 = vmatprep.subr.mxu0 %v4184_v14  ;;  %2152 = vst [vmem:[#allocation2 + $0x98] sm:$0xff] %v2118_v54  ;;  %v1882_v7 = vmax.f32 %v1848_v23, 0.0  ;;  %v1352_v17 = vadd.f32 %v1237_v15, %v964_v8  ;;  %5077 = vmatprep.mubr.f32.mxu1 %v6467_v6  ;;  %v4198_v8 = vld [vmem:[%s6903_s1 + $0x3b0] sm:$0xff]  ;;  %v2067_v59 = vpop.permute.xlu1 %2066 }
 0x16d   : > { %v1847_v37 = vadd.f32 %v6294_v41, %v1738_v61  ;;  %v1741_v63 = vadd.f32 %v4928_v22, %v1353_v21  ;;  %v1625_v60 = vpop.f32.mrf.mxu1  ;;  %5125 = vmatpush3.msra.mxu0 %v4184_v14  ;;  %v2117_v42 = vmul.f32 %v6395_v43, %v1879_v19  ;;  %v4848_v33 = vpop.f32.mrf.mxu0  ;;  %5207 = vmatprep.subr.mxu1 %v4200_v1  ;;  %v4199_v43 = vld [vmem:[%s6903_s1 + $0x3b8] sm:$0xff] }
 0x16e   : > { %v6484_v16 = vld [vmem:[#allocation2 + $0x69] sm:$0xff]  ;;  %v6486_v31 = vld [vmem:[#allocation2 + $0x71] sm:$0xff]  ;;  %5001 = vmatmul.mubr.f32.gmra.mxu0 %v2116_v0  ;;  %v2120_v49 = vmul.f32 %v6417_v20, %v1882_v7  ;;  %v1740_v56 = vadd.f32 %v1625_v60, %v1352_v17  ;;  %5208 = vmatpush3.msra.mxu1 %v4200_v1  ;;  %v1355_v10 = vadd.f32 %v4848_v33, %v6925_v36  ;;  %v2062_v19 = vpop.permute.xlu0 %2061 }
 0x16f   : > { %v1881_v53 = vmax.f32 %v1847_v37, 0.0  ;;  %v1850_v47 = vadd.f32 %v6294_v41, %v1741_v63  ;;  %v4931_v62 = vpop.f32.mrf.mxu1  ;;  %5126 = vmatprep.subr.mxu0 %v4183_v38  ;;  %2151 = vst [vmem:[#allocation2 + $0x90] sm:$0xff] %v2117_v42  ;;  %5078 = vmatmul.mubr.f32.gmra.mxu1 %v6484_v16  ;;  %v1247_v12 = vpop.f32.mrf.mxu0  ;;  %v6926_v0 = vld [vmem:[#allocation6_spill] sm:$0xff]  ;;  %v4181_v1 = vld [vmem:[%s6903_s1 + $0x328] sm:$0xff]  ;;  %v6929_v63 = vld [vmem:[#allocation9_spill] sm:$0xff] }
 0x170   : > { %5003 = vmatprep.mubr.f32.mxu0 %v2117_v42  ;;  %2154 = vst [vmem:[#allocation2 + $0xa8] sm:$0xff] %v2120_v49  ;;  %v1849_v46 = vadd.f32 %v6294_v41, %v1740_v56  ;;  %v1354_v5 = vadd.f32 %v1247_v12, %v6926_v0  ;;  %5080 = vmatprep.mubr.f32.mxu1 %v6486_v31  ;;  %v4180_v12 = vld [vmem:[%s6903_s1 + $0x320] sm:$0xff] }
 0x171   : > { %v2119_v20 = vmul.f32 %v6428_v34, %v1881_v53  ;;  %v1884_v9 = vmax.f32 %v1850_v47, 0.0  ;;  %v1635_v26 = vpop.f32.mrf.mxu1  ;;  %5127 = vmatpush3.msra.mxu0 %v4183_v38  ;;  %v1743_v51 = vadd.f32 %v4931_v62, %v1355_v10  ;;  %v4851_v40 = vpop.f32.mrf.mxu0  ;;  %v6504_v29 = vld [vmem:[#allocation2 + $0x79] sm:$0xff]  ;;  %v6506_v32 = vld [vmem:[#allocation2 + $0x81] sm:$0xff]  ;;  %5209 = vmatprep.subr.mxu1 %v4199_v43 }
 0x172   : > { %5004 = vmatmul.mubr.f32.gmra.mxu0 %v2118_v54  ;;  %v1883_v35 = vmax.f32 %v1849_v46, 0.0  ;;  %v1742_v57 = vadd.f32 %v1635_v26, %v1354_v5  ;;  %v1357_v39 = vadd.f32 %v4851_v40, %v6927_v4  ;;  %5210 = vmatpush3.msra.mxu1 %v4199_v43  ;;  %v4197_v53 = vld [vmem:[%s6903_s1 + $0x3a8] sm:$0xff]  ;;  %v2072_v4 = vpop.permute.xlu0 %2071 }
 0x173   : > { %2153 = vst [vmem:[#allocation2 + $0xa0] sm:$0xff] %v2119_v20  ;;  %v2122_v34 = vmul.f32 %v6452_v2, %v1884_v9  ;;  %v4934_v14 = vpop.f32.mrf.mxu1  ;;  %5006 = vmatprep.mubr.f32.mxu0 %v2119_v20  ;;  %v1852_v52 = vadd.f32 %v6294_v41, %v1743_v51  ;;  %5081 = vmatmul.mubr.f32.gmra.mxu1 %v6504_v29  ;;  %v1257_v54 = vpop.f32.mrf.mxu0  ;;  %v6931_v51 = vld [vmem:[#allocation11_spill] sm:$0xff] }
 0x174   : > { %5128 = vmatprep.subr.mxu0 %v4182_v18  ;;  %v2121_v2 = vmul.f32 %v6460_v24, %v1883_v35  ;;  %v1851_v23 = vadd.f32 %v6294_v41, %v1742_v57  ;;  %v1745_v61 = vadd.f32 %v4934_v14, %v1357_v39  ;;  %v1356_v21 = vadd.f32 %v1257_v54, %v6928_v48  ;;  %v2077_v20 = vpop.permute.xlu1 %2076  ;;  %v4196_v57 = vld [vmem:[%s6903_s1 + $0x3a0] sm:$0xff] }
 0x175   : > { %2156 = vst [vmem:[#allocation2 + $0xb8] sm:$0xff] %v2122_v34  ;;  %5083 = vmatprep.mubr.f32.mxu1 %v6506_v32  ;;  %v1645_v22 = vpop.f32.mrf.mxu1  ;;  %v1886_v15 = vmax.f32 %v1852_v52, 0.0  ;;  %v4854_v38 = vpop.f32.mrf.mxu0  ;;  %5211 = vmatprep.subr.mxu1 %v4198_v8  ;;  %v6932_v52 = vld [vmem:[#allocation12_spill] sm:$0xff] }
 0x176   : > { %5007 = vmatmul.mubr.f32.gmra.mxu0 %v2120_v49  ;;  %2155 = vst [vmem:[#allocation2 + $0xb0] sm:$0xff] %v2121_v2  ;;  %v1885_v7 = vmax.f32 %v1851_v23, 0.0  ;;  %v1854_v24 = vadd.f32 %v6294_v41, %v1745_v61  ;;  %v1744_v37 = vadd.f32 %v1645_v22, %v1356_v21  ;;  %v1359_v17 = vadd.f32 %v4854_v38, %v6929_v63  ;;  %v6524_v42 = vld [vmem:[#allocation2 + $0x89] sm:$0xff]  ;;  %v6526_v33 = vld [vmem:[#allocation2 + $0x91] sm:$0xff] }
 0x177   : > { %v4937_v60 = vpop.f32.mrf.mxu1  ;;  %5129 = vmatpush3.msra.mxu0 %v4182_v18  ;;  %5009 = vmatprep.mubr.f32.mxu0 %v2121_v2  ;;  %v2124_v49 = vmul.f32 %v6481_v27, %v1886_v15  ;;  %v1267_v47 = vpop.f32.mrf.mxu0  ;;  %v6930_v27 = vld [vmem:[#allocation10_spill] sm:$0xff]  ;;  %v6933_v15 = vld [vmem:[#allocation13_spill] sm:$0xff] }
 0x178   : > { %5084 = vmatmul.mubr.f32.gmra.mxu1 %v6524_v42  ;;  %5130 = vmatprep.subr.mxu0 %v4181_v1  ;;  %v2123_v56 = vmul.f32 %v6493_v11, %v1885_v7  ;;  %v1888_v62 = vmax.f32 %v1854_v24, 0.0  ;;  %v1853_v43 = vadd.f32 %v6294_v41, %v1744_v37  ;;  %v1747_v36 = vadd.f32 %v4937_v60, %v1359_v17  ;;  %v4179_v24 = vld [vmem:[%s6903_s1 + $0x318] sm:$0xff]  ;;  %v2087_v37 = vpop.permute.xlu1 %2086 }
 0x179   : > { %5086 = vmatprep.mubr.f32.mxu1 %v6526_v33  ;;  %v1655_v10 = vpop.f32.mrf.mxu1  ;;  %5212 = vmatpush3.msra.mxu1 %v4198_v8  ;;  %2158 = vst [vmem:[#allocation2 + $0xc8] sm:$0xff] %v2124_v49  ;;  %v1358_v9 = vadd.f32 %v1267_v47, %v6930_v27  ;;  %v4857_v46 = vpop.f32.mrf.mxu0  ;;  %v4195_v60 = vld [vmem:[%s6903_s1 + $0x398] sm:$0xff] }
 0x17a   : > { %v6540_v0 = vld [vmem:[#allocation2 + $0x99] sm:$0xff]  ;;  %v6542_v11 = vld [vmem:[#allocation2 + $0xa1] sm:$0xff]  ;;  %5010 = vmatmul.mubr.f32.gmra.mxu0 %v2122_v34  ;;  %5213 = vmatprep.subr.mxu1 %v4197_v53  ;;  %2157 = vst [vmem:[#allocation2 + $0xc0] sm:$0xff] %v2123_v56  ;;  %v2126_v5 = vmul.f32 %v2067_v59, %v1888_v62  ;;  %v1887_v26 = vmax.f32 %v1853_v43, 0.0  ;;  %v1856_v18 = vadd.f32 %v6294_v41, %v1747_v36  ;;  %v2082_v43 = vpop.permute.xlu0 %2081 }
 0x17b   : > { %v1361_v40 = vadd.f32 %v4857_v46, %v6931_v51  ;;  %v4940_v35 = vpop.f32.mrf.mxu1  ;;  %5131 = vmatpush3.msra.mxu0 %v4181_v1  ;;  %5012 = vmatprep.mubr.f32.mxu0 %v2123_v56  ;;  %v1746_v39 = vadd.f32 %v1655_v10, %v1358_v9  ;;  %v1277_v34 = vpop.f32.mrf.mxu0  ;;  %v6934_v56 = vld [vmem:[#allocation14_spill] sm:$0xff] }
 0x17c   : > { %5087 = vmatmul.mubr.f32.gmra.mxu1 %v6540_v0  ;;  %5132 = vmatprep.subr.mxu0 %v4180_v12  ;;  %2160 = vst [vmem:[#allocation2 + $0xd8] sm:$0xff] %v2126_v5  ;;  %v2125_v14 = vmul.f32 %v2062_v19, %v1887_v26  ;;  %v1890_v8 = vmax.f32 %v1856_v18, 0.0  ;;  %v1360_v54 = vadd.f32 %v1277_v34, %v6932_v52  ;;  %v4178_v18 = vld [vmem:[%s6903_s1 + $0x310] sm:$0xff]  ;;  %v4193_v52 = vld [vmem:[%s6903_s1 + $0x388] sm:$0xff] }
 0x17d   : > { %v1749_v59 = vadd.f32 %v4940_v35, %v1361_v40  ;;  %5089 = vmatprep.mubr.f32.mxu1 %v6542_v11  ;;  %v1665_v2 = vpop.f32.mrf.mxu1  ;;  %5214 = vmatpush3.msra.mxu1 %v4197_v53  ;;  %v1855_v23 = vadd.f32 %v6294_v41, %v1746_v39  ;;  %v4860_v61 = vpop.f32.mrf.mxu0  ;;  %v6553_v48 = vld [vmem:[#allocation2 + $0xa9] sm:$0xff]  ;;  %v6555_v21 = vld [vmem:[#allocation2 + $0xb1] sm:$0xff] }
 0x17e   : > { %5013 = vmatmul.mubr.f32.gmra.mxu0 %v2124_v49  ;;  %5215 = vmatprep.subr.mxu1 %v4196_v57  ;;  %2159 = vst [vmem:[#allocation2 + $0xd0] sm:$0xff] %v2125_v14  ;;  %v2128_v22 = vmul.f32 %v2077_v20, %v1890_v8  ;;  %v1748_v19 = vadd.f32 %v1665_v2, %v1360_v54  ;;  %v4194_v35 = vld [vmem:[%s6903_s1 + $0x390] sm:$0xff]  ;;  %v2092_v8 = vpop.permute.xlu0 %2091 }
 0x17f   : > { %v1858_v1 = vadd.f32 %v6294_v41, %v1749_v59  ;;  %v1363_v38 = vadd.f32 %v4860_v61, %v6933_v15  ;;  %v4943_v7 = vpop.f32.mrf.mxu1  ;;  %5133 = vmatpush3.msra.mxu0 %v4180_v12  ;;  %v1889_v63 = vmax.f32 %v1855_v23, 0.0  ;;  %v1287_v17 = vpop.f32.mrf.mxu0  ;;  %5015 = vmatprep.mubr.f32.mxu0 %v2125_v14  ;;  %v4176_v23 = vld [vmem:[%s6903_s1 + $0x300] sm:$0xff] }
 0x180   : > { %5090 = vmatmul.mubr.f32.gmra.mxu1 %v6553_v48  ;;  %2162 = vst [vmem:[#allocation2 + $0xe8] sm:$0xff] %v2128_v22  ;;  %v1857_v49 = vadd.f32 %v6294_v41, %v1748_v19  ;;  %v1362_v62 = vadd.f32 %v1287_v17, %v6934_v56  ;;  %5134 = vmatprep.subr.mxu0 %v4179_v24  ;;  %v4192_v61 = vld [vmem:[%s6903_s1 + $0x380] sm:$0xff] }
 0x181   : > { %v1892_v53 = vmax.f32 %v1858_v1, 0.0  ;;  %v1751_v47 = vadd.f32 %v4943_v7, %v1363_v38  ;;  %5092 = vmatprep.mubr.f32.mxu1 %v6555_v21  ;;  %5216 = vmatpush3.msra.mxu1 %v4196_v57  ;;  %v2127_v36 = vmul.f32 %v2072_v4, %v1889_v63  ;;  %v1675_v10 = vpop.f32.mrf.mxu1  ;;  %v6569_v12 = vld [vmem:[#allocation2 + $0xb9] sm:$0xff]  ;;  %v6571_v20 = vld [vmem:[#allocation2 + $0xc1] sm:$0xff]  ;;  %v2097_v57 = vpop.permute.xlu1 %2096 }
 0x182   : > { %5016 = vmatmul.mubr.f32.gmra.mxu0 %v2126_v5  ;;  %v1891_v9 = vmax.f32 %v1857_v49, 0.0  ;;  %v1750_v26 = vadd.f32 %v1675_v10, %v1362_v62  ;;  %5217 = vmatprep.subr.mxu1 %v4195_v60  ;;  %v3263_v38 = vld [vmem:[#allocation2 + $0x12] sm:$0xff]  ;;  %v3264_v7 = vld [vmem:[#allocation2 + $0x1a] sm:$0xff] }
 0x183   : > { %v2130_v27 = vmul.f32 %v2087_v37, %v1892_v53  ;;  %v1860_v46 = vadd.f32 %v6294_v41, %v1751_v47  ;;  %5135 = vmatpush3.msra.mxu0 %v4179_v24  ;;  %2161 = vst [vmem:[#allocation2 + $0xe0] sm:$0xff] %v2127_v36  ;;  %5018 = vmatprep.mubr.f32.mxu0 %v2127_v36  ;;  %v3285_v24 = vld [vmem:[#allocation2 + $0xc2] sm:$0xff]  ;;  %v2907_v53 = vld [vmem:[#allocation2 + $0x111] sm:$0xff]  ;;  %v2908_v47 = vld [vmem:[#allocation2 + $0x119] sm:$0xff] }
 0x184   : > { %5093 = vmatmul.mubr.f32.gmra.mxu1 %v6569_v12  ;;  %v2129_v51 = vmul.f32 %v2082_v43, %v1891_v9  ;;  %v1859_v5 = vadd.f32 %v6294_v41, %v1750_v26  ;;  %5136 = vmatprep.subr.mxu0 %v4178_v18  ;;  %v4177_v41 = vld [vmem:[%s6903_s1 + $0x308] sm:$0xff]  ;;  %v3295_v36 = vld [vmem:[#allocation2 + $0x112] sm:$0xff] }
 0x185   : > { %2164 = vst [vmem:[#allocation2 + $0xf8] sm:$0xff] %v2130_v27  ;;  %v1894_v40 = vmax.f32 %v1860_v46, 0.0  ;;  %5095 = vmatprep.mubr.f32.mxu1 %v6571_v20  ;;  %5218 = vmatpush3.msra.mxu1 %v4195_v60  ;;  %v6583_v4 = vld [vmem:[#allocation2 + $0xc9] sm:$0xff]  ;;  %v6585_v39 = vld [vmem:[#allocation2 + $0xd1] sm:$0xff] }
 0x186   : > { %5019 = vmatmul.mubr.f32.gmra.mxu0 %v2128_v22  ;;  %2163 = vst [vmem:[#allocation2 + $0xf0] sm:$0xff] %v2129_v51  ;;  %v1893_v14 = vmax.f32 %v1859_v5, 0.0  ;;  %5219 = vmatprep.subr.mxu1 %v4194_v35  ;;  %v3286_v37 = vld [vmem:[#allocation2 + $0xca] sm:$0xff]  ;;  %v3287_v63 = vld [vmem:[#allocation2 + $0xd2] sm:$0xff] }
 0x187   : > { %v2132_v34 = vmul.f32 %v2097_v57, %v1894_v40  ;;  %5137 = vmatpush3.msra.mxu0 %v4178_v18  ;;  %5021 = vmatprep.mubr.f32.mxu0 %v2129_v51 }
 0x188   : > { %5096 = vmatmul.mubr.f32.gmra.mxu1 %v6583_v4  ;;  %v2131_v59 = vmul.f32 %v2092_v8, %v1893_v14  ;;  %5138 = vmatprep.subr.mxu0 %v4177_v41 }
 0x189   : > { %2166 = vst [vmem:[#allocation2 + $0x108] sm:$0xff] %v2132_v34  ;;  %5098 = vmatprep.mubr.f32.mxu1 %v6585_v39  ;;  %5220 = vmatpush3.msra.mxu1 %v4194_v35 }
 0x18a   : > { %5022 = vmatmul.mubr.f32.gmra.mxu0 %v2130_v27  ;;  %2165 = vst [vmem:[#allocation2 + $0x100] sm:$0xff] %v2131_v59  ;;  %v6595_v54 = vld [vmem:[#allocation2 + $0xd9] sm:$0xff]  ;;  %v6597_v2 = vld [vmem:[#allocation2 + $0xe1] sm:$0xff]  ;;  %5221 = vmatprep.subr.mxu1 %v4193_v52 }
 0x18b   : > { %5139 = vmatpush3.msra.mxu0 %v4177_v41  ;;  %5024 = vmatprep.mubr.f32.mxu0 %v2131_v59  ;;  %v3288_v17 = vld [vmem:[#allocation2 + $0xda] sm:$0xff]  ;;  %v3289_v60 = vld [vmem:[#allocation2 + $0xe2] sm:$0xff] }
 0x18c   : > { %5099 = vmatmul.mubr.f32.gmra.mxu1 %v6595_v54  ;;  %5140 = vmatprep.subr.mxu0 %v4176_v23 }
 0x18d   : > { %5101 = vmatprep.mubr.f32.mxu1 %v6597_v2  ;;  %5222 = vmatpush3.msra.mxu1 %v4193_v52  ;;  %v6607_v22 = vld [vmem:[#allocation2 + $0xe9] sm:$0xff]  ;;  %v6609_v1 = vld [vmem:[#allocation2 + $0xf1] sm:$0xff] }
 0x18e   : > { %5025 = vmatmul.mubr.f32.gmra.mxu0 %v2132_v34  ;;  %5223 = vmatprep.subr.mxu1 %v4192_v61  ;;  %v3290_v49 = vld [vmem:[#allocation2 + $0xea] sm:$0xff]  ;;  %v3291_v56 = vld [vmem:[#allocation2 + $0xf2] sm:$0xff] }
 0x18f   : > { %5142 = vmatprep.mubr.f32.mxu0 %v6359_v45  ;;  %5141 = vmatpush3.msra.mxu0 %v4176_v23 }
 0x190   : > { %5102 = vmatmul.mubr.f32.gmra.mxu1 %v6607_v22  ;;  %v6623_v45 = vld [vmem:[#allocation2 + $0x109] sm:$0xff] }
 0x191   : > { %5104 = vmatprep.mubr.f32.mxu1 %v6609_v1  ;;  %5224 = vmatpush3.msra.mxu1 %v4192_v61  ;;  %v6614_v19 = vld [vmem:[#allocation2 + $0xf9] sm:$0xff]  ;;  %v6616_v15 = vld [vmem:[#allocation2 + $0x101] sm:$0xff]  ;;  %v3294_v10 = vld [vmem:[#allocation2 + $0x10a] sm:$0xff] }
 0x192   : > { %5143 = vmatmul.mubr.f32.vlgmr.msra.gmra.mxu0 %v6379_v13  ;;  %v3265_v13 = vld [vmem:[#allocation2 + $0x22] sm:$0xff]  ;;  %v3292_v62 = vld [vmem:[#allocation2 + $0xfa] sm:$0xff] }
 0x193   : > { %5145 = vmatprep.mubr.f32.mxu0 %v6381_v50  ;;  %v3266_v50 = vld [vmem:[#allocation2 + $0x2a] sm:$0xff]  ;;  %v3293_v43 = vld [vmem:[#allocation2 + $0x102] sm:$0xff] }
 0x194   : > { %5105 = vmatmul.mubr.f32.gmra.mxu1 %v6614_v19 }
 0x195   : > { %5107 = vmatprep.mubr.f32.mxu1 %v6616_v15 }
 0x196   : > { %5146 = vmatmul.mubr.f32.gmra.mxu0 %v6399_v28  ;;  %v3267_v28 = vld [vmem:[#allocation2 + $0x32] sm:$0xff] }
 0x197   : > { %5148 = vmatprep.mubr.f32.mxu0 %v6401_v3  ;;  %v3268_v3 = vld [vmem:[#allocation2 + $0x3a] sm:$0xff] }
 0x198   : > { %5108 = vmatmul.mubr.f32.gmra.mxu1 %v6623_v45 }
 0x199   : > { %5225 = vmatprep.mubr.f32.mxu1 %v3263_v38 }
 0x19a   : > { %5149 = vmatmul.mubr.f32.gmra.mxu0 %v6424_v55  ;;  %v3269_v55 = vld [vmem:[#allocation2 + $0x42] sm:$0xff] }
 0x19b   : > { %5151 = vmatprep.mubr.f32.mxu0 %v6426_v44  ;;  %v3270_v44 = vld [vmem:[#allocation2 + $0x4a] sm:$0xff] }
 0x19c   : > { %5226 = vmatmul.mubr.f32.vlgmr.msra.gmra.mxu1 %v3264_v7 }
 0x19d   : > { %5228 = vmatprep.mubr.f32.mxu1 %v3265_v13 }
 0x19e   : > { %5152 = vmatmul.mubr.f32.gmra.mxu0 %v6442_v25  ;;  %v3271_v25 = vld [vmem:[#allocation2 + $0x52] sm:$0xff] }
 0x19f   : > { %5154 = vmatprep.mubr.f32.mxu0 %v6444_v30  ;;  %v3272_v30 = vld [vmem:[#allocation2 + $0x5a] sm:$0xff] }
 0x1a0   : > { %5229 = vmatmul.mubr.f32.gmra.mxu1 %v3266_v50 }
 0x1a1   : > { %5231 = vmatprep.mubr.f32.mxu1 %v3267_v28 }
 0x1a2   : > { %5155 = vmatmul.mubr.f32.gmra.mxu0 %v6465_v58  ;;  %v3273_v58 = vld [vmem:[#allocation2 + $0x62] sm:$0xff] }
 0x1a3   : > { %5157 = vmatprep.mubr.f32.mxu0 %v6467_v6  ;;  %v3274_v6 = vld [vmem:[#allocation2 + $0x6a] sm:$0xff] }
 0x1a4   : > { %5232 = vmatmul.mubr.f32.gmra.mxu1 %v3268_v3 }
 0x1a5   : > { %5234 = vmatprep.mubr.f32.mxu1 %v3269_v55 }
 0x1a6   : > { %5158 = vmatmul.mubr.f32.gmra.mxu0 %v6484_v16  ;;  %v3275_v16 = vld [vmem:[#allocation2 + $0x72] sm:$0xff] }
 0x1a7   : > { %5160 = vmatprep.mubr.f32.mxu0 %v6486_v31  ;;  %v3276_v31 = vld [vmem:[#allocation2 + $0x7a] sm:$0xff] }
 0x1a8   : > { %5235 = vmatmul.mubr.f32.gmra.mxu1 %v3270_v44 }
 0x1a9   : > { %5237 = vmatprep.mubr.f32.mxu1 %v3271_v25 }
 0x1aa   : > { %5161 = vmatmul.mubr.f32.gmra.mxu0 %v6504_v29  ;;  %v3277_v29 = vld [vmem:[#allocation2 + $0x82] sm:$0xff] }
 0x1ab   : > { %5163 = vmatprep.mubr.f32.mxu0 %v6506_v32  ;;  %v3278_v32 = vld [vmem:[#allocation2 + $0x8a] sm:$0xff] }
 0x1ac   : > { %5238 = vmatmul.mubr.f32.gmra.mxu1 %v3272_v30 }
 0x1ad   : > { %5240 = vmatprep.mubr.f32.mxu1 %v3273_v58 }
 0x1ae   : > { %5164 = vmatmul.mubr.f32.gmra.mxu0 %v6524_v42  ;;  %v3279_v42 = vld [vmem:[#allocation2 + $0x92] sm:$0xff] }
 0x1af   : > { %5166 = vmatprep.mubr.f32.mxu0 %v6526_v33  ;;  %v3280_v33 = vld [vmem:[#allocation2 + $0x9a] sm:$0xff] }
 0x1b0   : > { %5241 = vmatmul.mubr.f32.gmra.mxu1 %v3274_v6 }
 0x1b1   : > { %5243 = vmatprep.mubr.f32.mxu1 %v3275_v16 }
 0x1b2   : > { %5167 = vmatmul.mubr.f32.gmra.mxu0 %v6540_v0  ;;  %v3281_v0 = vld [vmem:[#allocation2 + $0xa2] sm:$0xff] }
 0x1b3   : > { %5169 = vmatprep.mubr.f32.mxu0 %v6542_v11  ;;  %v3282_v11 = vld [vmem:[#allocation2 + $0xaa] sm:$0xff] }
 0x1b4   : > { %5244 = vmatmul.mubr.f32.gmra.mxu1 %v3276_v31 }
 0x1b5   : > { %5246 = vmatprep.mubr.f32.mxu1 %v3277_v29 }
 0x1b6   : > { %5170 = vmatmul.mubr.f32.gmra.mxu0 %v6553_v48  ;;  %v3283_v48 = vld [vmem:[#allocation2 + $0xb2] sm:$0xff] }
 0x1b7   : > { %5172 = vmatprep.mubr.f32.mxu0 %v6555_v21  ;;  %v3284_v21 = vld [vmem:[#allocation2 + $0xba] sm:$0xff] }
 0x1b8   : > { %5247 = vmatmul.mubr.f32.gmra.mxu1 %v3278_v32 }
 0x1b9   : > { %5249 = vmatprep.mubr.f32.mxu1 %v3279_v42 }
 0x1ba   : > { %5173 = vmatmul.mubr.f32.gmra.mxu0 %v6569_v12  ;;  %v3296_v12 = vld [vmem:[#allocation2 + $0x11a] sm:$0xff] }
 0x1bb   : > { %5175 = vmatprep.mubr.f32.mxu0 %v6571_v20 }
 0x1bc   : > { %5250 = vmatmul.mubr.f32.gmra.mxu1 %v3280_v33 }
 0x1bd   : > { %5252 = vmatprep.mubr.f32.mxu1 %v3281_v0 }
 0x1be   : > { %5176 = vmatmul.mubr.f32.gmra.mxu0 %v6583_v4 }
 0x1bf   : > { %5178 = vmatprep.mubr.f32.mxu0 %v6585_v39 }
 0x1c0   : > { %5253 = vmatmul.mubr.f32.gmra.mxu1 %v3282_v11 }
 0x1c1   : > { %5255 = vmatprep.mubr.f32.mxu1 %v3283_v48 }
 0x1c2   : > { %5179 = vmatmul.mubr.f32.gmra.mxu0 %v6595_v54 }
 0x1c3   : > { %5181 = vmatprep.mubr.f32.mxu0 %v6597_v2 }
 0x1c4   : > { %5256 = vmatmul.mubr.f32.gmra.mxu1 %v3284_v21 }
 0x1c5   : > { %5258 = vmatprep.mubr.f32.mxu1 %v3285_v24 }
 0x1c6   : > { %5182 = vmatmul.mubr.f32.gmra.mxu0 %v6607_v22 }
 0x1c7   : > { %5184 = vmatprep.mubr.f32.mxu0 %v6609_v1 }
 0x1c8   : > { %5259 = vmatmul.mubr.f32.gmra.mxu1 %v3286_v37 }
 0x1c9   : > { %5261 = vmatprep.mubr.f32.mxu1 %v3287_v63 }
 0x1ca   : > { %5185 = vmatmul.mubr.f32.gmra.mxu0 %v6614_v19 }
 0x1cb   : > { %5187 = vmatprep.mubr.f32.mxu0 %v6616_v15 }
 0x1cc   : > { %5262 = vmatmul.mubr.f32.gmra.mxu1 %v3288_v17 }
 0x1cd   : > { %5264 = vmatprep.mubr.f32.mxu1 %v3289_v60 }
 0x1ce   : > { %5188 = vmatmul.mubr.f32.gmra.mxu0 %v6623_v45 }
 0x1cf   : > { %5190 = vmatprep.mubr.f32.mxu0 %v2907_v53 }
 0x1d0   : > { %5265 = vmatmul.mubr.f32.gmra.mxu1 %v3290_v49 }
 0x1d1   : > { %5267 = vmatprep.mubr.f32.mxu1 %v3291_v56 }
 0x1d2   : > { %5191 = vmatmul.mubr.f32.gmra.mxu0 %v2908_v47 }
 0x1d4   : > { %5268 = vmatmul.mubr.f32.gmra.mxu1 %v3292_v62 }
 0x1d5   : > { %5270 = vmatprep.mubr.f32.mxu1 %v3293_v43 }
 0x1d8   : > { %5271 = vmatmul.mubr.f32.gmra.mxu1 %v3294_v10 }
 0x1d9   : > { %5273 = vmatprep.mubr.f32.mxu1 %v3295_v36 }
 0x1dc   : > { %5274 = vmatmul.mubr.f32.gmra.mxu1 %v3296_v12 }
 0x20b   : > { %v4978_v20 = vpop.f32.mrf.mxu0 }
 0x20d   : > { %v2284_v27 = vpop.f32.mrf.mxu0 }
 0x210   : > { %v4981_v9 = vpop.f32.mrf.mxu0 }
 0x212   : > { %v2294_v46 = vpop.f32.mrf.mxu0 }
 0x214   : > { %v4984_v26 = vpop.f32.mrf.mxu0 }
 0x216   : > { %v2304_v18 = vpop.f32.mrf.mxu0 }
 0x217   : > { %v5061_v51 = vpop.f32.mrf.mxu1 }
 0x218   : > { %v6654_v40 = vadd.f32 %v5061_v51, %v4978_v20 }
 0x219   : > { %v2604_v5 = vpop.f32.mrf.mxu1  ;;  %v4987_v57 = vpop.f32.mrf.mxu0 }
 0x21a   : > { %v6656_v35 = vadd.f32 %v2604_v5, %v2284_v27  ;;  %v6698_v5 = vpop.permute.xlu0 %3797 }
 0x21b   : > { %v5064_v4 = vpop.f32.mrf.mxu1  ;;  %v2314_v34 = vpop.f32.mrf.mxu0 }
 0x21c   : > { %v6658_v39 = vadd.f32 %v5064_v4, %v4981_v9 }
 0x21d   : > { %v2614_v14 = vpop.f32.mrf.mxu1 }
 0x21e   : > { %v6660_v41 = vadd.f32 %v2614_v14, %v2294_v46  ;;  %v4990_v8 = vpop.f32.mrf.mxu0  ;;  %v6694_v46 = vpop.permute.xlu1 %3802 }
 0x21f   : > { %v5067_v59 = vpop.f32.mrf.mxu1 }
 0x220   : > { %v6662_v52 = vadd.f32 %v5067_v59, %v4984_v26  ;;  %v2324_v54 = vpop.f32.mrf.mxu0 }
 0x221   : > { %v2624_v2 = vpop.f32.mrf.mxu1 }
 0x222   : > { %v6664_v23 = vadd.f32 %v2624_v2, %v2304_v18  ;;  %v4993_v61 = vpop.f32.mrf.mxu0 }
 0x223   : > { %v5070_v22 = vpop.f32.mrf.mxu1 }
 0x224   : > { %v2334_v1 = vpop.f32.mrf.mxu0  ;;  %v6666_v19 = vadd.f32 %v5070_v22, %v4987_v57 }
 0x225   : > { %v2634_v15 = vpop.f32.mrf.mxu1 }
 0x226   : > { %v4996_v45 = vpop.f32.mrf.mxu0  ;;  %v6668_v38 = vadd.f32 %v2634_v15, %v2314_v34 }
 0x227   : > { %v5073_v7 = vpop.f32.mrf.mxu1 }
 0x228   : > { %v2344_v13 = vpop.f32.mrf.mxu0  ;;  %v6670_v50 = vadd.f32 %v5073_v7, %v4990_v8 }
 0x229   : > { %v2644_v28 = vpop.f32.mrf.mxu1 }
 0x22a   : > { %v4999_v3 = vpop.f32.mrf.mxu0  ;;  %v6672_v55 = vadd.f32 %v2644_v28, %v2324_v54  ;;  %v6704_v54 = vpop.permute.xlu1 %3812 }
 0x22b   : > { %v5076_v44 = vpop.f32.mrf.mxu1 }
 0x22c   : > { %v2354_v25 = vpop.f32.mrf.mxu0  ;;  %v6674_v30 = vadd.f32 %v5076_v44, %v4993_v61 }
 0x22d   : > { %v2654_v58 = vpop.f32.mrf.mxu1 }
 0x22e   : > { %v5002_v6 = vpop.f32.mrf.mxu0  ;;  %v6676_v16 = vadd.f32 %v2654_v58, %v2334_v1  ;;  %v6708_v1 = vpop.permute.xlu0 %3807 }
 0x22f   : > { %v5079_v31 = vpop.f32.mrf.mxu1  ;;  %v6714_v44 = vpop.permute.xlu1 %3822 }
 0x230   : > { %v2364_v29 = vpop.f32.mrf.mxu0  ;;  %v6678_v32 = vadd.f32 %v5079_v31, %v4996_v45 }
 0x231   : > { %v2664_v42 = vpop.f32.mrf.mxu1 }
 0x232   : > { %v5005_v33 = vpop.f32.mrf.mxu0  ;;  %v6680_v0 = vadd.f32 %v2664_v42, %v2344_v13  ;;  %v6718_v31 = vpop.permute.xlu0 %3817 }
 0x233   : > { %v5082_v11 = vpop.f32.mrf.mxu1 }
 0x234   : > { %v2374_v48 = vpop.f32.mrf.mxu0  ;;  %v6682_v21 = vadd.f32 %v5082_v11, %v4999_v3 }
 0x235   : > { %v2674_v24 = vpop.f32.mrf.mxu1 }
 0x236   : > { %v5008_v37 = vpop.f32.mrf.mxu0  ;;  %v6684_v63 = vadd.f32 %v2674_v24, %v2354_v25 }
 0x238   : > { %v5085_v17 = vpop.f32.mrf.mxu1  ;;  %v2384_v60 = vpop.f32.mrf.mxu0 }
 0x239   : > { %v6686_v53 = vadd.f32 %v5085_v17, %v5002_v6 }
 0x23a   : > { %v2684_v49 = vpop.f32.mrf.mxu1  ;;  %v5011_v47 = vpop.f32.mrf.mxu0 }
 0x23b   : > { %v6688_v56 = vadd.f32 %v2684_v49, %v2364_v29 }
 0x23c   : > { %v5088_v62 = vpop.f32.mrf.mxu1  ;;  %v2394_v43 = vpop.f32.mrf.mxu0 }
 0x23d   : > { %v6690_v36 = vadd.f32 %v5088_v62, %v5005_v33 }
 0x23e   : > { %v2694_v10 = vpop.f32.mrf.mxu1  ;;  %v5014_v12 = vpop.f32.mrf.mxu0 }
 0x23f   : > { %v6692_v20 = vadd.f32 %v2694_v10, %v2374_v48 }
 0x240   : > { %v5091_v27 = vpop.f32.mrf.mxu1  ;;  %v2404_v9 = vpop.f32.mrf.mxu0 }
 0x241   : > { %v6696_v26 = vadd.f32 %v5091_v27, %v5008_v37  ;;  %v6724_v37 = vpop.permute.xlu1 %3832 }
 0x242   : > { %v2704_v18 = vpop.f32.mrf.mxu1  ;;  %v5017_v51 = vpop.f32.mrf.mxu0 }
 0x243   : > { %v6700_v57 = vadd.f32 %v2704_v18, %v2384_v60 }
 0x244   : > { %v5094_v4 = vpop.f32.mrf.mxu1  ;;  %v2414_v34 = vpop.f32.mrf.mxu0 }
 0x245   : > { %v6702_v14 = vadd.f32 %v5094_v4, %v5011_v47  ;;  %v6728_v47 = vpop.permute.xlu0 %3827  ;;  %v6734_v18 = vpop.permute.xlu1 %3842 }
 0x246   : > { %v2714_v8 = vpop.f32.mrf.mxu1  ;;  %v5020_v59 = vpop.f32.mrf.mxu0 }
 0x247   : > { %v6706_v2 = vadd.f32 %v2714_v8, %v2394_v43 }
 0x248   : > { %v5097_v61 = vpop.f32.mrf.mxu1  ;;  %v2424_v22 = vpop.f32.mrf.mxu0 }
 0x249   : > { %v6710_v15 = vadd.f32 %v5097_v61, %v5014_v12  ;;  %v6738_v8 = vpop.permute.xlu0 %3837 }
 0x24a   : > { %v2724_v45 = vpop.f32.mrf.mxu1  ;;  %v5023_v7 = vpop.f32.mrf.mxu0 }
 0x24b   : > { %v6712_v13 = vadd.f32 %v2724_v45, %v2404_v9  ;;  %v6746_v45 = vld [vmem:[%s6904_s2 + $0x1] ss:$0 sm:$0xff] }
 0x24c   : > { %v5100_v28 = vpop.f32.mrf.mxu1  ;;  %v2434_v3 = vpop.f32.mrf.mxu0 }
 0x24d   : > { %v6716_v25 = vadd.f32 %v5100_v28, %v5017_v51 }
 0x24e   : > { %v2734_v58 = vpop.f32.mrf.mxu1  ;;  %v5026_v6 = vpop.f32.mrf.mxu0 }
 0x24f   : > { %v6720_v29 = vadd.f32 %v2734_v58, %v2414_v34 }
 0x250   : > { %v5103_v42 = vpop.f32.mrf.mxu1  ;;  %v2444_v33 = vpop.f32.mrf.mxu0 }
 0x251   : > { %v6722_v11 = vadd.f32 %v5103_v42, %v5020_v59  ;;  %v6749_v42 = vpop.permute.xlu1 %3852 }
 0x252   : > { %v2744_v48 = vpop.f32.mrf.mxu1  ;;  %v5144_v24 = vpop.f32.mrf.mxu0 }
 0x253   : > { %v6726_v17 = vadd.f32 %v2744_v48, %v2424_v22  ;;  %v3196_v59 = vadd.f32 %v5144_v24, %v6654_v40 }
 0x254   : > { %v5106_v60 = vpop.f32.mrf.mxu1  ;;  %v2992_v49 = vpop.f32.mrf.mxu0 }
 0x255   : > { %v6730_v62 = vadd.f32 %v5106_v60, %v5023_v7  ;;  %v3195_v28 = vadd.f32 %v2992_v49, %v6656_v35 }
 0x256   : > { %v2754_v43 = vpop.f32.mrf.mxu1  ;;  %v5147_v10 = vpop.f32.mrf.mxu0 }
 0x257   : > { %v6732_v12 = vadd.f32 %v2754_v43, %v2434_v3  ;;  %v3198_v40 = vadd.f32 %v5147_v10, %v6658_v39  ;;  %v6753_v43 = vpop.permute.xlu0 %3847 }
 0x258   : > { %v5109_v27 = vpop.f32.mrf.mxu1  ;;  %v3002_v9 = vpop.f32.mrf.mxu0 }
 0x259   : > { %v6736_v51 = vadd.f32 %v5109_v27, %v5026_v6 }
 0x25a   : > { %v2764_v4 = vpop.f32.mrf.mxu1  ;;  %v5150_v34 = vpop.f32.mrf.mxu0 }
 0x25b   : > { %v6741_v61 = vadd.f32 %v2764_v4, %v2444_v33  ;;  %v3200_v39 = vadd.f32 %v5150_v34, %v6662_v52 }
 0x25c   : > { %v5227_v22 = vpop.f32.mrf.mxu1  ;;  %v3012_v7 = vpop.f32.mrf.mxu0 }
 0x25d   : > { %6935 = vst [vmem:[#allocation4_spill] sm:$0xff] %v6741_v61  ;;  %v3584_v3 = vadd.f32 %v5227_v22, %v3196_v59  ;;  %v3197_v61 = vadd.f32 %v3002_v9, %v6660_v41  ;;  %v3199_v41 = vadd.f32 %v3012_v7, %v6664_v23 }
 0x25e   : > { %v3380_v58 = vpop.f32.mrf.mxu1  ;;  %v5153_v6 = vpop.f32.mrf.mxu0 }
 0x25f   : > { %v3694_v48 = vadd.f32 %v6746_v45, %v3584_v3  ;;  %v3583_v33 = vadd.f32 %v3380_v58, %v3195_v28 }
 0x260   : > { %v5230_v24 = vpop.f32.mrf.mxu1  ;;  %v3022_v60 = vpop.f32.mrf.mxu0 }
 0x261   : > { %v3728_v27 = vmax.f32 %v3694_v48, 0.0  ;;  %v3693_v4 = vadd.f32 %v6746_v45, %v3583_v33  ;;  %v3586_v35 = vadd.f32 %v5230_v24, %v3198_v40  ;;  %v6768_v48 = vpop.permute.xlu1 %3862 }
 0x262   : > { %v3390_v49 = vpop.f32.mrf.mxu1  ;;  %v5156_v10 = vpop.f32.mrf.mxu0 }
 0x263   : > { %v3966_v59 = vmul.f32 %v6694_v46, %v3728_v27  ;;  %v3727_v22 = vmax.f32 %v3693_v4, 0.0  ;;  %v3696_v28 = vadd.f32 %v6746_v45, %v3586_v35  ;;  %v3585_v3 = vadd.f32 %v3390_v49, %v3197_v61  ;;  %v6774_v4 = vpop.permute.xlu0 %3857 }
 0x264   : > { %v5233_v9 = vpop.f32.mrf.mxu1  ;;  %v3032_v58 = vpop.f32.mrf.mxu0  ;;  %v3202_v46 = vadd.f32 %v5153_v6, %v6666_v19 }
 0x265   : > { %4000 = vst [vmem:[%s6762_s30 + $0x8] sm:$0xff] %v3966_v59  ;;  %v3965_v40 = vmul.f32 %v6698_v5, %v3727_v22  ;;  %v3730_v52 = vmax.f32 %v3696_v28, 0.0  ;;  %v3695_v34 = vadd.f32 %v6746_v45, %v3585_v3  ;;  %v3588_v33 = vadd.f32 %v5233_v9, %v3200_v39  ;;  %v6784_v9 = vpop.permute.xlu1 %3872 }
 0x266   : > { %v3400_v24 = vpop.f32.mrf.mxu1  ;;  %v5159_v27 = vpop.f32.mrf.mxu0  ;;  %v3201_v5 = vadd.f32 %v3022_v60, %v6668_v38  ;;  %v3204_v28 = vadd.f32 %v5156_v10, %v6670_v50 }
 0x267   : > { %3999 = vst [vmem:[%s6762_s30] sm:$0xff] %v3965_v40  ;;  %v3968_v23 = vmul.f32 %v6704_v54, %v3730_v52  ;;  %v3729_v61 = vmax.f32 %v3695_v34, 0.0  ;;  %v3698_v7 = vadd.f32 %v6746_v45, %v3588_v33  ;;  %v3587_v35 = vadd.f32 %v3400_v24, %v3199_v41  ;;  %v6790_v33 = vpop.permute.xlu0 %3867 }
 0x268   : > { %v5236_v49 = vpop.f32.mrf.mxu1  ;;  %v3042_v59 = vpop.f32.mrf.mxu0 }
 0x269   : > { %4002 = vst [vmem:[%s6762_s30 + $0x18] sm:$0xff] %v3968_v23  ;;  %v3967_v39 = vmul.f32 %v6708_v1, %v3729_v61  ;;  %v3732_v19 = vmax.f32 %v3698_v7, 0.0  ;;  %v3697_v6 = vadd.f32 %v6746_v45, %v3587_v35  ;;  %v3590_v22 = vadd.f32 %v5236_v49, %v3202_v46 }
 0x26a   : > { %v3410_v54 = vpop.f32.mrf.mxu1  ;;  %v5162_v3 = vpop.f32.mrf.mxu0  ;;  %v3203_v1 = vadd.f32 %v3032_v58, %v6672_v55 }
 0x26b   : > { %4001 = vst [vmem:[%s6762_s30 + $0x10] sm:$0xff] %v3967_v39  ;;  %v3970_v41 = vmul.f32 %v6714_v44, %v3732_v19  ;;  %v3731_v38 = vmax.f32 %v3697_v6, 0.0  ;;  %v3700_v60 = vadd.f32 %v6746_v45, %v3590_v22  ;;  %v3589_v40 = vadd.f32 %v3410_v54, %v3201_v5  ;;  %v6800_v39 = vpop.permute.xlu1 %3882  ;;  %v6806_v54 = vpop.permute.xlu0 %3877 }
 0x26c   : > { %v5239_v52 = vpop.f32.mrf.mxu1  ;;  %v3052_v34 = vpop.f32.mrf.mxu0  ;;  %v3206_v44 = vadd.f32 %v5159_v27, %v6674_v30  ;;  %v3205_v5 = vadd.f32 %v3042_v59, %v6676_v16 }
 0x26d   : > { %4004 = vst [vmem:[%s6762_s30 + $0x28] sm:$0xff] %v3970_v41  ;;  %v3969_v50 = vmul.f32 %v6718_v31, %v3731_v38  ;;  %v3734_v10 = vmax.f32 %v3700_v60, 0.0  ;;  %v3699_v46 = vadd.f32 %v6746_v45, %v3589_v40  ;;  %v3592_v24 = vadd.f32 %v5239_v52, %v3204_v28 }
 0x26e   : > { %v3420_v23 = vpop.f32.mrf.mxu1  ;;  %v5165_v61 = vpop.f32.mrf.mxu0 }
 0x26f   : > { %4003 = vst [vmem:[%s6762_s30 + $0x20] sm:$0xff] %v3969_v50  ;;  %v3972_v7 = vmul.f32 %v6724_v37, %v3734_v10  ;;  %v3733_v55 = vmax.f32 %v3699_v46, 0.0  ;;  %v3702_v58 = vadd.f32 %v6746_v45, %v3592_v24  ;;  %v3591_v35 = vadd.f32 %v3420_v23, %v3203_v1  ;;  %v6816_v46 = vpop.permute.xlu1 %3892 }
 0x270   : > { %v5242_v31 = vpop.f32.mrf.mxu1  ;;  %v3062_v49 = vpop.f32.mrf.mxu0  ;;  %v3208_v37 = vadd.f32 %v5162_v3, %v6678_v32  ;;  %v3210_v50 = vadd.f32 %v5165_v61, %v6682_v21 }
 0x271   : > { %4006 = vst [vmem:[%s6762_s30 + $0x38] sm:$0xff] %v3972_v7  ;;  %v3971_v19 = vmul.f32 %v6728_v47, %v3733_v55  ;;  %v3736_v30 = vmax.f32 %v3702_v58, 0.0  ;;  %v3701_v27 = vadd.f32 %v6746_v45, %v3591_v35  ;;  %v3594_v6 = vadd.f32 %v5242_v31, %v3206_v44  ;;  %v6822_v55 = vpop.permute.xlu0 %3887 }
 0x272   : > { %v3430_v22 = vpop.f32.mrf.mxu1  ;;  %v5168_v28 = vpop.f32.mrf.mxu0  ;;  %v3207_v47 = vadd.f32 %v3052_v34, %v6680_v0 }
 0x273   : > { %4005 = vst [vmem:[%s6762_s30 + $0x30] sm:$0xff] %v3971_v19  ;;  %v3974_v16 = vmul.f32 %v6734_v18, %v3736_v30  ;;  %v3735_v59 = vmax.f32 %v3701_v27, 0.0  ;;  %v3704_v41 = vadd.f32 %v6746_v45, %v3594_v6  ;;  %v3593_v38 = vadd.f32 %v3430_v22, %v3205_v5 }
 0x274   : > { %v5245_v60 = vpop.f32.mrf.mxu1  ;;  %v3072_v40 = vpop.f32.mrf.mxu0 }
 0x275   : > { %4008 = vst [vmem:[%s6762_s30 + $0x48] sm:$0xff] %v3974_v16  ;;  %v3973_v1 = vmul.f32 %v6738_v8, %v3735_v59  ;;  %v3738_v32 = vmax.f32 %v3704_v41, 0.0  ;;  %v3703_v3 = vadd.f32 %v6746_v45, %v3593_v38  ;;  %v3596_v52 = vadd.f32 %v5245_v60, %v3208_v37  ;;  %v6832_v37 = vpop.permute.xlu1 %3902  ;;  %v3898_v38 = vpop.permute.xlu0 %3897 }
 0x276   : > { %v3440_v18 = vpop.f32.mrf.mxu1  ;;  %v5171_v10 = vpop.f32.mrf.mxu0  ;;  %v3209_v8 = vadd.f32 %v3062_v49, %v6684_v63  ;;  %v3211_v27 = vadd.f32 %v3072_v40, %v6688_v56 }
 0x277   : > { %4007 = vst [vmem:[%s6762_s30 + $0x40] sm:$0xff] %v3973_v1  ;;  %v3976_v24 = vmul.f32 %v6749_v42, %v3738_v32  ;;  %v3737_v0 = vmax.f32 %v3703_v3, 0.0  ;;  %v3706_v34 = vadd.f32 %v6746_v45, %v3596_v52  ;;  %v3595_v44 = vadd.f32 %v3440_v18, %v3207_v47 }
 0x278   : > { %v5248_v23 = vpop.f32.mrf.mxu1  ;;  %v3082_v7 = vpop.f32.mrf.mxu0  ;;  %v3212_v42 = vadd.f32 %v5168_v28, %v6686_v53 }
 0x279   : > { %4010 = vst [vmem:[%s6762_s30 + $0x58] sm:$0xff] %v3976_v24  ;;  %v3975_v21 = vmul.f32 %v6753_v43, %v3737_v0  ;;  %v3740_v61 = vmax.f32 %v3706_v34, 0.0  ;;  %v3705_v58 = vadd.f32 %v6746_v45, %v3595_v44  ;;  %v3598_v35 = vadd.f32 %v5248_v23, %v3210_v50  ;;  %v3913_v24 = vpop.permute.xlu1 %3912 }
 0x27a   : > { %v3450_v5 = vpop.f32.mrf.mxu1  ;;  %v5174_v31 = vpop.f32.mrf.mxu0 }
 0x27b   : > { %4009 = vst [vmem:[%s6762_s30 + $0x50] sm:$0xff] %v3975_v21  ;;  %v3978_v19 = vmul.f32 %v6768_v48, %v3740_v61  ;;  %v3739_v63 = vmax.f32 %v3705_v58, 0.0  ;;  %v3708_v49 = vadd.f32 %v6746_v45, %v3598_v35  ;;  %v3597_v30 = vadd.f32 %v3450_v5, %v3209_v8 }
 0x27c   : > { %v5251_v43 = vpop.f32.mrf.mxu1  ;;  %v3092_v6 = vpop.f32.mrf.mxu0  ;;  %v3214_v48 = vadd.f32 %v5171_v10, %v6690_v36  ;;  %v3216_v18 = vadd.f32 %v5174_v31, %v6696_v26 }
 0x27d   : > { %4012 = vst [vmem:[%s6762_s30 + $0x68] sm:$0xff] %v3978_v19  ;;  %v3977_v22 = vmul.f32 %v6774_v4, %v3739_v63  ;;  %v3742_v53 = vmax.f32 %v3708_v49, 0.0  ;;  %v3707_v28 = vadd.f32 %v6746_v45, %v3597_v30  ;;  %v3600_v16 = vadd.f32 %v5251_v43, %v3212_v42  ;;  %v3923_v30 = vpop.permute.xlu1 %3922 }
 0x27e   : > { %v3460_v59 = vpop.f32.mrf.mxu1  ;;  %v5177_v41 = vpop.f32.mrf.mxu0  ;;  %v3213_v4 = vadd.f32 %v3082_v7, %v6692_v20 }
 0x27f   : > { %4011 = vst [vmem:[%s6762_s30 + $0x60] sm:$0xff] %v3977_v22  ;;  %v3980_v56 = vmul.f32 %v6784_v9, %v3742_v53  ;;  %v3741_v47 = vmax.f32 %v3707_v28, 0.0  ;;  %v3710_v60 = vadd.f32 %v6746_v45, %v3600_v16  ;;  %v3599_v40 = vadd.f32 %v3460_v59, %v3211_v27  ;;  %v3908_v7 = vpop.permute.xlu0 %3907 }
 0x280   : > { %v5254_v1 = vpop.f32.mrf.mxu1  ;;  %v3102_v32 = vpop.f32.mrf.mxu0 }
 0x281   : > { %4014 = vst [vmem:[%s6762_s30 + $0x78] sm:$0xff] %v3980_v56  ;;  %v3979_v3 = vmul.f32 %v6790_v33, %v3741_v47  ;;  %v3744_v52 = vmax.f32 %v3710_v60, 0.0  ;;  %v3709_v36 = vadd.f32 %v6746_v45, %v3599_v40  ;;  %v3602_v50 = vadd.f32 %v5254_v1, %v3214_v48 }
 0x282   : > { %v3470_v9 = vpop.f32.mrf.mxu1  ;;  %v5180_v10 = vpop.f32.mrf.mxu0  ;;  %v3215_v33 = vadd.f32 %v3092_v6, %v6700_v57  ;;  %v3217_v63 = vadd.f32 %v3102_v32, %v6706_v2 }
 0x283   : > { %4013 = vst [vmem:[%s6762_s30 + $0x70] sm:$0xff] %v3979_v3  ;;  %v3982_v0 = vmul.f32 %v6800_v39, %v3744_v52  ;;  %v3743_v20 = vmax.f32 %v3709_v36, 0.0  ;;  %v3712_v34 = vadd.f32 %v6746_v45, %v3602_v50  ;;  %v3601_v44 = vadd.f32 %v3470_v9, %v3213_v4  ;;  %v3918_v28 = vpop.permute.xlu0 %3917  ;;  %v3933_v36 = vpop.permute.xlu1 %3932 }
 0x284   : > { %v5257_v8 = vpop.f32.mrf.mxu1  ;;  %v3112_v23 = vpop.f32.mrf.mxu0  ;;  %v3218_v39 = vadd.f32 %v5177_v41, %v6702_v14 }
 0x285   : > { %4016 = vst [vmem:[%s6762_s30 + $0x88] sm:$0xff] %v3982_v0  ;;  %v3981_v21 = vmul.f32 %v6806_v54, %v3743_v20  ;;  %v3746_v26 = vmax.f32 %v3712_v34, 0.0  ;;  %v3711_v61 = vadd.f32 %v6746_v45, %v3601_v44  ;;  %v3604_v58 = vadd.f32 %v5257_v8, %v3216_v18 }
 0x286   : > { %v3480_v35 = vpop.f32.mrf.mxu1  ;;  %v5183_v42 = vpop.f32.mrf.mxu0 }
 0x287   : > { %4015 = vst [vmem:[%s6762_s30 + $0x80] sm:$0xff] %v3981_v21  ;;  %v3984_v5 = vmul.f32 %v6816_v46, %v3746_v26  ;;  %v3745_v31 = vmax.f32 %v3711_v61, 0.0  ;;  %v3714_v57 = vadd.f32 %v6746_v45, %v3604_v58  ;;  %v3603_v19 = vadd.f32 %v3480_v35, %v3215_v33  ;;  %v3928_v20 = vpop.permute.xlu0 %3927 }
 0x288   : > { %v5260_v54 = vpop.f32.mrf.mxu1  ;;  %v3122_v49 = vpop.f32.mrf.mxu0  ;;  %v3220_v46 = vadd.f32 %v5180_v10, %v6710_v15  ;;  %v3222_v4 = vadd.f32 %v5183_v42, %v6716_v25 }
 0x289   : > { %4018 = vst [vmem:[%s6762_s30 + $0x98] sm:$0xff] %v3984_v5  ;;  %v3983_v27 = vmul.f32 %v6822_v55, %v3745_v31  ;;  %v3748_v14 = vmax.f32 %v3714_v57, 0.0  ;;  %v3713_v43 = vadd.f32 %v6746_v45, %v3603_v19  ;;  %v3606_v6 = vadd.f32 %v5260_v54, %v3218_v39 }
 0x28a   : > { %v3490_v22 = vpop.f32.mrf.mxu1  ;;  %v5186_v53 = vpop.f32.mrf.mxu0  ;;  %v3219_v55 = vadd.f32 %v3112_v23, %v6712_v13  ;;  %v3221_v50 = vadd.f32 %v3122_v49, %v6720_v29 }
 0x28b   : > { %4017 = vst [vmem:[%s6762_s30 + $0x90] sm:$0xff] %v3983_v27  ;;  %v3986_v2 = vmul.f32 %v6832_v37, %v3748_v14  ;;  %v3747_v16 = vmax.f32 %v3713_v43, 0.0  ;;  %v3716_v48 = vadd.f32 %v6746_v45, %v3606_v6  ;;  %v3605_v59 = vadd.f32 %v3490_v22, %v3217_v63  ;;  %v3938_v19 = vpop.permute.xlu0 %3937 }
 0x28c   : > { %v5263_v41 = vpop.f32.mrf.mxu1  ;;  %v3132_v56 = vpop.f32.mrf.mxu0 }
 0x28d   : > { %4020 = vst [vmem:[%s6762_s30 + $0xa8] sm:$0xff] %v3986_v2  ;;  %v3985_v47 = vmul.f32 %v3898_v38, %v3747_v16  ;;  %v3750_v60 = vmax.f32 %v3716_v48, 0.0  ;;  %v3715_v15 = vadd.f32 %v6746_v45, %v3605_v59  ;;  %v3608_v40 = vadd.f32 %v5263_v41, %v3220_v46  ;;  %v6936_v2 = vld [vmem:[#allocation4_spill] sm:$0xff] }
 0x28e   : > { %v3500_v1 = vpop.f32.mrf.mxu1  ;;  %v5189_v32 = vpop.f32.mrf.mxu0  ;;  %v3223_v23 = vadd.f32 %v3132_v56, %v6726_v17 }
 0x28f   : > { %4019 = vst [vmem:[%s6762_s30 + $0xa0] sm:$0xff] %v3985_v47  ;;  %v3988_v37 = vmul.f32 %v3913_v24, %v3750_v60  ;;  %v3749_v3 = vmax.f32 %v3715_v15, 0.0  ;;  %v3718_v52 = vadd.f32 %v6746_v45, %v3608_v40  ;;  %v3607_v13 = vadd.f32 %v3500_v1, %v3219_v55  ;;  %v3948_v56 = vpop.permute.xlu0 %3947 }
 0x290   : > { %v5266_v18 = vpop.f32.mrf.mxu1  ;;  %v3142_v0 = vpop.f32.mrf.mxu0  ;;  %v3224_v24 = vadd.f32 %v5186_v53, %v6722_v11  ;;  %v3226_v35 = vadd.f32 %v5189_v32, %v6730_v62 }
 0x291   : > { %4022 = vst [vmem:[%s6762_s30 + $0xb8] sm:$0xff] %v3988_v37  ;;  %v3987_v38 = vmul.f32 %v3908_v7, %v3749_v3  ;;  %v3752_v9 = vmax.f32 %v3718_v52, 0.0  ;;  %v3717_v10 = vadd.f32 %v6746_v45, %v3607_v13  ;;  %v3610_v25 = vadd.f32 %v5266_v18, %v3222_v4  ;;  %v3943_v11 = vpop.permute.xlu1 %3942 }
 0x292   : > { %v3510_v34 = vpop.f32.mrf.mxu1  ;;  %v5192_v39 = vpop.f32.mrf.mxu0  ;;  %v3225_v63 = vadd.f32 %v3142_v0, %v6732_v12 }
 0x293   : > { %4021 = vst [vmem:[%s6762_s30 + $0xb0] sm:$0xff] %v3987_v38  ;;  %v3990_v44 = vmul.f32 %v3923_v30, %v3752_v9  ;;  %v3751_v33 = vmax.f32 %v3717_v10, 0.0  ;;  %v3720_v8 = vadd.f32 %v6746_v45, %v3610_v25  ;;  %v3609_v29 = vadd.f32 %v3510_v34, %v3221_v50 }
 0x294   : > { %v5269_v21 = vpop.f32.mrf.mxu1  ;;  %v3152_v62 = vpop.f32.mrf.mxu0  ;;  %v3228_v43 = vadd.f32 %v5192_v39, %v6736_v51 }
 0x295   : > { %4024 = vst [vmem:[%s6762_s30 + $0xc8] sm:$0xff] %v3990_v44  ;;  %v3989_v7 = vmul.f32 %v3918_v28, %v3751_v33  ;;  %v3754_v26 = vmax.f32 %v3720_v8, 0.0  ;;  %v3719_v61 = vadd.f32 %v6746_v45, %v3609_v29  ;;  %v3612_v58 = vadd.f32 %v5269_v21, %v3224_v24  ;;  %v3953_v12 = vpop.permute.xlu1 %3952 }
 0x296   : > { %v3520_v42 = vpop.f32.mrf.mxu1  ;;  %v3227_v16 = vadd.f32 %v3152_v62, %v6936_v2 }
 0x297   : > { %4023 = vst [vmem:[%s6762_s30 + $0xc0] sm:$0xff] %v3989_v7  ;;  %v3992_v5 = vmul.f32 %v3933_v36, %v3754_v26  ;;  %v3753_v31 = vmax.f32 %v3719_v61, 0.0  ;;  %v3722_v57 = vadd.f32 %v6746_v45, %v3612_v58  ;;  %v3611_v17 = vadd.f32 %v3520_v42, %v3223_v23  ;;  %v3958_v36 = vpop.permute.xlu0 %3957 }
 0x298   : > { %v5272_v54 = vpop.f32.mrf.mxu1 }
 0x299   : > { %4026 = vst [vmem:[%s6762_s30 + $0xd8] sm:$0xff] %v3992_v5  ;;  %v3991_v49 = vmul.f32 %v3928_v20, %v3753_v31  ;;  %v3756_v30 = vmax.f32 %v3722_v57, 0.0  ;;  %v3721_v27 = vadd.f32 %v6746_v45, %v3611_v17  ;;  %v3614_v14 = vadd.f32 %v5272_v54, %v3226_v35  ;;  %v3963_v3 = vpop.permute.xlu1 %3962 }
 0x29a   : > { %v3530_v6 = vpop.f32.mrf.mxu1 }
 0x29b   : > { %4025 = vst [vmem:[%s6762_s30 + $0xd0] sm:$0xff] %v3991_v49  ;;  %v3994_v46 = vmul.f32 %v3943_v11, %v3756_v30  ;;  %v3755_v22 = vmax.f32 %v3721_v27, 0.0  ;;  %v3724_v53 = vadd.f32 %v6746_v45, %v3614_v14  ;;  %v3613_v28 = vadd.f32 %v3530_v6, %v3225_v63 }
 0x29c   : > { %v5275_v48 = vpop.f32.mrf.mxu1 }
 0x29d   : > { %4028 = vst [vmem:[%s6762_s30 + $0xe8] sm:$0xff] %v3994_v46  ;;  %v3993_v59 = vmul.f32 %v3938_v19, %v3755_v22  ;;  %v3758_v55 = vmax.f32 %v3724_v53, 0.0  ;;  %v3723_v41 = vadd.f32 %v6746_v45, %v3613_v28  ;;  %v3616_v51 = vadd.f32 %v5275_v48, %v3228_v43 }
 0x29e   : > { %v3540_v47 = vpop.f32.mrf.mxu1 }
 0x29f   : > { %4027 = vst [vmem:[%s6762_s30 + $0xe0] sm:$0xff] %v3993_v59  ;;  %v3996_v60 = vmul.f32 %v3953_v12, %v3758_v55  ;;  %v3757_v15 = vmax.f32 %v3723_v41, 0.0  ;;  %v3726_v40 = vadd.f32 %v6746_v45, %v3616_v51  ;;  %v3615_v4 = vadd.f32 %v3540_v47, %v3227_v16 }
 0x2a1   : > { %4030 = vst [vmem:[%s6762_s30 + $0xf8] sm:$0xff] %v3996_v60  ;;  %v3995_v1 = vmul.f32 %v3948_v56, %v3757_v15  ;;  %v3760_v32 = vmax.f32 %v3726_v40, 0.0  ;;  %v3725_v37 = vadd.f32 %v6746_v45, %v3615_v4 }
 0x2a3   : > { %4029 = vst [vmem:[%s6762_s30 + $0xf0] sm:$0xff] %v3995_v1  ;;  %v3998_v52 = vmul.f32 %v3963_v3, %v3760_v32  ;;  %v3759_v13 = vmax.f32 %v3725_v37, 0.0 }
 0x2a5   : > { %4032 = vst [vmem:[%s6762_s30 + $0x108] sm:$0xff] %v3998_v52  ;;  %v3997_v50 = vmul.f32 %v3958_v36, %v3759_v13 }
 0x2a7   : > { %4031 = vst [vmem:[%s6762_s30 + $0x100] sm:$0xff] %v3997_v50 }
 0x2a8 PF: > { %s14_s15 = sadd.s32 1, %s5295_s15  }
 0x2a9   : > { %p11_p4 = scmp.ge.s32.totalorder %s14_s15, 4  }
 0x2ab   :  { %13 = sbr.rel (!%p11_p4) target bundleno = 1 (0x1), region = 74 }

</bundles_post_ra>
